<compile_context>
chip_gen: v7x
topology: tpu7x:2x2x1
jax: 0.10.0
libtpu: 0.0.40
codegen_flags: <defaults>
</compile_context>

<pallas_src>
import jax
import jax.numpy as jnp
import numpy as np
from jax.experimental import pallas as pl
from jax.experimental.pallas import tpu as pltpu

_VMEM = pl.BlockSpec(memory_space=pltpu.MemorySpace.VMEM)

# ---------------------------------------------------------------------------
# Static architecture config (Python ints; never traced)
# ---------------------------------------------------------------------------
_CONV_CFG = {
    "c1a": dict(cin=4,  cout=4,  k=3, stride=2, pad=1),
    "c1b": dict(cin=4,  cout=8,  k=3, stride=1, pad=1),
    "c2a": dict(cin=8,  cout=8,  k=3, stride=2, pad=1),
    "c2b": dict(cin=8,  cout=16, k=3, stride=1, pad=1),
    "c3a": dict(cin=16, cout=16, k=3, stride=2, pad=1),
    "c3b": dict(cin=16, cout=32, k=3, stride=1, pad=1),
    "c4a": dict(cin=32, cout=32, k=3, stride=2, pad=1),
    "c4b": dict(cin=32, cout=64, k=3, stride=1, pad=1),
    "fc1": dict(cin=64, cout=64, k=1, stride=1, pad=1),
    "fc2": dict(cin=64, cout=64, k=1, stride=1, pad=1),
}
_SE_CFG = {"se1": 8, "se2": 16, "se3": 32, "se4": 64}

# Kernel op plan.  Refs consumed per op (in order):
#   ("conv0", name): patches, wmat, bias
#   ("conv",  name): gather (taps, Mout, Nin), wtaps (taps, Ci, Co), bias
#   ("se",    name): pool, w1, b1, w2, b2, expand
_PLAN = [
    ("conv0", "c1a"),
    ("conv", "c1b"), ("se", "se1"),
    ("conv", "c2a"), ("conv", "c2b"), ("se", "se2"),
    ("conv", "c3a"), ("conv", "c3b"), ("se", "se3"),
    ("conv", "c4a"), ("conv", "c4b"), ("se", "se4"),
    ("conv", "fc1"), ("conv", "fc2"),
]


def _ru8(x):
    return (x + 7) // 8 * 8


def _conv_out(size, k, stride, pad):
    return (size + 2 * pad - k) // stride + 1


def _leaky(v):
    return jnp.where(v > 0.0, v, 0.2 * v)


# ---------------------------------------------------------------------------
# The single fused kernel: walks _PLAN, consuming refs positionally.
# All activations are 2-D (rows = flattened B*H*W padded to x8, cols = channels).
# ---------------------------------------------------------------------------
def _d_vi_kernel(*refs):
    out_ref = refs[-1]
    pos = 0

    def nxt():
        nonlocal pos
        r = refs[pos]
        pos += 1
        return r

    x = None
    for kind, _name in _PLAN:
        if kind == "conv0":
            patches = nxt()[...]                      # (M0, k*k*Cin)
            wmat = nxt()[...]                         # (k*k*Cin, Co)
            bias = nxt()[...]                         # (1, Co)
            x = jnp.dot(patches, wmat, preferred_element_type=jnp.float32) + bias
            x = _leaky(x)
        elif kind == "conv":
            g_ref = nxt()                             # (taps, Mout, Nin)
            w_ref = nxt()                             # (taps, Ci, Co)
            bias = nxt()[...]                         # (1, Co)
            taps, m_out, _ = g_ref.shape
            co = w_ref.shape[-1]
            acc = jnp.zeros((m_out, co), jnp.float32)
            for t in range(taps):                     # static unroll; zero pad rows/cols
                gathered = jnp.dot(g_ref[t], x, preferred_element_type=jnp.float32)
                acc = acc + jnp.dot(gathered, w_ref[t],
                                    preferred_element_type=jnp.float32)
            x = _leaky(acc + bias)
        else:  # "se"
            pool = nxt()[...]                         # (Bp, M)  mean-pool selector
            w1 = nxt()[...]
            b1 = nxt()[...]
            w2 = nxt()[...]
            b2 = nxt()[...]
            expand = nxt()[...]                       # (M, Bp) row-broadcast selector
            pooled = jnp.dot(pool, x, preferred_element_type=jnp.float32)
            h = jnp.maximum(jnp.dot(pooled, w1, preferred_element_type=jnp.float32) + b1, 0.0)
            z = jnp.dot(h, w2, preferred_element_type=jnp.float32) + b2
            s = jax.nn.sigmoid(z)
            x = x * jnp.dot(expand, s, preferred_element_type=jnp.float32)
    out_ref[...] = x


# ---------------------------------------------------------------------------
# One-time packing: gather/pool/expand constants + weight slabs (built with numpy)
# ---------------------------------------------------------------------------
def _gather_matrices(batch, h, w, ho, wo, k, stride, pad, rows_in, rows_out):
    """G[t] (rows_out, rows_in): 0/1 matrix selecting the flattened NHWC input row that
    feeds tap t of each output position; all-zero row where the tap lands in the zero
    padding; zero rows/cols beyond the real extents (sublane padding)."""
    g = np.zeros((k * k, rows_out, rows_in), np.float32)
    for b in range(batch):
        for y in range(ho):
            for xx in range(wo):
                m = (b * ho + y) * wo + xx
                for di in range(k):
                    for dj in range(k):
                        i = y * stride + di - pad
                        j = xx * stride + dj - pad
                        if 0 <= i < h and 0 <= j < w:
                            g[di * k + dj, m, (b * h + i) * w + j] = 1.0
    return jnp.asarray(g)


def _pool_expand(batch, hw, rows, bpad):
    pool = np.zeros((bpad, rows), np.float32)
    expand = np.zeros((rows, bpad), np.float32)
    for b in range(batch):
        pool[b, b * hw:(b + 1) * hw] = 1.0 / hw
        expand[b * hw:(b + 1) * hw, b] = 1.0
    return jnp.asarray(pool), jnp.asarray(expand)


def _conv_params(key, cout, cin, k):
    kw_, kb_ = jax.random.split(key)
    w = jax.random.normal(kw_, (cout, cin, k, k), jnp.float32) * 0.05
    b = jax.random.normal(kb_, (cout,), jnp.float32) * 0.05
    return w, b


def _se_params(key, c, r=4):
    hdim = max(c // r, 1)
    k1, k2, k3, k4 = jax.random.split(key, 4)
    return (jax.random.normal(k1, (c, hdim), jnp.float32) * 0.05,
            jax.random.normal(k2, (hdim,), jnp.float32) * 0.05,
            jax.random.normal(k3, (hdim, c), jnp.float32) * 0.05,
            jax.random.normal(k4, (c,), jnp.float32) * 0.05)


def build_d_vi(key, batch=2, height=16, width=16):
    conv_names = [n for kind, n in _PLAN if kind in ("conv0", "conv")]
    se_names = [n for kind, n in _PLAN if kind == "se"]
    keys = jax.random.split(key, len(conv_names) + len(se_names))
    raw_conv = {}
    for i, name in enumerate(conv_names):
        cfg = _CONV_CFG[name]
        raw_conv[name] = _conv_params(keys[i], cfg["cout"], cfg["cin"], cfg["k"])
    raw_se = {name: _se_params(keys[len(conv_names) + i], _SE_CFG[name])
              for i, name in enumerate(se_names)}

    bpad = _ru8(batch)
    params = []
    flops = 0
    trans = 0
    h, w = height, width
    rows = None               # padded row count of the current activation
    first = None
    for kind, name in _PLAN:
        if kind in ("conv0", "conv"):
            cfg = _CONV_CFG[name]
            k, s, p = cfg["k"], cfg["stride"], cfg["pad"]
            ci, co = cfg["cin"], cfg["cout"]
            co_p = _ru8(co)
            ho, wo = _conv_out(h, k, s, p), _conv_out(w, k, s, p)
            m = batch * ho * wo
            m_p = _ru8(m)
            wt, bias = raw_conv[name]
            bias_p = jnp.zeros((1, co_p), jnp.float32).at[0, :co].set(bias)
            if kind == "conv0":
                first = dict(k=k, stride=s, pad=p, rows=m_p, cols=k * k * ci)
                wmat = jnp.zeros((k * k * ci, co_p), jnp.float32)
                wmat = wmat.at[:, :co].set(
                    jnp.transpose(wt, (2, 3, 1, 0)).reshape(k * k * ci, co))
                params += [wmat, bias_p]
                flops += 2 * m * (k * k * ci) * co
            else:
                ci_p = _ru8(ci)
                g = _gather_matrices(batch, h, w, ho, wo, k, s, p, rows, m_p)
                wtaps = jnp.zeros((k * k, ci_p, co_p), jnp.float32)
                wtaps = wtaps.at[:, :ci, :co].set(
                    jnp.transpose(wt, (2, 3, 1, 0)).reshape(k * k, ci, co))
                params += [g, wtaps, bias_p]
                flops += k * k * (2 * m * batch * h * w * ci + 2 * m * ci * co)
            h, w, rows = ho, wo, m_p
        else:  # se
            c = _SE_CFG[name]
            w1, b1, w2, b2 = raw_se[name]
            hid = w1.shape[1]
            hid_p = _ru8(hid)
            pool, expand = _pool_expand(batch, h * w, rows, bpad)
            w1p = jnp.zeros((c, hid_p), jnp.float32).at[:, :hid].set(w1)
            b1p = jnp.zeros((1, hid_p), jnp.float32).at[0, :hid].set(b1)
            w2p = jnp.zeros((hid_p, c), jnp.float32).at[:hid, :].set(w2)
            b2p = b2.reshape(1, c)
            params += [pool, w1p, b1p, w2p, b2p, expand]
            m = batch * h * w
            flops += (2 * batch * m * c + 2 * batch * c * hid + 2 * batch * hid * c
                      + 2 * m * batch * c + m * c)
            trans += 2 * batch * c

    out_c = _CONV_CFG[_PLAN[-1][1]]["cout"]
    bytes_accessed = 4 * (sum(int(a.size) for a in params)
                          + first["rows"] * first["cols"] + rows * _ru8(out_c))
    meta = dict(batch=batch, first=first, out_hw=(h, w), out_c=out_c,
                out_rows=batch * h * w, out_rows_pad=rows, out_c_pad=_ru8(out_c),
                flops=int(flops), transcendentals=int(trans),
                bytes_accessed=int(bytes_accessed))
    return tuple(params), meta


# ---------------------------------------------------------------------------
# XLA-side glue for the FIRST conv only: NHWC im2col (fused into the pallas call
# via allow_input_fusion).
# ---------------------------------------------------------------------------
def _im2col_nhwc(x, k, stride, pad, rows_pad):
    b_, h, w, c = x.shape
    ho = _conv_out(h, k, stride, pad)
    wo = _conv_out(w, k, stride, pad)
    xp = jnp.pad(x, ((0, 0), (pad, pad), (pad, pad), (0, 0)))
    cols = []
    for i in range(k):
        for j in range(k):
            cols.append(xp[:, i:i + stride * (ho - 1) + 1:stride,
                              j:j + stride * (wo - 1) + 1:stride, :])
    patches = jnp.concatenate(cols, axis=-1).reshape(b_ * ho * wo, k * k * c)
    if rows_pad > b_ * ho * wo:
        patches = jnp.pad(patches, ((0, rows_pad - b_ * ho * wo), (0, 0)))
    return patches


def make_d_vi_forward(meta):
    batch = meta["batch"]
    first = meta["first"]
    ho, wo = meta["out_hw"]
    out_c = meta["out_c"]
    out_rows = meta["out_rows"]

    @jax.jit
    def forward(x_nchw, params):
        x = jnp.transpose(x_nchw, (0, 2, 3, 1))          # NHWC internally
        patches = _im2col_nhwc(x, first["k"], first["stride"], first["pad"],
                               first["rows"])
        n_in = 1 + len(params)
        out2d = pl.pallas_call(
            _d_vi_kernel,
            out_shape=jax.ShapeDtypeStruct(
                (meta["out_rows_pad"], meta["out_c_pad"]), jnp.float32),
            in_specs=[_VMEM] * n_in,
            out_specs=_VMEM,
            compiler_params=pltpu.CompilerParams(
                allow_input_fusion=[True] + [False] * (n_in - 1)),
            cost_estimate=pl.CostEstimate(
                flops=meta["flops"],
                transcendentals=meta["transcendentals"],
                bytes_accessed=meta["bytes_accessed"]),
        )(patches, *params)
        out = out2d[:out_rows, :out_c].reshape(batch, ho, wo, out_c)
        return jnp.transpose(out, (0, 3, 1, 2))          # back to NCHW

    return forward


if __name__ == "__main__":
    key = jax.random.PRNGKey(0)
    kx, kp = jax.random.split(key)
    x = jax.random.normal(kx, (2, 4, 16, 16), jnp.float32)   # NCHW, 4-channel input

    params, meta = build_d_vi(kp, batch=2, height=16, width=16)
    forward = make_d_vi_forward(meta)

    out = jax.block_until_ready(forward(x, params))
    # 16 -> 8 -> 4 -> 2 -> 1 spatially, then two 1x1 convs with padding=1: 1 -> 3 -> 5
    assert out.shape == (2, 64, 5, 5), out.shape
    assert bool(jnp.all(jnp.isfinite(out)))
    print("KERNEL_OK")
</pallas_src>

<mosaic_0001>
module attributes {stable_mosaic.version = 11 : i64} {
  func.func @_d_vi_kernel(%arg0: memref<128x36xf32, #tpu.memory_space<vmem>>, %arg1: memref<36x8xf32, #tpu.memory_space<vmem>>, %arg2: memref<1x8xf32, #tpu.memory_space<vmem>>, %arg3: memref<9x128x128xf32, #tpu.memory_space<vmem>>, %arg4: memref<9x8x8xf32, #tpu.memory_space<vmem>>, %arg5: memref<1x8xf32, #tpu.memory_space<vmem>>, %arg6: memref<8x128xf32, #tpu.memory_space<vmem>>, %arg7: memref<8x8xf32, #tpu.memory_space<vmem>>, %arg8: memref<1x8xf32, #tpu.memory_space<vmem>>, %arg9: memref<8x8xf32, #tpu.memory_space<vmem>>, %arg10: memref<1x8xf32, #tpu.memory_space<vmem>>, %arg11: memref<128x8xf32, #tpu.memory_space<vmem>>, %arg12: memref<9x32x128xf32, #tpu.memory_space<vmem>>, %arg13: memref<9x8x8xf32, #tpu.memory_space<vmem>>, %arg14: memref<1x8xf32, #tpu.memory_space<vmem>>, %arg15: memref<9x32x32xf32, #tpu.memory_space<vmem>>, %arg16: memref<9x8x16xf32, #tpu.memory_space<vmem>>, %arg17: memref<1x16xf32, #tpu.memory_space<vmem>>, %arg18: memref<8x32xf32, #tpu.memory_space<vmem>>, %arg19: memref<16x8xf32, #tpu.memory_space<vmem>>, %arg20: memref<1x8xf32, #tpu.memory_space<vmem>>, %arg21: memref<8x16xf32, #tpu.memory_space<vmem>>, %arg22: memref<1x16xf32, #tpu.memory_space<vmem>>, %arg23: memref<32x8xf32, #tpu.memory_space<vmem>>, %arg24: memref<9x8x32xf32, #tpu.memory_space<vmem>>, %arg25: memref<9x16x16xf32, #tpu.memory_space<vmem>>, %arg26: memref<1x16xf32, #tpu.memory_space<vmem>>, %arg27: memref<9x8x8xf32, #tpu.memory_space<vmem>>, %arg28: memref<9x16x32xf32, #tpu.memory_space<vmem>>, %arg29: memref<1x32xf32, #tpu.memory_space<vmem>>, %arg30: memref<8x8xf32, #tpu.memory_space<vmem>>, %arg31: memref<32x8xf32, #tpu.memory_space<vmem>>, %arg32: memref<1x8xf32, #tpu.memory_space<vmem>>, %arg33: memref<8x32xf32, #tpu.memory_space<vmem>>, %arg34: memref<1x32xf32, #tpu.memory_space<vmem>>, %arg35: memref<8x8xf32, #tpu.memory_space<vmem>>, %arg36: memref<9x8x8xf32, #tpu.memory_space<vmem>>, %arg37: memref<9x32x32xf32, #tpu.memory_space<vmem>>, %arg38: memref<1x32xf32, #tpu.memory_space<vmem>>, %arg39: memref<9x8x8xf32, #tpu.memory_space<vmem>>, %arg40: memref<9x32x64xf32, #tpu.memory_space<vmem>>, %arg41: memref<1x64xf32, #tpu.memory_space<vmem>>, %arg42: memref<8x8xf32, #tpu.memory_space<vmem>>, %arg43: memref<64x16xf32, #tpu.memory_space<vmem>>, %arg44: memref<1x16xf32, #tpu.memory_space<vmem>>, %arg45: memref<16x64xf32, #tpu.memory_space<vmem>>, %arg46: memref<1x64xf32, #tpu.memory_space<vmem>>, %arg47: memref<8x8xf32, #tpu.memory_space<vmem>>, %arg48: memref<1x24x8xf32, #tpu.memory_space<vmem>>, %arg49: memref<1x64x64xf32, #tpu.memory_space<vmem>>, %arg50: memref<1x64xf32, #tpu.memory_space<vmem>>, %arg51: memref<1x56x24xf32, #tpu.memory_space<vmem>>, %arg52: memref<1x64x64xf32, #tpu.memory_space<vmem>>, %arg53: memref<1x64xf32, #tpu.memory_space<vmem>>, %arg54: memref<56x64xf32, #tpu.memory_space<vmem>>) attributes {dimension_semantics = [], scalar_prefetch = 0 : i64, scratch_operands = 0 : i64, tpu.core_type = #tpu.core_type<tc>} {
    %c0 = arith.constant 0 : index
    %c0_0 = arith.constant 0 : index
    %0 = vector.load %arg0[%c0, %c0_0] : memref<128x36xf32, #tpu.memory_space<vmem>>, vector<128x36xf32>
    %c0_1 = arith.constant 0 : index
    %c0_2 = arith.constant 0 : index
    %1 = vector.load %arg1[%c0_1, %c0_2] : memref<36x8xf32, #tpu.memory_space<vmem>>, vector<36x8xf32>
    %c0_3 = arith.constant 0 : index
    %c0_4 = arith.constant 0 : index
    %2 = vector.load %arg2[%c0_3, %c0_4] : memref<1x8xf32, #tpu.memory_space<vmem>>, vector<1x8xf32>
    %cst = arith.constant dense<0.000000e+00> : vector<128x8xf32>
    %3 = tpu.matmul %0, %1, %cst {dimension_numbers = #tpu.dot_dimension_numbers<[1], [0], [0], [1], [0, 0, 1, 1], [], []>} : vector<128x36xf32>, vector<36x8xf32>, vector<128x8xf32> -> vector<128x8xf32>
    %4 = vector.broadcast %2 : vector<1x8xf32> to vector<128x8xf32>
    %5 = arith.addf %3, %4 : vector<128x8xf32>
    %cst_5 = arith.constant 0.000000e+00 : f32
    %6 = vector.broadcast %cst_5 : f32 to vector<128x8xf32>
    %7 = arith.cmpf ogt, %5, %6 : vector<128x8xf32>
    %cst_6 = arith.constant 2.000000e-01 : f32
    %8 = vector.broadcast %cst_6 : f32 to vector<128x8xf32>
    %9 = arith.mulf %8, %5 : vector<128x8xf32>
    %10 = arith.select %7, %5, %9 : vector<128x8xi1>, vector<128x8xf32>
    %c0_7 = arith.constant 0 : index
    %c0_8 = arith.constant 0 : index
    %11 = vector.load %arg5[%c0_7, %c0_8] : memref<1x8xf32, #tpu.memory_space<vmem>>, vector<1x8xf32>
    %cst_9 = arith.constant 0.000000e+00 : f32
    %12 = vector.broadcast %cst_9 : f32 to vector<128x8xf32>
    %c0_10 = arith.constant 0 : index
    %c0_11 = arith.constant 0 : index
    %c0_12 = arith.constant 0 : index
    %13 = vector.load %arg3[%c0_10, %c0_11, %c0_12] : memref<9x128x128xf32, #tpu.memory_space<vmem>>, vector<1x128x128xf32>
    %14 = vector.shape_cast %13 : vector<1x128x128xf32> to vector<128x128xf32>
    %cst_13 = arith.constant dense<0.000000e+00> : vector<128x8xf32>
    %15 = tpu.matmul %14, %10, %cst_13 {dimension_numbers = #tpu.dot_dimension_numbers<[1], [0], [0], [1], [0, 0, 1, 1], [], []>} : vector<128x128xf32>, vector<128x8xf32>, vector<128x8xf32> -> vector<128x8xf32>
    %c0_14 = arith.constant 0 : index
    %c0_15 = arith.constant 0 : index
    %c0_16 = arith.constant 0 : index
    %16 = vector.load %arg4[%c0_14, %c0_15, %c0_16] : memref<9x8x8xf32, #tpu.memory_space<vmem>>, vector<1x8x8xf32>
    %17 = vector.shape_cast %16 : vector<1x8x8xf32> to vector<8x8xf32>
    %cst_17 = arith.constant dense<0.000000e+00> : vector<128x8xf32>
    %18 = tpu.matmul %15, %17, %cst_17 {dimension_numbers = #tpu.dot_dimension_numbers<[1], [0], [0], [1], [0, 0, 1, 1], [], []>} : vector<128x8xf32>, vector<8x8xf32>, vector<128x8xf32> -> vector<128x8xf32>
    %19 = arith.addf %12, %18 : vector<128x8xf32>
    %c1 = arith.constant 1 : index
    %c0_18 = arith.constant 0 : index
    %c0_19 = arith.constant 0 : index
    %20 = vector.load %arg3[%c1, %c0_18, %c0_19] : memref<9x128x128xf32, #tpu.memory_space<vmem>>, vector<1x128x128xf32>
    %21 = vector.shape_cast %20 : vector<1x128x128xf32> to vector<128x128xf32>
    %cst_20 = arith.constant dense<0.000000e+00> : vector<128x8xf32>
    %22 = tpu.matmul %21, %10, %cst_20 {dimension_numbers = #tpu.dot_dimension_numbers<[1], [0], [0], [1], [0, 0, 1, 1], [], []>} : vector<128x128xf32>, vector<128x8xf32>, vector<128x8xf32> -> vector<128x8xf32>
    %c1_21 = arith.constant 1 : index
    %c0_22 = arith.constant 0 : index
    %c0_23 = arith.constant 0 : index
    %23 = vector.load %arg4[%c1_21, %c0_22, %c0_23] : memref<9x8x8xf32, #tpu.memory_space<vmem>>, vector<1x8x8xf32>
    %24 = vector.shape_cast %23 : vector<1x8x8xf32> to vector<8x8xf32>
    %cst_24 = arith.constant dense<0.000000e+00> : vector<128x8xf32>
    %25 = tpu.matmul %22, %24, %cst_24 {dimension_numbers = #tpu.dot_dimension_numbers<[1], [0], [0], [1], [0, 0, 1, 1], [], []>} : vector<128x8xf32>, vector<8x8xf32>, vector<128x8xf32> -> vector<128x8xf32>
    %26 = arith.addf %19, %25 : vector<128x8xf32>
    %c2 = arith.constant 2 : index
    %c0_25 = arith.constant 0 : index
    %c0_26 = arith.constant 0 : index
    %27 = vector.load %arg3[%c2, %c0_25, %c0_26] : memref<9x128x128xf32, #tpu.memory_space<vmem>>, vector<1x128x128xf32>
    %28 = vector.shape_cast %27 : vector<1x128x128xf32> to vector<128x128xf32>
    %cst_27 = arith.constant dense<0.000000e+00> : vector<128x8xf32>
    %29 = tpu.matmul %28, %10, %cst_27 {dimension_numbers = #tpu.dot_dimension_numbers<[1], [0], [0], [1], [0, 0, 1, 1], [], []>} : vector<128x128xf32>, vector<128x8xf32>, vector<128x8xf32> -> vector<128x8xf32>
    %c2_28 = arith.constant 2 : index
    %c0_29 = arith.constant 0 : index
    %c0_30 = arith.constant 0 : index
    %30 = vector.load %arg4[%c2_28, %c0_29, %c0_30] : memref<9x8x8xf32, #tpu.memory_space<vmem>>, vector<1x8x8xf32>
    %31 = vector.shape_cast %30 : vector<1x8x8xf32> to vector<8x8xf32>
    %cst_31 = arith.constant dense<0.000000e+00> : vector<128x8xf32>
    %32 = tpu.matmul %29, %31, %cst_31 {dimension_numbers = #tpu.dot_dimension_numbers<[1], [0], [0], [1], [0, 0, 1, 1], [], []>} : vector<128x8xf32>, vector<8x8xf32>, vector<128x8xf32> -> vector<128x8xf32>
    %33 = arith.addf %26, %32 : vector<128x8xf32>
    %c3 = arith.constant 3 : index
    %c0_32 = arith.constant 0 : index
    %c0_33 = arith.constant 0 : index
    %34 = vector.load %arg3[%c3, %c0_32, %c0_33] : memref<9x128x128xf32, #tpu.memory_space<vmem>>, vector<1x128x128xf32>
    %35 = vector.shape_cast %34 : vector<1x128x128xf32> to vector<128x128xf32>
    %cst_34 = arith.constant dense<0.000000e+00> : vector<128x8xf32>
    %36 = tpu.matmul %35, %10, %cst_34 {dimension_numbers = #tpu.dot_dimension_numbers<[1], [0], [0], [1], [0, 0, 1, 1], [], []>} : vector<128x128xf32>, vector<128x8xf32>, vector<128x8xf32> -> vector<128x8xf32>
    %c3_35 = arith.constant 3 : index
    %c0_36 = arith.constant 0 : index
    %c0_37 = arith.constant 0 : index
    %37 = vector.load %arg4[%c3_35, %c0_36, %c0_37] : memref<9x8x8xf32, #tpu.memory_space<vmem>>, vector<1x8x8xf32>
    %38 = vector.shape_cast %37 : vector<1x8x8xf32> to vector<8x8xf32>
    %cst_38 = arith.constant dense<0.000000e+00> : vector<128x8xf32>
    %39 = tpu.matmul %36, %38, %cst_38 {dimension_numbers = #tpu.dot_dimension_numbers<[1], [0], [0], [1], [0, 0, 1, 1], [], []>} : vector<128x8xf32>, vector<8x8xf32>, vector<128x8xf32> -> vector<128x8xf32>
    %40 = arith.addf %33, %39 : vector<128x8xf32>
    %c4 = arith.constant 4 : index
    %c0_39 = arith.constant 0 : index
    %c0_40 = arith.constant 0 : index
    %41 = vector.load %arg3[%c4, %c0_39, %c0_40] : memref<9x128x128xf32, #tpu.memory_space<vmem>>, vector<1x128x128xf32>
    %42 = vector.shape_cast %41 : vector<1x128x128xf32> to vector<128x128xf32>
    %cst_41 = arith.constant dense<0.000000e+00> : vector<128x8xf32>
    %43 = tpu.matmul %42, %10, %cst_41 {dimension_numbers = #tpu.dot_dimension_numbers<[1], [0], [0], [1], [0, 0, 1, 1], [], []>} : vector<128x128xf32>, vector<128x8xf32>, vector<128x8xf32> -> vector<128x8xf32>
    %c4_42 = arith.constant 4 : index
    %c0_43 = arith.constant 0 : index
    %c0_44 = arith.constant 0 : index
    %44 = vector.load %arg4[%c4_42, %c0_43, %c0_44] : memref<9x8x8xf32, #tpu.memory_space<vmem>>, vector<1x8x8xf32>
    %45 = vector.shape_cast %44 : vector<1x8x8xf32> to vector<8x8xf32>
    %cst_45 = arith.constant dense<0.000000e+00> : vector<128x8xf32>
    %46 = tpu.matmul %43, %45, %cst_45 {dimension_numbers = #tpu.dot_dimension_numbers<[1], [0], [0], [1], [0, 0, 1, 1], [], []>} : vector<128x8xf32>, vector<8x8xf32>, vector<128x8xf32> -> vector<128x8xf32>
    %47 = arith.addf %40, %46 : vector<128x8xf32>
    %c5 = arith.constant 5 : index
    %c0_46 = arith.constant 0 : index
    %c0_47 = arith.constant 0 : index
    %48 = vector.load %arg3[%c5, %c0_46, %c0_47] : memref<9x128x128xf32, #tpu.memory_space<vmem>>, vector<1x128x128xf32>
    %49 = vector.shape_cast %48 : vector<1x128x128xf32> to vector<128x128xf32>
    %cst_48 = arith.constant dense<0.000000e+00> : vector<128x8xf32>
    %50 = tpu.matmul %49, %10, %cst_48 {dimension_numbers = #tpu.dot_dimension_numbers<[1], [0], [0], [1], [0, 0, 1, 1], [], []>} : vector<128x128xf32>, vector<128x8xf32>, vector<128x8xf32> -> vector<128x8xf32>
    %c5_49 = arith.constant 5 : index
    %c0_50 = arith.constant 0 : index
    %c0_51 = arith.constant 0 : index
    %51 = vector.load %arg4[%c5_49, %c0_50, %c0_51] : memref<9x8x8xf32, #tpu.memory_space<vmem>>, vector<1x8x8xf32>
    %52 = vector.shape_cast %51 : vector<1x8x8xf32> to vector<8x8xf32>
    %cst_52 = arith.constant dense<0.000000e+00> : vector<128x8xf32>
    %53 = tpu.matmul %50, %52, %cst_52 {dimension_numbers = #tpu.dot_dimension_numbers<[1], [0], [0], [1], [0, 0, 1, 1], [], []>} : vector<128x8xf32>, vector<8x8xf32>, vector<128x8xf32> -> vector<128x8xf32>
    %54 = arith.addf %47, %53 : vector<128x8xf32>
    %c6 = arith.constant 6 : index
    %c0_53 = arith.constant 0 : index
    %c0_54 = arith.constant 0 : index
    %55 = vector.load %arg3[%c6, %c0_53, %c0_54] : memref<9x128x128xf32, #tpu.memory_space<vmem>>, vector<1x128x128xf32>
    %56 = vector.shape_cast %55 : vector<1x128x128xf32> to vector<128x128xf32>
    %cst_55 = arith.constant dense<0.000000e+00> : vector<128x8xf32>
    %57 = tpu.matmul %56, %10, %cst_55 {dimension_numbers = #tpu.dot_dimension_numbers<[1], [0], [0], [1], [0, 0, 1, 1], [], []>} : vector<128x128xf32>, vector<128x8xf32>, vector<128x8xf32> -> vector<128x8xf32>
    %c6_56 = arith.constant 6 : index
    %c0_57 = arith.constant 0 : index
    %c0_58 = arith.constant 0 : index
    %58 = vector.load %arg4[%c6_56, %c0_57, %c0_58] : memref<9x8x8xf32, #tpu.memory_space<vmem>>, vector<1x8x8xf32>
    %59 = vector.shape_cast %58 : vector<1x8x8xf32> to vector<8x8xf32>
    %cst_59 = arith.constant dense<0.000000e+00> : vector<128x8xf32>
    %60 = tpu.matmul %57, %59, %cst_59 {dimension_numbers = #tpu.dot_dimension_numbers<[1], [0], [0], [1], [0, 0, 1, 1], [], []>} : vector<128x8xf32>, vector<8x8xf32>, vector<128x8xf32> -> vector<128x8xf32>
    %61 = arith.addf %54, %60 : vector<128x8xf32>
    %c7 = arith.constant 7 : index
    %c0_60 = arith.constant 0 : index
    %c0_61 = arith.constant 0 : index
    %62 = vector.load %arg3[%c7, %c0_60, %c0_61] : memref<9x128x128xf32, #tpu.memory_space<vmem>>, vector<1x128x128xf32>
    %63 = vector.shape_cast %62 : vector<1x128x128xf32> to vector<128x128xf32>
    %cst_62 = arith.constant dense<0.000000e+00> : vector<128x8xf32>
    %64 = tpu.matmul %63, %10, %cst_62 {dimension_numbers = #tpu.dot_dimension_numbers<[1], [0], [0], [1], [0, 0, 1, 1], [], []>} : vector<128x128xf32>, vector<128x8xf32>, vector<128x8xf32> -> vector<128x8xf32>
    %c7_63 = arith.constant 7 : index
    %c0_64 = arith.constant 0 : index
    %c0_65 = arith.constant 0 : index
    %65 = vector.load %arg4[%c7_63, %c0_64, %c0_65] : memref<9x8x8xf32, #tpu.memory_space<vmem>>, vector<1x8x8xf32>
    %66 = vector.shape_cast %65 : vector<1x8x8xf32> to vector<8x8xf32>
    %cst_66 = arith.constant dense<0.000000e+00> : vector<128x8xf32>
    %67 = tpu.matmul %64, %66, %cst_66 {dimension_numbers = #tpu.dot_dimension_numbers<[1], [0], [0], [1], [0, 0, 1, 1], [], []>} : vector<128x8xf32>, vector<8x8xf32>, vector<128x8xf32> -> vector<128x8xf32>
    %68 = arith.addf %61, %67 : vector<128x8xf32>
    %c8 = arith.constant 8 : index
    %c0_67 = arith.constant 0 : index
    %c0_68 = arith.constant 0 : index
    %69 = vector.load %arg3[%c8, %c0_67, %c0_68] : memref<9x128x128xf32, #tpu.memory_space<vmem>>, vector<1x128x128xf32>
    %70 = vector.shape_cast %69 : vector<1x128x128xf32> to vector<128x128xf32>
    %cst_69 = arith.constant dense<0.000000e+00> : vector<128x8xf32>
    %71 = tpu.matmul %70, %10, %cst_69 {dimension_numbers = #tpu.dot_dimension_numbers<[1], [0], [0], [1], [0, 0, 1, 1], [], []>} : vector<128x128xf32>, vector<128x8xf32>, vector<128x8xf32> -> vector<128x8xf32>
    %c8_70 = arith.constant 8 : index
    %c0_71 = arith.constant 0 : index
    %c0_72 = arith.constant 0 : index
    %72 = vector.load %arg4[%c8_70, %c0_71, %c0_72] : memref<9x8x8xf32, #tpu.memory_space<vmem>>, vector<1x8x8xf32>
    %73 = vector.shape_cast %72 : vector<1x8x8xf32> to vector<8x8xf32>
    %cst_73 = arith.constant dense<0.000000e+00> : vector<128x8xf32>
    %74 = tpu.matmul %71, %73, %cst_73 {dimension_numbers = #tpu.dot_dimension_numbers<[1], [0], [0], [1], [0, 0, 1, 1], [], []>} : vector<128x8xf32>, vector<8x8xf32>, vector<128x8xf32> -> vector<128x8xf32>
    %75 = arith.addf %68, %74 : vector<128x8xf32>
    %76 = vector.broadcast %11 : vector<1x8xf32> to vector<128x8xf32>
    %77 = arith.addf %75, %76 : vector<128x8xf32>
    %cst_74 = arith.constant 0.000000e+00 : f32
    %78 = vector.broadcast %cst_74 : f32 to vector<128x8xf32>
    %79 = arith.cmpf ogt, %77, %78 : vector<128x8xf32>
    %cst_75 = arith.constant 2.000000e-01 : f32
    %80 = vector.broadcast %cst_75 : f32 to vector<128x8xf32>
    %81 = arith.mulf %80, %77 : vector<128x8xf32>
    %82 = arith.select %79, %77, %81 : vector<128x8xi1>, vector<128x8xf32>
    %c0_76 = arith.constant 0 : index
    %c0_77 = arith.constant 0 : index
    %83 = vector.load %arg6[%c0_76, %c0_77] : memref<8x128xf32, #tpu.memory_space<vmem>>, vector<8x128xf32>
    %c0_78 = arith.constant 0 : index
    %c0_79 = arith.constant 0 : index
    %84 = vector.load %arg7[%c0_78, %c0_79] : memref<8x8xf32, #tpu.memory_space<vmem>>, vector<8x8xf32>
    %c0_80 = arith.constant 0 : index
    %c0_81 = arith.constant 0 : index
    %85 = vector.load %arg8[%c0_80, %c0_81] : memref<1x8xf32, #tpu.memory_space<vmem>>, vector<1x8xf32>
    %c0_82 = arith.constant 0 : index
    %c0_83 = arith.constant 0 : index
    %86 = vector.load %arg9[%c0_82, %c0_83] : memref<8x8xf32, #tpu.memory_space<vmem>>, vector<8x8xf32>
    %c0_84 = arith.constant 0 : index
    %c0_85 = arith.constant 0 : index
    %87 = vector.load %arg10[%c0_84, %c0_85] : memref<1x8xf32, #tpu.memory_space<vmem>>, vector<1x8xf32>
    %c0_86 = arith.constant 0 : index
    %c0_87 = arith.constant 0 : index
    %88 = vector.load %arg11[%c0_86, %c0_87] : memref<128x8xf32, #tpu.memory_space<vmem>>, vector<128x8xf32>
    %cst_88 = arith.constant dense<0.000000e+00> : vector<8x8xf32>
    %89 = tpu.matmul %83, %82, %cst_88 {dimension_numbers = #tpu.dot_dimension_numbers<[1], [0], [0], [1], [0, 0, 1, 1], [], []>} : vector<8x128xf32>, vector<128x8xf32>, vector<8x8xf32> -> vector<8x8xf32>
    %cst_89 = arith.constant dense<0.000000e+00> : vector<8x8xf32>
    %90 = tpu.matmul %89, %84, %cst_89 {dimension_numbers = #tpu.dot_dimension_numbers<[1], [0], [0], [1], [0, 0, 1, 1], [], []>} : vector<8x8xf32>, vector<8x8xf32>, vector<8x8xf32> -> vector<8x8xf32>
    %91 = vector.broadcast %85 : vector<1x8xf32> to vector<8x8xf32>
    %92 = arith.addf %90, %91 : vector<8x8xf32>
    %cst_90 = arith.constant 0.000000e+00 : f32
    %93 = vector.broadcast %cst_90 : f32 to vector<8x8xf32>
    %94 = arith.maximumf %92, %93 : vector<8x8xf32>
    %cst_91 = arith.constant dense<0.000000e+00> : vector<8x8xf32>
    %95 = tpu.matmul %94, %86, %cst_91 {dimension_numbers = #tpu.dot_dimension_numbers<[1], [0], [0], [1], [0, 0, 1, 1], [], []>} : vector<8x8xf32>, vector<8x8xf32>, vector<8x8xf32> -> vector<8x8xf32>
    %96 = vector.broadcast %87 : vector<1x8xf32> to vector<8x8xf32>
    %97 = arith.addf %95, %96 : vector<8x8xf32>
    %98 = arith.negf %97 : vector<8x8xf32>
    %99 = math.exp %98 : vector<8x8xf32>
    %cst_92 = arith.constant 1.000000e+00 : f32
    %100 = vector.broadcast %cst_92 : f32 to vector<8x8xf32>
    %101 = arith.addf %100, %99 : vector<8x8xf32>
    %102 = arith.divf %100, %101 : vector<8x8xf32>
    %cst_93 = arith.constant dense<0.000000e+00> : vector<128x8xf32>
    %103 = tpu.matmul %88, %102, %cst_93 {dimension_numbers = #tpu.dot_dimension_numbers<[1], [0], [0], [1], [0, 0, 1, 1], [], []>} : vector<128x8xf32>, vector<8x8xf32>, vector<128x8xf32> -> vector<128x8xf32>
    %104 = arith.mulf %82, %103 : vector<128x8xf32>
    %c0_94 = arith.constant 0 : index
    %c0_95 = arith.constant 0 : index
    %105 = vector.load %arg14[%c0_94, %c0_95] : memref<1x8xf32, #tpu.memory_space<vmem>>, vector<1x8xf32>
    %cst_96 = arith.constant 0.000000e+00 : f32
    %106 = vector.broadcast %cst_96 : f32 to vector<32x8xf32>
    %c0_97 = arith.constant 0 : index
    %c0_98 = arith.constant 0 : index
    %c0_99 = arith.constant 0 : index
    %107 = vector.load %arg12[%c0_97, %c0_98, %c0_99] : memref<9x32x128xf32, #tpu.memory_space<vmem>>, vector<1x32x128xf32>
    %108 = vector.shape_cast %107 : vector<1x32x128xf32> to vector<32x128xf32>
    %cst_100 = arith.constant dense<0.000000e+00> : vector<32x8xf32>
    %109 = tpu.matmul %108, %104, %cst_100 {dimension_numbers = #tpu.dot_dimension_numbers<[1], [0], [0], [1], [0, 0, 1, 1], [], []>} : vector<32x128xf32>, vector<128x8xf32>, vector<32x8xf32> -> vector<32x8xf32>
    %c0_101 = arith.constant 0 : index
    %c0_102 = arith.constant 0 : index
    %c0_103 = arith.constant 0 : index
    %110 = vector.load %arg13[%c0_101, %c0_102, %c0_103] : memref<9x8x8xf32, #tpu.memory_space<vmem>>, vector<1x8x8xf32>
    %111 = vector.shape_cast %110 : vector<1x8x8xf32> to vector<8x8xf32>
    %cst_104 = arith.constant dense<0.000000e+00> : vector<32x8xf32>
    %112 = tpu.matmul %109, %111, %cst_104 {dimension_numbers = #tpu.dot_dimension_numbers<[1], [0], [0], [1], [0, 0, 1, 1], [], []>} : vector<32x8xf32>, vector<8x8xf32>, vector<32x8xf32> -> vector<32x8xf32>
    %113 = arith.addf %106, %112 : vector<32x8xf32>
    %c1_105 = arith.constant 1 : index
    %c0_106 = arith.constant 0 : index
    %c0_107 = arith.constant 0 : index
    %114 = vector.load %arg12[%c1_105, %c0_106, %c0_107] : memref<9x32x128xf32, #tpu.memory_space<vmem>>, vector<1x32x128xf32>
    %115 = vector.shape_cast %114 : vector<1x32x128xf32> to vector<32x128xf32>
    %cst_108 = arith.constant dense<0.000000e+00> : vector<32x8xf32>
    %116 = tpu.matmul %115, %104, %cst_108 {dimension_numbers = #tpu.dot_dimension_numbers<[1], [0], [0], [1], [0, 0, 1, 1], [], []>} : vector<32x128xf32>, vector<128x8xf32>, vector<32x8xf32> -> vector<32x8xf32>
    %c1_109 = arith.constant 1 : index
    %c0_110 = arith.constant 0 : index
    %c0_111 = arith.constant 0 : index
    %117 = vector.load %arg13[%c1_109, %c0_110, %c0_111] : memref<9x8x8xf32, #tpu.memory_space<vmem>>, vector<1x8x8xf32>
    %118 = vector.shape_cast %117 : vector<1x8x8xf32> to vector<8x8xf32>
    %cst_112 = arith.constant dense<0.000000e+00> : vector<32x8xf32>
    %119 = tpu.matmul %116, %118, %cst_112 {dimension_numbers = #tpu.dot_dimension_numbers<[1], [0], [0], [1], [0, 0, 1, 1], [], []>} : vector<32x8xf32>, vector<8x8xf32>, vector<32x8xf32> -> vector<32x8xf32>
    %120 = arith.addf %113, %119 : vector<32x8xf32>
    %c2_113 = arith.constant 2 : index
    %c0_114 = arith.constant 0 : index
    %c0_115 = arith.constant 0 : index
    %121 = vector.load %arg12[%c2_113, %c0_114, %c0_115] : memref<9x32x128xf32, #tpu.memory_space<vmem>>, vector<1x32x128xf32>
    %122 = vector.shape_cast %121 : vector<1x32x128xf32> to vector<32x128xf32>
    %cst_116 = arith.constant dense<0.000000e+00> : vector<32x8xf32>
    %123 = tpu.matmul %122, %104, %cst_116 {dimension_numbers = #tpu.dot_dimension_numbers<[1], [0], [0], [1], [0, 0, 1, 1], [], []>} : vector<32x128xf32>, vector<128x8xf32>, vector<32x8xf32> -> vector<32x8xf32>
    %c2_117 = arith.constant 2 : index
    %c0_118 = arith.constant 0 : index
    %c0_119 = arith.constant 0 : index
    %124 = vector.load %arg13[%c2_117, %c0_118, %c0_119] : memref<9x8x8xf32, #tpu.memory_space<vmem>>, vector<1x8x8xf32>
    %125 = vector.shape_cast %124 : vector<1x8x8xf32> to vector<8x8xf32>
    %cst_120 = arith.constant dense<0.000000e+00> : vector<32x8xf32>
    %126 = tpu.matmul %123, %125, %cst_120 {dimension_numbers = #tpu.dot_dimension_numbers<[1], [0], [0], [1], [0, 0, 1, 1], [], []>} : vector<32x8xf32>, vector<8x8xf32>, vector<32x8xf32> -> vector<32x8xf32>
    %127 = arith.addf %120, %126 : vector<32x8xf32>
    %c3_121 = arith.constant 3 : index
    %c0_122 = arith.constant 0 : index
    %c0_123 = arith.constant 0 : index
    %128 = vector.load %arg12[%c3_121, %c0_122, %c0_123] : memref<9x32x128xf32, #tpu.memory_space<vmem>>, vector<1x32x128xf32>
    %129 = vector.shape_cast %128 : vector<1x32x128xf32> to vector<32x128xf32>
    %cst_124 = arith.constant dense<0.000000e+00> : vector<32x8xf32>
    %130 = tpu.matmul %129, %104, %cst_124 {dimension_numbers = #tpu.dot_dimension_numbers<[1], [0], [0], [1], [0, 0, 1, 1], [], []>} : vector<32x128xf32>, vector<128x8xf32>, vector<32x8xf32> -> vector<32x8xf32>
    %c3_125 = arith.constant 3 : index
    %c0_126 = arith.constant 0 : index
    %c0_127 = arith.constant 0 : index
    %131 = vector.load %arg13[%c3_125, %c0_126, %c0_127] : memref<9x8x8xf32, #tpu.memory_space<vmem>>, vector<1x8x8xf32>
    %132 = vector.shape_cast %131 : vector<1x8x8xf32> to vector<8x8xf32>
    %cst_128 = arith.constant dense<0.000000e+00> : vector<32x8xf32>
    %133 = tpu.matmul %130, %132, %cst_128 {dimension_numbers = #tpu.dot_dimension_numbers<[1], [0], [0], [1], [0, 0, 1, 1], [], []>} : vector<32x8xf32>, vector<8x8xf32>, vector<32x8xf32> -> vector<32x8xf32>
    %134 = arith.addf %127, %133 : vector<32x8xf32>
    %c4_129 = arith.constant 4 : index
    %c0_130 = arith.constant 0 : index
    %c0_131 = arith.constant 0 : index
    %135 = vector.load %arg12[%c4_129, %c0_130, %c0_131] : memref<9x32x128xf32, #tpu.memory_space<vmem>>, vector<1x32x128xf32>
    %136 = vector.shape_cast %135 : vector<1x32x128xf32> to vector<32x128xf32>
    %cst_132 = arith.constant dense<0.000000e+00> : vector<32x8xf32>
    %137 = tpu.matmul %136, %104, %cst_132 {dimension_numbers = #tpu.dot_dimension_numbers<[1], [0], [0], [1], [0, 0, 1, 1], [], []>} : vector<32x128xf32>, vector<128x8xf32>, vector<32x8xf32> -> vector<32x8xf32>
    %c4_133 = arith.constant 4 : index
    %c0_134 = arith.constant 0 : index
    %c0_135 = arith.constant 0 : index
    %138 = vector.load %arg13[%c4_133, %c0_134, %c0_135] : memref<9x8x8xf32, #tpu.memory_space<vmem>>, vector<1x8x8xf32>
    %139 = vector.shape_cast %138 : vector<1x8x8xf32> to vector<8x8xf32>
    %cst_136 = arith.constant dense<0.000000e+00> : vector<32x8xf32>
    %140 = tpu.matmul %137, %139, %cst_136 {dimension_numbers = #tpu.dot_dimension_numbers<[1], [0], [0], [1], [0, 0, 1, 1], [], []>} : vector<32x8xf32>, vector<8x8xf32>, vector<32x8xf32> -> vector<32x8xf32>
    %141 = arith.addf %134, %140 : vector<32x8xf32>
    %c5_137 = arith.constant 5 : index
    %c0_138 = arith.constant 0 : index
    %c0_139 = arith.constant 0 : index
    %142 = vector.load %arg12[%c5_137, %c0_138, %c0_139] : memref<9x32x128xf32, #tpu.memory_space<vmem>>, vector<1x32x128xf32>
    %143 = vector.shape_cast %142 : vector<1x32x128xf32> to vector<32x128xf32>
    %cst_140 = arith.constant dense<0.000000e+00> : vector<32x8xf32>
    %144 = tpu.matmul %143, %104, %cst_140 {dimension_numbers = #tpu.dot_dimension_numbers<[1], [0], [0], [1], [0, 0, 1, 1], [], []>} : vector<32x128xf32>, vector<128x8xf32>, vector<32x8xf32> -> vector<32x8xf32>
    %c5_141 = arith.constant 5 : index
    %c0_142 = arith.constant 0 : index
    %c0_143 = arith.constant 0 : index
    %145 = vector.load %arg13[%c5_141, %c0_142, %c0_143] : memref<9x8x8xf32, #tpu.memory_space<vmem>>, vector<1x8x8xf32>
    %146 = vector.shape_cast %145 : vector<1x8x8xf32> to vector<8x8xf32>
    %cst_144 = arith.constant dense<0.000000e+00> : vector<32x8xf32>
    %147 = tpu.matmul %144, %146, %cst_144 {dimension_numbers = #tpu.dot_dimension_numbers<[1], [0], [0], [1], [0, 0, 1, 1], [], []>} : vector<32x8xf32>, vector<8x8xf32>, vector<32x8xf32> -> vector<32x8xf32>
    %148 = arith.addf %141, %147 : vector<32x8xf32>
    %c6_145 = arith.constant 6 : index
    %c0_146 = arith.constant 0 : index
    %c0_147 = arith.constant 0 : index
    %149 = vector.load %arg12[%c6_145, %c0_146, %c0_147] : memref<9x32x128xf32, #tpu.memory_space<vmem>>, vector<1x32x128xf32>
    %150 = vector.shape_cast %149 : vector<1x32x128xf32> to vector<32x128xf32>
    %cst_148 = arith.constant dense<0.000000e+00> : vector<32x8xf32>
    %151 = tpu.matmul %150, %104, %cst_148 {dimension_numbers = #tpu.dot_dimension_numbers<[1], [0], [0], [1], [0, 0, 1, 1], [], []>} : vector<32x128xf32>, vector<128x8xf32>, vector<32x8xf32> -> vector<32x8xf32>
    %c6_149 = arith.constant 6 : index
    %c0_150 = arith.constant 0 : index
    %c0_151 = arith.constant 0 : index
    %152 = vector.load %arg13[%c6_149, %c0_150, %c0_151] : memref<9x8x8xf32, #tpu.memory_space<vmem>>, vector<1x8x8xf32>
    %153 = vector.shape_cast %152 : vector<1x8x8xf32> to vector<8x8xf32>
    %cst_152 = arith.constant dense<0.000000e+00> : vector<32x8xf32>
    %154 = tpu.matmul %151, %153, %cst_152 {dimension_numbers = #tpu.dot_dimension_numbers<[1], [0], [0], [1], [0, 0, 1, 1], [], []>} : vector<32x8xf32>, vector<8x8xf32>, vector<32x8xf32> -> vector<32x8xf32>
    %155 = arith.addf %148, %154 : vector<32x8xf32>
    %c7_153 = arith.constant 7 : index
    %c0_154 = arith.constant 0 : index
    %c0_155 = arith.constant 0 : index
    %156 = vector.load %arg12[%c7_153, %c0_154, %c0_155] : memref<9x32x128xf32, #tpu.memory_space<vmem>>, vector<1x32x128xf32>
    %157 = vector.shape_cast %156 : vector<1x32x128xf32> to vector<32x128xf32>
    %cst_156 = arith.constant dense<0.000000e+00> : vector<32x8xf32>
    %158 = tpu.matmul %157, %104, %cst_156 {dimension_numbers = #tpu.dot_dimension_numbers<[1], [0], [0], [1], [0, 0, 1, 1], [], []>} : vector<32x128xf32>, vector<128x8xf32>, vector<32x8xf32> -> vector<32x8xf32>
    %c7_157 = arith.constant 7 : index
    %c0_158 = arith.constant 0 : index
    %c0_159 = arith.constant 0 : index
    %159 = vector.load %arg13[%c7_157, %c0_158, %c0_159] : memref<9x8x8xf32, #tpu.memory_space<vmem>>, vector<1x8x8xf32>
    %160 = vector.shape_cast %159 : vector<1x8x8xf32> to vector<8x8xf32>
    %cst_160 = arith.constant dense<0.000000e+00> : vector<32x8xf32>
    %161 = tpu.matmul %158, %160, %cst_160 {dimension_numbers = #tpu.dot_dimension_numbers<[1], [0], [0], [1], [0, 0, 1, 1], [], []>} : vector<32x8xf32>, vector<8x8xf32>, vector<32x8xf32> -> vector<32x8xf32>
    %162 = arith.addf %155, %161 : vector<32x8xf32>
    %c8_161 = arith.constant 8 : index
    %c0_162 = arith.constant 0 : index
    %c0_163 = arith.constant 0 : index
    %163 = vector.load %arg12[%c8_161, %c0_162, %c0_163] : memref<9x32x128xf32, #tpu.memory_space<vmem>>, vector<1x32x128xf32>
    %164 = vector.shape_cast %163 : vector<1x32x128xf32> to vector<32x128xf32>
    %cst_164 = arith.constant dense<0.000000e+00> : vector<32x8xf32>
    %165 = tpu.matmul %164, %104, %cst_164 {dimension_numbers = #tpu.dot_dimension_numbers<[1], [0], [0], [1], [0, 0, 1, 1], [], []>} : vector<32x128xf32>, vector<128x8xf32>, vector<32x8xf32> -> vector<32x8xf32>
    %c8_165 = arith.constant 8 : index
    %c0_166 = arith.constant 0 : index
    %c0_167 = arith.constant 0 : index
    %166 = vector.load %arg13[%c8_165, %c0_166, %c0_167] : memref<9x8x8xf32, #tpu.memory_space<vmem>>, vector<1x8x8xf32>
    %167 = vector.shape_cast %166 : vector<1x8x8xf32> to vector<8x8xf32>
    %cst_168 = arith.constant dense<0.000000e+00> : vector<32x8xf32>
    %168 = tpu.matmul %165, %167, %cst_168 {dimension_numbers = #tpu.dot_dimension_numbers<[1], [0], [0], [1], [0, 0, 1, 1], [], []>} : vector<32x8xf32>, vector<8x8xf32>, vector<32x8xf32> -> vector<32x8xf32>
    %169 = arith.addf %162, %168 : vector<32x8xf32>
    %170 = vector.broadcast %105 : vector<1x8xf32> to vector<32x8xf32>
    %171 = arith.addf %169, %170 : vector<32x8xf32>
    %cst_169 = arith.constant 0.000000e+00 : f32
    %172 = vector.broadcast %cst_169 : f32 to vector<32x8xf32>
    %173 = arith.cmpf ogt, %171, %172 : vector<32x8xf32>
    %cst_170 = arith.constant 2.000000e-01 : f32
    %174 = vector.broadcast %cst_170 : f32 to vector<32x8xf32>
    %175 = arith.mulf %174, %171 : vector<32x8xf32>
    %176 = arith.select %173, %171, %175 : vector<32x8xi1>, vector<32x8xf32>
    %c0_171 = arith.constant 0 : index
    %c0_172 = arith.constant 0 : index
    %177 = vector.load %arg17[%c0_171, %c0_172] : memref<1x16xf32, #tpu.memory_space<vmem>>, vector<1x16xf32>
    %cst_173 = arith.constant 0.000000e+00 : f32
    %178 = vector.broadcast %cst_173 : f32 to vector<32x16xf32>
    %c0_174 = arith.constant 0 : index
    %c0_175 = arith.constant 0 : index
    %c0_176 = arith.constant 0 : index
    %179 = vector.load %arg15[%c0_174, %c0_175, %c0_176] : memref<9x32x32xf32, #tpu.memory_space<vmem>>, vector<1x32x32xf32>
    %180 = vector.shape_cast %179 : vector<1x32x32xf32> to vector<32x32xf32>
    %cst_177 = arith.constant dense<0.000000e+00> : vector<32x8xf32>
    %181 = tpu.matmul %180, %176, %cst_177 {dimension_numbers = #tpu.dot_dimension_numbers<[1], [0], [0], [1], [0, 0, 1, 1], [], []>} : vector<32x32xf32>, vector<32x8xf32>, vector<32x8xf32> -> vector<32x8xf32>
    %c0_178 = arith.constant 0 : index
    %c0_179 = arith.constant 0 : index
    %c0_180 = arith.constant 0 : index
    %182 = vector.load %arg16[%c0_178, %c0_179, %c0_180] : memref<9x8x16xf32, #tpu.memory_space<vmem>>, vector<1x8x16xf32>
    %183 = vector.shape_cast %182 : vector<1x8x16xf32> to vector<8x16xf32>
    %cst_181 = arith.constant dense<0.000000e+00> : vector<32x16xf32>
    %184 = tpu.matmul %181, %183, %cst_181 {dimension_numbers = #tpu.dot_dimension_numbers<[1], [0], [0], [1], [0, 0, 1, 1], [], []>} : vector<32x8xf32>, vector<8x16xf32>, vector<32x16xf32> -> vector<32x16xf32>
    %185 = arith.addf %178, %184 : vector<32x16xf32>
    %c1_182 = arith.constant 1 : index
    %c0_183 = arith.constant 0 : index
    %c0_184 = arith.constant 0 : index
    %186 = vector.load %arg15[%c1_182, %c0_183, %c0_184] : memref<9x32x32xf32, #tpu.memory_space<vmem>>, vector<1x32x32xf32>
    %187 = vector.shape_cast %186 : vector<1x32x32xf32> to vector<32x32xf32>
    %cst_185 = arith.constant dense<0.000000e+00> : vector<32x8xf32>
    %188 = tpu.matmul %187, %176, %cst_185 {dimension_numbers = #tpu.dot_dimension_numbers<[1], [0], [0], [1], [0, 0, 1, 1], [], []>} : vector<32x32xf32>, vector<32x8xf32>, vector<32x8xf32> -> vector<32x8xf32>
    %c1_186 = arith.constant 1 : index
    %c0_187 = arith.constant 0 : index
    %c0_188 = arith.constant 0 : index
    %189 = vector.load %arg16[%c1_186, %c0_187, %c0_188] : memref<9x8x16xf32, #tpu.memory_space<vmem>>, vector<1x8x16xf32>
    %190 = vector.shape_cast %189 : vector<1x8x16xf32> to vector<8x16xf32>
    %cst_189 = arith.constant dense<0.000000e+00> : vector<32x16xf32>
    %191 = tpu.matmul %188, %190, %cst_189 {dimension_numbers = #tpu.dot_dimension_numbers<[1], [0], [0], [1], [0, 0, 1, 1], [], []>} : vector<32x8xf32>, vector<8x16xf32>, vector<32x16xf32> -> vector<32x16xf32>
    %192 = arith.addf %185, %191 : vector<32x16xf32>
    %c2_190 = arith.constant 2 : index
    %c0_191 = arith.constant 0 : index
    %c0_192 = arith.constant 0 : index
    %193 = vector.load %arg15[%c2_190, %c0_191, %c0_192] : memref<9x32x32xf32, #tpu.memory_space<vmem>>, vector<1x32x32xf32>
    %194 = vector.shape_cast %193 : vector<1x32x32xf32> to vector<32x32xf32>
    %cst_193 = arith.constant dense<0.000000e+00> : vector<32x8xf32>
    %195 = tpu.matmul %194, %176, %cst_193 {dimension_numbers = #tpu.dot_dimension_numbers<[1], [0], [0], [1], [0, 0, 1, 1], [], []>} : vector<32x32xf32>, vector<32x8xf32>, vector<32x8xf32> -> vector<32x8xf32>
    %c2_194 = arith.constant 2 : index
    %c0_195 = arith.constant 0 : index
    %c0_196 = arith.constant 0 : index
    %196 = vector.load %arg16[%c2_194, %c0_195, %c0_196] : memref<9x8x16xf32, #tpu.memory_space<vmem>>, vector<1x8x16xf32>
    %197 = vector.shape_cast %196 : vector<1x8x16xf32> to vector<8x16xf32>
    %cst_197 = arith.constant dense<0.000000e+00> : vector<32x16xf32>
    %198 = tpu.matmul %195, %197, %cst_197 {dimension_numbers = #tpu.dot_dimension_numbers<[1], [0], [0], [1], [0, 0, 1, 1], [], []>} : vector<32x8xf32>, vector<8x16xf32>, vector<32x16xf32> -> vector<32x16xf32>
    %199 = arith.addf %192, %198 : vector<32x16xf32>
    %c3_198 = arith.constant 3 : index
    %c0_199 = arith.constant 0 : index
    %c0_200 = arith.constant 0 : index
    %200 = vector.load %arg15[%c3_198, %c0_199, %c0_200] : memref<9x32x32xf32, #tpu.memory_space<vmem>>, vector<1x32x32xf32>
    %201 = vector.shape_cast %200 : vector<1x32x32xf32> to vector<32x32xf32>
    %cst_201 = arith.constant dense<0.000000e+00> : vector<32x8xf32>
    %202 = tpu.matmul %201, %176, %cst_201 {dimension_numbers = #tpu.dot_dimension_numbers<[1], [0], [0], [1], [0, 0, 1, 1], [], []>} : vector<32x32xf32>, vector<32x8xf32>, vector<32x8xf32> -> vector<32x8xf32>
    %c3_202 = arith.constant 3 : index
    %c0_203 = arith.constant 0 : index
    %c0_204 = arith.constant 0 : index
    %203 = vector.load %arg16[%c3_202, %c0_203, %c0_204] : memref<9x8x16xf32, #tpu.memory_space<vmem>>, vector<1x8x16xf32>
    %204 = vector.shape_cast %203 : vector<1x8x16xf32> to vector<8x16xf32>
    %cst_205 = arith.constant dense<0.000000e+00> : vector<32x16xf32>
    %205 = tpu.matmul %202, %204, %cst_205 {dimension_numbers = #tpu.dot_dimension_numbers<[1], [0], [0], [1], [0, 0, 1, 1], [], []>} : vector<32x8xf32>, vector<8x16xf32>, vector<32x16xf32> -> vector<32x16xf32>
    %206 = arith.addf %199, %205 : vector<32x16xf32>
    %c4_206 = arith.constant 4 : index
    %c0_207 = arith.constant 0 : index
    %c0_208 = arith.constant 0 : index
    %207 = vector.load %arg15[%c4_206, %c0_207, %c0_208] : memref<9x32x32xf32, #tpu.memory_space<vmem>>, vector<1x32x32xf32>
    %208 = vector.shape_cast %207 : vector<1x32x32xf32> to vector<32x32xf32>
    %cst_209 = arith.constant dense<0.000000e+00> : vector<32x8xf32>
    %209 = tpu.matmul %208, %176, %cst_209 {dimension_numbers = #tpu.dot_dimension_numbers<[1], [0], [0], [1], [0, 0, 1, 1], [], []>} : vector<32x32xf32>, vector<32x8xf32>, vector<32x8xf32> -> vector<32x8xf32>
    %c4_210 = arith.constant 4 : index
    %c0_211 = arith.constant 0 : index
    %c0_212 = arith.constant 0 : index
    %210 = vector.load %arg16[%c4_210, %c0_211, %c0_212] : memref<9x8x16xf32, #tpu.memory_space<vmem>>, vector<1x8x16xf32>
    %211 = vector.shape_cast %210 : vector<1x8x16xf32> to vector<8x16xf32>
    %cst_213 = arith.constant dense<0.000000e+00> : vector<32x16xf32>
    %212 = tpu.matmul %209, %211, %cst_213 {dimension_numbers = #tpu.dot_dimension_numbers<[1], [0], [0], [1], [0, 0, 1, 1], [], []>} : vector<32x8xf32>, vector<8x16xf32>, vector<32x16xf32> -> vector<32x16xf32>
    %213 = arith.addf %206, %212 : vector<32x16xf32>
    %c5_214 = arith.constant 5 : index
    %c0_215 = arith.constant 0 : index
    %c0_216 = arith.constant 0 : index
    %214 = vector.load %arg15[%c5_214, %c0_215, %c0_216] : memref<9x32x32xf32, #tpu.memory_space<vmem>>, vector<1x32x32xf32>
    %215 = vector.shape_cast %214 : vector<1x32x32xf32> to vector<32x32xf32>
    %cst_217 = arith.constant dense<0.000000e+00> : vector<32x8xf32>
    %216 = tpu.matmul %215, %176, %cst_217 {dimension_numbers = #tpu.dot_dimension_numbers<[1], [0], [0], [1], [0, 0, 1, 1], [], []>} : vector<32x32xf32>, vector<32x8xf32>, vector<32x8xf32> -> vector<32x8xf32>
    %c5_218 = arith.constant 5 : index
    %c0_219 = arith.constant 0 : index
    %c0_220 = arith.constant 0 : index
    %217 = vector.load %arg16[%c5_218, %c0_219, %c0_220] : memref<9x8x16xf32, #tpu.memory_space<vmem>>, vector<1x8x16xf32>
    %218 = vector.shape_cast %217 : vector<1x8x16xf32> to vector<8x16xf32>
    %cst_221 = arith.constant dense<0.000000e+00> : vector<32x16xf32>
    %219 = tpu.matmul %216, %218, %cst_221 {dimension_numbers = #tpu.dot_dimension_numbers<[1], [0], [0], [1], [0, 0, 1, 1], [], []>} : vector<32x8xf32>, vector<8x16xf32>, vector<32x16xf32> -> vector<32x16xf32>
    %220 = arith.addf %213, %219 : vector<32x16xf32>
    %c6_222 = arith.constant 6 : index
    %c0_223 = arith.constant 0 : index
    %c0_224 = arith.constant 0 : index
    %221 = vector.load %arg15[%c6_222, %c0_223, %c0_224] : memref<9x32x32xf32, #tpu.memory_space<vmem>>, vector<1x32x32xf32>
    %222 = vector.shape_cast %221 : vector<1x32x32xf32> to vector<32x32xf32>
    %cst_225 = arith.constant dense<0.000000e+00> : vector<32x8xf32>
    %223 = tpu.matmul %222, %176, %cst_225 {dimension_numbers = #tpu.dot_dimension_numbers<[1], [0], [0], [1], [0, 0, 1, 1], [], []>} : vector<32x32xf32>, vector<32x8xf32>, vector<32x8xf32> -> vector<32x8xf32>
    %c6_226 = arith.constant 6 : index
    %c0_227 = arith.constant 0 : index
    %c0_228 = arith.constant 0 : index
    %224 = vector.load %arg16[%c6_226, %c0_227, %c0_228] : memref<9x8x16xf32, #tpu.memory_space<vmem>>, vector<1x8x16xf32>
    %225 = vector.shape_cast %224 : vector<1x8x16xf32> to vector<8x16xf32>
    %cst_229 = arith.constant dense<0.000000e+00> : vector<32x16xf32>
    %226 = tpu.matmul %223, %225, %cst_229 {dimension_numbers = #tpu.dot_dimension_numbers<[1], [0], [0], [1], [0, 0, 1, 1], [], []>} : vector<32x8xf32>, vector<8x16xf32>, vector<32x16xf32> -> vector<32x16xf32>
    %227 = arith.addf %220, %226 : vector<32x16xf32>
    %c7_230 = arith.constant 7 : index
    %c0_231 = arith.constant 0 : index
    %c0_232 = arith.constant 0 : index
    %228 = vector.load %arg15[%c7_230, %c0_231, %c0_232] : memref<9x32x32xf32, #tpu.memory_space<vmem>>, vector<1x32x32xf32>
    %229 = vector.shape_cast %228 : vector<1x32x32xf32> to vector<32x32xf32>
    %cst_233 = arith.constant dense<0.000000e+00> : vector<32x8xf32>
    %230 = tpu.matmul %229, %176, %cst_233 {dimension_numbers = #tpu.dot_dimension_numbers<[1], [0], [0], [1], [0, 0, 1, 1], [], []>} : vector<32x32xf32>, vector<32x8xf32>, vector<32x8xf32> -> vector<32x8xf32>
    %c7_234 = arith.constant 7 : index
    %c0_235 = arith.constant 0 : index
    %c0_236 = arith.constant 0 : index
    %231 = vector.load %arg16[%c7_234, %c0_235, %c0_236] : memref<9x8x16xf32, #tpu.memory_space<vmem>>, vector<1x8x16xf32>
    %232 = vector.shape_cast %231 : vector<1x8x16xf32> to vector<8x16xf32>
    %cst_237 = arith.constant dense<0.000000e+00> : vector<32x16xf32>
    %233 = tpu.matmul %230, %232, %cst_237 {dimension_numbers = #tpu.dot_dimension_numbers<[1], [0], [0], [1], [0, 0, 1, 1], [], []>} : vector<32x8xf32>, vector<8x16xf32>, vector<32x16xf32> -> vector<32x16xf32>
    %234 = arith.addf %227, %233 : vector<32x16xf32>
    %c8_238 = arith.constant 8 : index
    %c0_239 = arith.constant 0 : index
    %c0_240 = arith.constant 0 : index
    %235 = vector.load %arg15[%c8_238, %c0_239, %c0_240] : memref<9x32x32xf32, #tpu.memory_space<vmem>>, vector<1x32x32xf32>
    %236 = vector.shape_cast %235 : vector<1x32x32xf32> to vector<32x32xf32>
    %cst_241 = arith.constant dense<0.000000e+00> : vector<32x8xf32>
    %237 = tpu.matmul %236, %176, %cst_241 {dimension_numbers = #tpu.dot_dimension_numbers<[1], [0], [0], [1], [0, 0, 1, 1], [], []>} : vector<32x32xf32>, vector<32x8xf32>, vector<32x8xf32> -> vector<32x8xf32>
    %c8_242 = arith.constant 8 : index
    %c0_243 = arith.constant 0 : index
    %c0_244 = arith.constant 0 : index
    %238 = vector.load %arg16[%c8_242, %c0_243, %c0_244] : memref<9x8x16xf32, #tpu.memory_space<vmem>>, vector<1x8x16xf32>
    %239 = vector.shape_cast %238 : vector<1x8x16xf32> to vector<8x16xf32>
    %cst_245 = arith.constant dense<0.000000e+00> : vector<32x16xf32>
    %240 = tpu.matmul %237, %239, %cst_245 {dimension_numbers = #tpu.dot_dimension_numbers<[1], [0], [0], [1], [0, 0, 1, 1], [], []>} : vector<32x8xf32>, vector<8x16xf32>, vector<32x16xf32> -> vector<32x16xf32>
    %241 = arith.addf %234, %240 : vector<32x16xf32>
    %242 = vector.broadcast %177 : vector<1x16xf32> to vector<32x16xf32>
    %243 = arith.addf %241, %242 : vector<32x16xf32>
    %cst_246 = arith.constant 0.000000e+00 : f32
    %244 = vector.broadcast %cst_246 : f32 to vector<32x16xf32>
    %245 = arith.cmpf ogt, %243, %244 : vector<32x16xf32>
    %cst_247 = arith.constant 2.000000e-01 : f32
    %246 = vector.broadcast %cst_247 : f32 to vector<32x16xf32>
    %247 = arith.mulf %246, %243 : vector<32x16xf32>
    %248 = arith.select %245, %243, %247 : vector<32x16xi1>, vector<32x16xf32>
    %c0_248 = arith.constant 0 : index
    %c0_249 = arith.constant 0 : index
    %249 = vector.load %arg18[%c0_248, %c0_249] : memref<8x32xf32, #tpu.memory_space<vmem>>, vector<8x32xf32>
    %c0_250 = arith.constant 0 : index
    %c0_251 = arith.constant 0 : index
    %250 = vector.load %arg19[%c0_250, %c0_251] : memref<16x8xf32, #tpu.memory_space<vmem>>, vector<16x8xf32>
    %c0_252 = arith.constant 0 : index
    %c0_253 = arith.constant 0 : index
    %251 = vector.load %arg20[%c0_252, %c0_253] : memref<1x8xf32, #tpu.memory_space<vmem>>, vector<1x8xf32>
    %c0_254 = arith.constant 0 : index
    %c0_255 = arith.constant 0 : index
    %252 = vector.load %arg21[%c0_254, %c0_255] : memref<8x16xf32, #tpu.memory_space<vmem>>, vector<8x16xf32>
    %c0_256 = arith.constant 0 : index
    %c0_257 = arith.constant 0 : index
    %253 = vector.load %arg22[%c0_256, %c0_257] : memref<1x16xf32, #tpu.memory_space<vmem>>, vector<1x16xf32>
    %c0_258 = arith.constant 0 : index
    %c0_259 = arith.constant 0 : index
    %254 = vector.load %arg23[%c0_258, %c0_259] : memref<32x8xf32, #tpu.memory_space<vmem>>, vector<32x8xf32>
    %cst_260 = arith.constant dense<0.000000e+00> : vector<8x16xf32>
    %255 = tpu.matmul %249, %248, %cst_260 {dimension_numbers = #tpu.dot_dimension_numbers<[1], [0], [0], [1], [0, 0, 1, 1], [], []>} : vector<8x32xf32>, vector<32x16xf32>, vector<8x16xf32> -> vector<8x16xf32>
    %cst_261 = arith.constant dense<0.000000e+00> : vector<8x8xf32>
    %256 = tpu.matmul %255, %250, %cst_261 {dimension_numbers = #tpu.dot_dimension_numbers<[1], [0], [0], [1], [0, 0, 1, 1], [], []>} : vector<8x16xf32>, vector<16x8xf32>, vector<8x8xf32> -> vector<8x8xf32>
    %257 = vector.broadcast %251 : vector<1x8xf32> to vector<8x8xf32>
    %258 = arith.addf %256, %257 : vector<8x8xf32>
    %cst_262 = arith.constant 0.000000e+00 : f32
    %259 = vector.broadcast %cst_262 : f32 to vector<8x8xf32>
    %260 = arith.maximumf %258, %259 : vector<8x8xf32>
    %cst_263 = arith.constant dense<0.000000e+00> : vector<8x16xf32>
    %261 = tpu.matmul %260, %252, %cst_263 {dimension_numbers = #tpu.dot_dimension_numbers<[1], [0], [0], [1], [0, 0, 1, 1], [], []>} : vector<8x8xf32>, vector<8x16xf32>, vector<8x16xf32> -> vector<8x16xf32>
    %262 = vector.broadcast %253 : vector<1x16xf32> to vector<8x16xf32>
    %263 = arith.addf %261, %262 : vector<8x16xf32>
    %264 = arith.negf %263 : vector<8x16xf32>
    %265 = math.exp %264 : vector<8x16xf32>
    %cst_264 = arith.constant 1.000000e+00 : f32
    %266 = vector.broadcast %cst_264 : f32 to vector<8x16xf32>
    %267 = arith.addf %266, %265 : vector<8x16xf32>
    %268 = arith.divf %266, %267 : vector<8x16xf32>
    %cst_265 = arith.constant dense<0.000000e+00> : vector<32x16xf32>
    %269 = tpu.matmul %254, %268, %cst_265 {dimension_numbers = #tpu.dot_dimension_numbers<[1], [0], [0], [1], [0, 0, 1, 1], [], []>} : vector<32x8xf32>, vector<8x16xf32>, vector<32x16xf32> -> vector<32x16xf32>
    %270 = arith.mulf %248, %269 : vector<32x16xf32>
    %c0_266 = arith.constant 0 : index
    %c0_267 = arith.constant 0 : index
    %271 = vector.load %arg26[%c0_266, %c0_267] : memref<1x16xf32, #tpu.memory_space<vmem>>, vector<1x16xf32>
    %cst_268 = arith.constant 0.000000e+00 : f32
    %272 = vector.broadcast %cst_268 : f32 to vector<8x16xf32>
    %c0_269 = arith.constant 0 : index
    %c0_270 = arith.constant 0 : index
    %c0_271 = arith.constant 0 : index
    %273 = vector.load %arg24[%c0_269, %c0_270, %c0_271] : memref<9x8x32xf32, #tpu.memory_space<vmem>>, vector<1x8x32xf32>
    %274 = vector.shape_cast %273 : vector<1x8x32xf32> to vector<8x32xf32>
    %cst_272 = arith.constant dense<0.000000e+00> : vector<8x16xf32>
    %275 = tpu.matmul %274, %270, %cst_272 {dimension_numbers = #tpu.dot_dimension_numbers<[1], [0], [0], [1], [0, 0, 1, 1], [], []>} : vector<8x32xf32>, vector<32x16xf32>, vector<8x16xf32> -> vector<8x16xf32>
    %c0_273 = arith.constant 0 : index
    %c0_274 = arith.constant 0 : index
    %c0_275 = arith.constant 0 : index
    %276 = vector.load %arg25[%c0_273, %c0_274, %c0_275] : memref<9x16x16xf32, #tpu.memory_space<vmem>>, vector<1x16x16xf32>
    %277 = vector.shape_cast %276 : vector<1x16x16xf32> to vector<16x16xf32>
    %cst_276 = arith.constant dense<0.000000e+00> : vector<8x16xf32>
    %278 = tpu.matmul %275, %277, %cst_276 {dimension_numbers = #tpu.dot_dimension_numbers<[1], [0], [0], [1], [0, 0, 1, 1], [], []>} : vector<8x16xf32>, vector<16x16xf32>, vector<8x16xf32> -> vector<8x16xf32>
    %279 = arith.addf %272, %278 : vector<8x16xf32>
    %c1_277 = arith.constant 1 : index
    %c0_278 = arith.constant 0 : index
    %c0_279 = arith.constant 0 : index
    %280 = vector.load %arg24[%c1_277, %c0_278, %c0_279] : memref<9x8x32xf32, #tpu.memory_space<vmem>>, vector<1x8x32xf32>
    %281 = vector.shape_cast %280 : vector<1x8x32xf32> to vector<8x32xf32>
    %cst_280 = arith.constant dense<0.000000e+00> : vector<8x16xf32>
    %282 = tpu.matmul %281, %270, %cst_280 {dimension_numbers = #tpu.dot_dimension_numbers<[1], [0], [0], [1], [0, 0, 1, 1], [], []>} : vector<8x32xf32>, vector<32x16xf32>, vector<8x16xf32> -> vector<8x16xf32>
    %c1_281 = arith.constant 1 : index
    %c0_282 = arith.constant 0 : index
    %c0_283 = arith.constant 0 : index
    %283 = vector.load %arg25[%c1_281, %c0_282, %c0_283] : memref<9x16x16xf32, #tpu.memory_space<vmem>>, vector<1x16x16xf32>
    %284 = vector.shape_cast %283 : vector<1x16x16xf32> to vector<16x16xf32>
    %cst_284 = arith.constant dense<0.000000e+00> : vector<8x16xf32>
    %285 = tpu.matmul %282, %284, %cst_284 {dimension_numbers = #tpu.dot_dimension_numbers<[1], [0], [0], [1], [0, 0, 1, 1], [], []>} : vector<8x16xf32>, vector<16x16xf32>, vector<8x16xf32> -> vector<8x16xf32>
    %286 = arith.addf %279, %285 : vector<8x16xf32>
    %c2_285 = arith.constant 2 : index
    %c0_286 = arith.constant 0 : index
    %c0_287 = arith.constant 0 : index
    %287 = vector.load %arg24[%c2_285, %c0_286, %c0_287] : memref<9x8x32xf32, #tpu.memory_space<vmem>>, vector<1x8x32xf32>
    %288 = vector.shape_cast %287 : vector<1x8x32xf32> to vector<8x32xf32>
    %cst_288 = arith.constant dense<0.000000e+00> : vector<8x16xf32>
    %289 = tpu.matmul %288, %270, %cst_288 {dimension_numbers = #tpu.dot_dimension_numbers<[1], [0], [0], [1], [0, 0, 1, 1], [], []>} : vector<8x32xf32>, vector<32x16xf32>, vector<8x16xf32> -> vector<8x16xf32>
    %c2_289 = arith.constant 2 : index
    %c0_290 = arith.constant 0 : index
    %c0_291 = arith.constant 0 : index
    %290 = vector.load %arg25[%c2_289, %c0_290, %c0_291] : memref<9x16x16xf32, #tpu.memory_space<vmem>>, vector<1x16x16xf32>
    %291 = vector.shape_cast %290 : vector<1x16x16xf32> to vector<16x16xf32>
    %cst_292 = arith.constant dense<0.000000e+00> : vector<8x16xf32>
    %292 = tpu.matmul %289, %291, %cst_292 {dimension_numbers = #tpu.dot_dimension_numbers<[1], [0], [0], [1], [0, 0, 1, 1], [], []>} : vector<8x16xf32>, vector<16x16xf32>, vector<8x16xf32> -> vector<8x16xf32>
    %293 = arith.addf %286, %292 : vector<8x16xf32>
    %c3_293 = arith.constant 3 : index
    %c0_294 = arith.constant 0 : index
    %c0_295 = arith.constant 0 : index
    %294 = vector.load %arg24[%c3_293, %c0_294, %c0_295] : memref<9x8x32xf32, #tpu.memory_space<vmem>>, vector<1x8x32xf32>
    %295 = vector.shape_cast %294 : vector<1x8x32xf32> to vector<8x32xf32>
    %cst_296 = arith.constant dense<0.000000e+00> : vector<8x16xf32>
    %296 = tpu.matmul %295, %270, %cst_296 {dimension_numbers = #tpu.dot_dimension_numbers<[1], [0], [0], [1], [0, 0, 1, 1], [], []>} : vector<8x32xf32>, vector<32x16xf32>, vector<8x16xf32> -> vector<8x16xf32>
    %c3_297 = arith.constant 3 : index
    %c0_298 = arith.constant 0 : index
    %c0_299 = arith.constant 0 : index
    %297 = vector.load %arg25[%c3_297, %c0_298, %c0_299] : memref<9x16x16xf32, #tpu.memory_space<vmem>>, vector<1x16x16xf32>
    %298 = vector.shape_cast %297 : vector<1x16x16xf32> to vector<16x16xf32>
    %cst_300 = arith.constant dense<0.000000e+00> : vector<8x16xf32>
    %299 = tpu.matmul %296, %298, %cst_300 {dimension_numbers = #tpu.dot_dimension_numbers<[1], [0], [0], [1], [0, 0, 1, 1], [], []>} : vector<8x16xf32>, vector<16x16xf32>, vector<8x16xf32> -> vector<8x16xf32>
    %300 = arith.addf %293, %299 : vector<8x16xf32>
    %c4_301 = arith.constant 4 : index
    %c0_302 = arith.constant 0 : index
    %c0_303 = arith.constant 0 : index
    %301 = vector.load %arg24[%c4_301, %c0_302, %c0_303] : memref<9x8x32xf32, #tpu.memory_space<vmem>>, vector<1x8x32xf32>
    %302 = vector.shape_cast %301 : vector<1x8x32xf32> to vector<8x32xf32>
    %cst_304 = arith.constant dense<0.000000e+00> : vector<8x16xf32>
    %303 = tpu.matmul %302, %270, %cst_304 {dimension_numbers = #tpu.dot_dimension_numbers<[1], [0], [0], [1], [0, 0, 1, 1], [], []>} : vector<8x32xf32>, vector<32x16xf32>, vector<8x16xf32> -> vector<8x16xf32>
    %c4_305 = arith.constant 4 : index
    %c0_306 = arith.constant 0 : index
    %c0_307 = arith.constant 0 : index
    %304 = vector.load %arg25[%c4_305, %c0_306, %c0_307] : memref<9x16x16xf32, #tpu.memory_space<vmem>>, vector<1x16x16xf32>
    %305 = vector.shape_cast %304 : vector<1x16x16xf32> to vector<16x16xf32>
    %cst_308 = arith.constant dense<0.000000e+00> : vector<8x16xf32>
    %306 = tpu.matmul %303, %305, %cst_308 {dimension_numbers = #tpu.dot_dimension_numbers<[1], [0], [0], [1], [0, 0, 1, 1], [], []>} : vector<8x16xf32>, vector<16x16xf32>, vector<8x16xf32> -> vector<8x16xf32>
    %307 = arith.addf %300, %306 : vector<8x16xf32>
    %c5_309 = arith.constant 5 : index
    %c0_310 = arith.constant 0 : index
    %c0_311 = arith.constant 0 : index
    %308 = vector.load %arg24[%c5_309, %c0_310, %c0_311] : memref<9x8x32xf32, #tpu.memory_space<vmem>>, vector<1x8x32xf32>
    %309 = vector.shape_cast %308 : vector<1x8x32xf32> to vector<8x32xf32>
    %cst_312 = arith.constant dense<0.000000e+00> : vector<8x16xf32>
    %310 = tpu.matmul %309, %270, %cst_312 {dimension_numbers = #tpu.dot_dimension_numbers<[1], [0], [0], [1], [0, 0, 1, 1], [], []>} : vector<8x32xf32>, vector<32x16xf32>, vector<8x16xf32> -> vector<8x16xf32>
    %c5_313 = arith.constant 5 : index
    %c0_314 = arith.constant 0 : index
    %c0_315 = arith.constant 0 : index
    %311 = vector.load %arg25[%c5_313, %c0_314, %c0_315] : memref<9x16x16xf32, #tpu.memory_space<vmem>>, vector<1x16x16xf32>
    %312 = vector.shape_cast %311 : vector<1x16x16xf32> to vector<16x16xf32>
    %cst_316 = arith.constant dense<0.000000e+00> : vector<8x16xf32>
    %313 = tpu.matmul %310, %312, %cst_316 {dimension_numbers = #tpu.dot_dimension_numbers<[1], [0], [0], [1], [0, 0, 1, 1], [], []>} : vector<8x16xf32>, vector<16x16xf32>, vector<8x16xf32> -> vector<8x16xf32>
    %314 = arith.addf %307, %313 : vector<8x16xf32>
    %c6_317 = arith.constant 6 : index
    %c0_318 = arith.constant 0 : index
    %c0_319 = arith.constant 0 : index
    %315 = vector.load %arg24[%c6_317, %c0_318, %c0_319] : memref<9x8x32xf32, #tpu.memory_space<vmem>>, vector<1x8x32xf32>
    %316 = vector.shape_cast %315 : vector<1x8x32xf32> to vector<8x32xf32>
    %cst_320 = arith.constant dense<0.000000e+00> : vector<8x16xf32>
    %317 = tpu.matmul %316, %270, %cst_320 {dimension_numbers = #tpu.dot_dimension_numbers<[1], [0], [0], [1], [0, 0, 1, 1], [], []>} : vector<8x32xf32>, vector<32x16xf32>, vector<8x16xf32> -> vector<8x16xf32>
    %c6_321 = arith.constant 6 : index
    %c0_322 = arith.constant 0 : index
    %c0_323 = arith.constant 0 : index
    %318 = vector.load %arg25[%c6_321, %c0_322, %c0_323] : memref<9x16x16xf32, #tpu.memory_space<vmem>>, vector<1x16x16xf32>
    %319 = vector.shape_cast %318 : vector<1x16x16xf32> to vector<16x16xf32>
    %cst_324 = arith.constant dense<0.000000e+00> : vector<8x16xf32>
    %320 = tpu.matmul %317, %319, %cst_324 {dimension_numbers = #tpu.dot_dimension_numbers<[1], [0], [0], [1], [0, 0, 1, 1], [], []>} : vector<8x16xf32>, vector<16x16xf32>, vector<8x16xf32> -> vector<8x16xf32>
    %321 = arith.addf %314, %320 : vector<8x16xf32>
    %c7_325 = arith.constant 7 : index
    %c0_326 = arith.constant 0 : index
    %c0_327 = arith.constant 0 : index
    %322 = vector.load %arg24[%c7_325, %c0_326, %c0_327] : memref<9x8x32xf32, #tpu.memory_space<vmem>>, vector<1x8x32xf32>
    %323 = vector.shape_cast %322 : vector<1x8x32xf32> to vector<8x32xf32>
    %cst_328 = arith.constant dense<0.000000e+00> : vector<8x16xf32>
    %324 = tpu.matmul %323, %270, %cst_328 {dimension_numbers = #tpu.dot_dimension_numbers<[1], [0], [0], [1], [0, 0, 1, 1], [], []>} : vector<8x32xf32>, vector<32x16xf32>, vector<8x16xf32> -> vector<8x16xf32>
    %c7_329 = arith.constant 7 : index
    %c0_330 = arith.constant 0 : index
    %c0_331 = arith.constant 0 : index
    %325 = vector.load %arg25[%c7_329, %c0_330, %c0_331] : memref<9x16x16xf32, #tpu.memory_space<vmem>>, vector<1x16x16xf32>
    %326 = vector.shape_cast %325 : vector<1x16x16xf32> to vector<16x16xf32>
    %cst_332 = arith.constant dense<0.000000e+00> : vector<8x16xf32>
    %327 = tpu.matmul %324, %326, %cst_332 {dimension_numbers = #tpu.dot_dimension_numbers<[1], [0], [0], [1], [0, 0, 1, 1], [], []>} : vector<8x16xf32>, vector<16x16xf32>, vector<8x16xf32> -> vector<8x16xf32>
    %328 = arith.addf %321, %327 : vector<8x16xf32>
    %c8_333 = arith.constant 8 : index
    %c0_334 = arith.constant 0 : index
    %c0_335 = arith.constant 0 : index
    %329 = vector.load %arg24[%c8_333, %c0_334, %c0_335] : memref<9x8x32xf32, #tpu.memory_space<vmem>>, vector<1x8x32xf32>
    %330 = vector.shape_cast %329 : vector<1x8x32xf32> to vector<8x32xf32>
    %cst_336 = arith.constant dense<0.000000e+00> : vector<8x16xf32>
    %331 = tpu.matmul %330, %270, %cst_336 {dimension_numbers = #tpu.dot_dimension_numbers<[1], [0], [0], [1], [0, 0, 1, 1], [], []>} : vector<8x32xf32>, vector<32x16xf32>, vector<8x16xf32> -> vector<8x16xf32>
    %c8_337 = arith.constant 8 : index
    %c0_338 = arith.constant 0 : index
    %c0_339 = arith.constant 0 : index
    %332 = vector.load %arg25[%c8_337, %c0_338, %c0_339] : memref<9x16x16xf32, #tpu.memory_space<vmem>>, vector<1x16x16xf32>
    %333 = vector.shape_cast %332 : vector<1x16x16xf32> to vector<16x16xf32>
    %cst_340 = arith.constant dense<0.000000e+00> : vector<8x16xf32>
    %334 = tpu.matmul %331, %333, %cst_340 {dimension_numbers = #tpu.dot_dimension_numbers<[1], [0], [0], [1], [0, 0, 1, 1], [], []>} : vector<8x16xf32>, vector<16x16xf32>, vector<8x16xf32> -> vector<8x16xf32>
    %335 = arith.addf %328, %334 : vector<8x16xf32>
    %336 = vector.broadcast %271 : vector<1x16xf32> to vector<8x16xf32>
    %337 = arith.addf %335, %336 : vector<8x16xf32>
    %cst_341 = arith.constant 0.000000e+00 : f32
    %338 = vector.broadcast %cst_341 : f32 to vector<8x16xf32>
    %339 = arith.cmpf ogt, %337, %338 : vector<8x16xf32>
    %cst_342 = arith.constant 2.000000e-01 : f32
    %340 = vector.broadcast %cst_342 : f32 to vector<8x16xf32>
    %341 = arith.mulf %340, %337 : vector<8x16xf32>
    %342 = arith.select %339, %337, %341 : vector<8x16xi1>, vector<8x16xf32>
    %c0_343 = arith.constant 0 : index
    %c0_344 = arith.constant 0 : index
    %343 = vector.load %arg29[%c0_343, %c0_344] : memref<1x32xf32, #tpu.memory_space<vmem>>, vector<1x32xf32>
    %cst_345 = arith.constant 0.000000e+00 : f32
    %344 = vector.broadcast %cst_345 : f32 to vector<8x32xf32>
    %c0_346 = arith.constant 0 : index
    %c0_347 = arith.constant 0 : index
    %c0_348 = arith.constant 0 : index
    %345 = vector.load %arg27[%c0_346, %c0_347, %c0_348] : memref<9x8x8xf32, #tpu.memory_space<vmem>>, vector<1x8x8xf32>
    %346 = vector.shape_cast %345 : vector<1x8x8xf32> to vector<8x8xf32>
    %cst_349 = arith.constant dense<0.000000e+00> : vector<8x16xf32>
    %347 = tpu.matmul %346, %342, %cst_349 {dimension_numbers = #tpu.dot_dimension_numbers<[1], [0], [0], [1], [0, 0, 1, 1], [], []>} : vector<8x8xf32>, vector<8x16xf32>, vector<8x16xf32> -> vector<8x16xf32>
    %c0_350 = arith.constant 0 : index
    %c0_351 = arith.constant 0 : index
    %c0_352 = arith.constant 0 : index
    %348 = vector.load %arg28[%c0_350, %c0_351, %c0_352] : memref<9x16x32xf32, #tpu.memory_space<vmem>>, vector<1x16x32xf32>
    %349 = vector.shape_cast %348 : vector<1x16x32xf32> to vector<16x32xf32>
    %cst_353 = arith.constant dense<0.000000e+00> : vector<8x32xf32>
    %350 = tpu.matmul %347, %349, %cst_353 {dimension_numbers = #tpu.dot_dimension_numbers<[1], [0], [0], [1], [0, 0, 1, 1], [], []>} : vector<8x16xf32>, vector<16x32xf32>, vector<8x32xf32> -> vector<8x32xf32>
    %351 = arith.addf %344, %350 : vector<8x32xf32>
    %c1_354 = arith.constant 1 : index
    %c0_355 = arith.constant 0 : index
    %c0_356 = arith.constant 0 : index
    %352 = vector.load %arg27[%c1_354, %c0_355, %c0_356] : memref<9x8x8xf32, #tpu.memory_space<vmem>>, vector<1x8x8xf32>
    %353 = vector.shape_cast %352 : vector<1x8x8xf32> to vector<8x8xf32>
    %cst_357 = arith.constant dense<0.000000e+00> : vector<8x16xf32>
    %354 = tpu.matmul %353, %342, %cst_357 {dimension_numbers = #tpu.dot_dimension_numbers<[1], [0], [0], [1], [0, 0, 1, 1], [], []>} : vector<8x8xf32>, vector<8x16xf32>, vector<8x16xf32> -> vector<8x16xf32>
    %c1_358 = arith.constant 1 : index
    %c0_359 = arith.constant 0 : index
    %c0_360 = arith.constant 0 : index
    %355 = vector.load %arg28[%c1_358, %c0_359, %c0_360] : memref<9x16x32xf32, #tpu.memory_space<vmem>>, vector<1x16x32xf32>
    %356 = vector.shape_cast %355 : vector<1x16x32xf32> to vector<16x32xf32>
    %cst_361 = arith.constant dense<0.000000e+00> : vector<8x32xf32>
    %357 = tpu.matmul %354, %356, %cst_361 {dimension_numbers = #tpu.dot_dimension_numbers<[1], [0], [0], [1], [0, 0, 1, 1], [], []>} : vector<8x16xf32>, vector<16x32xf32>, vector<8x32xf32> -> vector<8x32xf32>
    %358 = arith.addf %351, %357 : vector<8x32xf32>
    %c2_362 = arith.constant 2 : index
    %c0_363 = arith.constant 0 : index
    %c0_364 = arith.constant 0 : index
    %359 = vector.load %arg27[%c2_362, %c0_363, %c0_364] : memref<9x8x8xf32, #tpu.memory_space<vmem>>, vector<1x8x8xf32>
    %360 = vector.shape_cast %359 : vector<1x8x8xf32> to vector<8x8xf32>
    %cst_365 = arith.constant dense<0.000000e+00> : vector<8x16xf32>
    %361 = tpu.matmul %360, %342, %cst_365 {dimension_numbers = #tpu.dot_dimension_numbers<[1], [0], [0], [1], [0, 0, 1, 1], [], []>} : vector<8x8xf32>, vector<8x16xf32>, vector<8x16xf32> -> vector<8x16xf32>
    %c2_366 = arith.constant 2 : index
    %c0_367 = arith.constant 0 : index
    %c0_368 = arith.constant 0 : index
    %362 = vector.load %arg28[%c2_366, %c0_367, %c0_368] : memref<9x16x32xf32, #tpu.memory_space<vmem>>, vector<1x16x32xf32>
    %363 = vector.shape_cast %362 : vector<1x16x32xf32> to vector<16x32xf32>
    %cst_369 = arith.constant dense<0.000000e+00> : vector<8x32xf32>
    %364 = tpu.matmul %361, %363, %cst_369 {dimension_numbers = #tpu.dot_dimension_numbers<[1], [0], [0], [1], [0, 0, 1, 1], [], []>} : vector<8x16xf32>, vector<16x32xf32>, vector<8x32xf32> -> vector<8x32xf32>
    %365 = arith.addf %358, %364 : vector<8x32xf32>
    %c3_370 = arith.constant 3 : index
    %c0_371 = arith.constant 0 : index
    %c0_372 = arith.constant 0 : index
    %366 = vector.load %arg27[%c3_370, %c0_371, %c0_372] : memref<9x8x8xf32, #tpu.memory_space<vmem>>, vector<1x8x8xf32>
    %367 = vector.shape_cast %366 : vector<1x8x8xf32> to vector<8x8xf32>
    %cst_373 = arith.constant dense<0.000000e+00> : vector<8x16xf32>
    %368 = tpu.matmul %367, %342, %cst_373 {dimension_numbers = #tpu.dot_dimension_numbers<[1], [0], [0], [1], [0, 0, 1, 1], [], []>} : vector<8x8xf32>, vector<8x16xf32>, vector<8x16xf32> -> vector<8x16xf32>
    %c3_374 = arith.constant 3 : index
    %c0_375 = arith.constant 0 : index
    %c0_376 = arith.constant 0 : index
    %369 = vector.load %arg28[%c3_374, %c0_375, %c0_376] : memref<9x16x32xf32, #tpu.memory_space<vmem>>, vector<1x16x32xf32>
    %370 = vector.shape_cast %369 : vector<1x16x32xf32> to vector<16x32xf32>
    %cst_377 = arith.constant dense<0.000000e+00> : vector<8x32xf32>
    %371 = tpu.matmul %368, %370, %cst_377 {dimension_numbers = #tpu.dot_dimension_numbers<[1], [0], [0], [1], [0, 0, 1, 1], [], []>} : vector<8x16xf32>, vector<16x32xf32>, vector<8x32xf32> -> vector<8x32xf32>
    %372 = arith.addf %365, %371 : vector<8x32xf32>
    %c4_378 = arith.constant 4 : index
    %c0_379 = arith.constant 0 : index
    %c0_380 = arith.constant 0 : index
    %373 = vector.load %arg27[%c4_378, %c0_379, %c0_380] : memref<9x8x8xf32, #tpu.memory_space<vmem>>, vector<1x8x8xf32>
    %374 = vector.shape_cast %373 : vector<1x8x8xf32> to vector<8x8xf32>
    %cst_381 = arith.constant dense<0.000000e+00> : vector<8x16xf32>
    %375 = tpu.matmul %374, %342, %cst_381 {dimension_numbers = #tpu.dot_dimension_numbers<[1], [0], [0], [1], [0, 0, 1, 1], [], []>} : vector<8x8xf32>, vector<8x16xf32>, vector<8x16xf32> -> vector<8x16xf32>
    %c4_382 = arith.constant 4 : index
    %c0_383 = arith.constant 0 : index
    %c0_384 = arith.constant 0 : index
    %376 = vector.load %arg28[%c4_382, %c0_383, %c0_384] : memref<9x16x32xf32, #tpu.memory_space<vmem>>, vector<1x16x32xf32>
    %377 = vector.shape_cast %376 : vector<1x16x32xf32> to vector<16x32xf32>
    %cst_385 = arith.constant dense<0.000000e+00> : vector<8x32xf32>
    %378 = tpu.matmul %375, %377, %cst_385 {dimension_numbers = #tpu.dot_dimension_numbers<[1], [0], [0], [1], [0, 0, 1, 1], [], []>} : vector<8x16xf32>, vector<16x32xf32>, vector<8x32xf32> -> vector<8x32xf32>
    %379 = arith.addf %372, %378 : vector<8x32xf32>
    %c5_386 = arith.constant 5 : index
    %c0_387 = arith.constant 0 : index
    %c0_388 = arith.constant 0 : index
    %380 = vector.load %arg27[%c5_386, %c0_387, %c0_388] : memref<9x8x8xf32, #tpu.memory_space<vmem>>, vector<1x8x8xf32>
    %381 = vector.shape_cast %380 : vector<1x8x8xf32> to vector<8x8xf32>
    %cst_389 = arith.constant dense<0.000000e+00> : vector<8x16xf32>
    %382 = tpu.matmul %381, %342, %cst_389 {dimension_numbers = #tpu.dot_dimension_numbers<[1], [0], [0], [1], [0, 0, 1, 1], [], []>} : vector<8x8xf32>, vector<8x16xf32>, vector<8x16xf32> -> vector<8x16xf32>
    %c5_390 = arith.constant 5 : index
    %c0_391 = arith.constant 0 : index
    %c0_392 = arith.constant 0 : index
    %383 = vector.load %arg28[%c5_390, %c0_391, %c0_392] : memref<9x16x32xf32, #tpu.memory_space<vmem>>, vector<1x16x32xf32>
    %384 = vector.shape_cast %383 : vector<1x16x32xf32> to vector<16x32xf32>
    %cst_393 = arith.constant dense<0.000000e+00> : vector<8x32xf32>
    %385 = tpu.matmul %382, %384, %cst_393 {dimension_numbers = #tpu.dot_dimension_numbers<[1], [0], [0], [1], [0, 0, 1, 1], [], []>} : vector<8x16xf32>, vector<16x32xf32>, vector<8x32xf32> -> vector<8x32xf32>
    %386 = arith.addf %379, %385 : vector<8x32xf32>
    %c6_394 = arith.constant 6 : index
    %c0_395 = arith.constant 0 : index
    %c0_396 = arith.constant 0 : index
    %387 = vector.load %arg27[%c6_394, %c0_395, %c0_396] : memref<9x8x8xf32, #tpu.memory_space<vmem>>, vector<1x8x8xf32>
    %388 = vector.shape_cast %387 : vector<1x8x8xf32> to vector<8x8xf32>
    %cst_397 = arith.constant dense<0.000000e+00> : vector<8x16xf32>
    %389 = tpu.matmul %388, %342, %cst_397 {dimension_numbers = #tpu.dot_dimension_numbers<[1], [0], [0], [1], [0, 0, 1, 1], [], []>} : vector<8x8xf32>, vector<8x16xf32>, vector<8x16xf32> -> vector<8x16xf32>
    %c6_398 = arith.constant 6 : index
    %c0_399 = arith.constant 0 : index
    %c0_400 = arith.constant 0 : index
    %390 = vector.load %arg28[%c6_398, %c0_399, %c0_400] : memref<9x16x32xf32, #tpu.memory_space<vmem>>, vector<1x16x32xf32>
    %391 = vector.shape_cast %390 : vector<1x16x32xf32> to vector<16x32xf32>
    %cst_401 = arith.constant dense<0.000000e+00> : vector<8x32xf32>
    %392 = tpu.matmul %389, %391, %cst_401 {dimension_numbers = #tpu.dot_dimension_numbers<[1], [0], [0], [1], [0, 0, 1, 1], [], []>} : vector<8x16xf32>, vector<16x32xf32>, vector<8x32xf32> -> vector<8x32xf32>
    %393 = arith.addf %386, %392 : vector<8x32xf32>
    %c7_402 = arith.constant 7 : index
    %c0_403 = arith.constant 0 : index
    %c0_404 = arith.constant 0 : index
    %394 = vector.load %arg27[%c7_402, %c0_403, %c0_404] : memref<9x8x8xf32, #tpu.memory_space<vmem>>, vector<1x8x8xf32>
    %395 = vector.shape_cast %394 : vector<1x8x8xf32> to vector<8x8xf32>
    %cst_405 = arith.constant dense<0.000000e+00> : vector<8x16xf32>
    %396 = tpu.matmul %395, %342, %cst_405 {dimension_numbers = #tpu.dot_dimension_numbers<[1], [0], [0], [1], [0, 0, 1, 1], [], []>} : vector<8x8xf32>, vector<8x16xf32>, vector<8x16xf32> -> vector<8x16xf32>
    %c7_406 = arith.constant 7 : index
    %c0_407 = arith.constant 0 : index
    %c0_408 = arith.constant 0 : index
    %397 = vector.load %arg28[%c7_406, %c0_407, %c0_408] : memref<9x16x32xf32, #tpu.memory_space<vmem>>, vector<1x16x32xf32>
    %398 = vector.shape_cast %397 : vector<1x16x32xf32> to vector<16x32xf32>
    %cst_409 = arith.constant dense<0.000000e+00> : vector<8x32xf32>
    %399 = tpu.matmul %396, %398, %cst_409 {dimension_numbers = #tpu.dot_dimension_numbers<[1], [0], [0], [1], [0, 0, 1, 1], [], []>} : vector<8x16xf32>, vector<16x32xf32>, vector<8x32xf32> -> vector<8x32xf32>
    %400 = arith.addf %393, %399 : vector<8x32xf32>
    %c8_410 = arith.constant 8 : index
    %c0_411 = arith.constant 0 : index
    %c0_412 = arith.constant 0 : index
    %401 = vector.load %arg27[%c8_410, %c0_411, %c0_412] : memref<9x8x8xf32, #tpu.memory_space<vmem>>, vector<1x8x8xf32>
    %402 = vector.shape_cast %401 : vector<1x8x8xf32> to vector<8x8xf32>
    %cst_413 = arith.constant dense<0.000000e+00> : vector<8x16xf32>
    %403 = tpu.matmul %402, %342, %cst_413 {dimension_numbers = #tpu.dot_dimension_numbers<[1], [0], [0], [1], [0, 0, 1, 1], [], []>} : vector<8x8xf32>, vector<8x16xf32>, vector<8x16xf32> -> vector<8x16xf32>
    %c8_414 = arith.constant 8 : index
    %c0_415 = arith.constant 0 : index
    %c0_416 = arith.constant 0 : index
    %404 = vector.load %arg28[%c8_414, %c0_415, %c0_416] : memref<9x16x32xf32, #tpu.memory_space<vmem>>, vector<1x16x32xf32>
    %405 = vector.shape_cast %404 : vector<1x16x32xf32> to vector<16x32xf32>
    %cst_417 = arith.constant dense<0.000000e+00> : vector<8x32xf32>
    %406 = tpu.matmul %403, %405, %cst_417 {dimension_numbers = #tpu.dot_dimension_numbers<[1], [0], [0], [1], [0, 0, 1, 1], [], []>} : vector<8x16xf32>, vector<16x32xf32>, vector<8x32xf32> -> vector<8x32xf32>
    %407 = arith.addf %400, %406 : vector<8x32xf32>
    %408 = vector.broadcast %343 : vector<1x32xf32> to vector<8x32xf32>
    %409 = arith.addf %407, %408 : vector<8x32xf32>
    %cst_418 = arith.constant 0.000000e+00 : f32
    %410 = vector.broadcast %cst_418 : f32 to vector<8x32xf32>
    %411 = arith.cmpf ogt, %409, %410 : vector<8x32xf32>
    %cst_419 = arith.constant 2.000000e-01 : f32
    %412 = vector.broadcast %cst_419 : f32 to vector<8x32xf32>
    %413 = arith.mulf %412, %409 : vector<8x32xf32>
    %414 = arith.select %411, %409, %413 : vector<8x32xi1>, vector<8x32xf32>
    %c0_420 = arith.constant 0 : index
    %c0_421 = arith.constant 0 : index
    %415 = vector.load %arg30[%c0_420, %c0_421] : memref<8x8xf32, #tpu.memory_space<vmem>>, vector<8x8xf32>
    %c0_422 = arith.constant 0 : index
    %c0_423 = arith.constant 0 : index
    %416 = vector.load %arg31[%c0_422, %c0_423] : memref<32x8xf32, #tpu.memory_space<vmem>>, vector<32x8xf32>
    %c0_424 = arith.constant 0 : index
    %c0_425 = arith.constant 0 : index
    %417 = vector.load %arg32[%c0_424, %c0_425] : memref<1x8xf32, #tpu.memory_space<vmem>>, vector<1x8xf32>
    %c0_426 = arith.constant 0 : index
    %c0_427 = arith.constant 0 : index
    %418 = vector.load %arg33[%c0_426, %c0_427] : memref<8x32xf32, #tpu.memory_space<vmem>>, vector<8x32xf32>
    %c0_428 = arith.constant 0 : index
    %c0_429 = arith.constant 0 : index
    %419 = vector.load %arg34[%c0_428, %c0_429] : memref<1x32xf32, #tpu.memory_space<vmem>>, vector<1x32xf32>
    %c0_430 = arith.constant 0 : index
    %c0_431 = arith.constant 0 : index
    %420 = vector.load %arg35[%c0_430, %c0_431] : memref<8x8xf32, #tpu.memory_space<vmem>>, vector<8x8xf32>
    %cst_432 = arith.constant dense<0.000000e+00> : vector<8x32xf32>
    %421 = tpu.matmul %415, %414, %cst_432 {dimension_numbers = #tpu.dot_dimension_numbers<[1], [0], [0], [1], [0, 0, 1, 1], [], []>} : vector<8x8xf32>, vector<8x32xf32>, vector<8x32xf32> -> vector<8x32xf32>
    %cst_433 = arith.constant dense<0.000000e+00> : vector<8x8xf32>
    %422 = tpu.matmul %421, %416, %cst_433 {dimension_numbers = #tpu.dot_dimension_numbers<[1], [0], [0], [1], [0, 0, 1, 1], [], []>} : vector<8x32xf32>, vector<32x8xf32>, vector<8x8xf32> -> vector<8x8xf32>
    %423 = vector.broadcast %417 : vector<1x8xf32> to vector<8x8xf32>
    %424 = arith.addf %422, %423 : vector<8x8xf32>
    %cst_434 = arith.constant 0.000000e+00 : f32
    %425 = vector.broadcast %cst_434 : f32 to vector<8x8xf32>
    %426 = arith.maximumf %424, %425 : vector<8x8xf32>
    %cst_435 = arith.constant dense<0.000000e+00> : vector<8x32xf32>
    %427 = tpu.matmul %426, %418, %cst_435 {dimension_numbers = #tpu.dot_dimension_numbers<[1], [0], [0], [1], [0, 0, 1, 1], [], []>} : vector<8x8xf32>, vector<8x32xf32>, vector<8x32xf32> -> vector<8x32xf32>
    %428 = vector.broadcast %419 : vector<1x32xf32> to vector<8x32xf32>
    %429 = arith.addf %427, %428 : vector<8x32xf32>
    %430 = arith.negf %429 : vector<8x32xf32>
    %431 = math.exp %430 : vector<8x32xf32>
    %cst_436 = arith.constant 1.000000e+00 : f32
    %432 = vector.broadcast %cst_436 : f32 to vector<8x32xf32>
    %433 = arith.addf %432, %431 : vector<8x32xf32>
    %434 = arith.divf %432, %433 : vector<8x32xf32>
    %cst_437 = arith.constant dense<0.000000e+00> : vector<8x32xf32>
    %435 = tpu.matmul %420, %434, %cst_437 {dimension_numbers = #tpu.dot_dimension_numbers<[1], [0], [0], [1], [0, 0, 1, 1], [], []>} : vector<8x8xf32>, vector<8x32xf32>, vector<8x32xf32> -> vector<8x32xf32>
    %436 = arith.mulf %414, %435 : vector<8x32xf32>
    %c0_438 = arith.constant 0 : index
    %c0_439 = arith.constant 0 : index
    %437 = vector.load %arg38[%c0_438, %c0_439] : memref<1x32xf32, #tpu.memory_space<vmem>>, vector<1x32xf32>
    %cst_440 = arith.constant 0.000000e+00 : f32
    %438 = vector.broadcast %cst_440 : f32 to vector<8x32xf32>
    %c0_441 = arith.constant 0 : index
    %c0_442 = arith.constant 0 : index
    %c0_443 = arith.constant 0 : index
    %439 = vector.load %arg36[%c0_441, %c0_442, %c0_443] : memref<9x8x8xf32, #tpu.memory_space<vmem>>, vector<1x8x8xf32>
    %440 = vector.shape_cast %439 : vector<1x8x8xf32> to vector<8x8xf32>
    %cst_444 = arith.constant dense<0.000000e+00> : vector<8x32xf32>
    %441 = tpu.matmul %440, %436, %cst_444 {dimension_numbers = #tpu.dot_dimension_numbers<[1], [0], [0], [1], [0, 0, 1, 1], [], []>} : vector<8x8xf32>, vector<8x32xf32>, vector<8x32xf32> -> vector<8x32xf32>
    %c0_445 = arith.constant 0 : index
    %c0_446 = arith.constant 0 : index
    %c0_447 = arith.constant 0 : index
    %442 = vector.load %arg37[%c0_445, %c0_446, %c0_447] : memref<9x32x32xf32, #tpu.memory_space<vmem>>, vector<1x32x32xf32>
    %443 = vector.shape_cast %442 : vector<1x32x32xf32> to vector<32x32xf32>
    %cst_448 = arith.constant dense<0.000000e+00> : vector<8x32xf32>
    %444 = tpu.matmul %441, %443, %cst_448 {dimension_numbers = #tpu.dot_dimension_numbers<[1], [0], [0], [1], [0, 0, 1, 1], [], []>} : vector<8x32xf32>, vector<32x32xf32>, vector<8x32xf32> -> vector<8x32xf32>
    %445 = arith.addf %438, %444 : vector<8x32xf32>
    %c1_449 = arith.constant 1 : index
    %c0_450 = arith.constant 0 : index
    %c0_451 = arith.constant 0 : index
    %446 = vector.load %arg36[%c1_449, %c0_450, %c0_451] : memref<9x8x8xf32, #tpu.memory_space<vmem>>, vector<1x8x8xf32>
    %447 = vector.shape_cast %446 : vector<1x8x8xf32> to vector<8x8xf32>
    %cst_452 = arith.constant dense<0.000000e+00> : vector<8x32xf32>
    %448 = tpu.matmul %447, %436, %cst_452 {dimension_numbers = #tpu.dot_dimension_numbers<[1], [0], [0], [1], [0, 0, 1, 1], [], []>} : vector<8x8xf32>, vector<8x32xf32>, vector<8x32xf32> -> vector<8x32xf32>
    %c1_453 = arith.constant 1 : index
    %c0_454 = arith.constant 0 : index
    %c0_455 = arith.constant 0 : index
    %449 = vector.load %arg37[%c1_453, %c0_454, %c0_455] : memref<9x32x32xf32, #tpu.memory_space<vmem>>, vector<1x32x32xf32>
    %450 = vector.shape_cast %449 : vector<1x32x32xf32> to vector<32x32xf32>
    %cst_456 = arith.constant dense<0.000000e+00> : vector<8x32xf32>
    %451 = tpu.matmul %448, %450, %cst_456 {dimension_numbers = #tpu.dot_dimension_numbers<[1], [0], [0], [1], [0, 0, 1, 1], [], []>} : vector<8x32xf32>, vector<32x32xf32>, vector<8x32xf32> -> vector<8x32xf32>
    %452 = arith.addf %445, %451 : vector<8x32xf32>
    %c2_457 = arith.constant 2 : index
    %c0_458 = arith.constant 0 : index
    %c0_459 = arith.constant 0 : index
    %453 = vector.load %arg36[%c2_457, %c0_458, %c0_459] : memref<9x8x8xf32, #tpu.memory_space<vmem>>, vector<1x8x8xf32>
    %454 = vector.shape_cast %453 : vector<1x8x8xf32> to vector<8x8xf32>
    %cst_460 = arith.constant dense<0.000000e+00> : vector<8x32xf32>
    %455 = tpu.matmul %454, %436, %cst_460 {dimension_numbers = #tpu.dot_dimension_numbers<[1], [0], [0], [1], [0, 0, 1, 1], [], []>} : vector<8x8xf32>, vector<8x32xf32>, vector<8x32xf32> -> vector<8x32xf32>
    %c2_461 = arith.constant 2 : index
    %c0_462 = arith.constant 0 : index
    %c0_463 = arith.constant 0 : index
    %456 = vector.load %arg37[%c2_461, %c0_462, %c0_463] : memref<9x32x32xf32, #tpu.memory_space<vmem>>, vector<1x32x32xf32>
    %457 = vector.shape_cast %456 : vector<1x32x32xf32> to vector<32x32xf32>
    %cst_464 = arith.constant dense<0.000000e+00> : vector<8x32xf32>
    %458 = tpu.matmul %455, %457, %cst_464 {dimension_numbers = #tpu.dot_dimension_numbers<[1], [0], [0], [1], [0, 0, 1, 1], [], []>} : vector<8x32xf32>, vector<32x32xf32>, vector<8x32xf32> -> vector<8x32xf32>
    %459 = arith.addf %452, %458 : vector<8x32xf32>
    %c3_465 = arith.constant 3 : index
    %c0_466 = arith.constant 0 : index
    %c0_467 = arith.constant 0 : index
    %460 = vector.load %arg36[%c3_465, %c0_466, %c0_467] : memref<9x8x8xf32, #tpu.memory_space<vmem>>, vector<1x8x8xf32>
    %461 = vector.shape_cast %460 : vector<1x8x8xf32> to vector<8x8xf32>
    %cst_468 = arith.constant dense<0.000000e+00> : vector<8x32xf32>
    %462 = tpu.matmul %461, %436, %cst_468 {dimension_numbers = #tpu.dot_dimension_numbers<[1], [0], [0], [1], [0, 0, 1, 1], [], []>} : vector<8x8xf32>, vector<8x32xf32>, vector<8x32xf32> -> vector<8x32xf32>
    %c3_469 = arith.constant 3 : index
    %c0_470 = arith.constant 0 : index
    %c0_471 = arith.constant 0 : index
    %463 = vector.load %arg37[%c3_469, %c0_470, %c0_471] : memref<9x32x32xf32, #tpu.memory_space<vmem>>, vector<1x32x32xf32>
    %464 = vector.shape_cast %463 : vector<1x32x32xf32> to vector<32x32xf32>
    %cst_472 = arith.constant dense<0.000000e+00> : vector<8x32xf32>
    %465 = tpu.matmul %462, %464, %cst_472 {dimension_numbers = #tpu.dot_dimension_numbers<[1], [0], [0], [1], [0, 0, 1, 1], [], []>} : vector<8x32xf32>, vector<32x32xf32>, vector<8x32xf32> -> vector<8x32xf32>
    %466 = arith.addf %459, %465 : vector<8x32xf32>
    %c4_473 = arith.constant 4 : index
    %c0_474 = arith.constant 0 : index
    %c0_475 = arith.constant 0 : index
    %467 = vector.load %arg36[%c4_473, %c0_474, %c0_475] : memref<9x8x8xf32, #tpu.memory_space<vmem>>, vector<1x8x8xf32>
    %468 = vector.shape_cast %467 : vector<1x8x8xf32> to vector<8x8xf32>
    %cst_476 = arith.constant dense<0.000000e+00> : vector<8x32xf32>
    %469 = tpu.matmul %468, %436, %cst_476 {dimension_numbers = #tpu.dot_dimension_numbers<[1], [0], [0], [1], [0, 0, 1, 1], [], []>} : vector<8x8xf32>, vector<8x32xf32>, vector<8x32xf32> -> vector<8x32xf32>
    %c4_477 = arith.constant 4 : index
    %c0_478 = arith.constant 0 : index
    %c0_479 = arith.constant 0 : index
    %470 = vector.load %arg37[%c4_477, %c0_478, %c0_479] : memref<9x32x32xf32, #tpu.memory_space<vmem>>, vector<1x32x32xf32>
    %471 = vector.shape_cast %470 : vector<1x32x32xf32> to vector<32x32xf32>
    %cst_480 = arith.constant dense<0.000000e+00> : vector<8x32xf32>
    %472 = tpu.matmul %469, %471, %cst_480 {dimension_numbers = #tpu.dot_dimension_numbers<[1], [0], [0], [1], [0, 0, 1, 1], [], []>} : vector<8x32xf32>, vector<32x32xf32>, vector<8x32xf32> -> vector<8x32xf32>
    %473 = arith.addf %466, %472 : vector<8x32xf32>
    %c5_481 = arith.constant 5 : index
    %c0_482 = arith.constant 0 : index
    %c0_483 = arith.constant 0 : index
    %474 = vector.load %arg36[%c5_481, %c0_482, %c0_483] : memref<9x8x8xf32, #tpu.memory_space<vmem>>, vector<1x8x8xf32>
    %475 = vector.shape_cast %474 : vector<1x8x8xf32> to vector<8x8xf32>
    %cst_484 = arith.constant dense<0.000000e+00> : vector<8x32xf32>
    %476 = tpu.matmul %475, %436, %cst_484 {dimension_numbers = #tpu.dot_dimension_numbers<[1], [0], [0], [1], [0, 0, 1, 1], [], []>} : vector<8x8xf32>, vector<8x32xf32>, vector<8x32xf32> -> vector<8x32xf32>
    %c5_485 = arith.constant 5 : index
    %c0_486 = arith.constant 0 : index
    %c0_487 = arith.constant 0 : index
    %477 = vector.load %arg37[%c5_485, %c0_486, %c0_487] : memref<9x32x32xf32, #tpu.memory_space<vmem>>, vector<1x32x32xf32>
    %478 = vector.shape_cast %477 : vector<1x32x32xf32> to vector<32x32xf32>
    %cst_488 = arith.constant dense<0.000000e+00> : vector<8x32xf32>
    %479 = tpu.matmul %476, %478, %cst_488 {dimension_numbers = #tpu.dot_dimension_numbers<[1], [0], [0], [1], [0, 0, 1, 1], [], []>} : vector<8x32xf32>, vector<32x32xf32>, vector<8x32xf32> -> vector<8x32xf32>
    %480 = arith.addf %473, %479 : vector<8x32xf32>
    %c6_489 = arith.constant 6 : index
    %c0_490 = arith.constant 0 : index
    %c0_491 = arith.constant 0 : index
    %481 = vector.load %arg36[%c6_489, %c0_490, %c0_491] : memref<9x8x8xf32, #tpu.memory_space<vmem>>, vector<1x8x8xf32>
    %482 = vector.shape_cast %481 : vector<1x8x8xf32> to vector<8x8xf32>
    %cst_492 = arith.constant dense<0.000000e+00> : vector<8x32xf32>
    %483 = tpu.matmul %482, %436, %cst_492 {dimension_numbers = #tpu.dot_dimension_numbers<[1], [0], [0], [1], [0, 0, 1, 1], [], []>} : vector<8x8xf32>, vector<8x32xf32>, vector<8x32xf32> -> vector<8x32xf32>
    %c6_493 = arith.constant 6 : index
    %c0_494 = arith.constant 0 : index
    %c0_495 = arith.constant 0 : index
    %484 = vector.load %arg37[%c6_493, %c0_494, %c0_495] : memref<9x32x32xf32, #tpu.memory_space<vmem>>, vector<1x32x32xf32>
    %485 = vector.shape_cast %484 : vector<1x32x32xf32> to vector<32x32xf32>
    %cst_496 = arith.constant dense<0.000000e+00> : vector<8x32xf32>
    %486 = tpu.matmul %483, %485, %cst_496 {dimension_numbers = #tpu.dot_dimension_numbers<[1], [0], [0], [1], [0, 0, 1, 1], [], []>} : vector<8x32xf32>, vector<32x32xf32>, vector<8x32xf32> -> vector<8x32xf32>
    %487 = arith.addf %480, %486 : vector<8x32xf32>
    %c7_497 = arith.constant 7 : index
    %c0_498 = arith.constant 0 : index
    %c0_499 = arith.constant 0 : index
    %488 = vector.load %arg36[%c7_497, %c0_498, %c0_499] : memref<9x8x8xf32, #tpu.memory_space<vmem>>, vector<1x8x8xf32>
    %489 = vector.shape_cast %488 : vector<1x8x8xf32> to vector<8x8xf32>
    %cst_500 = arith.constant dense<0.000000e+00> : vector<8x32xf32>
    %490 = tpu.matmul %489, %436, %cst_500 {dimension_numbers = #tpu.dot_dimension_numbers<[1], [0], [0], [1], [0, 0, 1, 1], [], []>} : vector<8x8xf32>, vector<8x32xf32>, vector<8x32xf32> -> vector<8x32xf32>
    %c7_501 = arith.constant 7 : index
    %c0_502 = arith.constant 0 : index
    %c0_503 = arith.constant 0 : index
    %491 = vector.load %arg37[%c7_501, %c0_502, %c0_503] : memref<9x32x32xf32, #tpu.memory_space<vmem>>, vector<1x32x32xf32>
    %492 = vector.shape_cast %491 : vector<1x32x32xf32> to vector<32x32xf32>
    %cst_504 = arith.constant dense<0.000000e+00> : vector<8x32xf32>
    %493 = tpu.matmul %490, %492, %cst_504 {dimension_numbers = #tpu.dot_dimension_numbers<[1], [0], [0], [1], [0, 0, 1, 1], [], []>} : vector<8x32xf32>, vector<32x32xf32>, vector<8x32xf32> -> vector<8x32xf32>
    %494 = arith.addf %487, %493 : vector<8x32xf32>
    %c8_505 = arith.constant 8 : index
    %c0_506 = arith.constant 0 : index
    %c0_507 = arith.constant 0 : index
    %495 = vector.load %arg36[%c8_505, %c0_506, %c0_507] : memref<9x8x8xf32, #tpu.memory_space<vmem>>, vector<1x8x8xf32>
    %496 = vector.shape_cast %495 : vector<1x8x8xf32> to vector<8x8xf32>
    %cst_508 = arith.constant dense<0.000000e+00> : vector<8x32xf32>
    %497 = tpu.matmul %496, %436, %cst_508 {dimension_numbers = #tpu.dot_dimension_numbers<[1], [0], [0], [1], [0, 0, 1, 1], [], []>} : vector<8x8xf32>, vector<8x32xf32>, vector<8x32xf32> -> vector<8x32xf32>
    %c8_509 = arith.constant 8 : index
    %c0_510 = arith.constant 0 : index
    %c0_511 = arith.constant 0 : index
    %498 = vector.load %arg37[%c8_509, %c0_510, %c0_511] : memref<9x32x32xf32, #tpu.memory_space<vmem>>, vector<1x32x32xf32>
    %499 = vector.shape_cast %498 : vector<1x32x32xf32> to vector<32x32xf32>
    %cst_512 = arith.constant dense<0.000000e+00> : vector<8x32xf32>
    %500 = tpu.matmul %497, %499, %cst_512 {dimension_numbers = #tpu.dot_dimension_numbers<[1], [0], [0], [1], [0, 0, 1, 1], [], []>} : vector<8x32xf32>, vector<32x32xf32>, vector<8x32xf32> -> vector<8x32xf32>
    %501 = arith.addf %494, %500 : vector<8x32xf32>
    %502 = vector.broadcast %437 : vector<1x32xf32> to vector<8x32xf32>
    %503 = arith.addf %501, %502 : vector<8x32xf32>
    %cst_513 = arith.constant 0.000000e+00 : f32
    %504 = vector.broadcast %cst_513 : f32 to vector<8x32xf32>
    %505 = arith.cmpf ogt, %503, %504 : vector<8x32xf32>
    %cst_514 = arith.constant 2.000000e-01 : f32
    %506 = vector.broadcast %cst_514 : f32 to vector<8x32xf32>
    %507 = arith.mulf %506, %503 : vector<8x32xf32>
    %508 = arith.select %505, %503, %507 : vector<8x32xi1>, vector<8x32xf32>
    %c0_515 = arith.constant 0 : index
    %c0_516 = arith.constant 0 : index
    %509 = vector.load %arg41[%c0_515, %c0_516] : memref<1x64xf32, #tpu.memory_space<vmem>>, vector<1x64xf32>
    %cst_517 = arith.constant 0.000000e+00 : f32
    %510 = vector.broadcast %cst_517 : f32 to vector<8x64xf32>
    %c0_518 = arith.constant 0 : index
    %c0_519 = arith.constant 0 : index
    %c0_520 = arith.constant 0 : index
    %511 = vector.load %arg39[%c0_518, %c0_519, %c0_520] : memref<9x8x8xf32, #tpu.memory_space<vmem>>, vector<1x8x8xf32>
    %512 = vector.shape_cast %511 : vector<1x8x8xf32> to vector<8x8xf32>
    %cst_521 = arith.constant dense<0.000000e+00> : vector<8x32xf32>
    %513 = tpu.matmul %512, %508, %cst_521 {dimension_numbers = #tpu.dot_dimension_numbers<[1], [0], [0], [1], [0, 0, 1, 1], [], []>} : vector<8x8xf32>, vector<8x32xf32>, vector<8x32xf32> -> vector<8x32xf32>
    %c0_522 = arith.constant 0 : index
    %c0_523 = arith.constant 0 : index
    %c0_524 = arith.constant 0 : index
    %514 = vector.load %arg40[%c0_522, %c0_523, %c0_524] : memref<9x32x64xf32, #tpu.memory_space<vmem>>, vector<1x32x64xf32>
    %515 = vector.shape_cast %514 : vector<1x32x64xf32> to vector<32x64xf32>
    %cst_525 = arith.constant dense<0.000000e+00> : vector<8x64xf32>
    %516 = tpu.matmul %513, %515, %cst_525 {dimension_numbers = #tpu.dot_dimension_numbers<[1], [0], [0], [1], [0, 0, 1, 1], [], []>} : vector<8x32xf32>, vector<32x64xf32>, vector<8x64xf32> -> vector<8x64xf32>
    %517 = arith.addf %510, %516 : vector<8x64xf32>
    %c1_526 = arith.constant 1 : index
    %c0_527 = arith.constant 0 : index
    %c0_528 = arith.constant 0 : index
    %518 = vector.load %arg39[%c1_526, %c0_527, %c0_528] : memref<9x8x8xf32, #tpu.memory_space<vmem>>, vector<1x8x8xf32>
    %519 = vector.shape_cast %518 : vector<1x8x8xf32> to vector<8x8xf32>
    %cst_529 = arith.constant dense<0.000000e+00> : vector<8x32xf32>
    %520 = tpu.matmul %519, %508, %cst_529 {dimension_numbers = #tpu.dot_dimension_numbers<[1], [0], [0], [1], [0, 0, 1, 1], [], []>} : vector<8x8xf32>, vector<8x32xf32>, vector<8x32xf32> -> vector<8x32xf32>
    %c1_530 = arith.constant 1 : index
    %c0_531 = arith.constant 0 : index
    %c0_532 = arith.constant 0 : index
    %521 = vector.load %arg40[%c1_530, %c0_531, %c0_532] : memref<9x32x64xf32, #tpu.memory_space<vmem>>, vector<1x32x64xf32>
    %522 = vector.shape_cast %521 : vector<1x32x64xf32> to vector<32x64xf32>
    %cst_533 = arith.constant dense<0.000000e+00> : vector<8x64xf32>
    %523 = tpu.matmul %520, %522, %cst_533 {dimension_numbers = #tpu.dot_dimension_numbers<[1], [0], [0], [1], [0, 0, 1, 1], [], []>} : vector<8x32xf32>, vector<32x64xf32>, vector<8x64xf32> -> vector<8x64xf32>
    %524 = arith.addf %517, %523 : vector<8x64xf32>
    %c2_534 = arith.constant 2 : index
    %c0_535 = arith.constant 0 : index
    %c0_536 = arith.constant 0 : index
    %525 = vector.load %arg39[%c2_534, %c0_535, %c0_536] : memref<9x8x8xf32, #tpu.memory_space<vmem>>, vector<1x8x8xf32>
    %526 = vector.shape_cast %525 : vector<1x8x8xf32> to vector<8x8xf32>
    %cst_537 = arith.constant dense<0.000000e+00> : vector<8x32xf32>
    %527 = tpu.matmul %526, %508, %cst_537 {dimension_numbers = #tpu.dot_dimension_numbers<[1], [0], [0], [1], [0, 0, 1, 1], [], []>} : vector<8x8xf32>, vector<8x32xf32>, vector<8x32xf32> -> vector<8x32xf32>
    %c2_538 = arith.constant 2 : index
    %c0_539 = arith.constant 0 : index
    %c0_540 = arith.constant 0 : index
    %528 = vector.load %arg40[%c2_538, %c0_539, %c0_540] : memref<9x32x64xf32, #tpu.memory_space<vmem>>, vector<1x32x64xf32>
    %529 = vector.shape_cast %528 : vector<1x32x64xf32> to vector<32x64xf32>
    %cst_541 = arith.constant dense<0.000000e+00> : vector<8x64xf32>
    %530 = tpu.matmul %527, %529, %cst_541 {dimension_numbers = #tpu.dot_dimension_numbers<[1], [0], [0], [1], [0, 0, 1, 1], [], []>} : vector<8x32xf32>, vector<32x64xf32>, vector<8x64xf32> -> vector<8x64xf32>
    %531 = arith.addf %524, %530 : vector<8x64xf32>
    %c3_542 = arith.constant 3 : index
    %c0_543 = arith.constant 0 : index
    %c0_544 = arith.constant 0 : index
    %532 = vector.load %arg39[%c3_542, %c0_543, %c0_544] : memref<9x8x8xf32, #tpu.memory_space<vmem>>, vector<1x8x8xf32>
    %533 = vector.shape_cast %532 : vector<1x8x8xf32> to vector<8x8xf32>
    %cst_545 = arith.constant dense<0.000000e+00> : vector<8x32xf32>
    %534 = tpu.matmul %533, %508, %cst_545 {dimension_numbers = #tpu.dot_dimension_numbers<[1], [0], [0], [1], [0, 0, 1, 1], [], []>} : vector<8x8xf32>, vector<8x32xf32>, vector<8x32xf32> -> vector<8x32xf32>
    %c3_546 = arith.constant 3 : index
    %c0_547 = arith.constant 0 : index
    %c0_548 = arith.constant 0 : index
    %535 = vector.load %arg40[%c3_546, %c0_547, %c0_548] : memref<9x32x64xf32, #tpu.memory_space<vmem>>, vector<1x32x64xf32>
    %536 = vector.shape_cast %535 : vector<1x32x64xf32> to vector<32x64xf32>
    %cst_549 = arith.constant dense<0.000000e+00> : vector<8x64xf32>
    %537 = tpu.matmul %534, %536, %cst_549 {dimension_numbers = #tpu.dot_dimension_numbers<[1], [0], [0], [1], [0, 0, 1, 1], [], []>} : vector<8x32xf32>, vector<32x64xf32>, vector<8x64xf32> -> vector<8x64xf32>
    %538 = arith.addf %531, %537 : vector<8x64xf32>
    %c4_550 = arith.constant 4 : index
    %c0_551 = arith.constant 0 : index
    %c0_552 = arith.constant 0 : index
    %539 = vector.load %arg39[%c4_550, %c0_551, %c0_552] : memref<9x8x8xf32, #tpu.memory_space<vmem>>, vector<1x8x8xf32>
    %540 = vector.shape_cast %539 : vector<1x8x8xf32> to vector<8x8xf32>
    %cst_553 = arith.constant dense<0.000000e+00> : vector<8x32xf32>
    %541 = tpu.matmul %540, %508, %cst_553 {dimension_numbers = #tpu.dot_dimension_numbers<[1], [0], [0], [1], [0, 0, 1, 1], [], []>} : vector<8x8xf32>, vector<8x32xf32>, vector<8x32xf32> -> vector<8x32xf32>
    %c4_554 = arith.constant 4 : index
    %c0_555 = arith.constant 0 : index
    %c0_556 = arith.constant 0 : index
    %542 = vector.load %arg40[%c4_554, %c0_555, %c0_556] : memref<9x32x64xf32, #tpu.memory_space<vmem>>, vector<1x32x64xf32>
    %543 = vector.shape_cast %542 : vector<1x32x64xf32> to vector<32x64xf32>
    %cst_557 = arith.constant dense<0.000000e+00> : vector<8x64xf32>
    %544 = tpu.matmul %541, %543, %cst_557 {dimension_numbers = #tpu.dot_dimension_numbers<[1], [0], [0], [1], [0, 0, 1, 1], [], []>} : vector<8x32xf32>, vector<32x64xf32>, vector<8x64xf32> -> vector<8x64xf32>
    %545 = arith.addf %538, %544 : vector<8x64xf32>
    %c5_558 = arith.constant 5 : index
    %c0_559 = arith.constant 0 : index
    %c0_560 = arith.constant 0 : index
    %546 = vector.load %arg39[%c5_558, %c0_559, %c0_560] : memref<9x8x8xf32, #tpu.memory_space<vmem>>, vector<1x8x8xf32>
    %547 = vector.shape_cast %546 : vector<1x8x8xf32> to vector<8x8xf32>
    %cst_561 = arith.constant dense<0.000000e+00> : vector<8x32xf32>
    %548 = tpu.matmul %547, %508, %cst_561 {dimension_numbers = #tpu.dot_dimension_numbers<[1], [0], [0], [1], [0, 0, 1, 1], [], []>} : vector<8x8xf32>, vector<8x32xf32>, vector<8x32xf32> -> vector<8x32xf32>
    %c5_562 = arith.constant 5 : index
    %c0_563 = arith.constant 0 : index
    %c0_564 = arith.constant 0 : index
    %549 = vector.load %arg40[%c5_562, %c0_563, %c0_564] : memref<9x32x64xf32, #tpu.memory_space<vmem>>, vector<1x32x64xf32>
    %550 = vector.shape_cast %549 : vector<1x32x64xf32> to vector<32x64xf32>
    %cst_565 = arith.constant dense<0.000000e+00> : vector<8x64xf32>
    %551 = tpu.matmul %548, %550, %cst_565 {dimension_numbers = #tpu.dot_dimension_numbers<[1], [0], [0], [1], [0, 0, 1, 1], [], []>} : vector<8x32xf32>, vector<32x64xf32>, vector<8x64xf32> -> vector<8x64xf32>
    %552 = arith.addf %545, %551 : vector<8x64xf32>
    %c6_566 = arith.constant 6 : index
    %c0_567 = arith.constant 0 : index
    %c0_568 = arith.constant 0 : index
    %553 = vector.load %arg39[%c6_566, %c0_567, %c0_568] : memref<9x8x8xf32, #tpu.memory_space<vmem>>, vector<1x8x8xf32>
    %554 = vector.shape_cast %553 : vector<1x8x8xf32> to vector<8x8xf32>
    %cst_569 = arith.constant dense<0.000000e+00> : vector<8x32xf32>
    %555 = tpu.matmul %554, %508, %cst_569 {dimension_numbers = #tpu.dot_dimension_numbers<[1], [0], [0], [1], [0, 0, 1, 1], [], []>} : vector<8x8xf32>, vector<8x32xf32>, vector<8x32xf32> -> vector<8x32xf32>
    %c6_570 = arith.constant 6 : index
    %c0_571 = arith.constant 0 : index
    %c0_572 = arith.constant 0 : index
    %556 = vector.load %arg40[%c6_570, %c0_571, %c0_572] : memref<9x32x64xf32, #tpu.memory_space<vmem>>, vector<1x32x64xf32>
    %557 = vector.shape_cast %556 : vector<1x32x64xf32> to vector<32x64xf32>
    %cst_573 = arith.constant dense<0.000000e+00> : vector<8x64xf32>
    %558 = tpu.matmul %555, %557, %cst_573 {dimension_numbers = #tpu.dot_dimension_numbers<[1], [0], [0], [1], [0, 0, 1, 1], [], []>} : vector<8x32xf32>, vector<32x64xf32>, vector<8x64xf32> -> vector<8x64xf32>
    %559 = arith.addf %552, %558 : vector<8x64xf32>
    %c7_574 = arith.constant 7 : index
    %c0_575 = arith.constant 0 : index
    %c0_576 = arith.constant 0 : index
    %560 = vector.load %arg39[%c7_574, %c0_575, %c0_576] : memref<9x8x8xf32, #tpu.memory_space<vmem>>, vector<1x8x8xf32>
    %561 = vector.shape_cast %560 : vector<1x8x8xf32> to vector<8x8xf32>
    %cst_577 = arith.constant dense<0.000000e+00> : vector<8x32xf32>
    %562 = tpu.matmul %561, %508, %cst_577 {dimension_numbers = #tpu.dot_dimension_numbers<[1], [0], [0], [1], [0, 0, 1, 1], [], []>} : vector<8x8xf32>, vector<8x32xf32>, vector<8x32xf32> -> vector<8x32xf32>
    %c7_578 = arith.constant 7 : index
    %c0_579 = arith.constant 0 : index
    %c0_580 = arith.constant 0 : index
    %563 = vector.load %arg40[%c7_578, %c0_579, %c0_580] : memref<9x32x64xf32, #tpu.memory_space<vmem>>, vector<1x32x64xf32>
    %564 = vector.shape_cast %563 : vector<1x32x64xf32> to vector<32x64xf32>
    %cst_581 = arith.constant dense<0.000000e+00> : vector<8x64xf32>
    %565 = tpu.matmul %562, %564, %cst_581 {dimension_numbers = #tpu.dot_dimension_numbers<[1], [0], [0], [1], [0, 0, 1, 1], [], []>} : vector<8x32xf32>, vector<32x64xf32>, vector<8x64xf32> -> vector<8x64xf32>
    %566 = arith.addf %559, %565 : vector<8x64xf32>
    %c8_582 = arith.constant 8 : index
    %c0_583 = arith.constant 0 : index
    %c0_584 = arith.constant 0 : index
    %567 = vector.load %arg39[%c8_582, %c0_583, %c0_584] : memref<9x8x8xf32, #tpu.memory_space<vmem>>, vector<1x8x8xf32>
    %568 = vector.shape_cast %567 : vector<1x8x8xf32> to vector<8x8xf32>
    %cst_585 = arith.constant dense<0.000000e+00> : vector<8x32xf32>
    %569 = tpu.matmul %568, %508, %cst_585 {dimension_numbers = #tpu.dot_dimension_numbers<[1], [0], [0], [1], [0, 0, 1, 1], [], []>} : vector<8x8xf32>, vector<8x32xf32>, vector<8x32xf32> -> vector<8x32xf32>
    %c8_586 = arith.constant 8 : index
    %c0_587 = arith.constant 0 : index
    %c0_588 = arith.constant 0 : index
    %570 = vector.load %arg40[%c8_586, %c0_587, %c0_588] : memref<9x32x64xf32, #tpu.memory_space<vmem>>, vector<1x32x64xf32>
    %571 = vector.shape_cast %570 : vector<1x32x64xf32> to vector<32x64xf32>
    %cst_589 = arith.constant dense<0.000000e+00> : vector<8x64xf32>
    %572 = tpu.matmul %569, %571, %cst_589 {dimension_numbers = #tpu.dot_dimension_numbers<[1], [0], [0], [1], [0, 0, 1, 1], [], []>} : vector<8x32xf32>, vector<32x64xf32>, vector<8x64xf32> -> vector<8x64xf32>
    %573 = arith.addf %566, %572 : vector<8x64xf32>
    %574 = vector.broadcast %509 : vector<1x64xf32> to vector<8x64xf32>
    %575 = arith.addf %573, %574 : vector<8x64xf32>
    %cst_590 = arith.constant 0.000000e+00 : f32
    %576 = vector.broadcast %cst_590 : f32 to vector<8x64xf32>
    %577 = arith.cmpf ogt, %575, %576 : vector<8x64xf32>
    %cst_591 = arith.constant 2.000000e-01 : f32
    %578 = vector.broadcast %cst_591 : f32 to vector<8x64xf32>
    %579 = arith.mulf %578, %575 : vector<8x64xf32>
    %580 = arith.select %577, %575, %579 : vector<8x64xi1>, vector<8x64xf32>
    %c0_592 = arith.constant 0 : index
    %c0_593 = arith.constant 0 : index
    %581 = vector.load %arg42[%c0_592, %c0_593] : memref<8x8xf32, #tpu.memory_space<vmem>>, vector<8x8xf32>
    %c0_594 = arith.constant 0 : index
    %c0_595 = arith.constant 0 : index
    %582 = vector.load %arg43[%c0_594, %c0_595] : memref<64x16xf32, #tpu.memory_space<vmem>>, vector<64x16xf32>
    %c0_596 = arith.constant 0 : index
    %c0_597 = arith.constant 0 : index
    %583 = vector.load %arg44[%c0_596, %c0_597] : memref<1x16xf32, #tpu.memory_space<vmem>>, vector<1x16xf32>
    %c0_598 = arith.constant 0 : index
    %c0_599 = arith.constant 0 : index
    %584 = vector.load %arg45[%c0_598, %c0_599] : memref<16x64xf32, #tpu.memory_space<vmem>>, vector<16x64xf32>
    %c0_600 = arith.constant 0 : index
    %c0_601 = arith.constant 0 : index
    %585 = vector.load %arg46[%c0_600, %c0_601] : memref<1x64xf32, #tpu.memory_space<vmem>>, vector<1x64xf32>
    %c0_602 = arith.constant 0 : index
    %c0_603 = arith.constant 0 : index
    %586 = vector.load %arg47[%c0_602, %c0_603] : memref<8x8xf32, #tpu.memory_space<vmem>>, vector<8x8xf32>
    %cst_604 = arith.constant dense<0.000000e+00> : vector<8x64xf32>
    %587 = tpu.matmul %581, %580, %cst_604 {dimension_numbers = #tpu.dot_dimension_numbers<[1], [0], [0], [1], [0, 0, 1, 1], [], []>} : vector<8x8xf32>, vector<8x64xf32>, vector<8x64xf32> -> vector<8x64xf32>
    %cst_605 = arith.constant dense<0.000000e+00> : vector<8x16xf32>
    %588 = tpu.matmul %587, %582, %cst_605 {dimension_numbers = #tpu.dot_dimension_numbers<[1], [0], [0], [1], [0, 0, 1, 1], [], []>} : vector<8x64xf32>, vector<64x16xf32>, vector<8x16xf32> -> vector<8x16xf32>
    %589 = vector.broadcast %583 : vector<1x16xf32> to vector<8x16xf32>
    %590 = arith.addf %588, %589 : vector<8x16xf32>
    %cst_606 = arith.constant 0.000000e+00 : f32
    %591 = vector.broadcast %cst_606 : f32 to vector<8x16xf32>
    %592 = arith.maximumf %590, %591 : vector<8x16xf32>
    %cst_607 = arith.constant dense<0.000000e+00> : vector<8x64xf32>
    %593 = tpu.matmul %592, %584, %cst_607 {dimension_numbers = #tpu.dot_dimension_numbers<[1], [0], [0], [1], [0, 0, 1, 1], [], []>} : vector<8x16xf32>, vector<16x64xf32>, vector<8x64xf32> -> vector<8x64xf32>
    %594 = vector.broadcast %585 : vector<1x64xf32> to vector<8x64xf32>
    %595 = arith.addf %593, %594 : vector<8x64xf32>
    %596 = arith.negf %595 : vector<8x64xf32>
    %597 = math.exp %596 : vector<8x64xf32>
    %cst_608 = arith.constant 1.000000e+00 : f32
    %598 = vector.broadcast %cst_608 : f32 to vector<8x64xf32>
    %599 = arith.addf %598, %597 : vector<8x64xf32>
    %600 = arith.divf %598, %599 : vector<8x64xf32>
    %cst_609 = arith.constant dense<0.000000e+00> : vector<8x64xf32>
    %601 = tpu.matmul %586, %600, %cst_609 {dimension_numbers = #tpu.dot_dimension_numbers<[1], [0], [0], [1], [0, 0, 1, 1], [], []>} : vector<8x8xf32>, vector<8x64xf32>, vector<8x64xf32> -> vector<8x64xf32>
    %602 = arith.mulf %580, %601 : vector<8x64xf32>
    %c0_610 = arith.constant 0 : index
    %c0_611 = arith.constant 0 : index
    %603 = vector.load %arg50[%c0_610, %c0_611] : memref<1x64xf32, #tpu.memory_space<vmem>>, vector<1x64xf32>
    %cst_612 = arith.constant 0.000000e+00 : f32
    %604 = vector.broadcast %cst_612 : f32 to vector<24x64xf32>
    %c0_613 = arith.constant 0 : index
    %c0_614 = arith.constant 0 : index
    %c0_615 = arith.constant 0 : index
    %605 = vector.load %arg48[%c0_613, %c0_614, %c0_615] : memref<1x24x8xf32, #tpu.memory_space<vmem>>, vector<1x24x8xf32>
    %606 = vector.shape_cast %605 : vector<1x24x8xf32> to vector<24x8xf32>
    %cst_616 = arith.constant dense<0.000000e+00> : vector<24x64xf32>
    %607 = tpu.matmul %606, %602, %cst_616 {dimension_numbers = #tpu.dot_dimension_numbers<[1], [0], [0], [1], [0, 0, 1, 1], [], []>} : vector<24x8xf32>, vector<8x64xf32>, vector<24x64xf32> -> vector<24x64xf32>
    %c0_617 = arith.constant 0 : index
    %c0_618 = arith.constant 0 : index
    %c0_619 = arith.constant 0 : index
    %608 = vector.load %arg49[%c0_617, %c0_618, %c0_619] : memref<1x64x64xf32, #tpu.memory_space<vmem>>, vector<1x64x64xf32>
    %609 = vector.shape_cast %608 : vector<1x64x64xf32> to vector<64x64xf32>
    %cst_620 = arith.constant dense<0.000000e+00> : vector<24x64xf32>
    %610 = tpu.matmul %607, %609, %cst_620 {dimension_numbers = #tpu.dot_dimension_numbers<[1], [0], [0], [1], [0, 0, 1, 1], [], []>} : vector<24x64xf32>, vector<64x64xf32>, vector<24x64xf32> -> vector<24x64xf32>
    %611 = arith.addf %604, %610 : vector<24x64xf32>
    %612 = vector.broadcast %603 : vector<1x64xf32> to vector<24x64xf32>
    %613 = arith.addf %611, %612 : vector<24x64xf32>
    %cst_621 = arith.constant 0.000000e+00 : f32
    %614 = vector.broadcast %cst_621 : f32 to vector<24x64xf32>
    %615 = arith.cmpf ogt, %613, %614 : vector<24x64xf32>
    %cst_622 = arith.constant 2.000000e-01 : f32
    %616 = vector.broadcast %cst_622 : f32 to vector<24x64xf32>
    %617 = arith.mulf %616, %613 : vector<24x64xf32>
    %618 = arith.select %615, %613, %617 : vector<24x64xi1>, vector<24x64xf32>
    %c0_623 = arith.constant 0 : index
    %c0_624 = arith.constant 0 : index
    %619 = vector.load %arg53[%c0_623, %c0_624] : memref<1x64xf32, #tpu.memory_space<vmem>>, vector<1x64xf32>
    %cst_625 = arith.constant 0.000000e+00 : f32
    %620 = vector.broadcast %cst_625 : f32 to vector<56x64xf32>
    %c0_626 = arith.constant 0 : index
    %c0_627 = arith.constant 0 : index
    %c0_628 = arith.constant 0 : index
    %621 = vector.load %arg51[%c0_626, %c0_627, %c0_628] : memref<1x56x24xf32, #tpu.memory_space<vmem>>, vector<1x56x24xf32>
    %622 = vector.shape_cast %621 : vector<1x56x24xf32> to vector<56x24xf32>
    %cst_629 = arith.constant dense<0.000000e+00> : vector<56x64xf32>
    %623 = tpu.matmul %622, %618, %cst_629 {dimension_numbers = #tpu.dot_dimension_numbers<[1], [0], [0], [1], [0, 0, 1, 1], [], []>} : vector<56x24xf32>, vector<24x64xf32>, vector<56x64xf32> -> vector<56x64xf32>
    %c0_630 = arith.constant 0 : index
    %c0_631 = arith.constant 0 : index
    %c0_632 = arith.constant 0 : index
    %624 = vector.load %arg52[%c0_630, %c0_631, %c0_632] : memref<1x64x64xf32, #tpu.memory_space<vmem>>, vector<1x64x64xf32>
    %625 = vector.shape_cast %624 : vector<1x64x64xf32> to vector<64x64xf32>
    %cst_633 = arith.constant dense<0.000000e+00> : vector<56x64xf32>
    %626 = tpu.matmul %623, %625, %cst_633 {dimension_numbers = #tpu.dot_dimension_numbers<[1], [0], [0], [1], [0, 0, 1, 1], [], []>} : vector<56x64xf32>, vector<64x64xf32>, vector<56x64xf32> -> vector<56x64xf32>
    %627 = arith.addf %620, %626 : vector<56x64xf32>
    %628 = vector.broadcast %619 : vector<1x64xf32> to vector<56x64xf32>
    %629 = arith.addf %627, %628 : vector<56x64xf32>
    %cst_634 = arith.constant 0.000000e+00 : f32
    %630 = vector.broadcast %cst_634 : f32 to vector<56x64xf32>
    %631 = arith.cmpf ogt, %629, %630 : vector<56x64xf32>
    %cst_635 = arith.constant 2.000000e-01 : f32
    %632 = vector.broadcast %cst_635 : f32 to vector<56x64xf32>
    %633 = arith.mulf %632, %629 : vector<56x64xf32>
    %634 = arith.select %631, %629, %633 : vector<56x64xi1>, vector<56x64xf32>
    %c0_636 = arith.constant 0 : index
    %c0_637 = arith.constant 0 : index
    %635 = vector.load %arg54[%c0_636, %c0_637] : memref<56x64xf32, #tpu.memory_space<vmem>>, vector<56x64xf32>
    tpu.vector_store %arg54[%c0_636, %c0_637], %634 {strides = array<i32>} : memref<56x64xf32, #tpu.memory_space<vmem>>, vector<56x64xf32>,
    return
  }
}

</mosaic_0001>

<bundles_post_ra>
// kernel: forward.1
= control target key start
LH: loop header
LB: loop body
LE: loop exit
PB: predicated region body
PF: predicated region fallthrough
CT: control target
= control target key end

     0   :  { %s20884_s6 = smov 1   ;;  %s20885_s10 = smov 2   ;;  %s23084_s0 = inlined_call_operand.smem [shape: u32[55], index: -1, kind: input, shape index: {}] }
   0x1   :  { %s20962_s5 = sld [smem:[%s23084_s0]]   ;;  %s20886_s14 = smov 3  }
   0x2   :  { %s20967_s9 = sld [smem:[%s23084_s0 + %s20884_s6]]   ;;  %s20887_s18 = smov 4  }
   0x3   :  { %s20972_s13 = sld [smem:[%s23084_s0 + %s20885_s10]]   ;;  %s20888_s22 = smov 5  }
   0x4   :  { %s20977_s17 = sld [smem:[%s23084_s0 + %s20886_s14]]   ;;  %s20889_s26 = smov 6  }
   0x5   :  { %s20982_s21 = sld [smem:[%s23084_s0 + %s20887_s18]]   ;;  %s20890_s30 = smov 7  }
   0x6   :  { %s20987_s25 = sld [smem:[%s23084_s0 + %s20888_s22]]   ;;  %s20891_s4 = smov 8  }
   0x7   :  { %s20992_s29 = sld [smem:[%s23084_s0 + %s20889_s26]]   ;;  %s20892_s10 = smov 9  }
   0x8   :  { %s20997_s3 = sld [smem:[%s23084_s0 + %s20890_s30]]   ;;  %s20893_s15 = smov 10  }
   0x9   :  { %23107 = sst [smem:[#allocation29_spill]] %s20972_s13  ;;  %s20894_s20 = smov 11  }
   0xa   :  { %23108 = sst [smem:[#allocation30_spill]] %s20977_s17  ;;  %s20895_s26 = smov 12  }
   0xb   :  { %23109 = sst [smem:[#allocation31_spill]] %s20982_s21  ;;  %s20896_s1 = smov 13  }
   0xc   :  { %23110 = sst [smem:[#allocation32_spill]] %s20987_s25  ;;  %s20897_s7 = smov 14  }
   0xd   :  { %23111 = sst [smem:[#allocation33_spill]] %s20992_s29  ;;  %s20899_s22 = smov 16  }
   0xe   :  { %23112 = sst [smem:[#allocation34_spill]] %s20997_s3  ;;  %s20900_s28 = smov 17  }
   0xf   :  { %s21002_s8 = sld [smem:[%s23084_s0 + %s20891_s4]]  }
  0x10   :  { %s21007_s14 = sld [smem:[%s23084_s0 + %s20892_s10]]  }
  0x11   :  { %s21012_s19 = sld [smem:[%s23084_s0 + %s20893_s15]]   ;;  %s20898_s15 = smov 15  }
  0x12   :  { %s21017_s24 = sld [smem:[%s23084_s0 + %s20894_s20]]  }
  0x13   :  { %s21022_s30 = sld [smem:[%s23084_s0 + %s20895_s26]]  }
  0x14   :  { %s21027_s6 = sld [smem:[%s23084_s0 + %s20896_s1]]  }
  0x15   :  { %23113 = sst [smem:[#allocation35_spill]] %s21002_s8 }
  0x16   :  { %23114 = sst [smem:[#allocation36_spill]] %s21007_s14 }
  0x17   :  { %23115 = sst [smem:[#allocation37_spill]] %s21012_s19 }
  0x18   :  { %23116 = sst [smem:[#allocation38_spill]] %s21017_s24 }
  0x19   :  { %23117 = sst [smem:[#allocation39_spill]] %s21022_s30 }
  0x1a   :  { %23118 = sst [smem:[#allocation40_spill]] %s21027_s6 }
  0x1b   :  { %s21032_s12 = sld [smem:[%s23084_s0 + %s20897_s7]]   ;;  %s20901_s7 = smov 18  }
  0x1c   :  { %s21037_s20 = sld [smem:[%s23084_s0 + %s20898_s15]]   ;;  %s20902_s15 = smov 19  }
  0x1d   :  { %s21042_s27 = sld [smem:[%s23084_s0 + %s20899_s22]]   ;;  %s20903_s22 = smov 20  }
  0x1e   :  { %s21047_s4 = sld [smem:[%s23084_s0 + %s20900_s28]]   ;;  %s20904_s28 = smov 21  }
  0x1f   :  { %s21067_s6 = sld [smem:[%s23084_s0 + %s20904_s28]]   ;;  %s20908_s28 = smov 25  }
  0x21   :  { %23119 = sst [smem:[#allocation41_spill]] %s21032_s12 }
  0x22   :  { %23120 = sst [smem:[#allocation42_spill]] %s21037_s20 }
  0x23   :  { %23121 = sst [smem:[#allocation43_spill]] %s21042_s27 }
  0x24   :  { %s21052_s12 = sld [smem:[%s23084_s0 + %s20901_s7]]   ;;  %s20905_s7 = smov 22  }
  0x25   :  { %s21057_s20 = sld [smem:[%s23084_s0 + %s20902_s15]]   ;;  %s20906_s15 = smov 23  }
  0x26   :  { %s21062_s27 = sld [smem:[%s23084_s0 + %s20903_s22]]   ;;  %s20907_s22 = smov 24  }
  0x27   :  { %23124 = sst [smem:[#allocation46_spill]] %s21067_s6 }
  0x28   :  { %s21082_s30 = sld [smem:[%s23084_s0 + %s20907_s22]]   ;;  %s20911_s22 = smov 28  }
  0x29   :  { %s21087_s6 = sld [smem:[%s23084_s0 + %s20908_s28]]   ;;  %s20912_s28 = smov 29  }
  0x2a   :  { %23122 = sst [smem:[#allocation44_spill]] %s21052_s12 }
  0x2b   :  { %23123 = sst [smem:[#allocation45_spill]] %s21057_s20 }
  0x2c   :  { %s21072_s12 = sld [smem:[%s23084_s0 + %s20905_s7]]   ;;  %s20909_s7 = smov 26  }
  0x2d   :  { %s21077_s20 = sld [smem:[%s23084_s0 + %s20906_s15]]   ;;  %s20910_s15 = smov 27  }
  0x2e   :  { %23126 = sst [smem:[#allocation48_spill]] %s21082_s30 }
  0x2f   :  { %23127 = sst [smem:[#allocation49_spill]] %s21087_s6 }
  0x30   :  { %s21092_s19 = sld [smem:[%s23084_s0 + %s20909_s7]]   ;;  %s20913_s7 = smov 30  }
  0x31   :  { %s21102_s30 = sld [smem:[%s23084_s0 + %s20911_s22]]   ;;  %s20915_s22 = smov 32  }
  0x32   :  { %s21107_s6 = sld [smem:[%s23084_s0 + %s20912_s28]]   ;;  %s20916_s28 = smov 33  }
  0x33   :  { %23125 = sst [smem:[#allocation47_spill]] %s21077_s20 }
  0x34   :  { %s21097_s20 = sld [smem:[%s23084_s0 + %s20910_s15]]   ;;  %s20914_s15 = smov 31  }
  0x35   :  { %s21112_s24 = sld [smem:[%s23084_s0 + %s20913_s7]]   ;;  %s20917_s7 = smov 34  }
  0x36   :  { %s21127_s8 = sld [smem:[%s23084_s0 + %s20916_s28]]   ;;  %s20920_s28 = smov 37  }
  0x37   :  { %23129 = sst [smem:[#allocation51_spill]] %s21102_s30 }
  0x38   :  { %s21122_s30 = sld [smem:[%s23084_s0 + %s20915_s22]]   ;;  %s20919_s22 = smov 36  }
  0x39   :  { %s21142_s14 = sld [smem:[%s23084_s0 + %s20919_s22]]   ;;  %s20923_s22 = smov 40  }
  0x3a   :  { %23128 = sst [smem:[#allocation50_spill]] %s21097_s20 }
  0x3b   :  { %23130 = sst [smem:[#allocation52_spill]] %s21112_s24 }
  0x3c   :  { %s21117_s20 = sld [smem:[%s23084_s0 + %s20914_s15]]   ;;  %s20918_s15 = smov 35  }
  0x3d   :  { %23132 = sst [smem:[#allocation54_spill]] %s21127_s8 }
  0x3e   :  { %s21132_s24 = sld [smem:[%s23084_s0 + %s20917_s7]]   ;;  %s20921_s7 = smov 38  }
  0x3f   :  { %23134 = sst [smem:[#allocation56_spill]] %s21142_s14 }
  0x40   :  { %s21147_s8 = sld [smem:[%s23084_s0 + %s20920_s28]]   ;;  %s20924_s28 = smov 41  }
  0x41   :  { %s21152_s3 = sld [smem:[%s23084_s0 + %s20921_s7]]   ;;  %s20925_s7 = smov 42  }
  0x42   :  { %23131 = sst [smem:[#allocation53_spill]] %s21117_s20 }
  0x43   :  { %s21137_s20 = sld [smem:[%s23084_s0 + %s20918_s15]]   ;;  %s20922_s15 = smov 39  }
  0x44   :  { %s21162_s14 = sld [smem:[%s23084_s0 + %s20923_s22]]   ;;  %s20927_s22 = smov 44  }
  0x45   :  { %s21172_s29 = sld [smem:[%s23084_s0 + %s20925_s7]]   ;;  %s20929_s7 = smov 46  }
  0x46   :  { %23135 = sst [smem:[#allocation57_spill]] %s21147_s8 }
  0x47   :  { %s21167_s8 = sld [smem:[%s23084_s0 + %s20924_s28]]   ;;  %s20928_s28 = smov 45  }
  0x48   :  { %s21187_s25 = sld [smem:[%s23084_s0 + %s20928_s28]]   ;;  %s20932_s28 = smov 49  }
  0x49   :  { %23133 = sst [smem:[#allocation55_spill]] %s21137_s20 }
  0x4a   :  { %s21157_s20 = sld [smem:[%s23084_s0 + %s20922_s15]]   ;;  %s20926_s15 = smov 43  }
  0x4b   :  { %23137 = sst [smem:[#allocation59_spill]] %s21162_s14 }
  0x4c   :  { %23138 = sst [smem:[#allocation60_spill]] %s21172_s29 }
  0x4d   :  { %s21182_s14 = sld [smem:[%s23084_s0 + %s20927_s22]]   ;;  %s20931_s22 = smov 48  }
  0x4e   :  { %23140 = sst [smem:[#allocation62_spill]] %s21187_s25 }
  0x4f   :  { %s21192_s29 = sld [smem:[%s23084_s0 + %s20929_s7]]   ;;  %s20933_s7 = smov 50  }
  0x50   :  { %23136 = sst [smem:[#allocation58_spill]] %s21157_s20 }
  0x51   :  { %s21177_s20 = sld [smem:[%s23084_s0 + %s20926_s15]]   ;;  %s20930_s15 = smov 47  }
  0x52   :  { %s21202_s21 = sld [smem:[%s23084_s0 + %s20931_s22]]   ;;  %s20935_s22 = smov 52  }
  0x53   :  { %s21207_s25 = sld [smem:[%s23084_s0 + %s20932_s28]]   ;;  %s20936_s28 = smov 53  }
  0x54   :  { %s21212_s13 = sld [smem:[%s23084_s0 + %s20933_s7]]   ;;  %s20937_s7 = smov 54  }
  0x55   :  { %s21232_s17 = sld [smem:[%s23084_s0 + %s20937_s7]]  }
  0x57   :  { %23139 = sst [smem:[#allocation61_spill]] %s21177_s20 }
  0x58   :  { %s21197_s20 = sld [smem:[%s23084_s0 + %s20930_s15]]   ;;  %s20934_s15 = smov 51  }
  0x59   :  { %23142 = sst [smem:[#allocation64_spill]] %s21202_s21 }
  0x5a   :  { %23143 = sst [smem:[#allocation65_spill]] %s21207_s25 }
  0x5b   :  { %s21222_s21 = sld [smem:[%s23084_s0 + %s20935_s22]]  }
  0x5c   :  { %s21227_s25 = sld [smem:[%s23084_s0 + %s20936_s28]]  }
  0x5e   :  { %23141 = sst [smem:[#allocation63_spill]] %s21197_s20 }
  0x5f   :  { %s21217_s20 = sld [smem:[%s23084_s0 + %s20934_s15]]  }
  0x60   :  { %114 = vsyncpa [#allocation3], 0 }
  0x61   :  { %115 = vsyncpa [#allocation5], 0 }
  0x62   :  { %116 = vsyncpa [#allocation8], 0 }
  0x63   :  { %117 = vsyncpa [#allocation11], 0 }
  0x64   :  { %118 = vsyncpa [#allocation14], 0 }
  0x65   :  { %119 = vsyncpa [#allocation17], 0 }
  0x66   :  { %120 = vsyncpa [#allocation20], 0  ;;  %s20938_s15 = smov [#allocation4]   ;;  %s20939_s18 = smov [#allocation7]  }
  0x67   :  { %s175_s16 = sshll.u32 %s20938_s15, 4  ;;  %s203_s22 = sshll.u32 %s20939_s18, 4  ;;  %s176_s16 = int_to_ptr.vmem [resolvable:$true] %s175_s16  ;;  %s204_s22 = int_to_ptr.vmem [resolvable:$true] %s203_s22 }
  0x68   :  { %s20584_s23 = scalar_lea.hbm %s21062_s27, 16 }
  0x69   :  { %p20585_p0 = scmp.ne.s32.totalorder %s21062_s27, %s20584_s23  ;;  %p20588_p1 = scmp.lt.u32.totalorder %s20584_s23, %s21062_s27 }
  0x6b   :  { %p20590_p2 = pnand %p20588_p1, %p20585_p0 }
  0x6d   :  { %20593 = shalt.err (!%p20590_p2)
}
  0x6e   :  { %s20594_s0 = scalar_lea.vmem %s176_s16, 16  ;;  %s20598_s26 = scalar_lea.vmem %s176_s16, 32 }
  0x6f   :  { %p20595_p3 = scmp.ne.s32.totalorder %s176_s16, %s20594_s0  ;;  %p20599_p4 = scmp.lt.s32.totalorder %s176_s16, %s176_s16 }
  0x70   :  { %p20600_p5 = scmp.lt.s32.totalorder %s20598_s26, %s20594_s0 }
  0x72   :  { %p20601_p6 = por %p20600_p5, %p20599_p4 }
  0x74   :  { %p20602_p7 = pnand %p20601_p6, %p20595_p3 }
  0x76   :  { %20605 = shalt.err (!%p20602_p7)
}
  0x77   :  { %178 = dma.hbm_to_vmem [thread:$0]  %s21062_s27, 16, %s176_s16, [#allocation5]  }
  0x78   :  { %s20606_s28 = scalar_lea.hbm %s21092_s19, 16 }
  0x79   :  { %p20607_p8 = scmp.ne.s32.totalorder %s21092_s19, %s20606_s28  ;;  %p20610_p9 = scmp.lt.u32.totalorder %s20606_s28, %s21092_s19 }
  0x7b   :  { %p20612_p10 = pnand %p20610_p9, %p20607_p8 }
  0x7d   :  { %20615 = shalt.err (!%p20612_p10)
}
  0x7e   :  { %s20616_s1 = scalar_lea.vmem %s204_s22, 16  ;;  %s20620_s2 = scalar_lea.vmem %s204_s22, 32 }
  0x7f   :  { %p20617_p11 = scmp.ne.s32.totalorder %s204_s22, %s20616_s1  ;;  %p20621_p12 = scmp.lt.s32.totalorder %s204_s22, %s204_s22 }
  0x80   :  { %p20622_p13 = scmp.lt.s32.totalorder %s20620_s2, %s20616_s1 }
  0x82   :  { %p20623_p0 = por %p20622_p13, %p20621_p12 }
  0x84   :  { %p20624_p1 = pnand %p20623_p0, %p20617_p11 }
  0x86   :  { %20627 = shalt.err (!%p20624_p1)
}
  0x87   :  { %206 = dma.hbm_to_vmem [thread:$0]  %s21092_s19, 16, %s204_s22, [#allocation8]  }
  0x88   :  { %s20940_s7 = smov [#allocation10]   ;;  %s20941_s10 = smov [#allocation13]  }
  0x89   :  { %s231_s27 = sshll.u32 %s20940_s7, 4  ;;  %s259_s11 = sshll.u32 %s20941_s10, 4  ;;  %s232_s27 = int_to_ptr.vmem [resolvable:$true] %s231_s27  ;;  %s260_s11 = int_to_ptr.vmem [resolvable:$true] %s259_s11 }
  0x8a   :  { %s20628_s15 = scalar_lea.hbm %s21122_s30, 16 }
  0x8b   :  { %p20629_p2 = scmp.ne.s32.totalorder %s21122_s30, %s20628_s15  ;;  %p20632_p3 = scmp.lt.u32.totalorder %s20628_s15, %s21122_s30 }
  0x8d   :  { %p20634_p4 = pnand %p20632_p3, %p20629_p2 }
  0x8f   :  { %20637 = shalt.err (!%p20634_p4)
}
  0x90   :  { %s20638_s16 = scalar_lea.vmem %s232_s27, 16  ;;  %s20642_s18 = scalar_lea.vmem %s232_s27, 32 }
  0x91   :  { %p20639_p5 = scmp.ne.s32.totalorder %s232_s27, %s20638_s16  ;;  %p20643_p6 = scmp.lt.s32.totalorder %s232_s27, %s232_s27 }
  0x92   :  { %p20644_p7 = scmp.lt.s32.totalorder %s20642_s18, %s20638_s16 }
  0x94   :  { %p20645_p8 = por %p20644_p7, %p20643_p6 }
  0x96   :  { %p20646_p9 = pnand %p20645_p8, %p20639_p5 }
  0x98   :  { %20649 = shalt.err (!%p20646_p9)
}
  0x99   :  { %234 = dma.hbm_to_vmem [thread:$0]  %s21122_s30, 16, %s232_s27, [#allocation11]  }
  0x9a   :  { %s20650_s19 = scalar_lea.hbm %s21152_s3, 16 }
  0x9b   :  { %p20651_p10 = scmp.ne.s32.totalorder %s21152_s3, %s20650_s19  ;;  %p20654_p11 = scmp.lt.u32.totalorder %s20650_s19, %s21152_s3 }
  0x9d   :  { %p20656_p12 = pnand %p20654_p11, %p20651_p10 }
  0x9f   :  { %20659 = shalt.err (!%p20656_p12)
}
  0xa0   :  { %s20660_s22 = scalar_lea.vmem %s260_s11, 16  ;;  %s20664_s23 = scalar_lea.vmem %s260_s11, 32 }
  0xa1   :  { %p20661_p13 = scmp.ne.s32.totalorder %s260_s11, %s20660_s22  ;;  %p20665_p0 = scmp.lt.s32.totalorder %s260_s11, %s260_s11 }
  0xa2   :  { %p20666_p1 = scmp.lt.s32.totalorder %s20664_s23, %s20660_s22 }
  0xa4   :  { %p20667_p2 = por %p20666_p1, %p20665_p0 }
  0xa6   :  { %p20668_p3 = pnand %p20667_p2, %p20661_p13 }
  0xa8   :  { %20671 = shalt.err (!%p20668_p3)
}
  0xa9   :  { %262 = dma.hbm_to_vmem [thread:$0]  %s21152_s3, 16, %s260_s11, [#allocation14]  }
  0xaa   :  { %s20942_s0 = smov [#allocation16]   ;;  %s20943_s26 = smov [#allocation19]  }
  0xab   :  { %s287_s30 = sshll.u32 %s20942_s0, 4  ;;  %s315_s28 = sshll.u32 %s20943_s26, 4  ;;  %s288_s30 = int_to_ptr.vmem [resolvable:$true] %s287_s30  ;;  %s316_s28 = int_to_ptr.vmem [resolvable:$true] %s315_s28 }
  0xac   :  { %s20672_s1 = scalar_lea.hbm %s21182_s14, 16 }
  0xad   :  { %p20673_p4 = scmp.ne.s32.totalorder %s21182_s14, %s20672_s1  ;;  %p20676_p5 = scmp.lt.u32.totalorder %s20672_s1, %s21182_s14 }
  0xaf   :  { %p20678_p6 = pnand %p20676_p5, %p20673_p4 }
  0xb1   :  { %20681 = shalt.err (!%p20678_p6)
}
  0xb2   :  { %s20682_s2 = scalar_lea.vmem %s288_s30, 16  ;;  %s20686_s7 = scalar_lea.vmem %s288_s30, 32 }
  0xb3   :  { %p20683_p7 = scmp.ne.s32.totalorder %s288_s30, %s20682_s2  ;;  %p20687_p8 = scmp.lt.s32.totalorder %s288_s30, %s288_s30 }
  0xb4   :  { %p20688_p9 = scmp.lt.s32.totalorder %s20686_s7, %s20682_s2 }
  0xb6   :  { %p20689_p10 = por %p20688_p9, %p20687_p8 }
  0xb8   :  { %p20690_p11 = pnand %p20689_p10, %p20683_p7 }
  0xba   :  { %20693 = shalt.err (!%p20690_p11)
}
  0xbb   :  { %290 = dma.hbm_to_vmem [thread:$0]  %s21182_s14, 16, %s288_s30, [#allocation17]  }
  0xbc   :  { %s20694_s3 = scalar_lea.hbm %s21212_s13, 16 }
  0xbd   :  { %p20695_p12 = scmp.ne.s32.totalorder %s21212_s13, %s20694_s3  ;;  %p20698_p13 = scmp.lt.u32.totalorder %s20694_s3, %s21212_s13 }
  0xbf   :  { %p20700_p0 = pnand %p20698_p13, %p20695_p12 }
  0xc1   :  { %20703 = shalt.err (!%p20700_p0)
}
  0xc2   :  { %s20704_s27 = scalar_lea.vmem %s316_s28, 16  ;;  %s20708_s10 = scalar_lea.vmem %s316_s28, 32 }
  0xc3   :  { %p20705_p1 = scmp.ne.s32.totalorder %s316_s28, %s20704_s27  ;;  %p20709_p2 = scmp.lt.s32.totalorder %s316_s28, %s316_s28 }
  0xc4   :  { %p20710_p3 = scmp.lt.s32.totalorder %s20708_s10, %s20704_s27 }
  0xc6   :  { %p20711_p4 = por %p20710_p3, %p20709_p2 }
  0xc8   :  { %p20712_p5 = pnand %p20711_p4, %p20705_p1 }
  0xca   :  { %20715 = shalt.err (!%p20712_p5)
}
  0xcb   :  { %318 = dma.hbm_to_vmem [thread:$0]  %s21212_s13, 16, %s316_s28, [#allocation20]  }
  0xcc   :  { %s20944_s11 = smov [#allocation2]   ;;  %s20945_s15 = smov [#allocation6]  }
  0xcd   :  { %s161_s14 = sshll.u32 %s20944_s11, 4  ;;  %s187_s16 = sshll.u32 %s20945_s15, 4  ;;  %s162_s14 = int_to_ptr.vmem [resolvable:$true] %s161_s14  ;;  %s188_s16 = int_to_ptr.vmem [resolvable:$true] %s187_s16 }
  0xce   :  { %s20716_s18 = scalar_lea.hbm %s21047_s4, 16 }
  0xcf   :  { %p20717_p6 = scmp.ne.s32.totalorder %s21047_s4, %s20716_s18  ;;  %p20720_p7 = scmp.lt.u32.totalorder %s20716_s18, %s21047_s4 }
  0xd1   :  { %p20722_p8 = pnand %p20720_p7, %p20717_p6 }
  0xd3   :  { %20725 = shalt.err (!%p20722_p8)
}
  0xd4   :  { %s20726_s19 = scalar_lea.vmem %s162_s14, 16  ;;  %s20730_s22 = scalar_lea.vmem %s162_s14, 32 }
  0xd5   :  { %p20727_p9 = scmp.ne.s32.totalorder %s162_s14, %s20726_s19  ;;  %p20731_p10 = scmp.lt.s32.totalorder %s162_s14, %s162_s14 }
  0xd6   :  { %p20732_p11 = scmp.lt.s32.totalorder %s20730_s22, %s20726_s19 }
  0xd8   :  { %p20733_p12 = por %p20732_p11, %p20731_p10 }
  0xda   :  { %p20734_p13 = pnand %p20733_p12, %p20727_p9 }
  0xdc   :  { %20737 = shalt.err (!%p20734_p13)
}
  0xdd   :  { %164 = dma.hbm_to_vmem [thread:$0]  %s21047_s4, 16, %s162_s14, [#allocation3]  }
  0xde   :  { %s20738_s13 = scalar_lea.hbm %s21072_s12, 16 }
  0xdf   :  { %p20739_p0 = scmp.ne.s32.totalorder %s21072_s12, %s20738_s13  ;;  %p20742_p1 = scmp.lt.u32.totalorder %s20738_s13, %s21072_s12 }
  0xe1   :  { %p20744_p2 = pnand %p20742_p1, %p20739_p0 }
  0xe3   :  { %20747 = shalt.err (!%p20744_p2)
}
  0xe4   :  { %s20748_s23 = scalar_lea.vmem %s188_s16, 16  ;;  %s20752_s0 = scalar_lea.vmem %s188_s16, 32 }
  0xe5   :  { %p20749_p3 = scmp.ne.s32.totalorder %s188_s16, %s20748_s23  ;;  %p20753_p4 = scmp.lt.s32.totalorder %s188_s16, %s188_s16 }
  0xe6   :  { %p20754_p5 = scmp.lt.s32.totalorder %s20752_s0, %s20748_s23 }
  0xe8   :  { %p20755_p6 = por %p20754_p5, %p20753_p4 }
  0xea   :  { %p20756_p7 = pnand %p20755_p6, %p20749_p3 }
  0xec   :  { %20759 = shalt.err (!%p20756_p7)
}
  0xed   :  { %190 = dma.hbm_to_vmem [thread:$0]  %s21072_s12, 16, %s188_s16, [#allocation5]  }
  0xee   :  { %s20946_s30 = smov [#allocation9]   ;;  %s20947_s26 = smov [#allocation12]  }
  0xef   :  { %s217_s4 = sshll.u32 %s20946_s30, 4  ;;  %s243_s28 = sshll.u32 %s20947_s26, 4  ;;  %s218_s4 = int_to_ptr.vmem [resolvable:$true] %s217_s4  ;;  %s244_s28 = int_to_ptr.vmem [resolvable:$true] %s243_s28 }
  0xf0   :  { %s20760_s1 = scalar_lea.hbm %s21107_s6, 16 }
  0xf1   :  { %p20761_p8 = scmp.ne.s32.totalorder %s21107_s6, %s20760_s1  ;;  %p20764_p9 = scmp.lt.u32.totalorder %s20760_s1, %s21107_s6 }
  0xf3   :  { %p20766_p10 = pnand %p20764_p9, %p20761_p8 }
  0xf5   :  { %20769 = shalt.err (!%p20766_p10)
}
  0xf6   :  { %s20770_s2 = scalar_lea.vmem %s218_s4, 16  ;;  %s20774_s7 = scalar_lea.vmem %s218_s4, 32 }
  0xf7   :  { %p20771_p11 = scmp.ne.s32.totalorder %s218_s4, %s20770_s2  ;;  %p20775_p12 = scmp.lt.s32.totalorder %s218_s4, %s218_s4 }
  0xf8   :  { %p20776_p13 = scmp.lt.s32.totalorder %s20774_s7, %s20770_s2 }
  0xfa   :  { %p20777_p0 = por %p20776_p13, %p20775_p12 }
  0xfc   :  { %p20778_p1 = pnand %p20777_p0, %p20771_p11 }
  0xfe   :  { %20781 = shalt.err (!%p20778_p1)
}
  0xff   :  { %220 = dma.hbm_to_vmem [thread:$0]  %s21107_s6, 16, %s218_s4, [#allocation8]  }
 0x100   :  { %s20782_s12 = scalar_lea.hbm %s21132_s24, 16 }
 0x101   :  { %p20783_p2 = scmp.ne.s32.totalorder %s21132_s24, %s20782_s12  ;;  %p20786_p3 = scmp.lt.u32.totalorder %s20782_s12, %s21132_s24 }
 0x103   :  { %p20788_p4 = pnand %p20786_p3, %p20783_p2 }
 0x105   :  { %20791 = shalt.err (!%p20788_p4)
}
 0x106   :  { %s20792_s3 = scalar_lea.vmem %s244_s28, 16  ;;  %s20796_s27 = scalar_lea.vmem %s244_s28, 32 }
 0x107   :  { %p20793_p5 = scmp.ne.s32.totalorder %s244_s28, %s20792_s3  ;;  %p20797_p6 = scmp.lt.s32.totalorder %s244_s28, %s244_s28 }
 0x108   :  { %p20798_p7 = scmp.lt.s32.totalorder %s20796_s27, %s20792_s3 }
 0x10a   :  { %p20799_p8 = por %p20798_p7, %p20797_p6 }
 0x10c   :  { %p20800_p9 = pnand %p20799_p8, %p20793_p5 }
 0x10e   :  { %20803 = shalt.err (!%p20800_p9)
}
 0x10f   :  { %246 = dma.hbm_to_vmem [thread:$0]  %s21132_s24, 16, %s244_s28, [#allocation11]  }
 0x110   :  { %s20948_s10 = smov [#allocation15]   ;;  %s20949_s11 = smov [#allocation18]  }
 0x111   :  { %s273_s6 = sshll.u32 %s20948_s10, 4  ;;  %s299_s14 = sshll.u32 %s20949_s11, 4  ;;  %s274_s6 = int_to_ptr.vmem [resolvable:$true] %s273_s6  ;;  %s300_s14 = int_to_ptr.vmem [resolvable:$true] %s299_s14 }
 0x112   :  { %s20804_s15 = scalar_lea.hbm %s21167_s8, 16 }
 0x113   :  { %p20805_p10 = scmp.ne.s32.totalorder %s21167_s8, %s20804_s15  ;;  %p20808_p11 = scmp.lt.u32.totalorder %s20804_s15, %s21167_s8 }
 0x115   :  { %p20810_p12 = pnand %p20808_p11, %p20805_p10 }
 0x117   :  { %20813 = shalt.err (!%p20810_p12)
}
 0x118   :  { %s20814_s16 = scalar_lea.vmem %s274_s6, 16  ;;  %s20818_s18 = scalar_lea.vmem %s274_s6, 32 }
 0x119   :  { %p20815_p13 = scmp.ne.s32.totalorder %s274_s6, %s20814_s16  ;;  %p20819_p0 = scmp.lt.s32.totalorder %s274_s6, %s274_s6 }
 0x11a   :  { %p20820_p1 = scmp.lt.s32.totalorder %s20818_s18, %s20814_s16 }
 0x11c   :  { %p20821_p2 = por %p20820_p1, %p20819_p0 }
 0x11e   :  { %p20822_p3 = pnand %p20821_p2, %p20815_p13 }
 0x120   :  { %20825 = shalt.err (!%p20822_p3)
}
 0x121   :  { %276 = dma.hbm_to_vmem [thread:$0]  %s21167_s8, 16, %s274_s6, [#allocation14]  }
 0x122   :  { %s20826_s24 = scalar_lea.hbm %s21192_s29, 16 }
 0x123   :  { %p20827_p4 = scmp.ne.s32.totalorder %s21192_s29, %s20826_s24  ;;  %p20830_p5 = scmp.lt.u32.totalorder %s20826_s24, %s21192_s29 }
 0x125   :  { %p20832_p6 = pnand %p20830_p5, %p20827_p4 }
 0x127   :  { %20835 = shalt.err (!%p20832_p6)
}
 0x128   :  { %s20836_s19 = scalar_lea.vmem %s300_s14, 16  ;;  %s20840_s22 = scalar_lea.vmem %s300_s14, 32 }
 0x129   :  { %p20837_p7 = scmp.ne.s32.totalorder %s300_s14, %s20836_s19  ;;  %p20841_p8 = scmp.lt.s32.totalorder %s300_s14, %s300_s14 }
 0x12a   :  { %p20842_p9 = scmp.lt.s32.totalorder %s20840_s22, %s20836_s19 }
 0x12c   :  { %p20843_p10 = por %p20842_p9, %p20841_p8 }
 0x12e   :  { %p20844_p11 = pnand %p20843_p10, %p20837_p7 }
 0x130   :  { %20847 = shalt.err (!%p20844_p11)
}
 0x131   :  { %302 = dma.hbm_to_vmem [thread:$0]  %s21192_s29, 16, %s300_s14, [#allocation17]  }
 0x132   :  { %s20950_s13 = smov [#allocation21]   ;;  %s20848_s23 = scalar_lea.hbm %s21227_s25, 16 }
 0x133   :  { %s329_s8 = sshll.u32 %s20950_s13, 4  ;;  %p20849_p12 = scmp.ne.s32.totalorder %s21227_s25, %s20848_s23  ;;  %s330_s8 = int_to_ptr.vmem [resolvable:$true] %s329_s8 }
 0x134   :  { %p20852_p13 = scmp.lt.u32.totalorder %s20848_s23, %s21227_s25 }
 0x136   :  { %p20854_p0 = pnand %p20852_p13, %p20849_p12 }
 0x138   :  { %20857 = shalt.err (!%p20854_p0)
}
 0x139   :  { %s20858_s0 = scalar_lea.vmem %s330_s8, 16  ;;  %s20862_s30 = scalar_lea.vmem %s330_s8, 32 }
 0x13a   :  { %p20859_p1 = scmp.ne.s32.totalorder %s330_s8, %s20858_s0  ;;  %p20863_p2 = scmp.lt.s32.totalorder %s330_s8, %s330_s8 }
 0x13b   :  { %p20864_p3 = scmp.lt.s32.totalorder %s20862_s30, %s20858_s0 }
 0x13d   :  { %p20865_p4 = por %p20864_p3, %p20863_p2 }
 0x13f   :  { %p20866_p5 = pnand %p20865_p4, %p20859_p1 }
 0x141   :  { %20869 = shalt.err (!%p20866_p5)
}
 0x142   :  { %332 = dma.hbm_to_vmem [thread:$0]  %s21227_s25, 16, %s330_s8, [#allocation20]  }
 0x143   :  { %20870 = dma.done.wait [#allocation3], 16  }
 0x144   :  { %20871 = vsyncadd [#allocation3], 4294967280 }
 0x145   :  { %20872 = dma.done.wait [#allocation5], 32  }
 0x146   :  { %20873 = vsyncadd [#allocation5], 4294967264 }
 0x147   :  { %20874 = dma.done.wait [#allocation8], 32  }
 0x148   :  { %20875 = vsyncadd [#allocation8], 4294967264 }
 0x149   :  { %20876 = dma.done.wait [#allocation11], 32  }
 0x14a   :  { %20877 = vsyncadd [#allocation11], 4294967264 }
 0x14b   :  { %20878 = dma.done.wait [#allocation14], 32  }
 0x14c   :  { %20879 = vsyncadd [#allocation14], 4294967264 }
 0x14d   :  { %20880 = dma.done.wait [#allocation17], 32  }
 0x14e   :  { %20881 = vsyncadd [#allocation17], 4294967264 }
 0x14f   :  { %20882 = dma.done.wait [#allocation20], 32  }
 0x150   :  { %20883 = vsyncadd [#allocation20], 4294967264  ;;  %vm400_vm0 = vcmask 293888   ;;  %v388_v0 = vld [vmem:[%s20967_s9] sm:$0xff]  ;;  %v389_v1 = vld [vmem:[%s20967_s9 + $0x8] sm:$0xff]  ;;  %vm449_vm1 = vcmask 1043456  }
 0x151   :  { %v390_v2 = vld [vmem:[%s20967_s9 + $0x10] sm:$0xff]  ;;  %v19345_v3 = vpack.c.bf16 %v389_v1, %v388_v0  ;;  %v391_v4 = vld [vmem:[%s20967_s9 + $0x18] sm:$0xff]  ;;  %v372_v5 = vld [vmem:[%s20962_s5] sm:$0xff]  ;;  %s23145_s25 = sld [smem:[#allocation29_spill]]  ;;  %s23147_s29 = sld [smem:[#allocation32_spill]] }
 0x152   :  { %v19349_v6 = vpack.c.bf16 %v391_v4, %v390_v2  ;;  %17149 = vmatprep.mubr.msk.f32.mxu0 %vm400_vm0, %v372_v5  ;;  %v392_v7 = vld [vmem:[%s20967_s9 + $0x20] sm:$0xf]  ;;  %v373_v8 = vld [vmem:[%s20962_s5 + $0x8] sm:$0xff]  ;;  %v374_v9 = vld [vmem:[%s20962_s5 + $0x10] sm:$0xff]  ;;  %s23144_s9 = sld [smem:[#allocation30_spill]]  ;;  %s23148_s4 = sld [smem:[#allocation33_spill]] }
 0x153   :  { %19346 = vmatprep.subr.bf16.mxu0 %v19345_v3  ;;  %v375_v10 = vld [vmem:[%s20962_s5 + $0x18] sm:$0xff]  ;;  %v376_v11 = vld [vmem:[%s20962_s5 + $0x20] sm:$0xff]  ;;  %v377_v12 = vld [vmem:[%s20962_s5 + $0x28] sm:$0xff]  ;;  %s23149_s26 = sld [smem:[#allocation34_spill]]  ;;  %s23150_s28 = sld [smem:[#allocation36_spill]] }
 0x154   :  { %19348 = vmatpush3.bf16.msra.mxu0 %v19345_v3  ;;  %v378_v13 = vld [vmem:[%s20962_s5 + $0x30] sm:$0xff]  ;;  %v379_v14 = vld [vmem:[%s20962_s5 + $0x38] sm:$0xff]  ;;  %v380_v15 = vld [vmem:[%s20962_s5 + $0x40] sm:$0xff]  ;;  %s23151_s1 = sld [smem:[#allocation35_spill]]  ;;  %s23152_s2 = sld [smem:[#allocation38_spill]] }
 0x155   :  { %19350 = vmatprep.subr.bf16.mxu0 %v19349_v6  ;;  %v381_v16 = vld [vmem:[%s20962_s5 + $0x48] sm:$0xff]  ;;  %v382_v17 = vld [vmem:[%s20962_s5 + $0x50] sm:$0xff]  ;;  %v383_v18 = vld [vmem:[%s20962_s5 + $0x58] sm:$0xff]  ;;  %s23153_s7 = sld [smem:[#allocation37_spill]]  ;;  %s23154_s12 = sld [smem:[#allocation39_spill]] }
 0x156   :  { %v384_v19 = vld [vmem:[%s20962_s5 + $0x60] sm:$0xff]  ;;  %v385_v20 = vld [vmem:[%s20962_s5 + $0x68] sm:$0xff]  ;;  %v386_v21 = vld [vmem:[%s20962_s5 + $0x70] sm:$0xff]  ;;  %s23155_s3 = sld [smem:[#allocation40_spill]]  ;;  %s23156_s27 = sld [smem:[#allocation42_spill]] }
 0x157   :  { %v387_v22 = vld [vmem:[%s20962_s5 + $0x78] sm:$0xff]  ;;  %v21326_v25 = vld [vmem:[%s23145_s25] ss:$0 sm:$0xff]  ;;  %s23146_s5 = sld [smem:[#allocation31_spill]]  ;;  %s23157_s10 = sld [smem:[#allocation41_spill]] }
 0x158   :  { %19352 = vmatpush3.bf16.msra.mxu0 %v19349_v6  ;;  %v15230_v23 = vld [vmem:[%s23144_s9 + $0x80] sm:$0xff]  ;;  %s23158_s6 = sld [smem:[#allocation43_spill]]  ;;  %s23159_s11 = sld [smem:[#allocation45_spill]] }
 0x159   :  { %17147 = vmatprep.subr.msk.mxu0 %vm449_vm1, %v392_v7  ;;  %v647_v24 = vld [vmem:[%s23144_s9] sm:$0xff]  ;;  %s23160_s14 = sld [smem:[#allocation44_spill]]  ;;  %s23161_s15 = sld [smem:[#allocation46_spill]] }
 0x15a   :  { %17205 = vmatprep.mubr.f32.mxu1 %v647_v24  ;;  %s23162_s16 = sld [smem:[#allocation47_spill]]  ;;  %s23163_s18 = sld [smem:[#allocation49_spill]] }
 0x15b   :  { %s23164_s24 = sld [smem:[#allocation48_spill]]  ;;  %s23165_s19 = sld [smem:[#allocation51_spill]] }
 0x15c   :  { %17148 = vmatpush3.msk.msra.mxu0 %vm449_vm1, %v392_v7  ;;  %s23166_s22 = sld [smem:[#allocation50_spill]]  ;;  %s23167_s13 = sld [smem:[#allocation53_spill]] }
 0x15d   :  { %17150 = vmatmul.mubr.msk.f32.vlgmr.msra.gmra.mrb[0].mxu0 %vm400_vm0, %v373_v8  ;;  %s23168_s8 = sld [smem:[#allocation52_spill]]  ;;  %s23169_s23 = sld [smem:[#allocation54_spill]] }
 0x15e   :  { %17152 = vmatprep.mubr.msk.f32.mxu0 %vm400_vm0, %v374_v9  ;;  %s23170_s0 = sld [smem:[#allocation55_spill]]  ;;  %s23171_s30 = sld [smem:[#allocation57_spill]] }
 0x15f   :  { %s23173_s25 = sld [smem:[#allocation59_spill]] }
 0x161   :  { %17153 = vmatmul.mubr.msk.f32.gmra.mrb[2].mxu0 %vm400_vm0, %v375_v10 }
 0x162   :  { %17155 = vmatprep.mubr.msk.f32.mxu0 %vm400_vm0, %v376_v11 }
 0x165   :  { %17156 = vmatmul.mubr.msk.f32.gmra.mrb[4].mxu0 %vm400_vm0, %v377_v12 }
 0x166   :  { %17158 = vmatprep.mubr.msk.f32.mxu0 %vm400_vm0, %v378_v13 }
 0x169   :  { %17159 = vmatmul.mubr.msk.f32.gmra.mrb[6].mxu0 %vm400_vm0, %v379_v14 }
 0x16a   :  { %17161 = vmatprep.mubr.msk.f32.mxu0 %vm400_vm0, %v380_v15 }
 0x16d   :  { %17162 = vmatmul.mubr.msk.f32.gmra.mrb[8].mxu0 %vm400_vm0, %v381_v16 }
 0x16e   :  { %17164 = vmatprep.mubr.msk.f32.mxu0 %vm400_vm0, %v382_v17 }
 0x171   :  { %17165 = vmatmul.mubr.msk.f32.gmra.mrb[10].mxu0 %vm400_vm0, %v383_v18 }
 0x172   :  { %17167 = vmatprep.mubr.msk.f32.mxu0 %vm400_vm0, %v384_v19 }
 0x175   :  { %17168 = vmatmul.mubr.msk.f32.gmra.mrb[12].mxu0 %vm400_vm0, %v385_v20 }
 0x176   :  { %17170 = vmatprep.mubr.msk.f32.mxu0 %vm400_vm0, %v386_v21 }
 0x179   :  { %17171 = vmatmul.mubr.msk.f32.gmra.mrb[14].mxu0 %vm400_vm0, %v387_v22 }
 0x17a   :  { %17261 = vmatprep.mubr.f32.mxu0 %v15230_v23 }
 0x230   :  { %v17151_v26 = vpop.f32.mrb[0].mxu0 }
 0x231   :  { %v525_v27 = vadd.f32 %v17151_v26, %v21326_v25  ;;  %v519_v28 = vpop.f32.mrb[1].mxu0 }
 0x232   :  { %v520_v29 = vadd.f32 %v21326_v25, %v519_v28 }
 0x233   :  { %vm599_vm2 = vcmp.gt.f32.partialorder %v525_v27, 0.0  ;;  %v615_v30 = vmul.f32 0.2, %v525_v27 }
 0x234   :  { %vm598_vm3 = vcmp.gt.f32.partialorder %v520_v29, 0.0  ;;  %v614_v31 = vmul.f32 0.2, %v520_v29  ;;  %v17154_v32 = vpop.f32.mrb[2].mxu0 }
 0x235   :  { %v631_v33 = vsel %vm599_vm2, %v525_v27, %v615_v30  ;;  %v535_v34 = vadd.f32 %v17154_v32, %v21326_v25  ;;  %v529_v35 = vpop.f32.mrb[3].mxu0  ;;  %vm973_vm2 = vcmask 64512  }
 0x236   :  { %v630_v36 = vsel %vm598_vm3, %v520_v29, %v614_v31  ;;  %v530_v37 = vadd.f32 %v21326_v25, %v529_v35  ;;  %v648_v35 = vld [vmem:[%s23144_s9 + $0x8] sm:$0xff]  ;;  %vm20952_vm3 = vmmov 0  }
 0x237   :  { %v21332_v38 = vpack.c.bf16 %v631_v33, %v630_v36  ;;  %vm601_vm4 = vcmp.gt.f32.partialorder %v535_v34, 0.0  ;;  %v617_v39 = vmul.f32 0.2, %v535_v34  ;;  %v15232_v36 = vld [vmem:[%s23144_s9 + $0x90] sm:$0xff] }
 0x238   :  { %vm600_vm5 = vcmp.gt.f32.partialorder %v530_v37, 0.0  ;;  %v616_v40 = vmul.f32 0.2, %v530_v37  ;;  %v17157_v41 = vpop.f32.mrb[4].mxu0 }
 0x239   :  { %v633_v42 = vsel %vm601_vm4, %v535_v34, %v617_v39  ;;  %v545_v43 = vadd.f32 %v17157_v41, %v21326_v25  ;;  %v539_v44 = vpop.f32.mrb[5].mxu0  ;;  %19354 = vmatprep.subr.bf16.mxu1 %v21332_v38  ;;  %19386 = vmatprep.subr.bf16.mxu0 %v21332_v38  ;;  %v15231_v34 = vld [vmem:[%s23144_s9 + $0x88] sm:$0xff]  ;;  %v15233_v39 = vld [vmem:[%s23144_s9 + $0x98] sm:$0xff]  ;;  %v15234_v41 = vld [vmem:[%s23144_s9 + $0xa0] sm:$0xff] }
 0x23a   :  { %v632_v45 = vsel %vm600_vm5, %v530_v37, %v616_v40  ;;  %v540_v46 = vadd.f32 %v21326_v25, %v539_v44  ;;  %19356 = vmatpush3.bf16.msra.mxu1 %v21332_v38  ;;  %19388 = vmatpush3.bf16.msra.mxu0 %v21332_v38  ;;  %v649_v37 = vld [vmem:[%s23144_s9 + $0x10] sm:$0xff]  ;;  %v650_v40 = vld [vmem:[%s23144_s9 + $0x18] sm:$0xff]  ;;  %v652_v44 = vld [vmem:[%s23144_s9 + $0x28] sm:$0xff] }
 0x23b   :  { %v21340_v47 = vpack.c.bf16 %v633_v42, %v632_v45  ;;  %vm603_vm6 = vcmp.gt.f32.partialorder %v545_v43, 0.0  ;;  %v619_v48 = vmul.f32 0.2, %v545_v43  ;;  %v651_v42 = vld [vmem:[%s23144_s9 + $0x20] sm:$0xff]  ;;  %v15236_v45 = vld [vmem:[%s23144_s9 + $0xb0] sm:$0xff] }
 0x23c   :  { %vm602_vm7 = vcmp.gt.f32.partialorder %v540_v46, 0.0  ;;  %v618_v49 = vmul.f32 0.2, %v540_v46  ;;  %v17160_v50 = vpop.f32.mrb[6].mxu0 }
 0x23d   :  { %v635_v51 = vsel %vm603_vm6, %v545_v43, %v619_v48  ;;  %v555_v52 = vadd.f32 %v17160_v50, %v21326_v25  ;;  %v549_v53 = vpop.f32.mrb[7].mxu0  ;;  %19358 = vmatprep.subr.bf16.mxu1 %v21340_v47  ;;  %19390 = vmatprep.subr.bf16.mxu0 %v21340_v47  ;;  %v15235_v43 = vld [vmem:[%s23144_s9 + $0xa8] sm:$0xff]  ;;  %v15237_v48 = vld [vmem:[%s23144_s9 + $0xb8] sm:$0xff]  ;;  %v15238_v50 = vld [vmem:[%s23144_s9 + $0xc0] sm:$0xff] }
 0x23e   :  { %v634_v54 = vsel %vm602_vm7, %v540_v46, %v618_v49  ;;  %v550_v55 = vadd.f32 %v21326_v25, %v549_v53  ;;  %19360 = vmatpush3.bf16.msra.mxu1 %v21340_v47  ;;  %19392 = vmatpush3.bf16.msra.mxu0 %v21340_v47  ;;  %v653_v46 = vld [vmem:[%s23144_s9 + $0x30] sm:$0xff]  ;;  %v654_v49 = vld [vmem:[%s23144_s9 + $0x38] sm:$0xff]  ;;  %v656_v53 = vld [vmem:[%s23144_s9 + $0x48] sm:$0xff] }
 0x23f   :  { %v21348_v56 = vpack.c.bf16 %v635_v51, %v634_v54  ;;  %vm605_vm8 = vcmp.gt.f32.partialorder %v555_v52, 0.0  ;;  %v621_v57 = vmul.f32 0.2, %v555_v52  ;;  %v655_v51 = vld [vmem:[%s23144_s9 + $0x40] sm:$0xff]  ;;  %v15240_v54 = vld [vmem:[%s23144_s9 + $0xd0] sm:$0xff] }
 0x240   :  { %vm604_vm9 = vcmp.gt.f32.partialorder %v550_v55, 0.0  ;;  %v620_v58 = vmul.f32 0.2, %v550_v55  ;;  %v17163_v59 = vpop.f32.mrb[8].mxu0 }
 0x241   :  { %v637_v60 = vsel %vm605_vm8, %v555_v52, %v621_v57  ;;  %v565_v61 = vadd.f32 %v17163_v59, %v21326_v25  ;;  %v559_v62 = vpop.f32.mrb[9].mxu0  ;;  %19362 = vmatprep.subr.bf16.mxu1 %v21348_v56  ;;  %19394 = vmatprep.subr.bf16.mxu0 %v21348_v56  ;;  %v15239_v52 = vld [vmem:[%s23144_s9 + $0xc8] sm:$0xff]  ;;  %v15241_v57 = vld [vmem:[%s23144_s9 + $0xd8] sm:$0xff]  ;;  %v15242_v59 = vld [vmem:[%s23144_s9 + $0xe0] sm:$0xff] }
 0x242   :  { %v636_v63 = vsel %vm604_vm9, %v550_v55, %v620_v58  ;;  %v560_v0 = vadd.f32 %v21326_v25, %v559_v62  ;;  %19364 = vmatpush3.bf16.msra.mxu1 %v21348_v56  ;;  %19396 = vmatpush3.bf16.msra.mxu0 %v21348_v56  ;;  %v657_v55 = vld [vmem:[%s23144_s9 + $0x50] sm:$0xff]  ;;  %v658_v58 = vld [vmem:[%s23144_s9 + $0x58] sm:$0xff]  ;;  %v660_v62 = vld [vmem:[%s23144_s9 + $0x68] sm:$0xff] }
 0x243   :  { %v21356_v1 = vpack.c.bf16 %v637_v60, %v636_v63  ;;  %vm607_vm10 = vcmp.gt.f32.partialorder %v565_v61, 0.0  ;;  %v623_v2 = vmul.f32 0.2, %v565_v61  ;;  %v659_v60 = vld [vmem:[%s23144_s9 + $0x60] sm:$0xff]  ;;  %v15244_v63 = vld [vmem:[%s23144_s9 + $0xf0] sm:$0xff] }
 0x244   :  { %vm606_vm11 = vcmp.gt.f32.partialorder %v560_v0, 0.0  ;;  %v622_v3 = vmul.f32 0.2, %v560_v0  ;;  %v17166_v4 = vpop.f32.mrb[10].mxu0 }
 0x245   :  { %v639_v5 = vsel %vm607_vm10, %v565_v61, %v623_v2  ;;  %v575_v6 = vadd.f32 %v17166_v4, %v21326_v25  ;;  %v569_v7 = vpop.f32.mrb[11].mxu0  ;;  %19366 = vmatprep.subr.bf16.mxu1 %v21356_v1  ;;  %19398 = vmatprep.subr.bf16.mxu0 %v21356_v1  ;;  %v15243_v61 = vld [vmem:[%s23144_s9 + $0xe8] sm:$0xff]  ;;  %v15245_v2 = vld [vmem:[%s23144_s9 + $0xf8] sm:$0xff]  ;;  %v15279_v4 = vld [vmem:[%s23144_s9 + $0x100] sm:$0xff] }
 0x246   :  { %v638_v8 = vsel %vm606_vm11, %v560_v0, %v622_v3  ;;  %v570_v9 = vadd.f32 %v21326_v25, %v569_v7  ;;  %19368 = vmatpush3.bf16.msra.mxu1 %v21356_v1  ;;  %19400 = vmatpush3.bf16.msra.mxu0 %v21356_v1  ;;  %v661_v0 = vld [vmem:[%s23144_s9 + $0x70] sm:$0xff]  ;;  %v662_v3 = vld [vmem:[%s23144_s9 + $0x78] sm:$0xff] }
 0x247   :  { %v21364_v10 = vpack.c.bf16 %v639_v5, %v638_v8  ;;  %vm609_vm12 = vcmp.gt.f32.partialorder %v575_v6, 0.0  ;;  %v625_v11 = vmul.f32 0.2, %v575_v6  ;;  %v15280_v5 = vld [vmem:[%s23144_s9 + $0x108] sm:$0xff]  ;;  %v15282_v7 = vld [vmem:[%s23144_s9 + $0x118] sm:$0xff]  ;;  %v15283_v8 = vld [vmem:[%s23144_s9 + $0x120] sm:$0xff] }
 0x248   :  { %vm608_vm13 = vcmp.gt.f32.partialorder %v570_v9, 0.0  ;;  %v624_v12 = vmul.f32 0.2, %v570_v9  ;;  %v17169_v13 = vpop.f32.mrb[12].mxu0 }
 0x249   :  { %v641_v14 = vsel %vm609_vm12, %v575_v6, %v625_v11  ;;  %v585_v15 = vadd.f32 %v17169_v13, %v21326_v25  ;;  %v579_v16 = vpop.f32.mrb[13].mxu0  ;;  %19370 = vmatprep.subr.bf16.mxu1 %v21364_v10  ;;  %19402 = vmatprep.subr.bf16.mxu0 %v21364_v10  ;;  %v15281_v6 = vld [vmem:[%s23144_s9 + $0x110] sm:$0xff]  ;;  %v15287_v13 = vld [vmem:[%s23144_s9 + $0x140] sm:$0xff] }
 0x24a   :  { %v640_v17 = vsel %vm608_vm13, %v570_v9, %v624_v12  ;;  %v580_v18 = vadd.f32 %v21326_v25, %v579_v16  ;;  %19372 = vmatpush3.bf16.msra.mxu1 %v21364_v10  ;;  %19404 = vmatpush3.bf16.msra.mxu0 %v21364_v10  ;;  %v15284_v9 = vld [vmem:[%s23144_s9 + $0x128] sm:$0xff]  ;;  %v15285_v11 = vld [vmem:[%s23144_s9 + $0x130] sm:$0xff]  ;;  %v15286_v12 = vld [vmem:[%s23144_s9 + $0x138] sm:$0xff] }
 0x24b   :  { %v21372_v19 = vpack.c.bf16 %v641_v14, %v640_v17  ;;  %vm611_vm14 = vcmp.gt.f32.partialorder %v585_v15, 0.0  ;;  %v627_v20 = vmul.f32 0.2, %v585_v15  ;;  %v15288_v14 = vld [vmem:[%s23144_s9 + $0x148] sm:$0xff]  ;;  %v15290_v16 = vld [vmem:[%s23144_s9 + $0x158] sm:$0xff]  ;;  %v15291_v17 = vld [vmem:[%s23144_s9 + $0x160] sm:$0xff] }
 0x24c   :  { %vm610_vm15 = vcmp.gt.f32.partialorder %v580_v18, 0.0  ;;  %v626_v21 = vmul.f32 0.2, %v580_v18  ;;  %v17172_v22 = vpop.f32.mrb[14].mxu0 }
 0x24d   :  { %v643_v23 = vsel %vm611_vm14, %v585_v15, %v627_v20  ;;  %v595_v24 = vadd.f32 %v17172_v22, %v21326_v25  ;;  %v589_v26 = vpop.f32.mrb[15].mxu0  ;;  %19374 = vmatprep.subr.bf16.mxu1 %v21372_v19  ;;  %19406 = vmatprep.subr.bf16.mxu0 %v21372_v19  ;;  %v15289_v15 = vld [vmem:[%s23144_s9 + $0x150] sm:$0xff]  ;;  %v15294_v22 = vld [vmem:[%s23144_s9 + $0x178] sm:$0xff] }
 0x24e   :  { %v642_v27 = vsel %vm610_vm15, %v580_v18, %v626_v21  ;;  %v590_v28 = vadd.f32 %v21326_v25, %v589_v26  ;;  %19376 = vmatpush3.bf16.msra.mxu1 %v21372_v19  ;;  %19408 = vmatpush3.bf16.msra.mxu0 %v21372_v19  ;;  %v15292_v18 = vld [vmem:[%s23144_s9 + $0x168] sm:$0xff]  ;;  %v15293_v20 = vld [vmem:[%s23144_s9 + $0x170] sm:$0xff] }
 0x24f   :  { %v21380_v29 = vpack.c.bf16 %v643_v23, %v642_v27  ;;  %vm613_vm0 = vcmp.gt.f32.partialorder %v595_v24, 0.0  ;;  %v629_v30 = vmul.f32 0.2, %v595_v24  ;;  %v15246_v21 = vld [vmem:[%s23146_s5 + $0x8] sm:$0xff]  ;;  %v15312_v23 = vld [vmem:[%s23144_s9 + $0x180] sm:$0xff]  ;;  %v15314_v26 = vld [vmem:[%s23144_s9 + $0x190] sm:$0xff] }
 0x250   :  { %vm612_vm1 = vcmp.gt.f32.partialorder %v590_v28, 0.0  ;;  %v628_v31 = vmul.f32 0.2, %v590_v28  ;;  %v15315_v27 = vld [vmem:[%s23144_s9 + $0x198] sm:$0xff] }
 0x251   :  { %v645_v32 = vsel %vm613_vm0, %v595_v24, %v629_v30  ;;  %19378 = vmatprep.subr.bf16.mxu1 %v21380_v29  ;;  %19410 = vmatprep.subr.bf16.mxu0 %v21380_v29  ;;  %v15313_v24 = vld [vmem:[%s23144_s9 + $0x188] sm:$0xff] }
 0x252   :  { %v644_v25 = vsel %vm612_vm1, %v590_v28, %v628_v31  ;;  %19380 = vmatpush3.bf16.msra.mxu1 %v21380_v29  ;;  %19412 = vmatpush3.bf16.msra.mxu0 %v21380_v29  ;;  %v15316_v28 = vld [vmem:[%s23144_s9 + $0x1a0] sm:$0xff]  ;;  %v15317_v30 = vld [vmem:[%s23144_s9 + $0x1a8] sm:$0xff]  ;;  %v15318_v31 = vld [vmem:[%s23144_s9 + $0x1b0] sm:$0xff] }
 0x253   :  { %v21386_v33 = vpack.c.bf16 %v645_v32, %v644_v25  ;;  %v15319_v32 = vld [vmem:[%s23144_s9 + $0x1b8] sm:$0xff]  ;;  %v15320_v25 = vld [vmem:[%s23144_s9 + $0x1c0] sm:$0xff] }
 0x255   :  { %19382 = vmatprep.subr.bf16.mxu1 %v21386_v33  ;;  %19414 = vmatprep.subr.bf16.mxu0 %v21386_v33 }
 0x256   :  { %19384 = vmatpush3.bf16.msra.mxu1 %v21386_v33  ;;  %19416 = vmatpush3.bf16.msra.mxu0 %v21386_v33 }
 0x257   :  { %19418 = vmatprep.subr.bf16.mxu0 %v21332_v38  ;;  %17285 = vmatprep.subr.mxu1 %v15246_v21 }
 0x259   :  { %17262 = vmatmul.mubr.f32.vlgmr.msra.gmra.mrb[16].mxu0 %v15231_v34  ;;  %17206 = vmatmul.mubr.f32.vlgmr.msra.gmra.mrb[0].mxu1 %v648_v35  ;;  %v15321_v34 = vld [vmem:[%s23144_s9 + $0x1c8] sm:$0xff]  ;;  %v15322_v35 = vld [vmem:[%s23144_s9 + $0x1d0] sm:$0xff] }
 0x25a   :  { %19420 = vmatpush3.bf16.msra.mxu0 %v21332_v38  ;;  %17264 = vmatprep.mubr.f32.mxu0 %v15232_v36  ;;  %v15323_v36 = vld [vmem:[%s23144_s9 + $0x1d8] sm:$0xff] }
 0x25b   :  { %19422 = vmatprep.subr.bf16.mxu0 %v21340_v47  ;;  %17208 = vmatprep.mubr.f32.mxu1 %v649_v37  ;;  %v15324_v37 = vld [vmem:[%s23144_s9 + $0x1e0] sm:$0xff] }
 0x25c   :  { %17286 = vmatpush3.msra.mxu1 %v15246_v21  ;;  %v15416_v21 = vld [vmem:[%s23144_s9 + $0x328] sm:$0xff] }
 0x25d   :  { %17265 = vmatmul.mubr.f32.gmra.mrb[18].mxu0 %v15233_v39  ;;  %17209 = vmatmul.mubr.f32.gmra.mrb[2].mxu1 %v650_v40  ;;  %v15325_v39 = vld [vmem:[%s23144_s9 + $0x1e8] sm:$0xff]  ;;  %v15326_v40 = vld [vmem:[%s23144_s9 + $0x1f0] sm:$0xff] }
 0x25e   :  { %19424 = vmatpush3.bf16.msra.mxu0 %v21340_v47  ;;  %17267 = vmatprep.mubr.f32.mxu0 %v15234_v41  ;;  %v21500_v41 = vld [vmem:[%s23146_s5] sm:$0xff] }
 0x25f   :  { %19426 = vmatprep.subr.bf16.mxu0 %v21348_v56  ;;  %17211 = vmatprep.mubr.f32.mxu1 %v651_v42  ;;  %v15327_v42 = vld [vmem:[%s23144_s9 + $0x1f8] sm:$0xff] }
 0x260   :  { %17311 = vmatprep.subr.mxu1 %v21500_v41 }
 0x261   :  { %17268 = vmatmul.mubr.f32.gmra.mrb[20].mxu0 %v15235_v43  ;;  %17212 = vmatmul.mubr.f32.gmra.mrb[4].mxu1 %v652_v44  ;;  %v15345_v43 = vld [vmem:[%s23144_s9 + $0x200] sm:$0xff]  ;;  %v15346_v44 = vld [vmem:[%s23144_s9 + $0x208] sm:$0xff] }
 0x262   :  { %19428 = vmatpush3.bf16.msra.mxu0 %v21348_v56  ;;  %17270 = vmatprep.mubr.f32.mxu0 %v15236_v45  ;;  %v15347_v45 = vld [vmem:[%s23144_s9 + $0x210] sm:$0xff] }
 0x263   :  { %19430 = vmatprep.subr.bf16.mxu0 %v21356_v1  ;;  %17214 = vmatprep.mubr.f32.mxu1 %v653_v46  ;;  %v15348_v46 = vld [vmem:[%s23144_s9 + $0x218] sm:$0xff] }
 0x265   :  { %17271 = vmatmul.mubr.f32.gmra.mrb[22].mxu0 %v15237_v48  ;;  %17215 = vmatmul.mubr.f32.gmra.mrb[6].mxu1 %v654_v49  ;;  %v15349_v48 = vld [vmem:[%s23144_s9 + $0x220] sm:$0xff]  ;;  %v15350_v49 = vld [vmem:[%s23144_s9 + $0x228] sm:$0xff] }
 0x266   :  { %19432 = vmatpush3.bf16.msra.mxu0 %v21356_v1  ;;  %17273 = vmatprep.mubr.f32.mxu0 %v15238_v50  ;;  %v15351_v50 = vld [vmem:[%s23144_s9 + $0x230] sm:$0xff] }
 0x267   :  { %19434 = vmatprep.subr.bf16.mxu0 %v21364_v10  ;;  %17217 = vmatprep.mubr.f32.mxu1 %v655_v51  ;;  %v15352_v51 = vld [vmem:[%s23144_s9 + $0x238] sm:$0xff] }
 0x269   :  { %17274 = vmatmul.mubr.f32.gmra.mrb[24].mxu0 %v15239_v52  ;;  %17218 = vmatmul.mubr.f32.gmra.mrb[8].mxu1 %v656_v53  ;;  %v15353_v52 = vld [vmem:[%s23144_s9 + $0x240] sm:$0xff]  ;;  %v15354_v53 = vld [vmem:[%s23144_s9 + $0x248] sm:$0xff] }
 0x26a   :  { %19436 = vmatpush3.bf16.msra.mxu0 %v21364_v10  ;;  %17276 = vmatprep.mubr.f32.mxu0 %v15240_v54  ;;  %v15355_v54 = vld [vmem:[%s23144_s9 + $0x250] sm:$0xff] }
 0x26b   :  { %19438 = vmatprep.subr.bf16.mxu0 %v21372_v19  ;;  %17220 = vmatprep.mubr.f32.mxu1 %v657_v55  ;;  %v15356_v55 = vld [vmem:[%s23144_s9 + $0x258] sm:$0xff] }
 0x26d   :  { %17277 = vmatmul.mubr.f32.gmra.mrb[26].mxu0 %v15241_v57  ;;  %17221 = vmatmul.mubr.f32.gmra.mrb[10].mxu1 %v658_v58  ;;  %v15357_v57 = vld [vmem:[%s23144_s9 + $0x260] sm:$0xff]  ;;  %v15358_v58 = vld [vmem:[%s23144_s9 + $0x268] sm:$0xff] }
 0x26e   :  { %19440 = vmatpush3.bf16.msra.mxu0 %v21372_v19  ;;  %17279 = vmatprep.mubr.f32.mxu0 %v15242_v59  ;;  %v15359_v59 = vld [vmem:[%s23144_s9 + $0x270] sm:$0xff] }
 0x26f   :  { %19442 = vmatprep.subr.bf16.mxu0 %v21380_v29  ;;  %17223 = vmatprep.mubr.f32.mxu1 %v659_v60  ;;  %v15360_v60 = vld [vmem:[%s23144_s9 + $0x278] sm:$0xff] }
 0x271   :  { %17280 = vmatmul.mubr.f32.gmra.mrb[28].mxu0 %v15243_v61  ;;  %17224 = vmatmul.mubr.f32.gmra.mrb[12].mxu1 %v660_v62  ;;  %v15378_v61 = vld [vmem:[%s23144_s9 + $0x280] sm:$0xff]  ;;  %v15379_v62 = vld [vmem:[%s23144_s9 + $0x288] sm:$0xff] }
 0x272   :  { %19444 = vmatpush3.bf16.msra.mxu0 %v21380_v29  ;;  %17282 = vmatprep.mubr.f32.mxu0 %v15244_v63  ;;  %v15380_v63 = vld [vmem:[%s23144_s9 + $0x290] sm:$0xff] }
 0x273   :  { %19446 = vmatprep.subr.bf16.mxu0 %v21386_v33  ;;  %17226 = vmatprep.mubr.f32.mxu1 %v661_v0  ;;  %v15381_v0 = vld [vmem:[%s23144_s9 + $0x298] sm:$0xff] }
 0x275   :  { %17283 = vmatmul.mubr.f32.gmra.mrb[30].mxu0 %v15245_v2  ;;  %17227 = vmatmul.mubr.f32.gmra.mrb[14].mxu1 %v662_v3  ;;  %v15382_v2 = vld [vmem:[%s23144_s9 + $0x2a0] sm:$0xff]  ;;  %v15383_v3 = vld [vmem:[%s23144_s9 + $0x2a8] sm:$0xff] }
 0x276   :  { %19448 = vmatpush3.bf16.msra.mxu0 %v21386_v33  ;;  %17369 = vmatprep.mubr.f32.mxu0 %v15279_v4  ;;  %v15384_v4 = vld [vmem:[%s23144_s9 + $0x2b0] sm:$0xff] }
 0x277   :  { %19450 = vmatprep.subr.bf16.mxu0 %v21332_v38 }
 0x279   :  { %17370 = vmatmul.mubr.f32.vlgmr.msra.gmra.mrb[32].mxu0 %v15280_v5  ;;  %v15385_v5 = vld [vmem:[%s23144_s9 + $0x2b8] sm:$0xff] }
 0x27a   :  { %19452 = vmatpush3.bf16.msra.mxu0 %v21332_v38  ;;  %17372 = vmatprep.mubr.f32.mxu0 %v15281_v6  ;;  %v15386_v6 = vld [vmem:[%s23144_s9 + $0x2c0] sm:$0xff] }
 0x27b   :  { %19454 = vmatprep.subr.bf16.mxu0 %v21340_v47 }
 0x27d   :  { %17373 = vmatmul.mubr.f32.gmra.mrb[34].mxu0 %v15282_v7  ;;  %v15387_v7 = vld [vmem:[%s23144_s9 + $0x2c8] sm:$0xff] }
 0x27e   :  { %19456 = vmatpush3.bf16.msra.mxu0 %v21340_v47  ;;  %17375 = vmatprep.mubr.f32.mxu0 %v15283_v8  ;;  %v15388_v8 = vld [vmem:[%s23144_s9 + $0x2d0] sm:$0xff] }
 0x27f   :  { %19458 = vmatprep.subr.bf16.mxu0 %v21348_v56 }
 0x281   :  { %17376 = vmatmul.mubr.f32.gmra.mrb[36].mxu0 %v15284_v9  ;;  %v15389_v9 = vld [vmem:[%s23144_s9 + $0x2d8] sm:$0xff] }
 0x282   :  { %19460 = vmatpush3.bf16.msra.mxu0 %v21348_v56  ;;  %17378 = vmatprep.mubr.f32.mxu0 %v15285_v11  ;;  %v15390_v11 = vld [vmem:[%s23144_s9 + $0x2e0] sm:$0xff] }
 0x283   :  { %19462 = vmatprep.subr.bf16.mxu0 %v21356_v1 }
 0x285   :  { %17379 = vmatmul.mubr.f32.gmra.mrb[38].mxu0 %v15286_v12  ;;  %v15391_v12 = vld [vmem:[%s23144_s9 + $0x2e8] sm:$0xff] }
 0x286   :  { %19464 = vmatpush3.bf16.msra.mxu0 %v21356_v1  ;;  %17381 = vmatprep.mubr.f32.mxu0 %v15287_v13  ;;  %v15392_v13 = vld [vmem:[%s23144_s9 + $0x2f0] sm:$0xff] }
 0x287   :  { %19466 = vmatprep.subr.bf16.mxu0 %v21364_v10 }
 0x289   :  { %17382 = vmatmul.mubr.f32.gmra.mrb[40].mxu0 %v15288_v14  ;;  %v15393_v14 = vld [vmem:[%s23144_s9 + $0x2f8] sm:$0xff] }
 0x28a   :  { %19468 = vmatpush3.bf16.msra.mxu0 %v21364_v10  ;;  %17384 = vmatprep.mubr.f32.mxu0 %v15289_v15  ;;  %v15411_v15 = vld [vmem:[%s23144_s9 + $0x300] sm:$0xff] }
 0x28b   :  { %19470 = vmatprep.subr.bf16.mxu0 %v21372_v19 }
 0x28d   :  { %17385 = vmatmul.mubr.f32.gmra.mrb[42].mxu0 %v15290_v16  ;;  %v15412_v16 = vld [vmem:[%s23144_s9 + $0x308] sm:$0xff] }
 0x28e   :  { %19472 = vmatpush3.bf16.msra.mxu0 %v21372_v19  ;;  %17387 = vmatprep.mubr.f32.mxu0 %v15291_v17  ;;  %v15413_v17 = vld [vmem:[%s23144_s9 + $0x310] sm:$0xff] }
 0x28f   :  { %19474 = vmatprep.subr.bf16.mxu0 %v21380_v29 }
 0x291   :  { %17388 = vmatmul.mubr.f32.gmra.mrb[44].mxu0 %v15292_v18  ;;  %v15414_v18 = vld [vmem:[%s23144_s9 + $0x318] sm:$0xff] }
 0x292   :  { %19476 = vmatpush3.bf16.msra.mxu0 %v21380_v29  ;;  %17390 = vmatprep.mubr.f32.mxu0 %v15293_v20  ;;  %v15415_v20 = vld [vmem:[%s23144_s9 + $0x320] sm:$0xff] }
 0x293   :  { %19478 = vmatprep.subr.bf16.mxu0 %v21386_v33 }
 0x295   :  { %17391 = vmatmul.mubr.f32.gmra.mrb[46].mxu0 %v15294_v22  ;;  %v15417_v22 = vld [vmem:[%s23144_s9 + $0x330] sm:$0xff] }
 0x296   :  { %19480 = vmatpush3.bf16.msra.mxu0 %v21386_v33  ;;  %17451 = vmatprep.mubr.f32.mxu0 %v15312_v23  ;;  %v15418_v23 = vld [vmem:[%s23144_s9 + $0x338] sm:$0xff] }
 0x297   :  { %19482 = vmatprep.subr.bf16.mxu0 %v21332_v38 }
 0x299   :  { %17452 = vmatmul.mubr.f32.vlgmr.msra.gmra.mrb[48].mxu0 %v15313_v24  ;;  %v15419_v24 = vld [vmem:[%s23144_s9 + $0x340] sm:$0xff] }
 0x29a   :  { %19484 = vmatpush3.bf16.msra.mxu0 %v21332_v38  ;;  %17454 = vmatprep.mubr.f32.mxu0 %v15314_v26  ;;  %v15420_v26 = vld [vmem:[%s23144_s9 + $0x348] sm:$0xff] }
 0x29b   :  { %19486 = vmatprep.subr.bf16.mxu0 %v21340_v47 }
 0x29d   :  { %17455 = vmatmul.mubr.f32.gmra.mrb[50].mxu0 %v15315_v27  ;;  %v15421_v27 = vld [vmem:[%s23144_s9 + $0x350] sm:$0xff] }
 0x29e   :  { %19488 = vmatpush3.bf16.msra.mxu0 %v21340_v47  ;;  %17457 = vmatprep.mubr.f32.mxu0 %v15316_v28  ;;  %v15422_v28 = vld [vmem:[%s23144_s9 + $0x358] sm:$0xff] }
 0x29f   :  { %19490 = vmatprep.subr.bf16.mxu0 %v21348_v56 }
 0x2a1   :  { %17458 = vmatmul.mubr.f32.gmra.mrb[52].mxu0 %v15317_v30  ;;  %v15423_v30 = vld [vmem:[%s23144_s9 + $0x360] sm:$0xff] }
 0x2a2   :  { %19492 = vmatpush3.bf16.msra.mxu0 %v21348_v56  ;;  %17460 = vmatprep.mubr.f32.mxu0 %v15318_v31  ;;  %v15424_v31 = vld [vmem:[%s23144_s9 + $0x368] sm:$0xff] }
 0x2a3   :  { %19494 = vmatprep.subr.bf16.mxu0 %v21356_v1 }
 0x2a5   :  { %17461 = vmatmul.mubr.f32.gmra.mrb[54].mxu0 %v15319_v32  ;;  %v15425_v32 = vld [vmem:[%s23144_s9 + $0x370] sm:$0xff] }
 0x2a6   :  { %19496 = vmatpush3.bf16.msra.mxu0 %v21356_v1  ;;  %17463 = vmatprep.mubr.f32.mxu0 %v15320_v25  ;;  %v15426_v25 = vld [vmem:[%s23144_s9 + $0x378] sm:$0xff] }
 0x2a7   :  { %19498 = vmatprep.subr.bf16.mxu0 %v21364_v10 }
 0x2a9   :  { %17464 = vmatmul.mubr.f32.gmra.mrb[56].mxu0 %v15321_v34  ;;  %v15444_v34 = vld [vmem:[%s23144_s9 + $0x380] sm:$0xff] }
 0x2aa   :  { %19500 = vmatpush3.bf16.msra.mxu0 %v21364_v10  ;;  %17466 = vmatprep.mubr.f32.mxu0 %v15322_v35  ;;  %v15445_v35 = vld [vmem:[%s23144_s9 + $0x388] sm:$0xff] }
 0x2ab   :  { %19502 = vmatprep.subr.bf16.mxu0 %v21372_v19 }
 0x2ad   :  { %17467 = vmatmul.mubr.f32.gmra.mrb[58].mxu0 %v15323_v36  ;;  %v15446_v36 = vld [vmem:[%s23144_s9 + $0x390] sm:$0xff] }
 0x2ae   :  { %19504 = vmatpush3.bf16.msra.mxu0 %v21372_v19  ;;  %17469 = vmatprep.mubr.f32.mxu0 %v15324_v37  ;;  %v15447_v37 = vld [vmem:[%s23144_s9 + $0x398] sm:$0xff] }
 0x2af   :  { %19506 = vmatprep.subr.bf16.mxu0 %v21380_v29 }
 0x2b1   :  { %17470 = vmatmul.mubr.f32.gmra.mrb[60].mxu0 %v15325_v39  ;;  %v15448_v39 = vld [vmem:[%s23144_s9 + $0x3a0] sm:$0xff] }
 0x2b2   :  { %19508 = vmatpush3.bf16.msra.mxu0 %v21380_v29  ;;  %17472 = vmatprep.mubr.f32.mxu0 %v15326_v40  ;;  %v15449_v40 = vld [vmem:[%s23144_s9 + $0x3a8] sm:$0xff] }
 0x2b3   :  { %19510 = vmatprep.subr.bf16.mxu0 %v21386_v33 }
 0x2b5   :  { %17473 = vmatmul.mubr.f32.gmra.mrb[62].mxu0 %v15327_v42  ;;  %v15450_v42 = vld [vmem:[%s23144_s9 + $0x3b0] sm:$0xff] }
 0x2b6   :  { %19512 = vmatpush3.bf16.msra.mxu0 %v21386_v33  ;;  %17533 = vmatprep.mubr.f32.mxu0 %v15345_v43  ;;  %v15452_v43 = vld [vmem:[%s23144_s9 + $0x3c0] sm:$0xff] }
 0x2b7   :  { %19514 = vmatprep.subr.bf16.mxu0 %v21332_v38 }
 0x2b9   :  { %17534 = vmatmul.mubr.f32.vlgmr.msra.gmra.mrb[64].mxu0 %v15346_v44  ;;  %v15454_v44 = vld [vmem:[%s23144_s9 + $0x3d0] sm:$0xff] }
 0x2ba   :  { %19516 = vmatpush3.bf16.msra.mxu0 %v21332_v38  ;;  %17536 = vmatprep.mubr.f32.mxu0 %v15347_v45 }
 0x2bb   :  { %19518 = vmatprep.subr.bf16.mxu0 %v21340_v47 }
 0x2bd   :  { %17537 = vmatmul.mubr.f32.gmra.mrb[66].mxu0 %v15348_v46 }
 0x2be   :  { %19520 = vmatpush3.bf16.msra.mxu0 %v21340_v47  ;;  %17539 = vmatprep.mubr.f32.mxu0 %v15349_v48 }
 0x2bf   :  { %19522 = vmatprep.subr.bf16.mxu0 %v21348_v56 }
 0x2c1   :  { %17540 = vmatmul.mubr.f32.gmra.mrb[68].mxu0 %v15350_v49  ;;  %v15456_v49 = vld [vmem:[%s23144_s9 + $0x3e0] sm:$0xff] }
 0x2c2   :  { %19524 = vmatpush3.bf16.msra.mxu0 %v21348_v56  ;;  %17542 = vmatprep.mubr.f32.mxu0 %v15351_v50  ;;  %v21635_v50 = vld [vmem:[%s23146_s5 + $0x10] sm:$0xff] }
 0x2c3   :  { %19526 = vmatprep.subr.bf16.mxu0 %v21356_v1 }
 0x2c5   :  { %17543 = vmatmul.mubr.f32.gmra.mrb[70].mxu0 %v15352_v51 }
 0x2c6   :  { %19528 = vmatpush3.bf16.msra.mxu0 %v21356_v1  ;;  %17545 = vmatprep.mubr.f32.mxu0 %v15353_v52 }
 0x2c7   :  { %19530 = vmatprep.subr.bf16.mxu0 %v21364_v10 }
 0x2c9   :  { %17546 = vmatmul.mubr.f32.gmra.mrb[72].mxu0 %v15354_v53 }
 0x2ca   :  { %19532 = vmatpush3.bf16.msra.mxu0 %v21364_v10  ;;  %17548 = vmatprep.mubr.f32.mxu0 %v15355_v54 }
 0x2cb   :  { %19534 = vmatprep.subr.bf16.mxu0 %v21372_v19 }
 0x2cd   :  { %17549 = vmatmul.mubr.f32.gmra.mrb[74].mxu0 %v15356_v55  ;;  %v15459_v55 = vld [vmem:[%s23144_s9 + $0x3f8] sm:$0xff] }
 0x2ce   :  { %19536 = vmatpush3.bf16.msra.mxu0 %v21372_v19  ;;  %17551 = vmatprep.mubr.f32.mxu0 %v15357_v57 }
 0x2cf   :  { %19538 = vmatprep.subr.bf16.mxu0 %v21380_v29 }
 0x2d1   :  { %17552 = vmatmul.mubr.f32.gmra.mrb[76].mxu0 %v15358_v58  ;;  %v15477_v58 = vld [vmem:[%s23144_s9 + $0x400] sm:$0xff] }
 0x2d2   :  { %19540 = vmatpush3.bf16.msra.mxu0 %v21380_v29  ;;  %17554 = vmatprep.mubr.f32.mxu0 %v15359_v59 }
 0x2d3   :  { %19542 = vmatprep.subr.bf16.mxu0 %v21386_v33 }
 0x2d5   :  { %17555 = vmatmul.mubr.f32.gmra.mrb[78].mxu0 %v15360_v60 }
 0x2d6   :  { %19544 = vmatpush3.bf16.msra.mxu0 %v21386_v33  ;;  %17615 = vmatprep.mubr.f32.mxu0 %v15378_v61  ;;  %v15479_v61 = vld [vmem:[%s23144_s9 + $0x410] sm:$0xff] }
 0x2d7   :  { %19546 = vmatprep.subr.bf16.mxu0 %v21332_v38 }
 0x2d9   :  { %17616 = vmatmul.mubr.f32.vlgmr.msra.gmra.mrb[80].mxu0 %v15379_v62 }
 0x2da   :  { %19548 = vmatpush3.bf16.msra.mxu0 %v21332_v38  ;;  %17618 = vmatprep.mubr.f32.mxu0 %v15380_v63 }
 0x2db   :  { %19550 = vmatprep.subr.bf16.mxu0 %v21340_v47 }
 0x2dd   :  { %17619 = vmatmul.mubr.f32.gmra.mrb[82].mxu0 %v15381_v0 }
 0x2de   :  { %19552 = vmatpush3.bf16.msra.mxu0 %v21340_v47  ;;  %17621 = vmatprep.mubr.f32.mxu0 %v15382_v2 }
 0x2df   :  { %19554 = vmatprep.subr.bf16.mxu0 %v21348_v56 }
 0x2e1   :  { %17622 = vmatmul.mubr.f32.gmra.mrb[84].mxu0 %v15383_v3  ;;  %v15480_v3 = vld [vmem:[%s23144_s9 + $0x418] sm:$0xff] }
 0x2e2   :  { %19556 = vmatpush3.bf16.msra.mxu0 %v21348_v56  ;;  %17624 = vmatprep.mubr.f32.mxu0 %v15384_v4 }
 0x2e3   :  { %19558 = vmatprep.subr.bf16.mxu0 %v21356_v1 }
 0x2e5   :  { %17625 = vmatmul.mubr.f32.gmra.mrb[86].mxu0 %v15385_v5 }
 0x2e6   :  { %19560 = vmatpush3.bf16.msra.mxu0 %v21356_v1  ;;  %17627 = vmatprep.mubr.f32.mxu0 %v15386_v6 }
 0x2e7   :  { %19562 = vmatprep.subr.bf16.mxu0 %v21364_v10 }
 0x2e9   :  { %17628 = vmatmul.mubr.f32.gmra.mrb[88].mxu0 %v15387_v7 }
 0x2ea   :  { %19564 = vmatpush3.bf16.msra.mxu0 %v21364_v10  ;;  %17630 = vmatprep.mubr.f32.mxu0 %v15388_v8  ;;  %v15482_v8 = vld [vmem:[%s23144_s9 + $0x428] sm:$0xff] }
 0x2eb   :  { %19566 = vmatprep.subr.bf16.mxu0 %v21372_v19 }
 0x2ed   :  { %17631 = vmatmul.mubr.f32.gmra.mrb[90].mxu0 %v15389_v9  ;;  %v15483_v9 = vld [vmem:[%s23144_s9 + $0x430] sm:$0xff] }
 0x2ee   :  { %19568 = vmatpush3.bf16.msra.mxu0 %v21372_v19  ;;  %17633 = vmatprep.mubr.f32.mxu0 %v15390_v11 }
 0x2ef   :  { %19570 = vmatprep.subr.bf16.mxu0 %v21380_v29 }
 0x2f1   :  { %17634 = vmatmul.mubr.f32.gmra.mrb[92].mxu0 %v15391_v12 }
 0x2f2   :  { %19572 = vmatpush3.bf16.msra.mxu0 %v21380_v29  ;;  %17636 = vmatprep.mubr.f32.mxu0 %v15392_v13 }
 0x2f3   :  { %19574 = vmatprep.subr.bf16.mxu0 %v21386_v33 }
 0x2f5   :  { %17637 = vmatmul.mubr.f32.gmra.mrb[94].mxu0 %v15393_v14 }
 0x2f6   :  { %19576 = vmatpush3.bf16.msra.mxu0 %v21386_v33  ;;  %17697 = vmatprep.mubr.f32.mxu0 %v15411_v15  ;;  %v15484_v15 = vld [vmem:[%s23144_s9 + $0x438] sm:$0xff] }
 0x2f7   :  { %19578 = vmatprep.subr.bf16.mxu0 %v21332_v38 }
 0x2f9   :  { %17698 = vmatmul.mubr.f32.vlgmr.msra.gmra.mrb[96].mxu0 %v15412_v16  ;;  %v15485_v16 = vld [vmem:[%s23144_s9 + $0x440] sm:$0xff] }
 0x2fa   :  { %19580 = vmatpush3.bf16.msra.mxu0 %v21332_v38  ;;  %17700 = vmatprep.mubr.f32.mxu0 %v15413_v17 }
 0x2fb   :  { %19582 = vmatprep.subr.bf16.mxu0 %v21340_v47 }
 0x2fd   :  { %17701 = vmatmul.mubr.f32.gmra.mrb[98].mxu0 %v15414_v18 }
 0x2fe   :  { %19584 = vmatpush3.bf16.msra.mxu0 %v21340_v47  ;;  %17703 = vmatprep.mubr.f32.mxu0 %v15415_v20 }
 0x2ff   :  { %19586 = vmatprep.subr.bf16.mxu0 %v21348_v56 }
 0x301   :  { %17704 = vmatmul.mubr.f32.gmra.mrb[100].mxu0 %v15416_v21 }
 0x302   :  { %19588 = vmatpush3.bf16.msra.mxu0 %v21348_v56  ;;  %17706 = vmatprep.mubr.f32.mxu0 %v15417_v22  ;;  %v15486_v22 = vld [vmem:[%s23144_s9 + $0x448] sm:$0xff] }
 0x303   :  { %19590 = vmatprep.subr.bf16.mxu0 %v21356_v1 }
 0x305   :  { %17707 = vmatmul.mubr.f32.gmra.mrb[102].mxu0 %v15418_v23  ;;  %v15487_v23 = vld [vmem:[%s23144_s9 + $0x450] sm:$0xff] }
 0x306   :  { %19592 = vmatpush3.bf16.msra.mxu0 %v21356_v1  ;;  %17709 = vmatprep.mubr.f32.mxu0 %v15419_v24 }
 0x307   :  { %19594 = vmatprep.subr.bf16.mxu0 %v21364_v10 }
 0x309   :  { %17710 = vmatmul.mubr.f32.gmra.mrb[104].mxu0 %v15420_v26 }
 0x30a   :  { %19596 = vmatpush3.bf16.msra.mxu0 %v21364_v10  ;;  %17712 = vmatprep.mubr.f32.mxu0 %v15421_v27 }
 0x30b   :  { %19598 = vmatprep.subr.bf16.mxu0 %v21372_v19 }
 0x30d   :  { %17713 = vmatmul.mubr.f32.gmra.mrb[106].mxu0 %v15422_v28 }
 0x30e   :  { %19600 = vmatpush3.bf16.msra.mxu0 %v21372_v19  ;;  %17715 = vmatprep.mubr.f32.mxu0 %v15423_v30  ;;  %v15488_v30 = vld [vmem:[%s23144_s9 + $0x458] sm:$0xff] }
 0x30f   :  { %19602 = vmatprep.subr.bf16.mxu0 %v21380_v29 }
 0x311   :  { %17716 = vmatmul.mubr.f32.gmra.mrb[108].mxu0 %v15424_v31  ;;  %v15489_v31 = vld [vmem:[%s23144_s9 + $0x460] sm:$0xff] }
 0x312   :  { %19604 = vmatpush3.bf16.msra.mxu0 %v21380_v29  ;;  %17718 = vmatprep.mubr.f32.mxu0 %v15425_v32 }
 0x313   :  { %19606 = vmatprep.subr.bf16.mxu0 %v21386_v33 }
 0x315   :  { %17719 = vmatmul.mubr.f32.gmra.mrb[110].mxu0 %v15426_v25 }
 0x316   :  { %19608 = vmatpush3.bf16.msra.mxu0 %v21386_v33  ;;  %17779 = vmatprep.mubr.f32.mxu0 %v15444_v34  ;;  %v15490_v34 = vld [vmem:[%s23144_s9 + $0x468] sm:$0xff] }
 0x317   :  { %19610 = vmatprep.subr.bf16.mxu0 %v21332_v38 }
 0x319   :  { %17780 = vmatmul.mubr.f32.vlgmr.msra.gmra.mrb[112].mxu0 %v15445_v35  ;;  %v15328_v35 = vld [vmem:[%s23146_s5 + $0x18] sm:$0xff] }
 0x31a   :  { %19612 = vmatpush3.bf16.msra.mxu0 %v21332_v38  ;;  %17782 = vmatprep.mubr.f32.mxu0 %v15446_v36  ;;  %v15451_v38 = vld [vmem:[%s23144_s9 + $0x3b8] sm:$0xff]  ;;  %v15491_v36 = vld [vmem:[%s23144_s9 + $0x470] sm:$0xff] }
 0x31b   :  { %19614 = vmatprep.subr.bf16.mxu0 %v21340_v47 }
 0x31d   :  { %17783 = vmatmul.mubr.f32.gmra.mrb[114].mxu0 %v15447_v37 }
 0x31e   :  { %19616 = vmatpush3.bf16.msra.mxu0 %v21340_v47  ;;  %17785 = vmatprep.mubr.f32.mxu0 %v15448_v39  ;;  %v15453_v47 = vld [vmem:[%s23144_s9 + $0x3c8] sm:$0xff] }
 0x31f   :  { %19618 = vmatprep.subr.bf16.mxu0 %v21348_v56 }
 0x321   :  { %17786 = vmatmul.mubr.f32.gmra.mrb[116].mxu0 %v15449_v40  ;;  %v15492_v40 = vld [vmem:[%s23144_s9 + $0x478] sm:$0xff] }
 0x322   :  { %19620 = vmatpush3.bf16.msra.mxu0 %v21348_v56  ;;  %17788 = vmatprep.mubr.f32.mxu0 %v15450_v42  ;;  %v15455_v56 = vld [vmem:[%s23144_s9 + $0x3d8] sm:$0xff] }
 0x323   :  { %19622 = vmatprep.subr.bf16.mxu0 %v21356_v1 }
 0x325   :  { %17789 = vmatmul.mubr.f32.gmra.mrb[118].mxu0 %v15451_v38 }
 0x326   :  { %19624 = vmatpush3.bf16.msra.mxu0 %v21356_v1  ;;  %17791 = vmatprep.mubr.f32.mxu0 %v15452_v43 }
 0x327   :  { %19626 = vmatprep.subr.bf16.mxu0 %v21364_v10 }
 0x329   :  { %17792 = vmatmul.mubr.f32.gmra.mrb[120].mxu0 %v15453_v47 }
 0x32a   :  { %19628 = vmatpush3.bf16.msra.mxu0 %v21364_v10  ;;  %17794 = vmatprep.mubr.f32.mxu0 %v15454_v44  ;;  %v15457_v10 = vld [vmem:[%s23144_s9 + $0x3e8] sm:$0xff] }
 0x32b   :  { %19630 = vmatprep.subr.bf16.mxu0 %v21372_v19 }
 0x32c   :  { %v17263_v45 = vpop.f32.mrb[16].mxu0  ;;  %v21626_v46 = vpop.f32.mrb[0].mxu1 }
 0x32d   :  { %v892_v1 = vpop.f32.mrb[17].mxu0  ;;  %v21628_v48 = vpop.f32.mrb[1].mxu1  ;;  %17795 = vmatmul.mubr.f32.gmra.mrb[122].mxu0 %v15455_v56 }
 0x32e   :  { %17287 = vmatprep.mubr.msk.f32.mxu1 %vm973_vm2, %v892_v1  ;;  %19632 = vmatpush3.bf16.msra.mxu0 %v21372_v19  ;;  %v15458_v19 = vld [vmem:[%s23144_s9 + $0x3f0] sm:$0xff] }
 0x32f   :  { %17288 = vmatmul.mubr.msk.f32.vlgmr.msra.gmra.mrb[16].mxu1 %vm973_vm2, %v17263_v45  ;;  %19634 = vmatprep.subr.bf16.mxu0 %v21380_v29 }
 0x330   :  { %v17266_v51 = vpop.f32.mrb[18].mxu0  ;;  %17312 = vmatpush3.msra.mxu1 %v21500_v41  ;;  %v21640_v52 = vpop.f32.mrb[2].mxu1  ;;  %17797 = vmatprep.mubr.f32.mxu0 %v15456_v49 }
 0x331   :  { %v902_v53 = vpop.f32.mrb[19].mxu0  ;;  %v21642_v54 = vpop.f32.mrb[3].mxu1  ;;  %17798 = vmatmul.mubr.f32.gmra.mrb[124].mxu0 %v15457_v10  ;;  %17393 = vmatprep.subr.mxu1 %v21635_v50 }
 0x332   :  { %17290 = vmatprep.mubr.msk.f32.mxu1 %vm973_vm2, %v902_v53  ;;  %19636 = vmatpush3.bf16.msra.mxu0 %v21380_v29  ;;  %v15478_v29 = vld [vmem:[%s23144_s9 + $0x408] sm:$0xff] }
 0x333   :  { %17291 = vmatmul.mubr.msk.f32.gmra.mrb[18].mxu1 %vm973_vm2, %v17266_v51  ;;  %19638 = vmatprep.subr.bf16.mxu0 %v21386_v33 }
 0x334   :  { %v17269_v41 = vpop.f32.mrb[20].mxu0  ;;  %v21651_v57 = vpop.f32.mrb[4].mxu1  ;;  %17800 = vmatprep.mubr.f32.mxu0 %v15458_v19 }
 0x335   :  { %v912_v59 = vpop.f32.mrb[21].mxu0  ;;  %v21654_v60 = vpop.f32.mrb[5].mxu1  ;;  %17801 = vmatmul.mubr.f32.gmra.mrb[126].mxu0 %v15459_v55 }
 0x336   :  { %17293 = vmatprep.mubr.msk.f32.mxu1 %vm973_vm2, %v912_v59  ;;  %19640 = vmatpush3.bf16.msra.mxu0 %v21386_v33  ;;  %v15481_v33 = vld [vmem:[%s23144_s9 + $0x420] sm:$0xff]  ;;  %s23172_s9 = sld [smem:[#allocation56_spill]] }
 0x337   :  { %17294 = vmatmul.mubr.msk.f32.gmra.mrb[20].mxu1 %vm973_vm2, %v17269_v41  ;;  %17861 = vmatprep.mubr.f32.mxu0 %v15477_v58 }
 0x338   :  { %v17272_v62 = vpop.f32.mrb[22].mxu0  ;;  %v21661_v63 = vpop.f32.mrb[6].mxu1 }
 0x339   :  { %v922_v0 = vpop.f32.mrb[23].mxu0  ;;  %v21663_v2 = vpop.f32.mrb[7].mxu1  ;;  %17862 = vmatmul.mubr.f32.vlgmr.msra.gmra.mrb[128].mxu0 %v15478_v29 }
 0x33a   :  { %17296 = vmatprep.mubr.msk.f32.mxu1 %vm973_vm2, %v922_v0  ;;  %17864 = vmatprep.mubr.f32.mxu0 %v15479_v61 }
 0x33b   :  { %17297 = vmatmul.mubr.msk.f32.gmra.mrb[22].mxu1 %vm973_vm2, %v17272_v62 }
 0x33c   :  { %v17275_v4 = vpop.f32.mrb[24].mxu0  ;;  %v21669_v5 = vpop.f32.mrb[8].mxu1 }
 0x33d   :  { %v932_v6 = vpop.f32.mrb[25].mxu0  ;;  %v21671_v7 = vpop.f32.mrb[9].mxu1  ;;  %17865 = vmatmul.mubr.f32.gmra.mrb[130].mxu0 %v15480_v3 }
 0x33e   :  { %17299 = vmatprep.mubr.msk.f32.mxu1 %vm973_vm2, %v932_v6  ;;  %17867 = vmatprep.mubr.f32.mxu0 %v15481_v33  ;;  %v15394_v33 = vld [vmem:[%s23146_s5 + $0x28] sm:$0xff] }
 0x33f   :  { %17300 = vmatmul.mubr.msk.f32.gmra.mrb[24].mxu1 %vm973_vm2, %v17275_v4 }
 0x340   :  { %v17278_v11 = vpop.f32.mrb[26].mxu0  ;;  %v21677_v12 = vpop.f32.mrb[10].mxu1 }
 0x341   :  { %v942_v13 = vpop.f32.mrb[27].mxu0  ;;  %v779_v14 = vpop.f32.mrb[11].mxu1  ;;  %17868 = vmatmul.mubr.f32.gmra.mrb[132].mxu0 %v15482_v8 }
 0x342   :  { %17302 = vmatprep.mubr.msk.f32.mxu1 %vm973_vm2, %v942_v13  ;;  %17870 = vmatprep.mubr.f32.mxu0 %v15483_v9 }
 0x343   :  { %17303 = vmatmul.mubr.msk.f32.gmra.mrb[26].mxu1 %vm973_vm2, %v17278_v11 }
 0x344   :  { %v17281_v17 = vpop.f32.mrb[28].mxu0  ;;  %v17225_v18 = vpop.f32.mrb[12].mxu1 }
 0x345   :  { %v952_v20 = vpop.f32.mrb[29].mxu0  ;;  %v789_v21 = vpop.f32.mrb[13].mxu1  ;;  %17871 = vmatmul.mubr.f32.gmra.mrb[134].mxu0 %v15484_v15 }
 0x346   :  { %17305 = vmatprep.mubr.msk.f32.mxu1 %vm973_vm2, %v952_v20  ;;  %17873 = vmatprep.mubr.f32.mxu0 %v15485_v16 }
 0x347   :  { %17306 = vmatmul.mubr.msk.f32.gmra.mrb[28].mxu1 %vm973_vm2, %v17281_v17 }
 0x348   :  { %v17284_v24 = vpop.f32.mrb[30].mxu0  ;;  %v17228_v26 = vpop.f32.mrb[14].mxu1 }
 0x349   :  { %v962_v27 = vpop.f32.mrb[31].mxu0  ;;  %v799_v28 = vpop.f32.mrb[15].mxu1  ;;  %17874 = vmatmul.mubr.f32.gmra.mrb[136].mxu0 %v15486_v22  ;;  %v15427_v22 = vld [vmem:[%s23146_s5 + $0x30] sm:$0xff] }
 0x34a   :  { %17308 = vmatprep.mubr.msk.f32.mxu1 %vm973_vm2, %v962_v27  ;;  %17876 = vmatprep.mubr.f32.mxu0 %v15487_v23 }
 0x34b   :  { %17309 = vmatmul.mubr.msk.f32.gmra.mrb[30].mxu1 %vm973_vm2, %v17284_v24 }
 0x34c   :  { %17313 = vmatprep.mubr.msk.f32.mxu1 %vm973_vm2, %v21628_v48  ;;  %v17371_v32 = vpop.f32.mrb[32].mxu0 }
 0x34d   :  { %v1443_v25 = vpop.f32.mrb[33].mxu0  ;;  %17877 = vmatmul.mubr.f32.gmra.mrb[138].mxu0 %v15488_v30 }
 0x34e   :  { %17879 = vmatprep.mubr.f32.mxu0 %v15489_v31 }
 0x34f   :  { %17314 = vmatmul.mubr.msk.f32.vlgmr.msra.gmra.mrb[16].mxu1 %vm973_vm2, %v21626_v46 }
 0x350   :  { %17316 = vmatprep.mubr.msk.f32.mxu1 %vm973_vm2, %v21642_v54  ;;  %17394 = vmatpush3.msra.mxu1 %v21635_v50  ;;  %v17374_v37 = vpop.f32.mrb[34].mxu0 }
 0x351   :  { %v1453_v39 = vpop.f32.mrb[35].mxu0  ;;  %17880 = vmatmul.mubr.f32.gmra.mrb[140].mxu0 %v15490_v34  ;;  %17475 = vmatprep.subr.mxu1 %v15328_v35 }
 0x352   :  { %17882 = vmatprep.mubr.f32.mxu0 %v15491_v36 }
 0x353   :  { %17317 = vmatmul.mubr.msk.f32.gmra.mrb[18].mxu1 %vm973_vm2, %v21640_v52  ;;  %v15361_v52 = vld [vmem:[%s23146_s5 + $0x20] sm:$0xff] }
 0x354   :  { %17319 = vmatprep.mubr.msk.f32.mxu1 %vm973_vm2, %v21654_v60  ;;  %v17377_v42 = vpop.f32.mrb[36].mxu0 }
 0x355   :  { %v1463_v38 = vpop.f32.mrb[37].mxu0  ;;  %17883 = vmatmul.mubr.f32.gmra.mrb[142].mxu0 %v15492_v40 }
 0x357   :  { %17320 = vmatmul.mubr.msk.f32.gmra.mrb[20].mxu1 %vm973_vm2, %v21651_v57 }
 0x358   :  { %17322 = vmatprep.mubr.msk.f32.mxu1 %vm973_vm2, %v21663_v2  ;;  %v17380_v43 = vpop.f32.mrb[38].mxu0 }
 0x359   :  { %v1473_v47 = vpop.f32.mrb[39].mxu0 }
 0x35b   :  { %17323 = vmatmul.mubr.msk.f32.gmra.mrb[22].mxu1 %vm973_vm2, %v21661_v63 }
 0x35c   :  { %17325 = vmatprep.mubr.msk.f32.mxu1 %vm973_vm2, %v21671_v7  ;;  %v17383_v44 = vpop.f32.mrb[40].mxu0 }
 0x35d   :  { %v1483_v56 = vpop.f32.mrb[41].mxu0 }
 0x35f   :  { %17326 = vmatmul.mubr.msk.f32.gmra.mrb[24].mxu1 %vm973_vm2, %v21669_v5 }
 0x360   :  { %17328 = vmatprep.mubr.msk.f32.mxu1 %vm973_vm2, %v779_v14  ;;  %v17386_v45 = vpop.f32.mrb[42].mxu0 }
 0x361   :  { %v1493_v46 = vpop.f32.mrb[43].mxu0 }
 0x363   :  { %17329 = vmatmul.mubr.msk.f32.gmra.mrb[26].mxu1 %vm973_vm2, %v21677_v12 }
 0x364   :  { %17331 = vmatprep.mubr.msk.f32.mxu1 %vm973_vm2, %v789_v21  ;;  %v17389_v1 = vpop.f32.mrb[44].mxu0 }
 0x365   :  { %v1503_v48 = vpop.f32.mrb[45].mxu0 }
 0x367   :  { %17332 = vmatmul.mubr.msk.f32.gmra.mrb[28].mxu1 %vm973_vm2, %v17225_v18 }
 0x368   :  { %17334 = vmatprep.mubr.msk.f32.mxu1 %vm973_vm2, %v799_v28  ;;  %v17392_v49 = vpop.f32.mrb[46].mxu0 }
 0x369   :  { %v1513_v10 = vpop.f32.mrb[47].mxu0 }
 0x36b   :  { %17335 = vmatmul.mubr.msk.f32.gmra.mrb[30].mxu1 %vm973_vm2, %v17228_v26 }
 0x36c   :  { %17395 = vmatprep.mubr.msk.f32.mxu1 %vm973_vm2, %v1443_v25  ;;  %v17453_v50 = vpop.f32.mrb[48].mxu0 }
 0x36d   :  { %v1816_v51 = vpop.f32.mrb[49].mxu0 }
 0x36f   :  { %17396 = vmatmul.mubr.msk.f32.vlgmr.msra.gmra.mrb[16].mxu1 %vm973_vm2, %v17371_v32 }
 0x370   :  { %17398 = vmatprep.mubr.msk.f32.mxu1 %vm973_vm2, %v1453_v39  ;;  %17476 = vmatpush3.msra.mxu1 %v15328_v35  ;;  %v17456_v53 = vpop.f32.mrb[50].mxu0 }
 0x371   :  { %v1826_v54 = vpop.f32.mrb[51].mxu0  ;;  %17557 = vmatprep.subr.mxu1 %v15361_v52 }
 0x373   :  { %17399 = vmatmul.mubr.msk.f32.gmra.mrb[18].mxu1 %vm973_vm2, %v17374_v37 }
 0x374   :  { %17401 = vmatprep.mubr.msk.f32.mxu1 %vm973_vm2, %v1463_v38  ;;  %v17459_v19 = vpop.f32.mrb[52].mxu0  ;;  %v15460_v38 = vld [vmem:[%s23146_s5 + $0x38] sm:$0xff] }
 0x375   :  { %v1836_v55 = vpop.f32.mrb[53].mxu0 }
 0x377   :  { %17402 = vmatmul.mubr.msk.f32.gmra.mrb[20].mxu1 %vm973_vm2, %v17377_v42 }
 0x378   :  { %17404 = vmatprep.mubr.msk.f32.mxu1 %vm973_vm2, %v1473_v47  ;;  %v17462_v41 = vpop.f32.mrb[54].mxu0 }
 0x379   :  { %v1846_v57 = vpop.f32.mrb[55].mxu0 }
 0x37b   :  { %17405 = vmatmul.mubr.msk.f32.gmra.mrb[22].mxu1 %vm973_vm2, %v17380_v43 }
 0x37c   :  { %17407 = vmatprep.mubr.msk.f32.mxu1 %vm973_vm2, %v1483_v56  ;;  %v17465_v58 = vpop.f32.mrb[56].mxu0 }
 0x37d   :  { %v1856_v59 = vpop.f32.mrb[57].mxu0 }
 0x37f   :  { %17408 = vmatmul.mubr.msk.f32.gmra.mrb[24].mxu1 %vm973_vm2, %v17383_v44 }
 0x380   :  { %17410 = vmatprep.mubr.msk.f32.mxu1 %vm973_vm2, %v1493_v46  ;;  %v17468_v60 = vpop.f32.mrb[58].mxu0 }
 0x381   :  { %v1866_v29 = vpop.f32.mrb[59].mxu0 }
 0x383   :  { %17411 = vmatmul.mubr.msk.f32.gmra.mrb[26].mxu1 %vm973_vm2, %v17386_v45 }
 0x384   :  { %17413 = vmatprep.mubr.msk.f32.mxu1 %vm973_vm2, %v1503_v48  ;;  %v17471_v61 = vpop.f32.mrb[60].mxu0 }
 0x385   :  { %v1876_v62 = vpop.f32.mrb[61].mxu0 }
 0x387   :  { %17414 = vmatmul.mubr.msk.f32.gmra.mrb[28].mxu1 %vm973_vm2, %v17389_v1 }
 0x388   :  { %17416 = vmatprep.mubr.msk.f32.mxu1 %vm973_vm2, %v1513_v10  ;;  %v17474_v63 = vpop.f32.mrb[62].mxu0 }
 0x389   :  { %v1886_v0 = vpop.f32.mrb[63].mxu0 }
 0x38b   :  { %17417 = vmatmul.mubr.msk.f32.gmra.mrb[30].mxu1 %vm973_vm2, %v17392_v49 }
 0x38c   :  { %17477 = vmatprep.mubr.msk.f32.mxu1 %vm973_vm2, %v1816_v51  ;;  %v17535_v2 = vpop.f32.mrb[64].mxu0 }
 0x38d   :  { %v2189_v3 = vpop.f32.mrb[65].mxu0 }
 0x38f   :  { %17478 = vmatmul.mubr.msk.f32.vlgmr.msra.gmra.mrb[16].mxu1 %vm973_vm2, %v17453_v50 }
 0x390   :  { %17480 = vmatprep.mubr.msk.f32.mxu1 %vm973_vm2, %v1826_v54  ;;  %17558 = vmatpush3.msra.mxu1 %v15361_v52  ;;  %v17538_v4 = vpop.f32.mrb[66].mxu0 }
 0x391   :  { %v2199_v5 = vpop.f32.mrb[67].mxu0  ;;  %17639 = vmatprep.subr.mxu1 %v15394_v33 }
 0x393   :  { %17481 = vmatmul.mubr.msk.f32.gmra.mrb[18].mxu1 %vm973_vm2, %v17456_v53 }
 0x394   :  { %17483 = vmatprep.mubr.msk.f32.mxu1 %vm973_vm2, %v1836_v55  ;;  %v17541_v6 = vpop.f32.mrb[68].mxu0  ;;  %v15493_v55 = vld [vmem:[%s23146_s5 + $0x40] sm:$0xff]  ;;  %s23174_s5 = sld [smem:[#allocation58_spill]] }
 0x395   :  { %v2209_v7 = vpop.f32.mrb[69].mxu0 }
 0x397   :  { %17484 = vmatmul.mubr.msk.f32.gmra.mrb[20].mxu1 %vm973_vm2, %v17459_v19 }
 0x398   :  { %17486 = vmatprep.mubr.msk.f32.mxu1 %vm973_vm2, %v1846_v57  ;;  %v17544_v8 = vpop.f32.mrb[70].mxu0 }
 0x399   :  { %v2219_v9 = vpop.f32.mrb[71].mxu0 }
 0x39b   :  { %17487 = vmatmul.mubr.msk.f32.gmra.mrb[22].mxu1 %vm973_vm2, %v17462_v41 }
 0x39c   :  { %17489 = vmatprep.mubr.msk.f32.mxu1 %vm973_vm2, %v1856_v59  ;;  %v17547_v11 = vpop.f32.mrb[72].mxu0 }
 0x39d   :  { %v2229_v12 = vpop.f32.mrb[73].mxu0 }
 0x39f   :  { %17490 = vmatmul.mubr.msk.f32.gmra.mrb[24].mxu1 %vm973_vm2, %v17465_v58 }
 0x3a0   :  { %17492 = vmatprep.mubr.msk.f32.mxu1 %vm973_vm2, %v1866_v29  ;;  %v17550_v13 = vpop.f32.mrb[74].mxu0 }
 0x3a1   :  { %v2239_v14 = vpop.f32.mrb[75].mxu0 }
 0x3a3   :  { %17493 = vmatmul.mubr.msk.f32.gmra.mrb[26].mxu1 %vm973_vm2, %v17468_v60 }
 0x3a4   :  { %17495 = vmatprep.mubr.msk.f32.mxu1 %vm973_vm2, %v1876_v62  ;;  %v17553_v15 = vpop.f32.mrb[76].mxu0 }
 0x3a5   :  { %v2249_v16 = vpop.f32.mrb[77].mxu0 }
 0x3a7   :  { %17496 = vmatmul.mubr.msk.f32.gmra.mrb[28].mxu1 %vm973_vm2, %v17471_v61 }
 0x3a8   :  { %17498 = vmatprep.mubr.msk.f32.mxu1 %vm973_vm2, %v1886_v0  ;;  %v17556_v17 = vpop.f32.mrb[78].mxu0 }
 0x3a9   :  { %v2259_v18 = vpop.f32.mrb[79].mxu0 }
 0x3ab   :  { %17499 = vmatmul.mubr.msk.f32.gmra.mrb[30].mxu1 %vm973_vm2, %v17474_v63 }
 0x3ac   :  { %17559 = vmatprep.mubr.msk.f32.mxu1 %vm973_vm2, %v2189_v3  ;;  %v17617_v20 = vpop.f32.mrb[80].mxu0 }
 0x3ad   :  { %v2562_v21 = vpop.f32.mrb[81].mxu0 }
 0x3af   :  { %17560 = vmatmul.mubr.msk.f32.vlgmr.msra.gmra.mrb[16].mxu1 %vm973_vm2, %v17535_v2 }
 0x3b0   :  { %17562 = vmatprep.mubr.msk.f32.mxu1 %vm973_vm2, %v2199_v5  ;;  %17640 = vmatpush3.msra.mxu1 %v15394_v33  ;;  %v17620_v23 = vpop.f32.mrb[82].mxu0 }
 0x3b1   :  { %v2572_v24 = vpop.f32.mrb[83].mxu0  ;;  %17721 = vmatprep.subr.mxu1 %v15427_v22 }
 0x3b3   :  { %17563 = vmatmul.mubr.msk.f32.gmra.mrb[18].mxu1 %vm973_vm2, %v17538_v4 }
 0x3b4   :  { %17565 = vmatprep.mubr.msk.f32.mxu1 %vm973_vm2, %v2209_v7  ;;  %v17623_v26 = vpop.f32.mrb[84].mxu0 }
 0x3b5   :  { %v2582_v27 = vpop.f32.mrb[85].mxu0 }
 0x3b7   :  { %17566 = vmatmul.mubr.msk.f32.gmra.mrb[20].mxu1 %vm973_vm2, %v17541_v6 }
 0x3b8   :  { %17568 = vmatprep.mubr.msk.f32.mxu1 %vm973_vm2, %v2219_v9  ;;  %v17626_v28 = vpop.f32.mrb[86].mxu0 }
 0x3b9   :  { %v2592_v30 = vpop.f32.mrb[87].mxu0 }
 0x3bb   :  { %17569 = vmatmul.mubr.msk.f32.gmra.mrb[22].mxu1 %vm973_vm2, %v17544_v8 }
 0x3bc   :  { %17571 = vmatprep.mubr.msk.f32.mxu1 %vm973_vm2, %v2229_v12  ;;  %v17629_v31 = vpop.f32.mrb[88].mxu0 }
 0x3bd   :  { %v2602_v32 = vpop.f32.mrb[89].mxu0 }
 0x3bf   :  { %17572 = vmatmul.mubr.msk.f32.gmra.mrb[24].mxu1 %vm973_vm2, %v17547_v11 }
 0x3c0   :  { %17574 = vmatprep.mubr.msk.f32.mxu1 %vm973_vm2, %v2239_v14  ;;  %v17632_v25 = vpop.f32.mrb[90].mxu0 }
 0x3c1   :  { %v2612_v34 = vpop.f32.mrb[91].mxu0 }
 0x3c3   :  { %17575 = vmatmul.mubr.msk.f32.gmra.mrb[26].mxu1 %vm973_vm2, %v17550_v13 }
 0x3c4   :  { %17577 = vmatprep.mubr.msk.f32.mxu1 %vm973_vm2, %v2249_v16  ;;  %v17635_v35 = vpop.f32.mrb[92].mxu0 }
 0x3c5   :  { %v2622_v36 = vpop.f32.mrb[93].mxu0 }
 0x3c7   :  { %17578 = vmatmul.mubr.msk.f32.gmra.mrb[28].mxu1 %vm973_vm2, %v17553_v15 }
 0x3c8   :  { %17580 = vmatprep.mubr.msk.f32.mxu1 %vm973_vm2, %v2259_v18  ;;  %v17638_v37 = vpop.f32.mrb[94].mxu0 }
 0x3c9   :  { %v2632_v39 = vpop.f32.mrb[95].mxu0 }
 0x3cb   :  { %17581 = vmatmul.mubr.msk.f32.gmra.mrb[30].mxu1 %vm973_vm2, %v17556_v17 }
 0x3cc   :  { %17641 = vmatprep.mubr.msk.f32.mxu1 %vm973_vm2, %v2562_v21  ;;  %v17699_v40 = vpop.f32.mrb[96].mxu0 }
 0x3cd   :  { %v2935_v42 = vpop.f32.mrb[97].mxu0 }
 0x3cf   :  { %17642 = vmatmul.mubr.msk.f32.vlgmr.msra.gmra.mrb[16].mxu1 %vm973_vm2, %v17617_v20 }
 0x3d0   :  { %17644 = vmatprep.mubr.msk.f32.mxu1 %vm973_vm2, %v2572_v24  ;;  %17722 = vmatpush3.msra.mxu1 %v15427_v22  ;;  %v17702_v43 = vpop.f32.mrb[98].mxu0  ;;  %v20953_v24 = vmov 0.0  }
 0x3d1   :  { %v2945_v47 = vpop.f32.mrb[99].mxu0  ;;  %17803 = vmatprep.subr.mxu1 %v15460_v38  ;;  %17943 = vmatprep.mubr.msk.f32.mxu0 %vm20952_vm3, %v20953_v24 }
 0x3d3   :  { %17645 = vmatmul.mubr.msk.f32.gmra.mrb[18].mxu1 %vm973_vm2, %v17620_v23  ;;  %v20951_v23 = vmov 0.0|0.0  }
 0x3d4   :  { %17647 = vmatprep.mubr.msk.f32.mxu1 %vm973_vm2, %v2582_v27  ;;  %v17705_v44 = vpop.f32.mrb[100].mxu0  ;;  %19641 = vmatprep.subr.bf16.mxu0 %v20951_v23 }
 0x3d5   :  { %v2955_v56 = vpop.f32.mrb[101].mxu0 }
 0x3d7   :  { %17648 = vmatmul.mubr.msk.f32.gmra.mrb[20].mxu1 %vm973_vm2, %v17623_v26  ;;  %v21844_v26 = vld [vmem:[%s23147_s29] ss:$0 sm:$0xff]  ;;  %s23175_s29 = sld [smem:[#allocation61_spill]] }
 0x3d8   :  { %17650 = vmatprep.mubr.msk.f32.mxu1 %vm973_vm2, %v2592_v30  ;;  %v17708_v45 = vpop.f32.mrb[102].mxu0 }
 0x3d9   :  { %v2965_v46 = vpop.f32.mrb[103].mxu0 }
 0x3db   :  { %17651 = vmatmul.mubr.msk.f32.gmra.mrb[22].mxu1 %vm973_vm2, %v17626_v28 }
 0x3dc   :  { %17653 = vmatprep.mubr.msk.f32.mxu1 %vm973_vm2, %v2602_v32  ;;  %v17711_v1 = vpop.f32.mrb[104].mxu0 }
 0x3dd   :  { %v2975_v48 = vpop.f32.mrb[105].mxu0 }
 0x3df   :  { %17654 = vmatmul.mubr.msk.f32.gmra.mrb[24].mxu1 %vm973_vm2, %v17629_v31 }
 0x3e0   :  { %17656 = vmatprep.mubr.msk.f32.mxu1 %vm973_vm2, %v2612_v34  ;;  %v17714_v49 = vpop.f32.mrb[106].mxu0 }
 0x3e1   :  { %v2985_v10 = vpop.f32.mrb[107].mxu0 }
 0x3e3   :  { %17657 = vmatmul.mubr.msk.f32.gmra.mrb[26].mxu1 %vm973_vm2, %v17632_v25 }
 0x3e4   :  { %17659 = vmatprep.mubr.msk.f32.mxu1 %vm973_vm2, %v2622_v36  ;;  %v17717_v50 = vpop.f32.mrb[108].mxu0 }
 0x3e5   :  { %v2995_v51 = vpop.f32.mrb[109].mxu0 }
 0x3e7   :  { %17660 = vmatmul.mubr.msk.f32.gmra.mrb[28].mxu1 %vm973_vm2, %v17635_v35 }
 0x3e8   :  { %17662 = vmatprep.mubr.msk.f32.mxu1 %vm973_vm2, %v2632_v39  ;;  %v17720_v52 = vpop.f32.mrb[110].mxu0 }
 0x3e9   :  { %v3005_v53 = vpop.f32.mrb[111].mxu0 }
 0x3eb   :  { %17663 = vmatmul.mubr.msk.f32.gmra.mrb[30].mxu1 %vm973_vm2, %v17638_v37 }
 0x3ec   :  { %17723 = vmatprep.mubr.msk.f32.mxu1 %vm973_vm2, %v2935_v42  ;;  %v17781_v54 = vpop.f32.mrb[112].mxu0 }
 0x3ed   :  { %v3308_v19 = vpop.f32.mrb[113].mxu0 }
 0x3ef   :  { %17724 = vmatmul.mubr.msk.f32.vlgmr.msra.gmra.mrb[16].mxu1 %vm973_vm2, %v17699_v40 }
 0x3f0   :  { %17726 = vmatprep.mubr.msk.f32.mxu1 %vm973_vm2, %v2945_v47  ;;  %17804 = vmatpush3.msra.mxu1 %v15460_v38  ;;  %v17784_v41 = vpop.f32.mrb[114].mxu0 }
 0x3f1   :  { %v3318_v57 = vpop.f32.mrb[115].mxu0  ;;  %17885 = vmatprep.subr.mxu1 %v15493_v55 }
 0x3f3   :  { %17727 = vmatmul.mubr.msk.f32.gmra.mrb[18].mxu1 %vm973_vm2, %v17702_v43 }
 0x3f4   :  { %17729 = vmatprep.mubr.msk.f32.mxu1 %vm973_vm2, %v2955_v56  ;;  %v17787_v58 = vpop.f32.mrb[116].mxu0 }
 0x3f5   :  { %v3328_v59 = vpop.f32.mrb[117].mxu0 }
 0x3f7   :  { %17730 = vmatmul.mubr.msk.f32.gmra.mrb[20].mxu1 %vm973_vm2, %v17705_v44 }
 0x3f8   :  { %17732 = vmatprep.mubr.msk.f32.mxu1 %vm973_vm2, %v2965_v46  ;;  %v17790_v60 = vpop.f32.mrb[118].mxu0 }
 0x3f9   :  { %v3338_v29 = vpop.f32.mrb[119].mxu0 }
 0x3fb   :  { %17733 = vmatmul.mubr.msk.f32.gmra.mrb[22].mxu1 %vm973_vm2, %v17708_v45 }
 0x3fc   :  { %17735 = vmatprep.mubr.msk.f32.mxu1 %vm973_vm2, %v2975_v48  ;;  %v17793_v61 = vpop.f32.mrb[120].mxu0 }
 0x3fd   :  { %v3348_v62 = vpop.f32.mrb[121].mxu0 }
 0x3ff   :  { %17736 = vmatmul.mubr.msk.f32.gmra.mrb[24].mxu1 %vm973_vm2, %v17711_v1 }
 0x400   :  { %17738 = vmatprep.mubr.msk.f32.mxu1 %vm973_vm2, %v2985_v10  ;;  %v17796_v63 = vpop.f32.mrb[122].mxu0 }
 0x401   :  { %v3358_v0 = vpop.f32.mrb[123].mxu0 }
 0x403   :  { %17739 = vmatmul.mubr.msk.f32.gmra.mrb[26].mxu1 %vm973_vm2, %v17714_v49 }
 0x404   :  { %17741 = vmatprep.mubr.msk.f32.mxu1 %vm973_vm2, %v2995_v51  ;;  %v17799_v2 = vpop.f32.mrb[124].mxu0 }
 0x405   :  { %v3368_v3 = vpop.f32.mrb[125].mxu0 }
 0x407   :  { %17742 = vmatmul.mubr.msk.f32.gmra.mrb[28].mxu1 %vm973_vm2, %v17717_v50 }
 0x408   :  { %17744 = vmatprep.mubr.msk.f32.mxu1 %vm973_vm2, %v3005_v53  ;;  %v17802_v33 = vpop.f32.mrb[126].mxu0 }
 0x409   :  { %v3378_v4 = vpop.f32.mrb[127].mxu0 }
 0x40b   :  { %17745 = vmatmul.mubr.msk.f32.gmra.mrb[30].mxu1 %vm973_vm2, %v17720_v52 }
 0x40c   :  { %17805 = vmatprep.mubr.msk.f32.mxu1 %vm973_vm2, %v3308_v19  ;;  %v17863_v5 = vpop.f32.mrb[128].mxu0 }
 0x40d   :  { %v3681_v6 = vpop.f32.mrb[129].mxu0 }
 0x40f   :  { %17806 = vmatmul.mubr.msk.f32.vlgmr.msra.gmra.mrb[16].mxu1 %vm973_vm2, %v17781_v54 }
 0x410   :  { %17808 = vmatprep.mubr.msk.f32.mxu1 %vm973_vm2, %v3318_v57  ;;  %17886 = vmatpush3.msra.mxu1 %v15493_v55  ;;  %v17866_v7 = vpop.f32.mrb[130].mxu0 }
 0x411   :  { %v3691_v8 = vpop.f32.mrb[131].mxu0 }
 0x413   :  { %17809 = vmatmul.mubr.msk.f32.gmra.mrb[18].mxu1 %vm973_vm2, %v17784_v41 }
 0x414   :  { %17811 = vmatprep.mubr.msk.f32.mxu1 %vm973_vm2, %v3328_v59  ;;  %v17869_v9 = vpop.f32.mrb[132].mxu0 }
 0x415   :  { %v3701_v11 = vpop.f32.mrb[133].mxu0 }
 0x417   :  { %17812 = vmatmul.mubr.msk.f32.gmra.mrb[20].mxu1 %vm973_vm2, %v17787_v58 }
 0x418   :  { %17814 = vmatprep.mubr.msk.f32.mxu1 %vm973_vm2, %v3338_v29  ;;  %v17872_v12 = vpop.f32.mrb[134].mxu0 }
 0x419   :  { %v3711_v13 = vpop.f32.mrb[135].mxu0 }
 0x41b   :  { %17815 = vmatmul.mubr.msk.f32.gmra.mrb[22].mxu1 %vm973_vm2, %v17790_v60 }
 0x41c   :  { %17817 = vmatprep.mubr.msk.f32.mxu1 %vm973_vm2, %v3348_v62  ;;  %v17875_v14 = vpop.f32.mrb[136].mxu0 }
 0x41d   :  { %v3721_v15 = vpop.f32.mrb[137].mxu0 }
 0x41f   :  { %17818 = vmatmul.mubr.msk.f32.gmra.mrb[24].mxu1 %vm973_vm2, %v17793_v61 }
 0x420   :  { %17820 = vmatprep.mubr.msk.f32.mxu1 %vm973_vm2, %v3358_v0  ;;  %v17878_v16 = vpop.f32.mrb[138].mxu0 }
 0x421   :  { %v3731_v17 = vpop.f32.mrb[139].mxu0 }
 0x423   :  { %17821 = vmatmul.mubr.msk.f32.gmra.mrb[26].mxu1 %vm973_vm2, %v17796_v63 }
 0x424   :  { %17823 = vmatprep.mubr.msk.f32.mxu1 %vm973_vm2, %v3368_v3  ;;  %v17881_v18 = vpop.f32.mrb[140].mxu0 }
 0x425   :  { %v3741_v20 = vpop.f32.mrb[141].mxu0 }
 0x427   :  { %17824 = vmatmul.mubr.msk.f32.gmra.mrb[28].mxu1 %vm973_vm2, %v17799_v2 }
 0x428   :  { %17826 = vmatprep.mubr.msk.f32.mxu1 %vm973_vm2, %v3378_v4  ;;  %v17884_v21 = vpop.f32.mrb[142].mxu0 }
 0x429   :  { %v3751_v22 = vpop.f32.mrb[143].mxu0 }
 0x42b   :  { %17827 = vmatmul.mubr.msk.f32.gmra.mrb[30].mxu1 %vm973_vm2, %v17802_v33 }
 0x42c   :  { %17887 = vmatprep.mubr.msk.f32.mxu1 %vm973_vm2, %v3681_v6 }
 0x42f   :  { %17888 = vmatmul.mubr.msk.f32.vlgmr.msra.gmra.mrb[16].mxu1 %vm973_vm2, %v17863_v5 }
 0x430   :  { %17890 = vmatprep.mubr.msk.f32.mxu1 %vm973_vm2, %v3691_v8 }
 0x433   :  { %17891 = vmatmul.mubr.msk.f32.gmra.mrb[18].mxu1 %vm973_vm2, %v17866_v7 }
 0x434   :  { %17893 = vmatprep.mubr.msk.f32.mxu1 %vm973_vm2, %v3701_v11 }
 0x437   :  { %17894 = vmatmul.mubr.msk.f32.gmra.mrb[20].mxu1 %vm973_vm2, %v17869_v9 }
 0x438   :  { %17896 = vmatprep.mubr.msk.f32.mxu1 %vm973_vm2, %v3711_v13 }
 0x43b   :  { %17897 = vmatmul.mubr.msk.f32.gmra.mrb[22].mxu1 %vm973_vm2, %v17872_v12 }
 0x43c   :  { %17899 = vmatprep.mubr.msk.f32.mxu1 %vm973_vm2, %v3721_v15 }
 0x43f   :  { %17900 = vmatmul.mubr.msk.f32.gmra.mrb[24].mxu1 %vm973_vm2, %v17875_v14 }
 0x440   :  { %17902 = vmatprep.mubr.msk.f32.mxu1 %vm973_vm2, %v3731_v17 }
 0x443   :  { %17903 = vmatmul.mubr.msk.f32.gmra.mrb[26].mxu1 %vm973_vm2, %v17878_v16 }
 0x444   :  { %17905 = vmatprep.mubr.msk.f32.mxu1 %vm973_vm2, %v3741_v20 }
 0x447   :  { %17906 = vmatmul.mubr.msk.f32.gmra.mrb[28].mxu1 %vm973_vm2, %v17881_v18 }
 0x448   :  { %17908 = vmatprep.mubr.msk.f32.mxu1 %vm973_vm2, %v3751_v22 }
 0x44b   :  { %17909 = vmatmul.mubr.msk.f32.gmra.mrb[30].mxu1 %vm973_vm2, %v17884_v21 }
 0x502   :  { %v17889_v27 = vpop.f32.mrb[16].mxu1 }
 0x503   :  { %v3978_v28 = vadd.f32 %v17889_v27, %v21844_v26  ;;  %v3876_v30 = vpop.f32.mrb[17].mxu1 }
 0x504   :  { %v3977_v31 = vadd.f32 %v21844_v26, %v3876_v30 }
 0x505   :  { %vm3994_vm4 = vcmp.gt.f32.partialorder %v3978_v28, 0.0  ;;  %v4010_v32 = vmul.f32 0.2, %v3978_v28 }
 0x506   :  { %vm3993_vm5 = vcmp.gt.f32.partialorder %v3977_v31, 0.0  ;;  %v4009_v25 = vmul.f32 0.2, %v3977_v31  ;;  %v17892_v34 = vpop.f32.mrb[18].mxu1 }
 0x507   :  { %v21848_v35 = vsel %vm3994_vm4, %v3978_v28, %v4010_v32  ;;  %v3980_v36 = vadd.f32 %v17892_v34, %v21844_v26  ;;  %v3886_v37 = vpop.f32.mrb[19].mxu1 }
 0x508   :  { %v21851_v39 = vsel %vm3993_vm5, %v3977_v31, %v4009_v25  ;;  %v3979_v40 = vadd.f32 %v21844_v26, %v3886_v37 }
 0x509   :  { %v19642_v42 = vpack.c.bf16 %v21848_v35, %v21851_v39  ;;  %vm3996_vm6 = vcmp.gt.f32.partialorder %v3980_v36, 0.0  ;;  %v4012_v38 = vmul.f32 0.2, %v3980_v36 }
 0x50a   :  { %vm3995_vm7 = vcmp.gt.f32.partialorder %v3979_v40, 0.0  ;;  %v4011_v43 = vmul.f32 0.2, %v3979_v40  ;;  %v17895_v47 = vpop.f32.mrb[20].mxu1 }
 0x50b   :  { %v21856_v44 = vsel %vm3996_vm6, %v3980_v36, %v4012_v38  ;;  %v3982_v56 = vadd.f32 %v17895_v47, %v21844_v26  ;;  %v3896_v45 = vpop.f32.mrb[21].mxu1  ;;  %19643 = vmatpush3.bf16.msra.mxu0 %v19642_v42  ;;  %v4041_v42 = vld [vmem:[%s23148_s4] sm:$0xff]  ;;  %vm6261_vm6 = vcmask 261120   ;;  %s23176_s4 = sld [smem:[#allocation60_spill]] }
 0x50c   :  { %v21859_v46 = vsel %vm3995_vm7, %v3979_v40, %v4011_v43  ;;  %v3981_v1 = vadd.f32 %v21844_v26, %v3896_v45  ;;  %19644 = vmatprep.subr.bf16.mxu0 %v20951_v23  ;;  %v4042_v38 = vld [vmem:[%s23149_s26] sm:$0xff]  ;;  %s23177_s26 = sld [smem:[#allocation62_spill]] }
 0x50d   :  { %v19645_v48 = vpack.c.bf16 %v21856_v44, %v21859_v46  ;;  %vm3998_vm8 = vcmp.gt.f32.partialorder %v3982_v56, 0.0  ;;  %v4014_v49 = vmul.f32 0.2, %v3982_v56  ;;  %v15511_v45 = vld [vmem:[%s23151_s1] ss:$0 sm:$0xff]  ;;  %s23179_s1 = sld [smem:[#allocation65_spill]] }
 0x50e   :  { %vm3997_vm9 = vcmp.gt.f32.partialorder %v3981_v1, 0.0  ;;  %v4013_v10 = vmul.f32 0.2, %v3981_v1  ;;  %v17898_v50 = vpop.f32.mrb[22].mxu1 }
 0x50f   :  { %v21865_v51 = vsel %vm3998_vm8, %v3982_v56, %v4014_v49  ;;  %v3984_v52 = vadd.f32 %v17898_v50, %v21844_v26  ;;  %v3906_v53 = vpop.f32.mrb[23].mxu1  ;;  %19646 = vmatpush3.bf16.msra.mxu0 %v19645_v48  ;;  %v4044_v56 = vld [vmem:[%s23150_s28] sm:$0xff]  ;;  %s23178_s28 = sld [smem:[#allocation63_spill]] }
 0x510   :  { %v21868_v54 = vsel %vm3997_vm9, %v3981_v1, %v4013_v10  ;;  %v3983_v19 = vadd.f32 %v21844_v26, %v3906_v53  ;;  %19647 = vmatprep.subr.bf16.mxu0 %v20951_v23  ;;  %v4046_v50 = vld [vmem:[%s23152_s2] sm:$0xff] }
 0x511   :  { %v19648_v55 = vpack.c.bf16 %v21865_v51, %v21868_v54  ;;  %vm4000_vm10 = vcmp.gt.f32.partialorder %v3984_v52, 0.0  ;;  %v4016_v41 = vmul.f32 0.2, %v3984_v52 }
 0x512   :  { %vm3999_vm11 = vcmp.gt.f32.partialorder %v3983_v19, 0.0  ;;  %v4015_v57 = vmul.f32 0.2, %v3983_v19  ;;  %v17901_v58 = vpop.f32.mrb[24].mxu1 }
 0x513   :  { %v21874_v59 = vsel %vm4000_vm10, %v3984_v52, %v4016_v41  ;;  %v3986_v60 = vadd.f32 %v17901_v58, %v21844_v26  ;;  %v3916_v29 = vpop.f32.mrb[25].mxu1  ;;  %19649 = vmatpush3.bf16.msra.mxu0 %v19648_v55  ;;  %v15513_v52 = vld [vmem:[%s23153_s7] ss:$0 sm:$0xff] }
 0x514   :  { %v21877_v61 = vsel %vm3999_vm11, %v3983_v19, %v4015_v57  ;;  %v3985_v62 = vadd.f32 %v21844_v26, %v3916_v29  ;;  %19650 = vmatprep.subr.bf16.mxu0 %v20951_v23  ;;  %v4047_v29 = vld [vmem:[%s23152_s2 + $0x8] sm:$0xff] }
 0x515   :  { %v19651_v63 = vpack.c.bf16 %v21874_v59, %v21877_v61  ;;  %vm4002_vm12 = vcmp.gt.f32.partialorder %v3986_v60, 0.0  ;;  %v4018_v0 = vmul.f32 0.2, %v3986_v60 }
 0x516   :  { %vm4001_vm13 = vcmp.gt.f32.partialorder %v3985_v62, 0.0  ;;  %v4017_v2 = vmul.f32 0.2, %v3985_v62  ;;  %v17904_v3 = vpop.f32.mrb[26].mxu1 }
 0x517   :  { %v21883_v33 = vsel %vm4002_vm12, %v3986_v60, %v4018_v0  ;;  %v3988_v4 = vadd.f32 %v17904_v3, %v21844_v26  ;;  %v3926_v5 = vpop.f32.mrb[27].mxu1  ;;  %19652 = vmatpush3.bf16.msra.mxu0 %v19651_v63  ;;  %v4049_v63 = vld [vmem:[%s23152_s2 + $0x18] sm:$0xff]  ;;  %v4050_v0 = vld [vmem:[%s23152_s2 + $0x20] sm:$0xff]  ;;  %v4052_v3 = vld [vmem:[%s23152_s2 + $0x30] sm:$0xff] }
 0x518   :  { %v21886_v6 = vsel %vm4001_vm13, %v3985_v62, %v4017_v2  ;;  %v3987_v7 = vadd.f32 %v21844_v26, %v3926_v5  ;;  %19653 = vmatprep.subr.bf16.mxu0 %v20951_v23  ;;  %v4048_v62 = vld [vmem:[%s23152_s2 + $0x10] sm:$0xff]  ;;  %v4051_v2 = vld [vmem:[%s23152_s2 + $0x28] sm:$0xff]  ;;  %v4054_v5 = vld [vmem:[%s23152_s2 + $0x40] sm:$0xff] }
 0x519   :  { %v19654_v8 = vpack.c.bf16 %v21883_v33, %v21886_v6  ;;  %vm4004_vm14 = vcmp.gt.f32.partialorder %v3988_v4, 0.0  ;;  %v4020_v9 = vmul.f32 0.2, %v3988_v4 }
 0x51a   :  { %vm4003_vm15 = vcmp.gt.f32.partialorder %v3987_v7, 0.0  ;;  %v4019_v11 = vmul.f32 0.2, %v3987_v7  ;;  %v17907_v12 = vpop.f32.mrb[28].mxu1 }
 0x51b   :  { %v21892_v13 = vsel %vm4004_vm14, %v3988_v4, %v4020_v9  ;;  %v3990_v14 = vadd.f32 %v17907_v12, %v21844_v26  ;;  %v3936_v15 = vpop.f32.mrb[29].mxu1  ;;  %19655 = vmatpush3.bf16.msra.mxu0 %v19654_v8  ;;  %v4053_v4 = vld [vmem:[%s23152_s2 + $0x38] sm:$0xff]  ;;  %v4056_v8 = vld [vmem:[%s23152_s2 + $0x50] sm:$0xff]  ;;  %v4059_v12 = vld [vmem:[%s23152_s2 + $0x68] sm:$0xff] }
 0x51c   :  { %v21895_v16 = vsel %vm4003_vm15, %v3987_v7, %v4019_v11  ;;  %v3989_v17 = vadd.f32 %v21844_v26, %v3936_v15  ;;  %19656 = vmatprep.subr.bf16.mxu0 %v20951_v23  ;;  %v4055_v7 = vld [vmem:[%s23152_s2 + $0x48] sm:$0xff]  ;;  %v4057_v9 = vld [vmem:[%s23152_s2 + $0x58] sm:$0xff]  ;;  %v4058_v11 = vld [vmem:[%s23152_s2 + $0x60] sm:$0xff]  ;;  %vm8204_vm15 = vcmask 130048  }
 0x51d   :  { %v19657_v18 = vpack.c.bf16 %v21892_v13, %v21895_v16  ;;  %vm4006_vm0 = vcmp.gt.f32.partialorder %v3990_v14, 0.0  ;;  %v4022_v20 = vmul.f32 0.2, %v3990_v14  ;;  %v4061_v15 = vld [vmem:[%s23152_s2 + $0x78] sm:$0xff] }
 0x51e   :  { %vm4005_vm1 = vcmp.gt.f32.partialorder %v3989_v17, 0.0  ;;  %v4021_v21 = vmul.f32 0.2, %v3989_v17  ;;  %v17910_v22 = vpop.f32.mrb[30].mxu1 }
 0x51f   :  { %v21901_v27 = vsel %vm4006_vm0, %v3990_v14, %v4022_v20  ;;  %v3992_v28 = vadd.f32 %v17910_v22, %v21844_v26  ;;  %v3946_v30 = vpop.f32.mrb[31].mxu1  ;;  %19658 = vmatpush3.bf16.msra.mxu0 %v19657_v18  ;;  %v4060_v14 = vld [vmem:[%s23152_s2 + $0x70] sm:$0xff]  ;;  %v4507_v18 = vld [vmem:[%s23154_s12] sm:$0xff]  ;;  %s23180_s2 = sld [smem:[#allocation64_spill]] }
 0x520   :  { %v21904_v31 = vsel %vm4005_vm1, %v3989_v17, %v4021_v21  ;;  %v3991_v32 = vadd.f32 %v21844_v26, %v3946_v30  ;;  %19659 = vmatprep.subr.bf16.mxu0 %v20951_v23  ;;  %v15532_v17 = vld [vmem:[%s23154_s12 + $0x20] sm:$0xff] }
 0x521   :  { %v19660_v25 = vpack.c.bf16 %v21901_v27, %v21904_v31  ;;  %vm4008_vm4 = vcmp.gt.f32.partialorder %v3992_v28, 0.0  ;;  %v4024_v34 = vmul.f32 0.2, %v3992_v28  ;;  %18052 = vmatprep.mubr.f32.mxu1 %v15532_v17 }
 0x522   :  { %vm4007_vm5 = vcmp.gt.f32.partialorder %v3991_v32, 0.0  ;;  %v4023_v36 = vmul.f32 0.2, %v3991_v32 }
 0x523   :  { %v21910_v37 = vsel %vm4008_vm4, %v3992_v28, %v4024_v34  ;;  %19661 = vmatpush3.bf16.msra.mxu0 %v19660_v25 }
 0x524   :  { %v21912_v40 = vsel %vm4007_vm5, %v3991_v32, %v4023_v36  ;;  %19662 = vmatprep.subr.bf16.mxu0 %v20951_v23 }
 0x525   :  { %v19663_v26 = vpack.c.bf16 %v21910_v37, %v21912_v40 }
 0x527   :  { %19664 = vmatpush3.bf16.msra.mxu0 %v19663_v26 }
 0x528   :  { %17946 = vmatprep.subr.mxu0 %v20953_v24 }
 0x52a   :  { %17944 = vmatmul.mubr.f32.vlgmr.msra.gmra.mrb[144].mxu0 %v4041_v42 }
 0x52b   :  { %17948 = vmatprep.mubr.msk.f32.mxu0 %vm20952_vm3, %v20953_v24  ;;  %17947 = vmatpush3.msra.mxu0 %v4042_v38 }
 0x52c   :  { %17951 = vmatprep.subr.mxu0 %v20953_v24 }
 0x5fd   :  { %v4128_v43 = vpop.f32.mrb[144].mxu0 }
 0x5fe   :  { %v17945_v47 = vpop.f32.mrb[145].mxu0  ;;  %17949 = vmatmul.mubr.msk.f32.vlgmr.msra.gmra.mrb[146].mxu0 %vm973_vm2, %v4128_v43 }
 0x5ff   :  { %17953 = vmatprep.mubr.msk.f32.mxu0 %vm20952_vm3, %v20953_v24  ;;  %17952 = vmatpush3.msra.mxu0 %v4044_v56 }
 0x6d1   :  { %v4207_v1 = vpop.f32.mrb[146].mxu0 }
 0x6d2   :  { %v4208_v48 = vadd.f32 %v15511_v45, %v4207_v1  ;;  %v17950_v49 = vpop.f32.mrb[147].mxu0 }
 0x6d4   :  { %v4211_v10 = vmax.f32 %v4208_v48, 0.0 }
 0x6d6   :  { %17954 = vmatmul.mubr.msk.f32.vlgmr.msra.gmra.mrb[148].mxu0 %vm973_vm2, %v4211_v10 }
 0x6d7   :  { %17958 = vmatprep.mubr.msk.f32.mxu0 %vm973_vm2, %v4046_v50 }
 0x7a9   :  { %v4287_v53 = vpop.f32.mrb[148].mxu0 }
 0x7aa   :  { %v4288_v19 = vadd.f32 %v15513_v52, %v4287_v53  ;;  %v17955_v55 = vpop.f32.mrb[149].mxu0 }
 0x7ac   :  { %v15515_v41 = vmul.f32 -1.442695, %v4288_v19 }
 0x7ae   :  { %20568 = vpow2.f32 %v15515_v41 }
 0x7b8   :  { %v20569_v57 = vpop.eup %20568 }
 0x7b9   :  { %v4294_v58 = vadd.f32 1.0, %v20569_v57  ;;  %v15534_v57 = vld [vmem:[%s23154_s12 + $0x30] sm:$0xff] }
 0x7bb   :  { %20570 = vrcp.f32 %v4294_v58  ;;  %v4509_v58 = vld [vmem:[%s23154_s12 + $0x10] sm:$0xff] }
 0x7c5   :  { %v20571_v60 = vpop.eup %20570 }
 0x7c6   :  { %17956 = vmatprep.subr.mxu0 %v20571_v60 }
 0x7c7   :  { %17957 = vmatpush3.msra.mxu0 %v20571_v60  ;;  %v15535_v60 = vld [vmem:[%s23154_s12 + $0x38] sm:$0xff] }
 0x7c8   :  { %17959 = vmatmul.mubr.msk.f32.vlgmr.msra.gmra.mrb[150].mxu0 %vm973_vm2, %v4047_v29  ;;  %v4510_v29 = vld [vmem:[%s23154_s12 + $0x18] sm:$0xff] }
 0x7c9   :  { %17961 = vmatprep.mubr.msk.f32.mxu0 %vm973_vm2, %v4048_v62  ;;  %v15545_v62 = vld [vmem:[%s23154_s12 + $0x40] sm:$0xff] }
 0x7cc   :  { %17962 = vmatmul.mubr.msk.f32.gmra.mrb[152].mxu0 %vm973_vm2, %v4049_v63  ;;  %v15546_v63 = vld [vmem:[%s23154_s12 + $0x48] sm:$0xff] }
 0x7cd   :  { %17964 = vmatprep.mubr.msk.f32.mxu0 %vm973_vm2, %v4050_v0  ;;  %v15547_v0 = vld [vmem:[%s23154_s12 + $0x50] sm:$0xff] }
 0x7d0   :  { %17965 = vmatmul.mubr.msk.f32.gmra.mrb[154].mxu0 %vm973_vm2, %v4051_v2  ;;  %v15548_v2 = vld [vmem:[%s23154_s12 + $0x58] sm:$0xff] }
 0x7d1   :  { %17967 = vmatprep.mubr.msk.f32.mxu0 %vm973_vm2, %v4052_v3  ;;  %v15563_v3 = vld [vmem:[%s23154_s12 + $0x80] sm:$0xff] }
 0x7d4   :  { %17968 = vmatmul.mubr.msk.f32.gmra.mrb[156].mxu0 %vm973_vm2, %v4053_v4  ;;  %v15564_v4 = vld [vmem:[%s23154_s12 + $0x88] sm:$0xff] }
 0x7d5   :  { %17970 = vmatprep.mubr.msk.f32.mxu0 %vm973_vm2, %v4054_v5  ;;  %v15565_v5 = vld [vmem:[%s23154_s12 + $0x90] sm:$0xff] }
 0x7d8   :  { %17971 = vmatmul.mubr.msk.f32.gmra.mrb[158].mxu0 %vm973_vm2, %v4055_v7  ;;  %v15566_v7 = vld [vmem:[%s23154_s12 + $0x98] sm:$0xff] }
 0x7d9   :  { %17973 = vmatprep.mubr.msk.f32.mxu0 %vm973_vm2, %v4056_v8  ;;  %v15581_v8 = vld [vmem:[%s23154_s12 + $0xc0] sm:$0xff] }
 0x7dc   :  { %17974 = vmatmul.mubr.msk.f32.gmra.mrb[160].mxu0 %vm973_vm2, %v4057_v9  ;;  %v15536_v9 = vld [vmem:[%s23155_s3 + $0x8] sm:$0xff] }
 0x7dd   :  { %17976 = vmatprep.mubr.msk.f32.mxu0 %vm973_vm2, %v4058_v11  ;;  %v4596_v11 = vld [vmem:[%s23155_s3] sm:$0xff] }
 0x7e0   :  { %17977 = vmatmul.mubr.msk.f32.gmra.mrb[162].mxu0 %vm973_vm2, %v4059_v12  ;;  %v15582_v12 = vld [vmem:[%s23154_s12 + $0xc8] sm:$0xff] }
 0x7e1   :  { %17979 = vmatprep.mubr.msk.f32.mxu0 %vm973_vm2, %v4060_v14 }
 0x7e4   :  { %17980 = vmatmul.mubr.msk.f32.gmra.mrb[164].mxu0 %vm973_vm2, %v4061_v15 }
 0x7e5   :  { %18014 = vmatprep.mubr.f32.mxu0 %v4507_v18 }
 0x89b   :  { %v17960_v20 = vpop.f32.mrb[150].mxu0 }
 0x89c   :  { %v4491_v21 = vmul.f32 %v17960_v20, %v21848_v35  ;;  %v4411_v22 = vpop.f32.mrb[151].mxu0  ;;  %v15549_v20 = vld [vmem:[%s23155_s3 + $0x10] sm:$0xff] }
 0x89d   :  { %v4490_v28 = vmul.f32 %v4411_v22, %v21851_v39 }
 0x89f   :  { %v21966_v30 = vpack.c.bf16 %v4491_v21, %v4490_v28  ;;  %v17963_v32 = vpop.f32.mrb[152].mxu0 }
 0x8a0   :  { %v4493_v25 = vmul.f32 %v17963_v32, %v21856_v44  ;;  %v4421_v34 = vpop.f32.mrb[153].mxu0 }
 0x8a1   :  { %v4492_v36 = vmul.f32 %v4421_v34, %v21859_v46  ;;  %19666 = vmatprep.subr.bf16.mxu0 %v21966_v30  ;;  %19698 = vmatprep.subr.bf16.mxu1 %v21966_v30 }
 0x8a2   :  { %19668 = vmatpush3.bf16.msra.mxu0 %v21966_v30  ;;  %19700 = vmatpush3.bf16.msra.mxu1 %v21966_v30 }
 0x8a3   :  { %v21974_v35 = vpack.c.bf16 %v4493_v25, %v4492_v36  ;;  %v17966_v26 = vpop.f32.mrb[154].mxu0 }
 0x8a4   :  { %v4495_v39 = vmul.f32 %v17966_v26, %v21865_v51  ;;  %v4431_v42 = vpop.f32.mrb[155].mxu0 }
 0x8a5   :  { %v4494_v38 = vmul.f32 %v4431_v42, %v21868_v54  ;;  %19670 = vmatprep.subr.bf16.mxu0 %v21974_v35  ;;  %19702 = vmatprep.subr.bf16.mxu1 %v21974_v35  ;;  %v15558_v42 = vld [vmem:[%s23155_s3 + $0x18] sm:$0xff] }
 0x8a6   :  { %19672 = vmatpush3.bf16.msra.mxu0 %v21974_v35  ;;  %19704 = vmatpush3.bf16.msra.mxu1 %v21974_v35 }
 0x8a7   :  { %v21982_v44 = vpack.c.bf16 %v4495_v39, %v4494_v38  ;;  %v17969_v46 = vpop.f32.mrb[156].mxu0  ;;  %v15554_v39 = vld [vmem:[%s23154_s12 + $0x60] sm:$0xff]  ;;  %v15555_v38 = vld [vmem:[%s23154_s12 + $0x68] sm:$0xff] }
 0x8a8   :  { %v4497_v43 = vmul.f32 %v17969_v46, %v21874_v59  ;;  %v4441_v47 = vpop.f32.mrb[157].mxu0  ;;  %v15556_v46 = vld [vmem:[%s23154_s12 + $0x70] sm:$0xff] }
 0x8a9   :  { %v4496_v56 = vmul.f32 %v4441_v47, %v21877_v61  ;;  %19674 = vmatprep.subr.bf16.mxu0 %v21982_v44  ;;  %19706 = vmatprep.subr.bf16.mxu1 %v21982_v44  ;;  %v15567_v47 = vld [vmem:[%s23155_s3 + $0x20] sm:$0xff] }
 0x8aa   :  { %19676 = vmatpush3.bf16.msra.mxu0 %v21982_v44  ;;  %19708 = vmatpush3.bf16.msra.mxu1 %v21982_v44 }
 0x8ab   :  { %v21990_v51 = vpack.c.bf16 %v4497_v43, %v4496_v56  ;;  %v17972_v54 = vpop.f32.mrb[158].mxu0  ;;  %v15557_v43 = vld [vmem:[%s23154_s12 + $0x78] sm:$0xff] }
 0x8ac   :  { %v4499_v45 = vmul.f32 %v17972_v54, %v21883_v33  ;;  %v4451_v1 = vpop.f32.mrb[159].mxu0 }
 0x8ad   :  { %v4498_v48 = vmul.f32 %v4451_v1, %v21886_v6  ;;  %19678 = vmatprep.subr.bf16.mxu0 %v21990_v51  ;;  %19710 = vmatprep.subr.bf16.mxu1 %v21990_v51 }
 0x8ae   :  { %19680 = vmatpush3.bf16.msra.mxu0 %v21990_v51  ;;  %19712 = vmatpush3.bf16.msra.mxu1 %v21990_v51 }
 0x8af   :  { %v21998_v59 = vpack.c.bf16 %v4499_v45, %v4498_v48  ;;  %v17975_v61 = vpop.f32.mrb[160].mxu0  ;;  %v15583_v48 = vld [vmem:[%s23154_s12 + $0xd0] sm:$0xff] }
 0x8b0   :  { %v4501_v49 = vmul.f32 %v17975_v61, %v21892_v13  ;;  %v4461_v10 = vpop.f32.mrb[161].mxu0  ;;  %v15584_v61 = vld [vmem:[%s23154_s12 + $0xd8] sm:$0xff] }
 0x8b1   :  { %v4500_v50 = vmul.f32 %v4461_v10, %v21895_v16  ;;  %19682 = vmatprep.subr.bf16.mxu0 %v21998_v59  ;;  %19714 = vmatprep.subr.bf16.mxu1 %v21998_v59 }
 0x8b2   :  { %19684 = vmatpush3.bf16.msra.mxu0 %v21998_v59  ;;  %19716 = vmatpush3.bf16.msra.mxu1 %v21998_v59 }
 0x8b3   :  { %v22006_v33 = vpack.c.bf16 %v4501_v49, %v4500_v50  ;;  %v17978_v6 = vpop.f32.mrb[162].mxu0  ;;  %v15590_v49 = vld [vmem:[%s23154_s12 + $0xe0] sm:$0xff] }
 0x8b4   :  { %v4503_v52 = vmul.f32 %v17978_v6, %v21901_v27  ;;  %v4471_v53 = vpop.f32.mrb[163].mxu0  ;;  %v15591_v6 = vld [vmem:[%s23154_s12 + $0xe8] sm:$0xff] }
 0x8b5   :  { %v4502_v19 = vmul.f32 %v4471_v53, %v21904_v31  ;;  %19686 = vmatprep.subr.bf16.mxu0 %v22006_v33  ;;  %19718 = vmatprep.subr.bf16.mxu1 %v22006_v33  ;;  %v15593_v53 = vld [vmem:[%s23154_s12 + $0xf8] sm:$0xff] }
 0x8b6   :  { %19688 = vmatpush3.bf16.msra.mxu0 %v22006_v33  ;;  %19720 = vmatpush3.bf16.msra.mxu1 %v22006_v33 }
 0x8b7   :  { %v22014_v13 = vpack.c.bf16 %v4503_v52, %v4502_v19  ;;  %v17981_v16 = vpop.f32.mrb[164].mxu0  ;;  %v15592_v52 = vld [vmem:[%s23154_s12 + $0xf0] sm:$0xff] }
 0x8b8   :  { %v4505_v55 = vmul.f32 %v17981_v16, %v21910_v37  ;;  %v4481_v27 = vpop.f32.mrb[165].mxu0  ;;  %v15533_v37 = vld [vmem:[%s23154_s12 + $0x28] sm:$0xff] }
 0x8b9   :  { %v4504_v31 = vmul.f32 %v4481_v27, %v21912_v40  ;;  %19690 = vmatprep.subr.bf16.mxu0 %v22014_v13  ;;  %19722 = vmatprep.subr.bf16.mxu1 %v22014_v13  ;;  %v4508_v40 = vld [vmem:[%s23154_s12 + $0x8] sm:$0xff] }
 0x8ba   :  { %19692 = vmatpush3.bf16.msra.mxu0 %v22014_v13  ;;  %19724 = vmatpush3.bf16.msra.mxu1 %v22014_v13 }
 0x8bb   :  { %v22022_v41 = vpack.c.bf16 %v4505_v55, %v4504_v31  ;;  %v15572_v31 = vld [vmem:[%s23154_s12 + $0xa0] sm:$0xff] }
 0x8bd   :  { %19694 = vmatprep.subr.bf16.mxu0 %v22022_v41  ;;  %19726 = vmatprep.subr.bf16.mxu1 %v22022_v41 }
 0x8be   :  { %19696 = vmatpush3.bf16.msra.mxu0 %v22022_v41  ;;  %19728 = vmatpush3.bf16.msra.mxu1 %v22022_v41 }
 0x8bf   :  { %19730 = vmatprep.subr.bf16.mxu1 %v21966_v30  ;;  %18058 = vmatprep.subr.mxu0 %v15536_v9 }
 0x8c1   :  { %18053 = vmatmul.mubr.f32.vlgmr.msra.gmra.mrb[32].mxu1 %v15533_v37  ;;  %18015 = vmatmul.mubr.f32.vlgmr.msra.gmra.mrb[166].mxu0 %v4508_v40  ;;  %v15576_v37 = vld [vmem:[%s23155_s3 + $0x28] sm:$0xff] }
 0x8c2   :  { %19732 = vmatpush3.bf16.msra.mxu1 %v21966_v30  ;;  %18055 = vmatprep.mubr.f32.mxu1 %v15534_v57  ;;  %v15573_v40 = vld [vmem:[%s23154_s12 + $0xa8] sm:$0xff]  ;;  %v15574_v57 = vld [vmem:[%s23154_s12 + $0xb0] sm:$0xff] }
 0x8c3   :  { %19734 = vmatprep.subr.bf16.mxu1 %v21974_v35  ;;  %18017 = vmatprep.mubr.f32.mxu0 %v4509_v58  ;;  %v15575_v58 = vld [vmem:[%s23154_s12 + $0xb8] sm:$0xff] }
 0x8c4   :  { %18059 = vmatpush3.msra.mxu0 %v15536_v9 }
 0x8c5   :  { %18056 = vmatmul.mubr.f32.gmra.mrb[34].mxu1 %v15535_v60  ;;  %18018 = vmatmul.mubr.f32.gmra.mrb[168].mxu0 %v4510_v29  ;;  %v15585_v60 = vld [vmem:[%s23155_s3 + $0x30] sm:$0xff] }
 0x8c6   :  { %19736 = vmatpush3.bf16.msra.mxu1 %v21974_v35  ;;  %18106 = vmatprep.mubr.f32.mxu1 %v15545_v62 }
 0x8c7   :  { %19738 = vmatprep.subr.bf16.mxu1 %v21982_v44  ;;  %18066 = vmatprep.subr.mxu0 %v4596_v11 }
 0x8ca   :  { %19740 = vmatpush3.bf16.msra.mxu1 %v21982_v44 }
 0x8cb   :  { %19742 = vmatprep.subr.bf16.mxu1 %v21990_v51 }
 0x8ce   :  { %19744 = vmatpush3.bf16.msra.mxu1 %v21990_v51 }
 0x8cf   :  { %19746 = vmatprep.subr.bf16.mxu1 %v21998_v59 }
 0x8d2   :  { %19748 = vmatpush3.bf16.msra.mxu1 %v21998_v59 }
 0x8d3   :  { %19750 = vmatprep.subr.bf16.mxu1 %v22006_v33 }
 0x8d6   :  { %19752 = vmatpush3.bf16.msra.mxu1 %v22006_v33 }
 0x8d7   :  { %19754 = vmatprep.subr.bf16.mxu1 %v22014_v13 }
 0x8da   :  { %19756 = vmatpush3.bf16.msra.mxu1 %v22014_v13 }
 0x8db   :  { %19758 = vmatprep.subr.bf16.mxu1 %v22022_v41 }
 0x8de   :  { %19760 = vmatpush3.bf16.msra.mxu1 %v22022_v41 }
 0x8df   :  { %19794 = vmatprep.subr.bf16.mxu1 %v21966_v30 }
 0x8e1   :  { %18107 = vmatmul.mubr.f32.vlgmr.msra.gmra.mrb[36].mxu1 %v15546_v63 }
 0x8e2   :  { %19796 = vmatpush3.bf16.msra.mxu1 %v21966_v30  ;;  %18109 = vmatprep.mubr.f32.mxu1 %v15547_v0 }
 0x8e3   :  { %19798 = vmatprep.subr.bf16.mxu1 %v21974_v35 }
 0x8e5   :  { %18110 = vmatmul.mubr.f32.gmra.mrb[38].mxu1 %v15548_v2 }
 0x8e6   :  { %19800 = vmatpush3.bf16.msra.mxu1 %v21974_v35  ;;  %18198 = vmatprep.mubr.f32.mxu1 %v15563_v3 }
 0x8e7   :  { %19802 = vmatprep.subr.bf16.mxu1 %v21982_v44 }
 0x8ea   :  { %19804 = vmatpush3.bf16.msra.mxu1 %v21982_v44 }
 0x8eb   :  { %19806 = vmatprep.subr.bf16.mxu1 %v21990_v51 }
 0x8ee   :  { %19808 = vmatpush3.bf16.msra.mxu1 %v21990_v51 }
 0x8ef   :  { %19810 = vmatprep.subr.bf16.mxu1 %v21998_v59 }
 0x8f2   :  { %19812 = vmatpush3.bf16.msra.mxu1 %v21998_v59 }
 0x8f3   :  { %19814 = vmatprep.subr.bf16.mxu1 %v22006_v33 }
 0x8f6   :  { %19816 = vmatpush3.bf16.msra.mxu1 %v22006_v33 }
 0x8f7   :  { %19818 = vmatprep.subr.bf16.mxu1 %v22014_v13 }
 0x8fa   :  { %19820 = vmatpush3.bf16.msra.mxu1 %v22014_v13 }
 0x8fb   :  { %19822 = vmatprep.subr.bf16.mxu1 %v22022_v41 }
 0x8fe   :  { %19824 = vmatpush3.bf16.msra.mxu1 %v22022_v41 }
 0x8ff   :  { %19858 = vmatprep.subr.bf16.mxu1 %v21966_v30 }
 0x901   :  { %18199 = vmatmul.mubr.f32.vlgmr.msra.gmra.mrb[40].mxu1 %v15564_v4 }
 0x902   :  { %19860 = vmatpush3.bf16.msra.mxu1 %v21966_v30  ;;  %18201 = vmatprep.mubr.f32.mxu1 %v15565_v5 }
 0x903   :  { %19862 = vmatprep.subr.bf16.mxu1 %v21974_v35 }
 0x905   :  { %18202 = vmatmul.mubr.f32.gmra.mrb[42].mxu1 %v15566_v7  ;;  %v15594_v7 = vld [vmem:[%s23155_s3 + $0x38] sm:$0xff] }
 0x906   :  { %19864 = vmatpush3.bf16.msra.mxu1 %v21974_v35  ;;  %18290 = vmatprep.mubr.f32.mxu1 %v15581_v8 }
 0x907   :  { %19866 = vmatprep.subr.bf16.mxu1 %v21982_v44 }
 0x90a   :  { %19868 = vmatpush3.bf16.msra.mxu1 %v21982_v44 }
 0x90b   :  { %19870 = vmatprep.subr.bf16.mxu1 %v21990_v51 }
 0x90e   :  { %19872 = vmatpush3.bf16.msra.mxu1 %v21990_v51 }
 0x90f   :  { %19874 = vmatprep.subr.bf16.mxu1 %v21998_v59 }
 0x912   :  { %19876 = vmatpush3.bf16.msra.mxu1 %v21998_v59 }
 0x913   :  { %19878 = vmatprep.subr.bf16.mxu1 %v22006_v33 }
 0x916   :  { %19880 = vmatpush3.bf16.msra.mxu1 %v22006_v33 }
 0x917   :  { %19882 = vmatprep.subr.bf16.mxu1 %v22014_v13 }
 0x91a   :  { %19884 = vmatpush3.bf16.msra.mxu1 %v22014_v13 }
 0x91b   :  { %19886 = vmatprep.subr.bf16.mxu1 %v22022_v41 }
 0x91e   :  { %19888 = vmatpush3.bf16.msra.mxu1 %v22022_v41 }
 0x91f   :  { %19890 = vmatprep.subr.bf16.mxu1 %v21966_v30 }
 0x921   :  { %18291 = vmatmul.mubr.f32.vlgmr.msra.gmra.mrb[44].mxu1 %v15582_v12 }
 0x922   :  { %19892 = vmatpush3.bf16.msra.mxu1 %v21966_v30  ;;  %18293 = vmatprep.mubr.f32.mxu1 %v15583_v48  ;;  %v15632_v48 = vld [vmem:[%s23156_s27 + $0x50] sm:$0xff] }
 0x923   :  { %19894 = vmatprep.subr.bf16.mxu1 %v21974_v35 }
 0x925   :  { %18294 = vmatmul.mubr.f32.gmra.mrb[46].mxu1 %v15584_v61  ;;  %v6260_v61 = vld [vmem:[%s23156_s27 + $0x18] sm:$0xff] }
 0x926   :  { %19896 = vmatpush3.bf16.msra.mxu1 %v21974_v35  ;;  %18336 = vmatprep.mubr.f32.mxu1 %v15590_v49  ;;  %v15633_v49 = vld [vmem:[%s23156_s27 + $0x58] sm:$0xff] }
 0x927   :  { %19898 = vmatprep.subr.bf16.mxu1 %v21982_v44 }
 0x92a   :  { %19900 = vmatpush3.bf16.msra.mxu1 %v21982_v44 }
 0x92b   :  { %19902 = vmatprep.subr.bf16.mxu1 %v21990_v51 }
 0x92e   :  { %19904 = vmatpush3.bf16.msra.mxu1 %v21990_v51 }
 0x92f   :  { %19906 = vmatprep.subr.bf16.mxu1 %v21998_v59 }
 0x932   :  { %19908 = vmatpush3.bf16.msra.mxu1 %v21998_v59 }
 0x933   :  { %19910 = vmatprep.subr.bf16.mxu1 %v22006_v33 }
 0x936   :  { %19912 = vmatpush3.bf16.msra.mxu1 %v22006_v33 }
 0x937   :  { %19914 = vmatprep.subr.bf16.mxu1 %v22014_v13 }
 0x93a   :  { %19916 = vmatpush3.bf16.msra.mxu1 %v22014_v13 }
 0x93b   :  { %19918 = vmatprep.subr.bf16.mxu1 %v22022_v41 }
 0x93e   :  { %19920 = vmatpush3.bf16.msra.mxu1 %v22022_v41 }
 0x941   :  { %18337 = vmatmul.mubr.f32.vlgmr.msra.gmra.mrb[48].mxu1 %v15591_v6  ;;  %v15614_v6 = vld [vmem:[%s23156_s27 + $0x28] sm:$0xff] }
 0x942   :  { %18339 = vmatprep.mubr.f32.mxu1 %v15592_v52  ;;  %v15644_v52 = vld [vmem:[%s23156_s27 + $0x68] sm:$0xff] }
 0x945   :  { %18340 = vmatmul.mubr.f32.gmra.mrb[50].mxu1 %v15593_v53  ;;  %v15615_v53 = vld [vmem:[%s23156_s27 + $0x30] sm:$0xff] }
 0x994   :  { %v18054_v14 = vpop.f32.mrb[32].mxu1  ;;  %v18016_v15 = vpop.f32.mrb[166].mxu0 }
 0x995   :  { %v4668_v17 = vpop.f32.mrb[33].mxu1  ;;  %v4577_v18 = vpop.f32.mrb[167].mxu0 }
 0x996   :  { %18060 = vmatprep.mubr.msk.f32.mxu0 %vm973_vm2, %v4668_v17 }
 0x997   :  { %18061 = vmatmul.mubr.msk.f32.vlgmr.msra.gmra.mrb[170].mxu0 %vm973_vm2, %v18054_v14  ;;  %v15630_v14 = vld [vmem:[%s23156_s27 + $0x40] sm:$0xff] }
 0x998   :  { %v18057_v21 = vpop.f32.mrb[34].mxu1  ;;  %18067 = vmatpush3.msra.mxu0 %v4596_v11  ;;  %v18019_v22 = vpop.f32.mrb[168].mxu0  ;;  %v15599_v11 = vld [vmem:[%s23154_s12 + $0x100] sm:$0xff] }
 0x999   :  { %v4678_v28 = vpop.f32.mrb[35].mxu1  ;;  %18112 = vmatprep.subr.mxu0 %v15549_v20  ;;  %v4587_v32 = vpop.f32.mrb[169].mxu0 }
 0x99a   :  { %18063 = vmatprep.mubr.msk.f32.mxu0 %vm973_vm2, %v4678_v28 }
 0x99b   :  { %18064 = vmatmul.mubr.msk.f32.gmra.mrb[172].mxu0 %vm973_vm2, %v18057_v21 }
 0x99c   :  { %18068 = vmatprep.mubr.msk.f32.mxu0 %vm973_vm2, %v4577_v18 }
 0x99f   :  { %18069 = vmatmul.mubr.msk.f32.vlgmr.msra.gmra.mrb[170].mxu0 %vm973_vm2, %v18016_v15  ;;  %v15608_v15 = vld [vmem:[%s23157_s10] ss:$0 sm:$0xff] }
 0x9a0   :  { %18113 = vmatpush3.msra.mxu0 %v15549_v20  ;;  %18071 = vmatprep.mubr.msk.f32.mxu0 %vm973_vm2, %v4587_v32 }
 0x9a1   :  { %19762 = vmatprep.subr.bf16.mxu0 %v21966_v30 }
 0x9a3   :  { %18072 = vmatmul.mubr.msk.f32.gmra.mrb[172].mxu0 %vm973_vm2, %v18019_v22 }
 0x9b4   :  { %v18108_v25 = vpop.f32.mrb[36].mxu1 }
 0x9b5   :  { %v4954_v34 = vpop.f32.mrb[37].mxu1 }
 0x9b6   :  { %18114 = vmatprep.mubr.msk.f32.mxu0 %vm973_vm2, %v4954_v34 }
 0x9b7   :  { %18115 = vmatmul.mubr.msk.f32.vlgmr.msra.gmra.mrb[170].mxu0 %vm973_vm2, %v18108_v25 }
 0x9b8   :  { %19764 = vmatpush3.bf16.msra.mxu0 %v21966_v30  ;;  %v18111_v36 = vpop.f32.mrb[38].mxu1 }
 0x9b9   :  { %19766 = vmatprep.subr.bf16.mxu0 %v21974_v35  ;;  %v4964_v26 = vpop.f32.mrb[39].mxu1 }
 0x9ba   :  { %18117 = vmatprep.mubr.msk.f32.mxu0 %vm973_vm2, %v4964_v26 }
 0x9bb   :  { %18118 = vmatmul.mubr.msk.f32.gmra.mrb[172].mxu0 %vm973_vm2, %v18111_v36 }
 0x9bc   :  { %19768 = vmatpush3.bf16.msra.mxu0 %v21974_v35  ;;  %18152 = vmatprep.mubr.f32.mxu0 %v15554_v39 }
 0x9bd   :  { %19770 = vmatprep.subr.bf16.mxu0 %v21982_v44 }
 0x9c0   :  { %19772 = vmatpush3.bf16.msra.mxu0 %v21982_v44 }
 0x9c1   :  { %19774 = vmatprep.subr.bf16.mxu0 %v21990_v51 }
 0x9c4   :  { %19776 = vmatpush3.bf16.msra.mxu0 %v21990_v51 }
 0x9c5   :  { %19778 = vmatprep.subr.bf16.mxu0 %v21998_v59 }
 0x9c8   :  { %19780 = vmatpush3.bf16.msra.mxu0 %v21998_v59 }
 0x9c9   :  { %19782 = vmatprep.subr.bf16.mxu0 %v22006_v33 }
 0x9cc   :  { %19784 = vmatpush3.bf16.msra.mxu0 %v22006_v33 }
 0x9cd   :  { %19786 = vmatprep.subr.bf16.mxu0 %v22014_v13 }
 0x9d0   :  { %19788 = vmatpush3.bf16.msra.mxu0 %v22014_v13 }
 0x9d1   :  { %19790 = vmatprep.subr.bf16.mxu0 %v22022_v41 }
 0x9d4   :  { %19792 = vmatpush3.bf16.msra.mxu0 %v22022_v41  ;;  %v18200_v56 = vpop.f32.mrb[40].mxu1 }
 0x9d5   :  { %18158 = vmatprep.subr.mxu0 %v15558_v42  ;;  %v5340_v54 = vpop.f32.mrb[41].mxu1 }
 0x9d7   :  { %18153 = vmatmul.mubr.f32.vlgmr.msra.gmra.mrb[174].mxu0 %v15555_v38 }
 0x9d8   :  { %18155 = vmatprep.mubr.f32.mxu0 %v15556_v46  ;;  %18159 = vmatpush3.msra.mxu0 %v15558_v42  ;;  %v18203_v45 = vpop.f32.mrb[42].mxu1 }
 0x9d9   :  { %18204 = vmatprep.subr.mxu0 %v15567_v47  ;;  %v5350_v1 = vpop.f32.mrb[43].mxu1 }
 0x9db   :  { %18156 = vmatmul.mubr.f32.gmra.mrb[176].mxu0 %v15557_v43 }
 0x9f4   :  { %v22148_v10 = vpop.f32.mrb[44].mxu1 }
 0x9f5   :  { %v22150_v50 = vpop.f32.mrb[45].mxu1 }
 0x9f8   :  { %v18295_v29 = vpop.f32.mrb[46].mxu1 }
 0x9f9   :  { %v5736_v62 = vpop.f32.mrb[47].mxu1 }
 0xa14   :  { %v18338_v63 = vpop.f32.mrb[48].mxu1 }
 0xa15   :  { %v5919_v0 = vpop.f32.mrb[49].mxu1 }
 0xa18   :  { %v18341_v2 = vpop.f32.mrb[50].mxu1 }
 0xa19   :  { %v5929_v3 = vpop.f32.mrb[51].mxu1 }
 0xaaa   :  { %v18154_v19 = vpop.f32.mrb[174].mxu0 }
 0xaab   :  { %v5147_v16 = vpop.f32.mrb[175].mxu0 }
 0xaac   :  { %18160 = vmatprep.mubr.msk.f32.mxu0 %vm973_vm2, %v5147_v16  ;;  %v15616_v16 = vld [vmem:[%s23156_s27 + $0x38] sm:$0xff] }
 0xaad   :  { %18161 = vmatmul.mubr.msk.f32.vlgmr.msra.gmra.mrb[170].mxu0 %vm973_vm2, %v18154_v19  ;;  %v15645_v19 = vld [vmem:[%s23156_s27 + $0x70] sm:$0xff] }
 0xaae   :  { %18205 = vmatpush3.msra.mxu0 %v15567_v47  ;;  %v18157_v55 = vpop.f32.mrb[176].mxu0 }
 0xaaf   :  { %19826 = vmatprep.subr.bf16.mxu0 %v21966_v30  ;;  %v5157_v27 = vpop.f32.mrb[177].mxu0 }
 0xab0   :  { %18163 = vmatprep.mubr.msk.f32.mxu0 %vm973_vm2, %v5157_v27  ;;  %v15656_v27 = vld [vmem:[%s23156_s27 + $0x80] sm:$0xff] }
 0xab1   :  { %18164 = vmatmul.mubr.msk.f32.gmra.mrb[172].mxu0 %vm973_vm2, %v18157_v55  ;;  %v15646_v55 = vld [vmem:[%s23156_s27 + $0x78] sm:$0xff] }
 0xab2   :  { %18206 = vmatprep.mubr.msk.f32.mxu0 %vm973_vm2, %v5340_v54  ;;  %v6258_v54 = vld [vmem:[%s23156_s27 + $0x8] sm:$0xff] }
 0xab5   :  { %18207 = vmatmul.mubr.msk.f32.vlgmr.msra.gmra.mrb[170].mxu0 %vm973_vm2, %v18200_v56 }
 0xab6   :  { %19828 = vmatpush3.bf16.msra.mxu0 %v21966_v30  ;;  %18209 = vmatprep.mubr.msk.f32.mxu0 %vm973_vm2, %v5350_v1  ;;  %v6259_v1 = vld [vmem:[%s23156_s27 + $0x10] sm:$0xff] }
 0xab7   :  { %19830 = vmatprep.subr.bf16.mxu0 %v21974_v35 }
 0xab9   :  { %18210 = vmatmul.mubr.msk.f32.gmra.mrb[172].mxu0 %vm973_vm2, %v18203_v45  ;;  %v15631_v45 = vld [vmem:[%s23156_s27 + $0x48] sm:$0xff] }
 0xaba   :  { %19832 = vmatpush3.bf16.msra.mxu0 %v21974_v35  ;;  %18244 = vmatprep.mubr.f32.mxu0 %v15572_v31  ;;  %v15657_v31 = vld [vmem:[%s23156_s27 + $0x88] sm:$0xff] }
 0xabb   :  { %19834 = vmatprep.subr.bf16.mxu0 %v21982_v44 }
 0xabe   :  { %19836 = vmatpush3.bf16.msra.mxu0 %v21982_v44 }
 0xabf   :  { %19838 = vmatprep.subr.bf16.mxu0 %v21990_v51 }
 0xac2   :  { %19840 = vmatpush3.bf16.msra.mxu0 %v21990_v51 }
 0xac3   :  { %19842 = vmatprep.subr.bf16.mxu0 %v21998_v59 }
 0xac6   :  { %19844 = vmatpush3.bf16.msra.mxu0 %v21998_v59 }
 0xac7   :  { %19846 = vmatprep.subr.bf16.mxu0 %v22006_v33 }
 0xaca   :  { %19848 = vmatpush3.bf16.msra.mxu0 %v22006_v33 }
 0xacb   :  { %19850 = vmatprep.subr.bf16.mxu0 %v22014_v13 }
 0xace   :  { %19852 = vmatpush3.bf16.msra.mxu0 %v22014_v13 }
 0xacf   :  { %19854 = vmatprep.subr.bf16.mxu0 %v22022_v41 }
 0xad2   :  { %19856 = vmatpush3.bf16.msra.mxu0 %v22022_v41 }
 0xad3   :  { %18250 = vmatprep.subr.mxu0 %v15576_v37 }
 0xad5   :  { %18245 = vmatmul.mubr.f32.vlgmr.msra.gmra.mrb[178].mxu0 %v15573_v40  ;;  %v15659_v40 = vld [vmem:[%s23156_s27 + $0x98] sm:$0xff] }
 0xad6   :  { %18247 = vmatprep.mubr.f32.mxu0 %v15574_v57  ;;  %18251 = vmatpush3.msra.mxu0 %v15576_v37  ;;  %v15658_v37 = vld [vmem:[%s23156_s27 + $0x90] sm:$0xff]  ;;  %v15669_v57 = vld [vmem:[%s23156_s27 + $0xa0] sm:$0xff] }
 0xad7   :  { %18296 = vmatprep.subr.mxu0 %v15585_v60 }
 0xad9   :  { %18248 = vmatmul.mubr.f32.gmra.mrb[180].mxu0 %v15575_v58  ;;  %v15670_v58 = vld [vmem:[%s23156_s27 + $0xa8] sm:$0xff] }
 0xba8   :  { %v18246_v4 = vpop.f32.mrb[178].mxu0 }
 0xba9   :  { %v5533_v5 = vpop.f32.mrb[179].mxu0 }
 0xbaa   :  { %18252 = vmatprep.mubr.msk.f32.mxu0 %vm973_vm2, %v5533_v5  ;;  %v15697_v5 = vld [vmem:[%s23156_s27 + $0xf0] sm:$0xff] }
 0xbab   :  { %18253 = vmatmul.mubr.msk.f32.vlgmr.msra.gmra.mrb[170].mxu0 %vm973_vm2, %v18246_v4  ;;  %v15696_v4 = vld [vmem:[%s23156_s27 + $0xe8] sm:$0xff] }
 0xbac   :  { %v18249_v8 = vpop.f32.mrb[180].mxu0  ;;  %18297 = vmatpush3.msra.mxu0 %v15585_v60  ;;  %v15671_v60 = vld [vmem:[%s23156_s27 + $0xb0] sm:$0xff] }
 0xbad   :  { %v5543_v9 = vpop.f32.mrb[181].mxu0  ;;  %18342 = vmatprep.subr.mxu0 %v15594_v7 }
 0xbae   :  { %18255 = vmatprep.mubr.msk.f32.mxu0 %vm973_vm2, %v5543_v9  ;;  %v15709_v9 = vld [vmem:[%s23156_s27 + $0x108] sm:$0xff] }
 0xbaf   :  { %18256 = vmatmul.mubr.msk.f32.gmra.mrb[172].mxu0 %vm973_vm2, %v18249_v8  ;;  %v15708_v8 = vld [vmem:[%s23156_s27 + $0x100] sm:$0xff] }
 0xbb0   :  { %18298 = vmatprep.mubr.msk.f32.mxu0 %vm973_vm2, %v22150_v50  ;;  %v15643_v50 = vld [vmem:[%s23156_s27 + $0x60] sm:$0xff] }
 0xbb3   :  { %18299 = vmatmul.mubr.msk.f32.vlgmr.msra.gmra.mrb[170].mxu0 %vm973_vm2, %v22148_v10  ;;  %v15613_v10 = vld [vmem:[%s23156_s27 + $0x20] sm:$0xff] }
 0xbb4   :  { %18343 = vmatpush3.msra.mxu0 %v15594_v7  ;;  %18301 = vmatprep.mubr.msk.f32.mxu0 %vm973_vm2, %v5736_v62  ;;  %v15682_v62 = vld [vmem:[%s23156_s27 + $0xc0] sm:$0xff]  ;;  %v15698_v7 = vld [vmem:[%s23156_s27 + $0xf8] sm:$0xff] }
 0xbb5   :  { %19922 = vmatprep.subr.bf16.mxu0 %v21966_v30 }
 0xbb7   :  { %18302 = vmatmul.mubr.msk.f32.gmra.mrb[172].mxu0 %vm973_vm2, %v18295_v29  ;;  %v15672_v29 = vld [vmem:[%s23156_s27 + $0xb8] sm:$0xff] }
 0xbb8   :  { %18344 = vmatprep.mubr.msk.f32.mxu0 %vm973_vm2, %v5919_v0  ;;  %v15684_v0 = vld [vmem:[%s23156_s27 + $0xd0] sm:$0xff] }
 0xbbb   :  { %18345 = vmatmul.mubr.msk.f32.vlgmr.msra.gmra.mrb[170].mxu0 %vm973_vm2, %v18338_v63  ;;  %v15683_v63 = vld [vmem:[%s23156_s27 + $0xc8] sm:$0xff] }
 0xbbc   :  { %19924 = vmatpush3.bf16.msra.mxu0 %v21966_v30  ;;  %18347 = vmatprep.mubr.msk.f32.mxu0 %vm973_vm2, %v5929_v3  ;;  %v15603_v30 = vld [vmem:[%s23155_s3 + $0x40] sm:$0xff] }
 0xbbd   :  { %19926 = vmatprep.subr.bf16.mxu0 %v21974_v35  ;;  %v15695_v3 = vld [vmem:[%s23156_s27 + $0xe0] sm:$0xff] }
 0xbbf   :  { %18348 = vmatmul.mubr.msk.f32.gmra.mrb[172].mxu0 %vm973_vm2, %v18341_v2  ;;  %v15685_v2 = vld [vmem:[%s23156_s27 + $0xd8] sm:$0xff] }
 0xbc0   :  { %19928 = vmatpush3.bf16.msra.mxu0 %v21974_v35  ;;  %18382 = vmatprep.mubr.f32.mxu0 %v15599_v11  ;;  %v15600_v35 = vld [vmem:[%s23154_s12 + $0x108] sm:$0xff]  ;;  %v15710_v11 = vld [vmem:[%s23156_s27 + $0x110] sm:$0xff] }
 0xbc1   :  { %19930 = vmatprep.subr.bf16.mxu0 %v21982_v44 }
 0xbc4   :  { %19932 = vmatpush3.bf16.msra.mxu0 %v21982_v44  ;;  %v15601_v44 = vld [vmem:[%s23154_s12 + $0x110] sm:$0xff] }
 0xbc5   :  { %19934 = vmatprep.subr.bf16.mxu0 %v21990_v51 }
 0xbc8   :  { %19936 = vmatpush3.bf16.msra.mxu0 %v21990_v51  ;;  %v15602_v51 = vld [vmem:[%s23154_s12 + $0x118] sm:$0xff] }
 0xbc9   :  { %19938 = vmatprep.subr.bf16.mxu0 %v21998_v59 }
 0xbcc   :  { %19940 = vmatpush3.bf16.msra.mxu0 %v21998_v59 }
 0xbcd   :  { %19942 = vmatprep.subr.bf16.mxu0 %v22006_v33 }
 0xbd0   :  { %19944 = vmatpush3.bf16.msra.mxu0 %v22006_v33 }
 0xbd1   :  { %19946 = vmatprep.subr.bf16.mxu0 %v22014_v13 }
 0xbd4   :  { %19948 = vmatpush3.bf16.msra.mxu0 %v22014_v13 }
 0xbd5   :  { %19950 = vmatprep.subr.bf16.mxu0 %v22022_v41 }
 0xbd8   :  { %19952 = vmatpush3.bf16.msra.mxu0 %v22022_v41  ;;  %v6257_v41 = vld [vmem:[%s23156_s27] sm:$0xff] }
 0xbd9   :  { %18388 = vmatprep.subr.mxu0 %v15603_v30  ;;  %18404 = vmatprep.mubr.msk.f32.mxu1 %vm6261_vm6, %v6257_v41 }
 0xbdb   :  { %18383 = vmatmul.mubr.f32.vlgmr.msra.gmra.mrb[182].mxu0 %v15600_v35  ;;  %v15621_v35 = vld [vmem:[%s23158_s6 + $0x8] sm:$0xff] }
 0xbdc   :  { %18385 = vmatprep.mubr.f32.mxu0 %v15601_v44  ;;  %18389 = vmatpush3.msra.mxu0 %v15603_v30  ;;  %v15711_v30 = vld [vmem:[%s23156_s27 + $0x118] sm:$0xff]  ;;  %v6359_v44 = vld [vmem:[%s23158_s6] sm:$0xff] }
 0xbdf   :  { %18386 = vmatmul.mubr.f32.gmra.mrb[184].mxu0 %v15602_v51 }
 0xcae   :  { %v18384_v59 = vpop.f32.mrb[182].mxu0 }
 0xcaf   :  { %v6112_v33 = vpop.f32.mrb[183].mxu0 }
 0xcb0   :  { %18390 = vmatprep.mubr.msk.f32.mxu0 %vm973_vm2, %v6112_v33 }
 0xcb1   :  { %18391 = vmatmul.mubr.msk.f32.vlgmr.msra.gmra.mrb[170].mxu0 %vm973_vm2, %v18384_v59 }
 0xcb2   :  { %v18387_v13 = vpop.f32.mrb[184].mxu0 }
 0xcb3   :  { %v6122_v12 = vpop.f32.mrb[185].mxu0 }
 0xcb4   :  { %18393 = vmatprep.mubr.msk.f32.mxu0 %vm973_vm2, %v6122_v12 }
 0xcb5   :  { %18394 = vmatmul.mubr.msk.f32.gmra.mrb[172].mxu0 %vm973_vm2, %v18387_v13 }
 0xcb6   :  { %18448 = vmatprep.mubr.msk.f32.mxu0 %vm6261_vm6, %v15630_v14 }
 0xd84   :  { %v18392_v17 = vpop.f32.mrb[170].mxu0 }
 0xd85   :  { %v6241_v18 = vadd.f32 %v18392_v17, %v15608_v15  ;;  %v6211_v20 = vpop.f32.mrb[171].mxu0 }
 0xd86   :  { %v6240_v21 = vadd.f32 %v15608_v15, %v6211_v20 }
 0xd87   :  { %vm6245_vm7 = vcmp.gt.f32.partialorder %v6241_v18, 0.0  ;;  %v6249_v22 = vmul.f32 0.2, %v6241_v18 }
 0xd88   :  { %vm6244_vm8 = vcmp.gt.f32.partialorder %v6240_v21, 0.0  ;;  %v6248_v28 = vmul.f32 0.2, %v6240_v21  ;;  %v18395_v32 = vpop.f32.mrb[172].mxu0 }
 0xd89   :  { %v6253_v25 = vsel %vm6245_vm7, %v6241_v18, %v6249_v22  ;;  %v6243_v34 = vadd.f32 %v18395_v32, %v15608_v15  ;;  %v6221_v36 = vpop.f32.mrb[173].mxu0  ;;  %v15638_v22 = vld [vmem:[%s23158_s6 + $0x10] sm:$0xff] }
 0xd8a   :  { %v6252_v26 = vsel %vm6244_vm8, %v6240_v21, %v6248_v28  ;;  %v6242_v39 = vadd.f32 %v15608_v15, %v6221_v36 }
 0xd8b   :  { %v22230_v42 = vpack.c.bf16 %v6253_v25, %v6252_v26  ;;  %vm6247_vm9 = vcmp.gt.f32.partialorder %v6243_v34, 0.0  ;;  %v6251_v38 = vmul.f32 0.2, %v6243_v34 }
 0xd8c   :  { %vm6246_vm10 = vcmp.gt.f32.partialorder %v6242_v39, 0.0  ;;  %v6250_v46 = vmul.f32 0.2, %v6242_v39 }
 0xd8d   :  { %v6255_v43 = vsel %vm6247_vm9, %v6243_v34, %v6251_v38  ;;  %19954 = vmatprep.subr.bf16.mxu1 %v22230_v42  ;;  %19970 = vmatprep.subr.bf16.mxu0 %v22230_v42  ;;  %vm14862_vm9 = vcmask 195584  }
 0xd8e   :  { %v6254_v47 = vsel %vm6246_vm10, %v6242_v39, %v6250_v46  ;;  %19956 = vmatpush3.bf16.msra.mxu1 %v22230_v42  ;;  %19972 = vmatpush3.bf16.msra.mxu0 %v22230_v42  ;;  %v15651_v39 = vld [vmem:[%s23158_s6 + $0x18] sm:$0xff] }
 0xd8f   :  { %v22236_v56 = vpack.c.bf16 %v6255_v43, %v6254_v47  ;;  %v15664_v47 = vld [vmem:[%s23158_s6 + $0x20] sm:$0xff] }
 0xd91   :  { %19958 = vmatprep.subr.bf16.mxu1 %v22236_v56  ;;  %19974 = vmatprep.subr.bf16.mxu0 %v22236_v56 }
 0xd92   :  { %19960 = vmatpush3.bf16.msra.mxu1 %v22236_v56  ;;  %19976 = vmatpush3.bf16.msra.mxu0 %v22236_v56 }
 0xd93   :  { %19962 = vmatprep.subr.bf16.mxu1 %v22230_v42  ;;  %19978 = vmatprep.subr.bf16.mxu0 %v22230_v42 }
 0xd95   :  { %18405 = vmatmul.mubr.msk.f32.vlgmr.msra.gmra.mrb[52].mxu1 %vm6261_vm6, %v6258_v54  ;;  %18449 = vmatmul.mubr.msk.f32.vlgmr.msra.gmra.mrb[186].mxu0 %vm6261_vm6, %v15631_v45 }
 0xd96   :  { %19964 = vmatpush3.bf16.msra.mxu1 %v22230_v42  ;;  %19980 = vmatpush3.bf16.msra.mxu0 %v22230_v42 }
 0xd97   :  { %19966 = vmatprep.subr.bf16.mxu1 %v22236_v56  ;;  %19982 = vmatprep.subr.bf16.mxu0 %v22236_v56 }
 0xd98   :  { %18407 = vmatprep.mubr.msk.f32.mxu1 %vm6261_vm6, %v6259_v1  ;;  %18451 = vmatprep.mubr.msk.f32.mxu0 %vm6261_vm6, %v15632_v48  ;;  %v15677_v48 = vld [vmem:[%s23158_s6 + $0x28] sm:$0xff] }
 0xd99   :  { %18408 = vmatmul.mubr.msk.f32.gmra.mrb[54].mxu1 %vm6261_vm6, %v6260_v61  ;;  %18452 = vmatmul.mubr.msk.f32.gmra.mrb[188].mxu0 %vm6261_vm6, %v15633_v49 }
 0xd9a   :  { %19968 = vmatpush3.bf16.msra.mxu1 %v22236_v56  ;;  %19984 = vmatpush3.bf16.msra.mxu0 %v22236_v56 }
 0xd9b   :  { %19986 = vmatprep.subr.bf16.mxu0 %v22230_v42  ;;  %18418 = vmatprep.mubr.msk.f32.mxu1 %vm6261_vm6, %v15613_v10 }
 0xd9c   :  { %18470 = vmatprep.mubr.msk.f32.mxu0 %vm6261_vm6, %v15643_v50  ;;  %18424 = vmatprep.subr.mxu1 %v15621_v35 }
 0xd9d   :  { %18419 = vmatmul.mubr.msk.f32.vlgmr.msra.gmra.mrb[56].mxu1 %vm6261_vm6, %v15614_v6  ;;  %18471 = vmatmul.mubr.msk.f32.vlgmr.msra.gmra.mrb[190].mxu0 %vm6261_vm6, %v15644_v52  ;;  %v15690_v6 = vld [vmem:[%s23158_s6 + $0x30] sm:$0xff] }
 0xd9e   :  { %19988 = vmatpush3.bf16.msra.mxu0 %v22230_v42  ;;  %18421 = vmatprep.mubr.msk.f32.mxu1 %vm6261_vm6, %v15615_v53 }
 0xd9f   :  { %19990 = vmatprep.subr.bf16.mxu0 %v22236_v56  ;;  %18473 = vmatprep.mubr.msk.f32.mxu0 %vm6261_vm6, %v15645_v19 }
 0xda0   :  { %18425 = vmatpush3.msra.mxu1 %v15621_v35 }
 0xda1   :  { %18422 = vmatmul.mubr.msk.f32.gmra.mrb[58].mxu1 %vm6261_vm6, %v15616_v16  ;;  %18474 = vmatmul.mubr.msk.f32.gmra.mrb[192].mxu0 %vm6261_vm6, %v15646_v55  ;;  %v15703_v55 = vld [vmem:[%s23158_s6 + $0x38] sm:$0xff] }
 0xda2   :  { %19992 = vmatpush3.bf16.msra.mxu0 %v22236_v56  ;;  %18492 = vmatprep.mubr.msk.f32.mxu0 %vm6261_vm6, %v15656_v27 }
 0xda3   :  { %19994 = vmatprep.subr.bf16.mxu0 %v22230_v42  ;;  %18432 = vmatprep.subr.mxu1 %v6359_v44 }
 0xda5   :  { %18493 = vmatmul.mubr.msk.f32.vlgmr.msra.gmra.mrb[194].mxu0 %vm6261_vm6, %v15657_v31 }
 0xda6   :  { %19996 = vmatpush3.bf16.msra.mxu0 %v22230_v42  ;;  %18495 = vmatprep.mubr.msk.f32.mxu0 %vm6261_vm6, %v15658_v37  ;;  %v15716_v37 = vld [vmem:[%s23158_s6 + $0x40] sm:$0xff] }
 0xda7   :  { %19998 = vmatprep.subr.bf16.mxu0 %v22236_v56 }
 0xda9   :  { %18496 = vmatmul.mubr.msk.f32.gmra.mrb[196].mxu0 %vm6261_vm6, %v15659_v40  ;;  %v8116_v40 = vld [vmem:[%s23159_s11] sm:$0xff] }
 0xdaa   :  { %20000 = vmatpush3.bf16.msra.mxu0 %v22236_v56  ;;  %18514 = vmatprep.mubr.msk.f32.mxu0 %vm6261_vm6, %v15669_v57  ;;  %v8117_v57 = vld [vmem:[%s23159_s11 + $0x8] sm:$0xff] }
 0xdab   :  { %20002 = vmatprep.subr.bf16.mxu0 %v22230_v42 }
 0xdad   :  { %18515 = vmatmul.mubr.msk.f32.vlgmr.msra.gmra.mrb[198].mxu0 %vm6261_vm6, %v15670_v58  ;;  %v20032_v58 = vpack.c.bf16 %v8117_v57, %v8116_v40 }
 0xdae   :  { %20004 = vmatpush3.bf16.msra.mxu0 %v22230_v42  ;;  %18517 = vmatprep.mubr.msk.f32.mxu0 %vm6261_vm6, %v15671_v60  ;;  %v15721_v60 = vld [vmem:[#allocation2] ss:$0 sm:$0xff] }
 0xdaf   :  { %20006 = vmatprep.subr.bf16.mxu0 %v22236_v56 }
 0xdb1   :  { %18518 = vmatmul.mubr.msk.f32.gmra.mrb[200].mxu0 %vm6261_vm6, %v15672_v29 }
 0xdb2   :  { %20008 = vmatpush3.bf16.msra.mxu0 %v22236_v56  ;;  %18536 = vmatprep.mubr.msk.f32.mxu0 %vm6261_vm6, %v15682_v62 }
 0xdb3   :  { %20010 = vmatprep.subr.bf16.mxu0 %v22230_v42 }
 0xdb5   :  { %18537 = vmatmul.mubr.msk.f32.vlgmr.msra.gmra.mrb[202].mxu0 %vm6261_vm6, %v15683_v63 }
 0xdb6   :  { %20012 = vmatpush3.bf16.msra.mxu0 %v22230_v42  ;;  %18539 = vmatprep.mubr.msk.f32.mxu0 %vm6261_vm6, %v15684_v0 }
 0xdb7   :  { %20014 = vmatprep.subr.bf16.mxu0 %v22236_v56 }
 0xdb9   :  { %18540 = vmatmul.mubr.msk.f32.gmra.mrb[204].mxu0 %vm6261_vm6, %v15685_v2 }
 0xdba   :  { %20016 = vmatpush3.bf16.msra.mxu0 %v22236_v56  ;;  %18558 = vmatprep.mubr.msk.f32.mxu0 %vm6261_vm6, %v15695_v3 }
 0xdbb   :  { %20018 = vmatprep.subr.bf16.mxu0 %v22230_v42 }
 0xdbd   :  { %18559 = vmatmul.mubr.msk.f32.vlgmr.msra.gmra.mrb[206].mxu0 %vm6261_vm6, %v15696_v4 }
 0xdbe   :  { %20020 = vmatpush3.bf16.msra.mxu0 %v22230_v42  ;;  %18561 = vmatprep.mubr.msk.f32.mxu0 %vm6261_vm6, %v15697_v5 }
 0xdbf   :  { %20022 = vmatprep.subr.bf16.mxu0 %v22236_v56 }
 0xdc1   :  { %18562 = vmatmul.mubr.msk.f32.gmra.mrb[208].mxu0 %vm6261_vm6, %v15698_v7 }
 0xdc2   :  { %20024 = vmatpush3.bf16.msra.mxu0 %v22236_v56  ;;  %18580 = vmatprep.mubr.msk.f32.mxu0 %vm6261_vm6, %v15708_v8 }
 0xdc3   :  { %20025 = vmatprep.subr.bf16.mxu0 %v20951_v23 }
 0xdc5   :  { %18581 = vmatmul.mubr.msk.f32.vlgmr.msra.gmra.mrb[210].mxu0 %vm6261_vm6, %v15709_v9 }
 0xdc6   :  { %18583 = vmatprep.mubr.msk.f32.mxu0 %vm6261_vm6, %v15710_v11 }
 0xdc9   :  { %18584 = vmatmul.mubr.msk.f32.gmra.mrb[212].mxu0 %vm6261_vm6, %v15711_v30 }
 0xdca   :  { %18602 = vmatprep.mubr.msk.f32.mxu0 %vm20952_vm3, %v20953_v24 }
 0xe68   :  { %v18406_v51 = vpop.f32.mrb[52].mxu1  ;;  %v18450_v59 = vpop.f32.mrb[186].mxu0 }
 0xe69   :  { %v6340_v33 = vpop.f32.mrb[53].mxu1  ;;  %v6741_v13 = vpop.f32.mrb[187].mxu0 }
 0xe6c   :  { %v18409_v12 = vpop.f32.mrb[54].mxu1  ;;  %v18453_v41 = vpop.f32.mrb[188].mxu0 }
 0xe6d   :  { %v6350_v14 = vpop.f32.mrb[55].mxu1  ;;  %v6751_v15 = vpop.f32.mrb[189].mxu0 }
 0xe70   :  { %v18420_v17 = vpop.f32.mrb[56].mxu1  ;;  %v18472_v18 = vpop.f32.mrb[190].mxu0 }
 0xe71   :  { %v6443_v20 = vpop.f32.mrb[57].mxu1  ;;  %v6946_v21 = vpop.f32.mrb[191].mxu0 }
 0xe72   :  { %18426 = vmatprep.mubr.msk.f32.mxu1 %vm973_vm2, %v6443_v20 }
 0xe73   :  { %18427 = vmatmul.mubr.msk.f32.vlgmr.msra.gmra.mrb[60].mxu1 %vm973_vm2, %v18420_v17 }
 0xe74   :  { %v18423_v28 = vpop.f32.mrb[58].mxu1  ;;  %18433 = vmatpush3.msra.mxu1 %v6359_v44  ;;  %v18475_v32 = vpop.f32.mrb[192].mxu0 }
 0xe75   :  { %v6453_v25 = vpop.f32.mrb[59].mxu1  ;;  %18454 = vmatprep.subr.mxu1 %v15638_v22  ;;  %v6956_v34 = vpop.f32.mrb[193].mxu0 }
 0xe76   :  { %18429 = vmatprep.mubr.msk.f32.mxu1 %vm973_vm2, %v6453_v25 }
 0xe77   :  { %18430 = vmatmul.mubr.msk.f32.gmra.mrb[62].mxu1 %vm973_vm2, %v18423_v28  ;;  %v15725_v28 = vld [vmem:[#allocation6] ss:$0 sm:$0xff] }
 0xe78   :  { %18434 = vmatprep.mubr.msk.f32.mxu1 %vm973_vm2, %v6340_v33  ;;  %v18494_v36 = vpop.f32.mrb[194].mxu0 }
 0xe79   :  { %v7151_v26 = vpop.f32.mrb[195].mxu0 }
 0xe7b   :  { %18435 = vmatmul.mubr.msk.f32.vlgmr.msra.gmra.mrb[60].mxu1 %vm973_vm2, %v18406_v51 }
 0xe7c   :  { %18437 = vmatprep.mubr.msk.f32.mxu1 %vm973_vm2, %v6350_v14  ;;  %18455 = vmatpush3.msra.mxu1 %v15638_v22  ;;  %v18497_v42 = vpop.f32.mrb[196].mxu0  ;;  %v8119_v14 = vld [vmem:[%s23161_s15] sm:$0xff] }
 0xe7d   :  { %18476 = vmatprep.subr.mxu1 %v15651_v39  ;;  %v7161_v38 = vpop.f32.mrb[197].mxu0  ;;  %v8121_v22 = vld [vmem:[%s23162_s16] sm:$0xff] }
 0xe7f   :  { %18438 = vmatmul.mubr.msk.f32.gmra.mrb[62].mxu1 %vm973_vm2, %v18409_v12 }
 0xe80   :  { %18456 = vmatprep.mubr.msk.f32.mxu1 %vm973_vm2, %v6741_v13  ;;  %v18516_v46 = vpop.f32.mrb[198].mxu0  ;;  %v8115_v13 = vld [vmem:[%s23160_s14] sm:$0xff] }
 0xe81   :  { %v7356_v43 = vpop.f32.mrb[199].mxu0 }
 0xe83   :  { %18457 = vmatmul.mubr.msk.f32.vlgmr.msra.gmra.mrb[60].mxu1 %vm973_vm2, %v18450_v59 }
 0xe84   :  { %18459 = vmatprep.mubr.msk.f32.mxu1 %vm973_vm2, %v6751_v15  ;;  %18477 = vmatpush3.msra.mxu1 %v15651_v39  ;;  %v18519_v56 = vpop.f32.mrb[200].mxu0  ;;  %v15723_v15 = vld [vmem:[#allocation4] ss:$0 sm:$0xff] }
 0xe85   :  { %18498 = vmatprep.subr.mxu1 %v15664_v47  ;;  %v7366_v54 = vpop.f32.mrb[201].mxu0 }
 0xe87   :  { %18460 = vmatmul.mubr.msk.f32.gmra.mrb[62].mxu1 %vm973_vm2, %v18453_v41 }
 0xe88   :  { %18478 = vmatprep.mubr.msk.f32.mxu1 %vm973_vm2, %v6946_v21  ;;  %v18538_v45 = vpop.f32.mrb[202].mxu0 }
 0xe89   :  { %v7561_v1 = vpop.f32.mrb[203].mxu0 }
 0xe8b   :  { %18479 = vmatmul.mubr.msk.f32.vlgmr.msra.gmra.mrb[60].mxu1 %vm973_vm2, %v18472_v18 }
 0xe8c   :  { %18481 = vmatprep.mubr.msk.f32.mxu1 %vm973_vm2, %v6956_v34  ;;  %18499 = vmatpush3.msra.mxu1 %v15664_v47  ;;  %v18541_v61 = vpop.f32.mrb[204].mxu0 }
 0xe8d   :  { %18520 = vmatprep.subr.mxu1 %v15677_v48  ;;  %v7571_v49 = vpop.f32.mrb[205].mxu0 }
 0xe8f   :  { %18482 = vmatmul.mubr.msk.f32.gmra.mrb[62].mxu1 %vm973_vm2, %v18475_v32 }
 0xe90   :  { %18500 = vmatprep.mubr.msk.f32.mxu1 %vm973_vm2, %v7151_v26  ;;  %v18560_v10 = vpop.f32.mrb[206].mxu0 }
 0xe91   :  { %v7766_v50 = vpop.f32.mrb[207].mxu0 }
 0xe93   :  { %18501 = vmatmul.mubr.msk.f32.vlgmr.msra.gmra.mrb[60].mxu1 %vm973_vm2, %v18494_v36 }
 0xe94   :  { %18503 = vmatprep.mubr.msk.f32.mxu1 %vm973_vm2, %v7161_v38  ;;  %18521 = vmatpush3.msra.mxu1 %v15677_v48  ;;  %v18563_v52 = vpop.f32.mrb[208].mxu0  ;;  %v8122_v38 = vld [vmem:[%s23162_s16 + $0x8] sm:$0xff] }
 0xe95   :  { %18542 = vmatprep.subr.mxu1 %v15690_v6  ;;  %v7776_v53 = vpop.f32.mrb[209].mxu0 }
 0xe97   :  { %18504 = vmatmul.mubr.msk.f32.gmra.mrb[62].mxu1 %vm973_vm2, %v18497_v42 }
 0xe98   :  { %18522 = vmatprep.mubr.msk.f32.mxu1 %vm973_vm2, %v7356_v43  ;;  %v18582_v19 = vpop.f32.mrb[210].mxu0  ;;  %v8124_v43 = vld [vmem:[%s23162_s16 + $0x18] sm:$0xff] }
 0xe99   :  { %v7971_v16 = vpop.f32.mrb[211].mxu0 }
 0xe9b   :  { %18523 = vmatmul.mubr.msk.f32.vlgmr.msra.gmra.mrb[60].mxu1 %vm973_vm2, %v18516_v46  ;;  %v8123_v46 = vld [vmem:[%s23162_s16 + $0x10] sm:$0xff] }
 0xe9c   :  { %18525 = vmatprep.mubr.msk.f32.mxu1 %vm973_vm2, %v7366_v54  ;;  %18543 = vmatpush3.msra.mxu1 %v15690_v6  ;;  %v18585_v27 = vpop.f32.mrb[212].mxu0  ;;  %v15736_v6 = vld [vmem:[%s23163_s18 + $0x18] sm:$0xff] }
 0xe9d   :  { %18564 = vmatprep.subr.mxu1 %v15703_v55  ;;  %v7981_v31 = vpop.f32.mrb[213].mxu0 }
 0xe9f   :  { %18526 = vmatmul.mubr.msk.f32.gmra.mrb[62].mxu1 %vm973_vm2, %v18519_v56 }
 0xea0   :  { %18544 = vmatprep.mubr.msk.f32.mxu1 %vm973_vm2, %v7561_v1 }
 0xea3   :  { %18545 = vmatmul.mubr.msk.f32.vlgmr.msra.gmra.mrb[60].mxu1 %vm973_vm2, %v18538_v45 }
 0xea4   :  { %18547 = vmatprep.mubr.msk.f32.mxu1 %vm973_vm2, %v7571_v49  ;;  %18565 = vmatpush3.msra.mxu1 %v15703_v55  ;;  %v15733_v55 = vld [vmem:[%s23164_s24 + $0x8] sm:$0xff] }
 0xea5   :  { %18586 = vmatprep.subr.mxu1 %v15716_v37 }
 0xea7   :  { %18548 = vmatmul.mubr.msk.f32.gmra.mrb[62].mxu1 %vm973_vm2, %v18541_v61 }
 0xea8   :  { %18566 = vmatprep.mubr.msk.f32.mxu1 %vm973_vm2, %v7766_v50  ;;  %v15735_v50 = vld [vmem:[%s23163_s18 + $0x10] sm:$0xff] }
 0xeab   :  { %18567 = vmatmul.mubr.msk.f32.vlgmr.msra.gmra.mrb[60].mxu1 %vm973_vm2, %v18560_v10 }
 0xeac   :  { %18569 = vmatprep.mubr.msk.f32.mxu1 %vm973_vm2, %v7776_v53  ;;  %18587 = vmatpush3.msra.mxu1 %v15716_v37  ;;  %v8541_v53 = vld [vmem:[%s23163_s18 + $0x8] sm:$0xff] }
 0xead   :  { %20031 = vmatprep.subr.bf16.mxu1 %v20951_v23 }
 0xeaf   :  { %18570 = vmatmul.mubr.msk.f32.gmra.mrb[62].mxu1 %vm973_vm2, %v18563_v52  ;;  %v8540_v52 = vld [vmem:[%s23163_s18] sm:$0xff] }
 0xeb0   :  { %18588 = vmatprep.mubr.msk.f32.mxu1 %vm973_vm2, %v7971_v16  ;;  %v8466_v16 = vld [vmem:[%s23164_s24] sm:$0xff] }
 0xeb3   :  { %18589 = vmatmul.mubr.msk.f32.vlgmr.msra.gmra.mrb[60].mxu1 %vm973_vm2, %v18582_v19 }
 0xeb4   :  { %18591 = vmatprep.mubr.msk.f32.mxu1 %vm973_vm2, %v7981_v31  ;;  %20033 = vmatpush3.bf16.msra.mxu1 %v20032_v58  ;;  %v20050_v31 = vpack.c.bf16 %v8541_v53, %v8540_v52 }
 0xeb7   :  { %18592 = vmatmul.mubr.msk.f32.gmra.mrb[62].mxu1 %vm973_vm2, %v18585_v27  ;;  %v20047_v27 = vpack.c.bf16 %v15736_v6, %v15735_v50  ;;  %v15766_v50 = vld [vmem:[%s23163_s18 + $0x70] sm:$0xff]  ;;  %v15767_v6 = vld [vmem:[%s23163_s18 + $0x78] sm:$0xff] }
 0xeb8   :  { %18609 = vmatprep.mubr.msk.f32.mxu1 %vm20952_vm3, %v20953_v24  ;;  %v20104_v52 = vpack.c.bf16 %v15767_v6, %v15766_v50 }
 0xf86   :  { %v18590_v29 = vpop.f32.mrb[60].mxu1 }
 0xf87   :  { %v8100_v62 = vadd.f32 %v18590_v29, %v15721_v60  ;;  %v8070_v63 = vpop.f32.mrb[61].mxu1  ;;  %v15741_v29 = vld [vmem:[%s23163_s18 + $0x20] sm:$0xff] }
 0xf88   :  { %v8099_v0 = vadd.f32 %v15721_v60, %v8070_v63 }
 0xf89   :  { %vm8104_vm11 = vcmp.gt.f32.partialorder %v8100_v62, 0.0  ;;  %v8108_v2 = vmul.f32 0.2, %v8100_v62 }
 0xf8a   :  { %vm8103_vm12 = vcmp.gt.f32.partialorder %v8099_v0, 0.0  ;;  %v8107_v3 = vmul.f32 0.2, %v8099_v0  ;;  %v18593_v4 = vpop.f32.mrb[62].mxu1 }
 0xf8b   :  { %v8112_v5 = vsel %vm8104_vm11, %v8100_v62, %v8108_v2  ;;  %v8102_v7 = vadd.f32 %v18593_v4, %v15721_v60  ;;  %v8080_v8 = vpop.f32.mrb[63].mxu1  ;;  %v15742_v62 = vld [vmem:[%s23163_s18 + $0x28] sm:$0xff] }
 0xf8c   :  { %v8111_v9 = vsel %vm8103_vm12, %v8099_v0, %v8107_v3  ;;  %v8101_v11 = vadd.f32 %v15721_v60, %v8080_v8  ;;  %v15739_v60 = vld [vmem:[%s23164_s24 + $0x10] sm:$0xff]  ;;  %v20059_v63 = vpack.c.bf16 %v15742_v62, %v15741_v29 }
 0xf8d   :  { %v20026_v30 = vpack.c.bf16 %v8112_v5, %v8111_v9  ;;  %vm8106_vm13 = vcmp.gt.f32.partialorder %v8102_v7, 0.0  ;;  %v8110_v35 = vmul.f32 0.2, %v8102_v7 }
 0xf8e   :  { %vm8105_vm14 = vcmp.gt.f32.partialorder %v8101_v11, 0.0  ;;  %v8109_v44 = vmul.f32 0.2, %v8101_v11 }
 0xf8f   :  { %v8114_v51 = vsel %vm8106_vm13, %v8102_v7, %v8110_v35  ;;  %20027 = vmatpush3.bf16.msra.mxu0 %v20026_v30  ;;  %v15747_v30 = vld [vmem:[%s23163_s18 + $0x38] sm:$0xff] }
 0xf90   :  { %v8113_v59 = vsel %vm8105_vm14, %v8101_v11, %v8109_v44  ;;  %20028 = vmatprep.subr.bf16.mxu0 %v20951_v23  ;;  %v15746_v11 = vld [vmem:[%s23163_s18 + $0x30] sm:$0xff] }
 0xf91   :  { %v20029_v33 = vpack.c.bf16 %v8114_v51, %v8113_v59  ;;  %v20068_v35 = vpack.c.bf16 %v15747_v30, %v15746_v11  ;;  %v9841_v30 = vld [vmem:[%s23166_s22] sm:$0xff] }
 0xf93   :  { %20030 = vmatpush3.bf16.msra.mxu0 %v20029_v33 }
 0xf94   :  { %18612 = vmatprep.subr.mxu0 %v20953_v24 }
 0xf96   :  { %18603 = vmatmul.mubr.msk.f32.vlgmr.msra.gmra.mrb[214].mxu0 %vm6261_vm6, %v8115_v13 }
 0xf97   :  { %18614 = vmatprep.mubr.msk.f32.mxu0 %vm20952_vm3, %v20953_v24  ;;  %18613 = vmatpush3.msra.mxu0 %v8119_v14  ;;  %v15752_v14 = vld [vmem:[%s23163_s18 + $0x48] sm:$0xff] }
 0xf98   :  { %20034 = vmatprep.subr.bf16.mxu0 %v20951_v23 }
0x1069   :  { %v8194_v12 = vpop.f32.mrb[214].mxu0 }
0x106a   :  { %v18604_v41 = vpop.f32.mrb[215].mxu0  ;;  %18610 = vmatmul.mubr.msk.f32.vlgmr.msra.gmra.mrb[64].mxu1 %vm8204_vm15, %v8194_v12  ;;  %v15749_v12 = vld [vmem:[%s23164_s24 + $0x20] sm:$0xff] }
0x106b   :  { %18619 = vmatprep.mubr.msk.f32.mxu1 %vm973_vm2, %v8121_v22  ;;  %v15751_v41 = vld [vmem:[%s23163_s18 + $0x40] sm:$0xff] }
0x113d   :  { %v8274_v17 = vpop.f32.mrb[64].mxu1 }
0x113e   :  { %v8275_v18 = vadd.f32 %v15723_v15, %v8274_v17  ;;  %v18611_v20 = vpop.f32.mrb[65].mxu1  ;;  %v20077_v15 = vpack.c.bf16 %v15752_v14, %v15751_v41  ;;  %v15782_v14 = vld [vmem:[%s23166_s22 + $0x10] sm:$0xff] }
0x1140   :  { %v8278_v21 = vmax.f32 %v8275_v18, 0.0 }
0x1142   :  { %18615 = vmatmul.mubr.msk.f32.vlgmr.msra.gmra.mrb[216].mxu0 %vm973_vm2, %v8278_v21 }
0x1143   :  { %18633 = vmatprep.mubr.msk.f32.mxu0 %vm20952_vm3, %v20953_v24 }
0x1215   :  { %v8354_v32 = vpop.f32.mrb[216].mxu0 }
0x1216   :  { %v8355_v25 = vadd.f32 %v15725_v28, %v8354_v32  ;;  %v18616_v34 = vpop.f32.mrb[217].mxu0  ;;  %v15754_v28 = vld [vmem:[%s23164_s24 + $0x28] sm:$0xff]  ;;  %v15756_v32 = vld [vmem:[%s23163_s18 + $0x50] sm:$0xff] }
0x1218   :  { %v15727_v36 = vmul.f32 -1.442695, %v8355_v25  ;;  %v15757_v25 = vld [vmem:[%s23163_s18 + $0x58] sm:$0xff] }
0x1219   :  { %v20086_v34 = vpack.c.bf16 %v15757_v25, %v15756_v32  ;;  %v15785_v32 = vld [vmem:[%s23165_s19 + $0x28] sm:$0xff] }
0x121a   :  { %20572 = vpow2.f32 %v15727_v36 }
0x1224   :  { %v20573_v26 = vpop.eup %20572 }
0x1225   :  { %v8361_v39 = vadd.f32 1.0, %v20573_v26 }
0x1227   :  { %20574 = vrcp.f32 %v8361_v39 }
0x1231   :  { %v20575_v42 = vpop.eup %20574 }
0x1232   :  { %18617 = vmatprep.subr.mxu1 %v20575_v42 }
0x1233   :  { %18618 = vmatpush3.msra.mxu1 %v20575_v42 }
0x1234   :  { %18620 = vmatmul.mubr.msk.f32.vlgmr.msra.gmra.mrb[66].mxu1 %vm973_vm2, %v8122_v38  ;;  %20040 = vmatprep.subr.bf16.mxu1 %v20951_v23 }
0x1235   :  { %18622 = vmatprep.mubr.msk.f32.mxu1 %vm973_vm2, %v8123_v46  ;;  %v15759_v46 = vld [vmem:[%s23164_s24 + $0x30] sm:$0xff] }
0x1238   :  { %18623 = vmatmul.mubr.msk.f32.gmra.mrb[68].mxu1 %vm973_vm2, %v8124_v43  ;;  %v15761_v43 = vld [vmem:[%s23163_s18 + $0x60] sm:$0xff] }
0x1239   :  { %18644 = vmatprep.mubr.msk.f32.mxu1 %vm20952_vm3, %v20953_v24 }
0x1307   :  { %v18621_v47 = vpop.f32.mrb[66].mxu1 }
0x1308   :  { %v8462_v56 = vmul.f32 %v18621_v47, %v8112_v5  ;;  %v8442_v54 = vpop.f32.mrb[67].mxu1  ;;  %v15762_v47 = vld [vmem:[%s23163_s18 + $0x68] sm:$0xff] }
0x1309   :  { %v8461_v45 = vmul.f32 %v8442_v54, %v8111_v9  ;;  %v15744_v9 = vld [vmem:[%s23164_s24 + $0x18] sm:$0xff] }
0x130b   :  { %v22414_v1 = vpack.c.bf16 %v8462_v56, %v8461_v45  ;;  %v18624_v48 = vpop.f32.mrb[68].mxu1  ;;  %v20095_v56 = vpack.c.bf16 %v15762_v47, %v15761_v43  ;;  %v15794_v47 = vld [vmem:[%s23165_s19 + $0x40] sm:$0xff] }
0x130c   :  { %v8464_v61 = vmul.f32 %v18624_v48, %v8114_v51  ;;  %v8452_v49 = vpop.f32.mrb[69].mxu1 }
0x130d   :  { %v8463_v10 = vmul.f32 %v8452_v49, %v8113_v59  ;;  %20036 = vmatpush3.bf16.msra.mxu0 %v22414_v1  ;;  %20042 = vmatpush3.bf16.msra.mxu1 %v22414_v1 }
0x130e   :  { %20037 = vmatprep.subr.bf16.mxu0 %v20951_v23  ;;  %20043 = vmatprep.subr.bf16.mxu1 %v20951_v23 }
0x130f   :  { %v22424_v19 = vpack.c.bf16 %v8464_v61, %v8463_v10  ;;  %v15764_v10 = vld [vmem:[%s23164_s24 + $0x38] sm:$0xff] }
0x1311   :  { %20039 = vmatpush3.bf16.msra.mxu0 %v22424_v19  ;;  %20045 = vmatpush3.bf16.msra.mxu1 %v22424_v19 }
0x1312   :  { %20046 = vmatprep.subr.bf16.mxu0 %v20951_v23  ;;  %20049 = vmatprep.subr.bf16.mxu1 %v20951_v23 }
0x1314   :  { %18634 = vmatmul.mubr.msk.f32.vlgmr.msra.gmra.mrb[218].mxu0 %vm6261_vm6, %v8466_v16  ;;  %18645 = vmatmul.mubr.msk.f32.vlgmr.msra.gmra.mrb[70].mxu1 %vm6261_vm6, %v15733_v55 }
0x1315   :  { %20048 = vmatpush3.bf16.msra.mxu0 %v20047_v27  ;;  %20051 = vmatpush3.bf16.msra.mxu1 %v20050_v31 }
0x1316   :  { %18651 = vmatprep.mubr.msk.f32.mxu0 %vm20952_vm3, %v20953_v24  ;;  %18658 = vmatprep.mubr.msk.f32.mxu1 %vm20952_vm3, %v20953_v24 }
0x1317   :  { %20052 = vmatprep.subr.bf16.mxu0 %v20951_v23  ;;  %20058 = vmatprep.subr.bf16.mxu1 %v20951_v23 }
0x13e7   :  { %v8536_v37 = vpop.f32.mrb[218].mxu0  ;;  %v8613_v40 = vpop.f32.mrb[70].mxu1 }
0x13e8   :  { %v18646_v57 = vpop.f32.mrb[71].mxu1  ;;  %18652 = vmatmul.mubr.msk.f32.vlgmr.msra.gmra.mrb[220].mxu0 %vm8204_vm15, %v8613_v40  ;;  %18659 = vmatmul.mubr.msk.f32.vlgmr.msra.gmra.mrb[72].mxu1 %vm8204_vm15, %v8536_v37  ;;  %v18635_v58 = vpop.f32.mrb[219].mxu0  ;;  %v15769_v37 = vld [vmem:[%s23164_s24 + $0x40] sm:$0xff] }
0x13e9   :  { %20054 = vmatpush3.bf16.msra.mxu0 %v22414_v1  ;;  %18669 = vmatprep.mubr.msk.f32.mxu0 %vm20952_vm3, %v20953_v24  ;;  %v15771_v40 = vld [vmem:[%s23163_s18 + $0x80] sm:$0xff]  ;;  %v15772_v57 = vld [vmem:[%s23163_s18 + $0x88] sm:$0xff] }
0x13ea   :  { %20055 = vmatprep.subr.bf16.mxu0 %v20951_v23  ;;  %18676 = vmatprep.mubr.msk.f32.mxu1 %vm20952_vm3, %v20953_v24  ;;  %v20113_v58 = vpack.c.bf16 %v15772_v57, %v15771_v40 }
0x13eb   :  { %20060 = vmatpush3.bf16.msra.mxu1 %v20059_v63  ;;  %v15774_v63 = vld [vmem:[#allocation7] ss:$0 sm:$0xff] }
0x13ec   :  { %20061 = vmatprep.subr.bf16.mxu1 %v20951_v23 }
0x13ed   :  { %20057 = vmatpush3.bf16.msra.mxu0 %v22424_v19 }
0x13ee   :  { %20067 = vmatprep.subr.bf16.mxu0 %v20951_v23 }
0x13f0   :  { %18670 = vmatmul.mubr.msk.f32.vlgmr.msra.gmra.mrb[222].mxu0 %vm6261_vm6, %v15739_v60 }
0x13f1   :  { %18694 = vmatprep.mubr.msk.f32.mxu0 %vm20952_vm3, %v20953_v24  ;;  %20069 = vmatpush3.bf16.msra.mxu0 %v20068_v35  ;;  %v15776_v35 = vld [vmem:[%s23166_s22 + $0x8] sm:$0xff] }
0x13f2   :  { %20070 = vmatprep.subr.bf16.mxu0 %v20951_v23 }
0x14bb   :  { %v8689_v0 = vpop.f32.mrb[220].mxu0  ;;  %v8762_v2 = vpop.f32.mrb[72].mxu1 }
0x14bc   :  { %v8763_v3 = vadd.f32 %v8762_v2, %v8689_v0  ;;  %v18653_v4 = vpop.f32.mrb[221].mxu0  ;;  %v18660_v5 = vpop.f32.mrb[73].mxu1 }
0x14bd   :  { %v15778_v5 = vld [vmem:[%s23165_s19 + $0x10] sm:$0xff] }
0x14c3   :  { %v8837_v7 = vpop.f32.mrb[222].mxu0 }
0x14c4   :  { %v18671_v8 = vpop.f32.mrb[223].mxu0  ;;  %18677 = vmatmul.mubr.msk.f32.vlgmr.msra.gmra.mrb[74].mxu1 %vm8204_vm15, %v8837_v7  ;;  %v15779_v7 = vld [vmem:[%s23165_s19 + $0x18] sm:$0xff] }
0x14c5   :  { %20063 = vmatpush3.bf16.msra.mxu1 %v22414_v1  ;;  %18687 = vmatprep.mubr.msk.f32.mxu1 %vm20952_vm3, %v20953_v24  ;;  %v9915_v8 = vld [vmem:[%s23165_s19] sm:$0xff] }
0x14c6   :  { %20064 = vmatprep.subr.bf16.mxu1 %v20951_v23 }
0x14c9   :  { %20066 = vmatpush3.bf16.msra.mxu1 %v22424_v19 }
0x14ca   :  { %20076 = vmatprep.subr.bf16.mxu1 %v20951_v23 }
0x14cc   :  { %18688 = vmatmul.mubr.msk.f32.vlgmr.msra.gmra.mrb[76].mxu1 %vm6261_vm6, %v15744_v9  ;;  %v9916_v9 = vld [vmem:[%s23165_s19 + $0x8] sm:$0xff] }
0x14cd   :  { %18712 = vmatprep.mubr.msk.f32.mxu1 %vm20952_vm3, %v20953_v24  ;;  %20078 = vmatpush3.bf16.msra.mxu1 %v20077_v15  ;;  %v15787_v15 = vld [vmem:[%s23166_s22 + $0x18] sm:$0xff] }
0x14ce   :  { %20079 = vmatprep.subr.bf16.mxu1 %v20951_v23 }
0x1597   :  { %v8913_v44 = vpop.f32.mrb[74].mxu1 }
0x1598   :  { %v8917_v51 = vadd.f32 %v8913_v44, %v8763_v3  ;;  %v18678_v59 = vpop.f32.mrb[75].mxu1 }
0x1599   :  { %v20119_v59 = vpack.c.bf16 %v9916_v9, %v9915_v8  ;;  %v11219_v9 = vld [vmem:[%s23167_s13 + $0x18] sm:$0xff] }
0x159f   :  { %v8989_v33 = vpop.f32.mrb[76].mxu1 }
0x15a0   :  { %v18689_v13 = vpop.f32.mrb[77].mxu1  ;;  %18695 = vmatmul.mubr.msk.f32.vlgmr.msra.gmra.mrb[224].mxu0 %vm8204_vm15, %v8989_v33 }
0x15a1   :  { %20072 = vmatpush3.bf16.msra.mxu0 %v22414_v1  ;;  %18705 = vmatprep.mubr.msk.f32.mxu0 %vm20952_vm3, %v20953_v24 }
0x15a2   :  { %20073 = vmatprep.subr.bf16.mxu0 %v20951_v23 }
0x15a5   :  { %20075 = vmatpush3.bf16.msra.mxu0 %v22424_v19 }
0x15a6   :  { %20085 = vmatprep.subr.bf16.mxu0 %v20951_v23 }
0x15a8   :  { %18706 = vmatmul.mubr.msk.f32.vlgmr.msra.gmra.mrb[226].mxu0 %vm6261_vm6, %v15749_v12 }
0x15a9   :  { %18730 = vmatprep.mubr.msk.f32.mxu0 %vm20952_vm3, %v20953_v24  ;;  %20087 = vmatpush3.bf16.msra.mxu0 %v20086_v34  ;;  %v15789_v34 = vld [vmem:[%s23165_s19 + $0x30] sm:$0xff] }
0x15aa   :  { %20088 = vmatprep.subr.bf16.mxu0 %v20951_v23 }
0x1673   :  { %v9065_v17 = vpop.f32.mrb[224].mxu0 }
0x1674   :  { %v9069_v18 = vadd.f32 %v9065_v17, %v8917_v51  ;;  %v18696_v20 = vpop.f32.mrb[225].mxu0  ;;  %v20116_v51 = vpack.c.bf16 %v15779_v7, %v15778_v5  ;;  %v15792_v17 = vld [vmem:[%s23166_s22 + $0x20] sm:$0xff]  ;;  %v11217_v5 = vld [vmem:[%s23167_s13 + $0x8] sm:$0xff]  ;;  %v11218_v7 = vld [vmem:[%s23167_s13 + $0x10] sm:$0xff] }
0x1675   :  { %v15802_v20 = vld [vmem:[%s23166_s22 + $0x30] sm:$0xff] }
0x167b   :  { %v9141_v21 = vpop.f32.mrb[226].mxu0 }
0x167c   :  { %v18707_v22 = vpop.f32.mrb[227].mxu0  ;;  %18713 = vmatmul.mubr.msk.f32.vlgmr.msra.gmra.mrb[78].mxu1 %vm8204_vm15, %v9141_v21  ;;  %v15807_v21 = vld [vmem:[%s23166_s22 + $0x38] sm:$0xff] }
0x167d   :  { %20081 = vmatpush3.bf16.msra.mxu1 %v22414_v1  ;;  %18723 = vmatprep.mubr.msk.f32.mxu1 %vm20952_vm3, %v20953_v24  ;;  %v15812_v22 = vld [vmem:[%s23166_s22 + $0x40] sm:$0xff] }
0x167e   :  { %20082 = vmatprep.subr.bf16.mxu1 %v20951_v23 }
0x1681   :  { %20084 = vmatpush3.bf16.msra.mxu1 %v22424_v19 }
0x1682   :  { %20094 = vmatprep.subr.bf16.mxu1 %v20951_v23 }
0x1684   :  { %18724 = vmatmul.mubr.msk.f32.vlgmr.msra.gmra.mrb[80].mxu1 %vm6261_vm6, %v15754_v28  ;;  %v15784_v28 = vld [vmem:[%s23165_s19 + $0x20] sm:$0xff] }
0x1685   :  { %18748 = vmatprep.mubr.msk.f32.mxu1 %vm20952_vm3, %v20953_v24  ;;  %20096 = vmatpush3.bf16.msra.mxu1 %v20095_v56  ;;  %v20122_v25 = vpack.c.bf16 %v15785_v32, %v15784_v28  ;;  %v15795_v56 = vld [vmem:[%s23165_s19 + $0x48] sm:$0xff] }
0x1686   :  { %20097 = vmatprep.subr.bf16.mxu1 %v20951_v23 }
0x174f   :  { %v9217_v36 = vpop.f32.mrb[78].mxu1 }
0x1750   :  { %v9221_v26 = vadd.f32 %v9217_v36, %v9069_v18  ;;  %v18714_v39 = vpop.f32.mrb[79].mxu1  ;;  %v15797_v18 = vld [vmem:[%s23166_s22 + $0x28] sm:$0xff]  ;;  %v15790_v36 = vld [vmem:[%s23165_s19 + $0x38] sm:$0xff] }
0x1751   :  { %v20125_v43 = vpack.c.bf16 %v15790_v36, %v15789_v34 }
0x1757   :  { %v9293_v42 = vpop.f32.mrb[80].mxu1 }
0x1758   :  { %v18725_v38 = vpop.f32.mrb[81].mxu1  ;;  %18731 = vmatmul.mubr.msk.f32.vlgmr.msra.gmra.mrb[228].mxu0 %vm8204_vm15, %v9293_v42 }
0x1759   :  { %20090 = vmatpush3.bf16.msra.mxu0 %v22414_v1  ;;  %18741 = vmatprep.mubr.msk.f32.mxu0 %vm20952_vm3, %v20953_v24 }
0x175a   :  { %20091 = vmatprep.subr.bf16.mxu0 %v20951_v23 }
0x175d   :  { %20093 = vmatpush3.bf16.msra.mxu0 %v22424_v19 }
0x175e   :  { %20103 = vmatprep.subr.bf16.mxu0 %v20951_v23 }
0x1760   :  { %18742 = vmatmul.mubr.msk.f32.vlgmr.msra.gmra.mrb[230].mxu0 %vm6261_vm6, %v15759_v46 }
0x1761   :  { %18766 = vmatprep.mubr.msk.f32.mxu0 %vm20952_vm3, %v20953_v24  ;;  %20105 = vmatpush3.bf16.msra.mxu0 %v20104_v52  ;;  %v15804_v52 = vld [vmem:[%s23165_s19 + $0x60] sm:$0xff] }
0x1762   :  { %20106 = vmatprep.subr.bf16.mxu0 %v20951_v23 }
0x182b   :  { %v9369_v54 = vpop.f32.mrb[228].mxu0 }
0x182c   :  { %v9373_v45 = vadd.f32 %v9369_v54, %v9221_v26  ;;  %v18732_v48 = vpop.f32.mrb[229].mxu0 }
0x182d   :  { %v20128_v48 = vpack.c.bf16 %v15795_v56, %v15794_v47  ;;  %v11221_v56 = vld [vmem:[%s23169_s23] sm:$0xff] }
0x1833   :  { %v9445_v61 = vpop.f32.mrb[230].mxu0 }
0x1834   :  { %v18743_v49 = vpop.f32.mrb[231].mxu0  ;;  %18749 = vmatmul.mubr.msk.f32.vlgmr.msra.gmra.mrb[82].mxu1 %vm8204_vm15, %v9445_v61  ;;  %v15799_v61 = vld [vmem:[%s23165_s19 + $0x50] sm:$0xff] }
0x1835   :  { %20099 = vmatpush3.bf16.msra.mxu1 %v22414_v1  ;;  %18759 = vmatprep.mubr.msk.f32.mxu1 %vm20952_vm3, %v20953_v24  ;;  %v15800_v49 = vld [vmem:[%s23165_s19 + $0x58] sm:$0xff] }
0x1836   :  { %20100 = vmatprep.subr.bf16.mxu1 %v20951_v23  ;;  %v20131_v6 = vpack.c.bf16 %v15800_v49, %v15799_v61 }
0x1839   :  { %20102 = vmatpush3.bf16.msra.mxu1 %v22424_v19 }
0x183a   :  { %20112 = vmatprep.subr.bf16.mxu1 %v20951_v23 }
0x183c   :  { %18760 = vmatmul.mubr.msk.f32.vlgmr.msra.gmra.mrb[84].mxu1 %vm6261_vm6, %v15764_v10 }
0x183d   :  { %18784 = vmatprep.mubr.msk.f32.mxu1 %vm20952_vm3, %v20953_v24  ;;  %20114 = vmatpush3.bf16.msra.mxu1 %v20113_v58 }
0x183e   :  { %18787 = vmatprep.subr.mxu1 %v20953_v24 }
0x1907   :  { %v9521_v53 = vpop.f32.mrb[82].mxu1 }
0x1908   :  { %v9525_v16 = vadd.f32 %v9521_v53, %v9373_v45  ;;  %v18750_v55 = vpop.f32.mrb[83].mxu1  ;;  %v15805_v53 = vld [vmem:[%s23165_s19 + $0x68] sm:$0xff] }
0x190f   :  { %v9597_v27 = vpop.f32.mrb[84].mxu1 }
0x1910   :  { %v18761_v31 = vpop.f32.mrb[85].mxu1  ;;  %18767 = vmatmul.mubr.msk.f32.vlgmr.msra.gmra.mrb[232].mxu0 %vm8204_vm15, %v9597_v27  ;;  %v20134_v27 = vpack.c.bf16 %v15805_v53, %v15804_v52 }
0x1911   :  { %20108 = vmatpush3.bf16.msra.mxu0 %v22414_v1  ;;  %18777 = vmatprep.mubr.msk.f32.mxu0 %vm20952_vm3, %v20953_v24  ;;  %v15809_v31 = vld [vmem:[%s23165_s19 + $0x70] sm:$0xff] }
0x1912   :  { %20109 = vmatprep.subr.bf16.mxu0 %v20951_v23 }
0x1915   :  { %20111 = vmatpush3.bf16.msra.mxu0 %v22424_v19 }
0x1916   :  { %18792 = vmatprep.subr.mxu0 %v20953_v24 }
0x1918   :  { %18778 = vmatmul.mubr.msk.f32.vlgmr.msra.gmra.mrb[234].mxu0 %vm6261_vm6, %v15769_v37  ;;  %v15810_v37 = vld [vmem:[%s23165_s19 + $0x78] sm:$0xff] }
0x1919   :  { %18794 = vmatprep.mubr.msk.f32.mxu0 %vm20952_vm3, %v20953_v24  ;;  %v20137_v58 = vpack.c.bf16 %v15810_v37, %v15809_v31  ;;  %v15828_v37 = vld [vmem:[%s23171_s30 + $0x20] sm:$0xff] }
0x19e3   :  { %v9673_v1 = vpop.f32.mrb[232].mxu0 }
0x19e4   :  { %v9677_v19 = vadd.f32 %v9673_v1, %v9525_v16  ;;  %v18768_v60 = vpop.f32.mrb[233].mxu0  ;;  %v15814_v1 = vld [vmem:[%s23165_s19 + $0x80] sm:$0xff] }
0x19eb   :  { %v9749_v29 = vpop.f32.mrb[234].mxu0 }
0x19ec   :  { %v18779_v62 = vpop.f32.mrb[235].mxu0  ;;  %18785 = vmatmul.mubr.msk.f32.vlgmr.msra.gmra.mrb[86].mxu1 %vm8204_vm15, %v9749_v29 }
0x19ed   :  { %18789 = vmatprep.mubr.msk.f32.mxu1 %vm20952_vm3, %v20953_v24 }
0x1abf   :  { %v9825_v0 = vpop.f32.mrb[86].mxu1 }
0x1ac0   :  { %v9829_v2 = vadd.f32 %v9825_v0, %v9677_v19  ;;  %v18786_v3 = vpop.f32.mrb[87].mxu1  ;;  %v15815_v19 = vld [vmem:[%s23165_s19 + $0x88] sm:$0xff] }
0x1ac1   :  { %v20140_v62 = vpack.c.bf16 %v15815_v19, %v15814_v1 }
0x1ac2   :  { %v9836_v4 = vadd.f32 %v15774_v63, %v9829_v2 }
0x1ac4   :  { %vm9837_vm0 = vcmp.gt.f32.partialorder %v9836_v4, 0.0  ;;  %v9838_v11 = vmul.f32 0.2, %v9836_v4 }
0x1ac6   :  { %v9839_v44 = vsel %vm9837_vm0, %v9836_v4, %v9838_v11  ;;  %v11216_v4 = vld [vmem:[%s23167_s13] sm:$0xff]  ;;  %v20146_v11 = vpack.c.bf16 %v11219_v9, %v11218_v7 }
0x1ac7   :  { %18788 = vmatpush3.msra.mxu1 %v9839_v44  ;;  %18793 = vmatpush3.msra.mxu0 %v9839_v44  ;;  %v20143_v8 = vpack.c.bf16 %v11217_v5, %v11216_v4  ;;  %v11613_v4 = vld [vmem:[%s23171_s30 + $0x10] sm:$0xff]  ;;  %v11614_v5 = vld [vmem:[%s23171_s30 + $0x18] sm:$0xff]  ;;  %v15836_v9 = vld [vmem:[%s23171_s30 + $0x40] sm:$0xff] }
0x1ac8   :  { %18790 = vmatmul.mubr.msk.f32.vlgmr.msra.gmra.mrb[88].mxu1 %vm973_vm2, %v9841_v30  ;;  %18795 = vmatmul.mubr.msk.f32.vlgmr.msra.gmra.mrb[236].mxu0 %vm973_vm2, %v15776_v35 }
0x1ac9   :  { %20115 = vmatprep.subr.bf16.mxu1 %v20951_v23  ;;  %20118 = vmatprep.subr.bf16.mxu0 %v20951_v23 }
0x1aca   :  { %20117 = vmatpush3.bf16.msra.mxu1 %v20116_v51  ;;  %20120 = vmatpush3.bf16.msra.mxu0 %v20119_v59 }
0x1acb   :  { %18801 = vmatprep.mubr.msk.f32.mxu1 %vm20952_vm3, %v20953_v24  ;;  %18808 = vmatprep.mubr.msk.f32.mxu0 %vm20952_vm3, %v20953_v24 }
0x1acc   :  { %18811 = vmatprep.subr.mxu1 %v20953_v24  ;;  %20121 = vmatprep.subr.bf16.mxu0 %v20951_v23 }
0x1b9b   :  { %v9911_v33 = vpop.f32.mrb[88].mxu1  ;;  %v9988_v13 = vpop.f32.mrb[236].mxu0 }
0x1b9c   :  { %v18796_v12 = vpop.f32.mrb[237].mxu0  ;;  %18802 = vmatmul.mubr.msk.f32.vlgmr.msra.gmra.mrb[90].mxu1 %vm8204_vm15, %v9988_v13  ;;  %18809 = vmatmul.mubr.msk.f32.vlgmr.msra.gmra.mrb[238].mxu0 %vm8204_vm15, %v9911_v33  ;;  %v18791_v41 = vpop.f32.mrb[89].mxu1 }
0x1b9d   :  { %18812 = vmatpush3.msra.mxu1 %v9839_v44  ;;  %18813 = vmatprep.mubr.msk.f32.mxu1 %vm20952_vm3, %v20953_v24 }
0x1b9e   :  { %18823 = vmatprep.subr.mxu1 %v20953_v24  ;;  %18820 = vmatprep.mubr.msk.f32.mxu0 %vm20952_vm3, %v20953_v24 }
0x1b9f   :  { %20123 = vmatpush3.bf16.msra.mxu0 %v20122_v25  ;;  %v15817_v25 = vld [vmem:[#allocation9] ss:$0 sm:$0xff] }
0x1ba0   :  { %18814 = vmatmul.mubr.msk.f32.vlgmr.msra.gmra.mrb[92].mxu1 %vm973_vm2, %v15782_v14  ;;  %20124 = vmatprep.subr.bf16.mxu0 %v20951_v23 }
0x1ba1   :  { %18824 = vmatpush3.msra.mxu1 %v9839_v44  ;;  %18825 = vmatprep.mubr.msk.f32.mxu1 %vm20952_vm3, %v20953_v24 }
0x1ba2   :  { %18835 = vmatprep.subr.mxu1 %v20953_v24 }
0x1ba4   :  { %18826 = vmatmul.mubr.msk.f32.vlgmr.msra.gmra.mrb[94].mxu1 %vm973_vm2, %v15787_v15 }
0x1ba5   :  { %18836 = vmatpush3.msra.mxu1 %v9839_v44  ;;  %18837 = vmatprep.mubr.msk.f32.mxu1 %vm20952_vm3, %v20953_v24 }
0x1ba6   :  { %18847 = vmatprep.subr.mxu1 %v20953_v24 }
0x1ba8   :  { %18838 = vmatmul.mubr.msk.f32.vlgmr.msra.gmra.mrb[96].mxu1 %vm973_vm2, %v15792_v17 }
0x1ba9   :  { %18848 = vmatpush3.msra.mxu1 %v9839_v44  ;;  %18849 = vmatprep.mubr.msk.f32.mxu1 %vm20952_vm3, %v20953_v24 }
0x1baa   :  { %18859 = vmatprep.subr.mxu1 %v20953_v24 }
0x1bac   :  { %18850 = vmatmul.mubr.msk.f32.vlgmr.msra.gmra.mrb[98].mxu1 %vm973_vm2, %v15797_v18 }
0x1bad   :  { %18860 = vmatpush3.msra.mxu1 %v9839_v44  ;;  %18861 = vmatprep.mubr.msk.f32.mxu1 %vm20952_vm3, %v20953_v24 }
0x1bae   :  { %18871 = vmatprep.subr.mxu1 %v20953_v24 }
0x1bb0   :  { %18862 = vmatmul.mubr.msk.f32.vlgmr.msra.gmra.mrb[100].mxu1 %vm973_vm2, %v15802_v20 }
0x1bb1   :  { %18872 = vmatpush3.msra.mxu1 %v9839_v44  ;;  %18873 = vmatprep.mubr.msk.f32.mxu1 %vm20952_vm3, %v20953_v24 }
0x1bb2   :  { %18883 = vmatprep.subr.mxu1 %v20953_v24 }
0x1bb4   :  { %18874 = vmatmul.mubr.msk.f32.vlgmr.msra.gmra.mrb[102].mxu1 %vm973_vm2, %v15807_v21 }
0x1bb5   :  { %18884 = vmatpush3.msra.mxu1 %v9839_v44  ;;  %18885 = vmatprep.mubr.msk.f32.mxu1 %vm20952_vm3, %v20953_v24 }
0x1bb6   :  { %18895 = vmatprep.subr.mxu1 %v20953_v24 }
0x1bb8   :  { %18886 = vmatmul.mubr.msk.f32.vlgmr.msra.gmra.mrb[104].mxu1 %vm973_vm2, %v15812_v22 }
0x1bb9   :  { %18897 = vmatprep.mubr.msk.f32.mxu1 %vm20952_vm3, %v20953_v24 }
0x1c6f   :  { %v10064_v26 = vpop.f32.mrb[90].mxu1  ;;  %v10137_v39 = vpop.f32.mrb[238].mxu0 }
0x1c70   :  { %v22606_v42 = vadd.f32 %v10137_v39, %v10064_v26  ;;  %v18803_v38 = vpop.f32.mrb[91].mxu1  ;;  %v18810_v46 = vpop.f32.mrb[239].mxu0 }
0x1c71   :  { %v11215_v38 = vld [vmem:[%s23168_s8] sm:$0xff] }
0x1c73   :  { %v10212_v54 = vpop.f32.mrb[92].mxu1 }
0x1c74   :  { %v18815_v45 = vpop.f32.mrb[93].mxu1  ;;  %18821 = vmatmul.mubr.msk.f32.vlgmr.msra.gmra.mrb[240].mxu0 %vm8204_vm15, %v10212_v54  ;;  %v15819_v54 = vld [vmem:[#allocation10] ss:$0 sm:$0xff] }
0x1c75   :  { %20126 = vmatpush3.bf16.msra.mxu0 %v20125_v43  ;;  %18832 = vmatprep.mubr.msk.f32.mxu0 %vm20952_vm3, %v20953_v24 }
0x1c76   :  { %20127 = vmatprep.subr.bf16.mxu0 %v20951_v23 }
0x1c77   :  { %v10364_v10 = vpop.f32.mrb[94].mxu1 }
0x1c78   :  { %v18827_v50 = vpop.f32.mrb[95].mxu1  ;;  %18833 = vmatmul.mubr.msk.f32.vlgmr.msra.gmra.mrb[242].mxu0 %vm8204_vm15, %v10364_v10  ;;  %v15821_v10 = vld [vmem:[#allocation12] ss:$0 sm:$0xff] }
0x1c79   :  { %20129 = vmatpush3.bf16.msra.mxu0 %v20128_v48  ;;  %18844 = vmatprep.mubr.msk.f32.mxu0 %vm20952_vm3, %v20953_v24 }
0x1c7a   :  { %20130 = vmatprep.subr.bf16.mxu0 %v20951_v23 }
0x1c7b   :  { %v10516_v16 = vpop.f32.mrb[96].mxu1 }
0x1c7c   :  { %v18839_v55 = vpop.f32.mrb[97].mxu1  ;;  %18845 = vmatmul.mubr.msk.f32.vlgmr.msra.gmra.mrb[244].mxu0 %vm8204_vm15, %v10516_v16 }
0x1c7d   :  { %20132 = vmatpush3.bf16.msra.mxu0 %v20131_v6  ;;  %18856 = vmatprep.mubr.msk.f32.mxu0 %vm20952_vm3, %v20953_v24 }
0x1c7e   :  { %20133 = vmatprep.subr.bf16.mxu0 %v20951_v23 }
0x1c7f   :  { %v10668_v40 = vpop.f32.mrb[98].mxu1 }
0x1c80   :  { %v18851_v57 = vpop.f32.mrb[99].mxu1  ;;  %18857 = vmatmul.mubr.msk.f32.vlgmr.msra.gmra.mrb[246].mxu0 %vm8204_vm15, %v10668_v40  ;;  %v15829_v40 = vld [vmem:[%s23171_s30 + $0x28] sm:$0xff] }
0x1c81   :  { %20135 = vmatpush3.bf16.msra.mxu0 %v20134_v27  ;;  %18868 = vmatprep.mubr.msk.f32.mxu0 %vm20952_vm3, %v20953_v24  ;;  %v11223_v27 = vld [vmem:[%s23170_s0] sm:$0xff] }
0x1c82   :  { %20136 = vmatprep.subr.bf16.mxu0 %v20951_v23  ;;  %v11611_v57 = vld [vmem:[%s23171_s30] sm:$0xff] }
0x1c83   :  { %v10820_v60 = vpop.f32.mrb[100].mxu1 }
0x1c84   :  { %v18863_v29 = vpop.f32.mrb[101].mxu1  ;;  %18869 = vmatmul.mubr.msk.f32.vlgmr.msra.gmra.mrb[248].mxu0 %vm8204_vm15, %v10820_v60 }
0x1c85   :  { %20138 = vmatpush3.bf16.msra.mxu0 %v20137_v58  ;;  %18880 = vmatprep.mubr.msk.f32.mxu0 %vm20952_vm3, %v20953_v24  ;;  %v11612_v58 = vld [vmem:[%s23171_s30 + $0x8] sm:$0xff]  ;;  %v11537_v29 = vld [vmem:[%s23172_s9] sm:$0xff] }
0x1c86   :  { %20139 = vmatprep.subr.bf16.mxu0 %v20951_v23 }
0x1c87   :  { %v10972_v63 = vpop.f32.mrb[102].mxu1 }
0x1c88   :  { %v18875_v0 = vpop.f32.mrb[103].mxu1  ;;  %18881 = vmatmul.mubr.msk.f32.vlgmr.msra.gmra.mrb[250].mxu0 %vm8204_vm15, %v10972_v63  ;;  %v20149_v63 = vpack.c.bf16 %v15829_v40, %v15828_v37  ;;  %v15864_v40 = vld [vmem:[%s23171_s30 + $0xc0] sm:$0xff] }
0x1c89   :  { %20141 = vmatpush3.bf16.msra.mxu0 %v20140_v62  ;;  %18892 = vmatprep.mubr.msk.f32.mxu0 %vm20952_vm3, %v20953_v24  ;;  %v15826_v62 = vld [vmem:[%s23172_s9 + $0x8] sm:$0xff]  ;;  %v20155_v0 = vpack.c.bf16 %v11612_v58, %v11611_v57 }
0x1c8a   :  { %20142 = vmatprep.subr.bf16.mxu0 %v20951_v23  ;;  %v15865_v57 = vld [vmem:[%s23171_s30 + $0xc8] sm:$0xff] }
0x1c8b   :  { %v11124_v2 = vpop.f32.mrb[104].mxu1 }
0x1c8c   :  { %v18887_v3 = vpop.f32.mrb[105].mxu1  ;;  %18893 = vmatmul.mubr.msk.f32.vlgmr.msra.gmra.mrb[252].mxu0 %vm8204_vm15, %v11124_v2  ;;  %v15830_v2 = vld [vmem:[%s23171_s30 + $0x30] sm:$0xff] }
0x1c8d   :  { %18908 = vmatprep.mubr.msk.f32.mxu0 %vm20952_vm3, %v20953_v24  ;;  %20144 = vmatpush3.bf16.msra.mxu0 %v20143_v8  ;;  %v15831_v3 = vld [vmem:[%s23171_s30 + $0x38] sm:$0xff]  ;;  %v20158_v8 = vpack.c.bf16 %v11614_v5, %v11613_v4 }
0x1c8e   :  { %20145 = vmatprep.subr.bf16.mxu0 %v20951_v23  ;;  %v20152_v7 = vpack.c.bf16 %v15831_v3, %v15830_v2  ;;  %v15869_v2 = vld [vmem:[%s23172_s9 + $0x38] sm:$0xff]  ;;  %v15866_v3 = vld [vmem:[%s23171_s30 + $0xd0] sm:$0xff] }
0x1c8f   :  { %v15867_v4 = vld [vmem:[%s23171_s30 + $0xd8] sm:$0xff] }
0x1c90   :  { %v20188_v5 = vpack.c.bf16 %v15867_v4, %v15866_v3  ;;  %v15896_v3 = vld [vmem:[%s23173_s25 + $0x48] sm:$0xff] }
0x1c91   :  { %20147 = vmatpush3.bf16.msra.mxu0 %v20146_v11  ;;  %v15837_v11 = vld [vmem:[%s23171_s30 + $0x48] sm:$0xff] }
0x1c92   :  { %18921 = vmatprep.subr.mxu0 %v20953_v24 }
0x1d47   :  { %v10288_v30 = vpop.f32.mrb[240].mxu0 }
0x1d48   :  { %v10292_v35 = vadd.f32 %v10288_v30, %v22606_v42  ;;  %v18822_v44 = vpop.f32.mrb[241].mxu0  ;;  %v20161_v30 = vpack.c.bf16 %v15837_v11, %v15836_v9  ;;  %v15873_v11 = vld [vmem:[%s23171_s30 + $0xf0] sm:$0xff] }
0x1d4b   :  { %v10440_v51 = vpop.f32.mrb[242].mxu0 }
0x1d4c   :  { %v10444_v59 = vadd.f32 %v10440_v51, %v10292_v35  ;;  %v18834_v33 = vpop.f32.mrb[243].mxu0 }
0x1d4d   :  { %v15834_v33 = vld [vmem:[%s23172_s9 + $0x10] sm:$0xff] }
0x1d4f   :  { %v10592_v13 = vpop.f32.mrb[244].mxu0 }
0x1d50   :  { %v10596_v12 = vadd.f32 %v10592_v13, %v10444_v59  ;;  %v18846_v41 = vpop.f32.mrb[245].mxu0  ;;  %v15841_v13 = vld [vmem:[%s23172_s9 + $0x18] sm:$0xff] }
0x1d51   :  { %v15839_v41 = vld [vmem:[%s23171_s30 + $0x58] sm:$0xff] }
0x1d53   :  { %v10744_v14 = vpop.f32.mrb[246].mxu0 }
0x1d54   :  { %v10748_v15 = vadd.f32 %v10744_v14, %v10596_v12  ;;  %v18858_v17 = vpop.f32.mrb[247].mxu0  ;;  %v15838_v12 = vld [vmem:[%s23171_s30 + $0x50] sm:$0xff]  ;;  %v15843_v14 = vld [vmem:[%s23171_s30 + $0x60] sm:$0xff] }
0x1d55   :  { %v15844_v17 = vld [vmem:[%s23171_s30 + $0x68] sm:$0xff] }
0x1d57   :  { %v10896_v18 = vpop.f32.mrb[248].mxu0 }
0x1d58   :  { %v10900_v20 = vadd.f32 %v10896_v18, %v10748_v15  ;;  %v18870_v21 = vpop.f32.mrb[249].mxu0  ;;  %v20164_v15 = vpack.c.bf16 %v15839_v41, %v15838_v12  ;;  %v20167_v18 = vpack.c.bf16 %v15844_v17, %v15843_v14 }
0x1d59   :  { %v15846_v21 = vld [vmem:[%s23171_s30 + $0x78] sm:$0xff] }
0x1d5b   :  { %v11048_v22 = vpop.f32.mrb[250].mxu0 }
0x1d5c   :  { %v11052_v28 = vadd.f32 %v11048_v22, %v10900_v20  ;;  %v18882_v32 = vpop.f32.mrb[251].mxu0  ;;  %v15845_v20 = vld [vmem:[%s23171_s30 + $0x70] sm:$0xff] }
0x1d5d   :  { %v20170_v22 = vpack.c.bf16 %v15846_v21, %v15845_v20 }
0x1d5f   :  { %v11200_v34 = vpop.f32.mrb[252].mxu0 }
0x1d60   :  { %v11204_v36 = vadd.f32 %v11200_v34, %v11052_v28  ;;  %v18894_v26 = vpop.f32.mrb[253].mxu0 }
0x1d62   :  { %v11211_v39 = vadd.f32 %v15817_v25, %v11204_v36 }
0x1d64   :  { %v11213_v42 = vmul.f32 0.2, %v11211_v39  ;;  %vm11212_vm1 = vcmp.gt.f32.partialorder %v11211_v39, 0.0 }
0x1d66   :  { %v11214_v46 = vsel %vm11212_vm1, %v11211_v39, %v11213_v42  ;;  %v15850_v39 = vld [vmem:[%s23171_s30 + $0x80] sm:$0xff]  ;;  %v15851_v42 = vld [vmem:[%s23171_s30 + $0x88] sm:$0xff] }
0x1d67   :  { %18896 = vmatpush3.msra.mxu1 %v11214_v46 }
0x1d68   :  { %18898 = vmatmul.mubr.msk.f32.vlgmr.msra.gmra.mrb[106].mxu1 %vm973_vm2, %v11215_v38  ;;  %18911 = vmatprep.subr.mxu1 %v20953_v24 }
0x1d69   :  { %18913 = vmatprep.mubr.msk.f32.mxu1 %vm20952_vm3, %v20953_v24  ;;  %18912 = vmatpush3.msra.mxu1 %v11221_v56 }
0x1d6a   :  { %18916 = vmatprep.subr.mxu1 %v20953_v24 }
0x1e3b   :  { %v11293_v43 = vpop.f32.mrb[106].mxu1 }
0x1e3c   :  { %v18899_v47 = vpop.f32.mrb[107].mxu1  ;;  %18909 = vmatmul.mubr.msk.f32.vlgmr.msra.gmra.mrb[254].mxu0 %vm6261_vm6, %v11293_v43  ;;  %v20173_v43 = vpack.c.bf16 %v15851_v42, %v15850_v39 }
0x1e3d   :  { %18923 = vmatprep.mubr.msk.f32.mxu0 %vm20952_vm3, %v20953_v24 }
0x1f0f   :  { %v11372_v45 = vpop.f32.mrb[254].mxu0 }
0x1f10   :  { %v11373_v48 = vadd.f32 %v15819_v54, %v11372_v45  ;;  %v18910_v61 = vpop.f32.mrb[255].mxu0  ;;  %v15855_v54 = vld [vmem:[%s23172_s9 + $0x28] sm:$0xff]  ;;  %v15852_v45 = vld [vmem:[%s23171_s30 + $0x90] sm:$0xff] }
0x1f11   :  { %v15857_v61 = vld [vmem:[%s23171_s30 + $0xa0] sm:$0xff] }
0x1f12   :  { %v11376_v49 = vmax.f32 %v11373_v48, 0.0  ;;  %v15853_v48 = vld [vmem:[%s23171_s30 + $0x98] sm:$0xff] }
0x1f14   :  { %18914 = vmatmul.mubr.msk.f32.vlgmr.msra.gmra.mrb[108].mxu1 %vm973_vm2, %v11376_v49  ;;  %v20176_v49 = vpack.c.bf16 %v15853_v48, %v15852_v45 }
0x1f15   :  { %18918 = vmatprep.mubr.msk.f32.mxu1 %vm20952_vm3, %v20953_v24 }
0x1fe7   :  { %v11452_v50 = vpop.f32.mrb[108].mxu1 }
0x1fe8   :  { %v11453_v6 = vadd.f32 %v15821_v10, %v11452_v50  ;;  %v18915_v52 = vpop.f32.mrb[109].mxu1  ;;  %v15858_v10 = vld [vmem:[%s23171_s30 + $0xa8] sm:$0xff] }
0x1fe9   :  { %v20179_v50 = vpack.c.bf16 %v15858_v10, %v15857_v61  ;;  %v15860_v52 = vld [vmem:[%s23171_s30 + $0xb8] sm:$0xff] }
0x1fea   :  { %v15823_v53 = vmul.f32 -1.442695, %v11453_v6  ;;  %v15859_v6 = vld [vmem:[%s23171_s30 + $0xb0] sm:$0xff] }
0x1fec   :  { %20576 = vpow2.f32 %v15823_v53  ;;  %v20182_v53 = vpack.c.bf16 %v15860_v52, %v15859_v6  ;;  %v13004_v52 = vld [vmem:[%s23173_s25] sm:$0xff] }
0x1ff6   :  { %v20577_v16 = vpop.eup %20576 }
0x1ff7   :  { %v11459_v55 = vadd.f32 1.0, %v20577_v16 }
0x1ff9   :  { %20578 = vrcp.f32 %v11459_v55 }
0x2003   :  { %v20579_v31 = vpop.eup %20578 }
0x2004   :  { %18917 = vmatpush3.msra.mxu1 %v20579_v31 }
0x2005   :  { %18919 = vmatmul.mubr.msk.f32.vlgmr.msra.gmra.mrb[110].mxu1 %vm973_vm2, %v11223_v27  ;;  %18926 = vmatprep.subr.mxu1 %v20953_v24 }
0x2006   :  { %18928 = vmatprep.mubr.msk.f32.mxu1 %vm20952_vm3, %v20953_v24 }
0x20d8   :  { %v11531_v1 = vpop.f32.mrb[110].mxu1 }
0x20d9   :  { %v22674_v19 = vmul.f32 %v11531_v1, %v11214_v46  ;;  %v18920_v60 = vpop.f32.mrb[111].mxu1  ;;  %v15848_v46 = vld [vmem:[%s23172_s9 + $0x20] sm:$0xff] }
0x20db   :  { %18922 = vmatpush3.msra.mxu0 %v22674_v19  ;;  %18927 = vmatpush3.msra.mxu1 %v22674_v19 }
0x20dc   :  { %18924 = vmatmul.mubr.msk.f32.vlgmr.msra.gmra.mrb[0].mxu0 %vm973_vm2, %v11537_v29  ;;  %18929 = vmatmul.mubr.msk.f32.vlgmr.msra.gmra.mrb[112].mxu1 %vm973_vm2, %v15826_v62  ;;  %v15862_v29 = vld [vmem:[%s23172_s9 + $0x30] sm:$0xff]  ;;  %v20185_v62 = vpack.c.bf16 %v15865_v57, %v15864_v40  ;;  %v15890_v57 = vld [vmem:[%s23173_s25 + $0x38] sm:$0xff] }
0x20dd   :  { %20148 = vmatprep.subr.bf16.mxu0 %v20951_v23  ;;  %20154 = vmatprep.subr.bf16.mxu1 %v20951_v23  ;;  %v15889_v40 = vld [vmem:[%s23173_s25 + $0x30] sm:$0xff] }
0x20de   :  { %20150 = vmatpush3.bf16.msra.mxu0 %v20149_v63  ;;  %20156 = vmatpush3.bf16.msra.mxu1 %v20155_v0 }
0x20df   :  { %20151 = vmatprep.subr.bf16.mxu0 %v20951_v23  ;;  %20157 = vmatprep.subr.bf16.mxu1 %v20951_v23 }
0x20e0   :  { %18939 = vmatprep.mubr.msk.f32.mxu0 %vm20952_vm3, %v20953_v24  ;;  %18950 = vmatprep.mubr.msk.f32.mxu1 %vm20952_vm3, %v20953_v24 }
0x20e2   :  { %20153 = vmatpush3.bf16.msra.mxu0 %v20152_v7  ;;  %20159 = vmatpush3.bf16.msra.mxu1 %v20158_v8  ;;  %v15871_v7 = vld [vmem:[%s23171_s30 + $0xe0] sm:$0xff]  ;;  %v15872_v8 = vld [vmem:[%s23171_s30 + $0xe8] sm:$0xff] }
0x20e3   :  { %18953 = vmatprep.subr.mxu0 %v20953_v24  ;;  %20160 = vmatprep.subr.bf16.mxu1 %v20951_v23  ;;  %v20191_v9 = vpack.c.bf16 %v15872_v8, %v15871_v7  ;;  %v15898_v7 = vld [vmem:[%s23173_s25 + $0x58] sm:$0xff]  ;;  %v15902_v8 = vld [vmem:[%s23173_s25 + $0x60] sm:$0xff] }
0x21af   :  { %v11607_v35 = vpop.f32.mrb[0].mxu0  ;;  %v11686_v44 = vpop.f32.mrb[112].mxu1 }
0x21b0   :  { %v18930_v51 = vpop.f32.mrb[113].mxu1  ;;  %18940 = vmatmul.mubr.msk.f32.vlgmr.msra.gmra.mrb[2].mxu0 %vm6261_vm6, %v11686_v44  ;;  %18951 = vmatmul.mubr.msk.f32.vlgmr.msra.gmra.mrb[114].mxu1 %vm6261_vm6, %v11607_v35  ;;  %v18925_v59 = vpop.f32.mrb[1].mxu0 }
0x21b1   :  { %18954 = vmatpush3.msra.mxu0 %v22674_v19  ;;  %18955 = vmatprep.mubr.msk.f32.mxu0 %vm20952_vm3, %v20953_v24 }
0x21b2   :  { %18969 = vmatprep.subr.mxu0 %v20953_v24  ;;  %20162 = vmatpush3.bf16.msra.mxu1 %v20161_v30  ;;  %v15874_v30 = vld [vmem:[%s23171_s30 + $0xf8] sm:$0xff] }
0x21b3   :  { %20163 = vmatprep.subr.bf16.mxu1 %v20951_v23  ;;  %18966 = vmatprep.mubr.msk.f32.mxu1 %vm20952_vm3, %v20953_v24  ;;  %v20194_v35 = vpack.c.bf16 %v15874_v30, %v15873_v11  ;;  %v15903_v11 = vld [vmem:[%s23173_s25 + $0x68] sm:$0xff] }
0x21b4   :  { %18956 = vmatmul.mubr.msk.f32.vlgmr.msra.gmra.mrb[4].mxu0 %vm973_vm2, %v15834_v33  ;;  %v15878_v33 = vld [vmem:[%s23171_s30 + $0x100] sm:$0xff]  ;;  %v20221_v30 = vpack.c.bf16 %v15903_v11, %v15902_v8 }
0x21b5   :  { %18970 = vmatpush3.msra.mxu0 %v22674_v19  ;;  %18971 = vmatprep.mubr.msk.f32.mxu0 %vm20952_vm3, %v20953_v24 }
0x21b6   :  { %20166 = vmatprep.subr.bf16.mxu0 %v20951_v23  ;;  %20165 = vmatpush3.bf16.msra.mxu1 %v20164_v15 }
0x21b7   :  { %18985 = vmatprep.subr.mxu1 %v20953_v24 }
0x21b8   :  { %18972 = vmatmul.mubr.msk.f32.vlgmr.msra.gmra.mrb[6].mxu0 %vm973_vm2, %v15841_v13  ;;  %v15879_v13 = vld [vmem:[%s23171_s30 + $0x108] sm:$0xff] }
0x21b9   :  { %18982 = vmatprep.mubr.msk.f32.mxu0 %vm20952_vm3, %v20953_v24  ;;  %20168 = vmatpush3.bf16.msra.mxu0 %v20167_v18  ;;  %v15876_v18 = vld [vmem:[%s23172_s9 + $0x40] sm:$0xff]  ;;  %v20197_v20 = vpack.c.bf16 %v15879_v13, %v15878_v33 }
0x21ba   :  { %20169 = vmatprep.subr.bf16.mxu0 %v20951_v23 }
0x21bd   :  { %20171 = vmatpush3.bf16.msra.mxu0 %v20170_v22 }
0x21be   :  { %19001 = vmatprep.subr.mxu0 %v20953_v24 }
0x2283   :  { %v11764_v28 = vpop.f32.mrb[2].mxu0  ;;  %v11837_v32 = vpop.f32.mrb[114].mxu1 }
0x2284   :  { %v11838_v25 = vadd.f32 %v11837_v32, %v11764_v28  ;;  %v18941_v34 = vpop.f32.mrb[3].mxu0  ;;  %v18952_v36 = vpop.f32.mrb[115].mxu1  ;;  %v15881_v28 = vld [vmem:[%s23171_s30 + $0x118] sm:$0xff] }
0x2287   :  { %v11912_v26 = vpop.f32.mrb[4].mxu0 }
0x2288   :  { %v18957_v38 = vpop.f32.mrb[5].mxu0  ;;  %18967 = vmatmul.mubr.msk.f32.vlgmr.msra.gmra.mrb[116].mxu1 %vm6261_vm6, %v11912_v26 }
0x2289   :  { %18986 = vmatpush3.msra.mxu1 %v22674_v19  ;;  %18987 = vmatprep.mubr.msk.f32.mxu1 %vm20952_vm3, %v20953_v24 }
0x228a   :  { %20172 = vmatprep.subr.bf16.mxu1 %v20951_v23 }
0x228b   :  { %v12066_v47 = vpop.f32.mrb[6].mxu0 }
0x228c   :  { %18983 = vmatmul.mubr.msk.f32.vlgmr.msra.gmra.mrb[8].mxu0 %vm6261_vm6, %v12066_v47  ;;  %18988 = vmatmul.mubr.msk.f32.vlgmr.msra.gmra.mrb[118].mxu1 %vm973_vm2, %v15848_v46  ;;  %v18973_v56 = vpop.f32.mrb[7].mxu0  ;;  %v15888_v47 = vld [vmem:[%s23173_s25 + $0x28] sm:$0xff] }
0x228d   :  { %19002 = vmatpush3.msra.mxu0 %v22674_v19  ;;  %19003 = vmatprep.mubr.msk.f32.mxu0 %vm20952_vm3, %v20953_v24 }
0x228e   :  { %20174 = vmatpush3.bf16.msra.mxu1 %v20173_v43  ;;  %20178 = vmatprep.subr.bf16.mxu0 %v20951_v23  ;;  %v15887_v43 = vld [vmem:[%s23173_s25 + $0x20] sm:$0xff] }
0x228f   :  { %20175 = vmatprep.subr.bf16.mxu1 %v20951_v23  ;;  %18998 = vmatprep.mubr.msk.f32.mxu1 %vm20952_vm3, %v20953_v24  ;;  %v20203_v56 = vpack.c.bf16 %v15888_v47, %v15887_v43 }
0x2290   :  { %19004 = vmatmul.mubr.msk.f32.vlgmr.msra.gmra.mrb[10].mxu0 %vm973_vm2, %v15855_v54  ;;  %v15883_v54 = vld [vmem:[#allocation13] ss:$0 sm:$0xff] }
0x2291   :  { %19014 = vmatprep.mubr.msk.f32.mxu0 %vm20952_vm3, %v20953_v24  ;;  %20180 = vmatpush3.bf16.msra.mxu0 %v20179_v50  ;;  %v12930_v50 = vld [vmem:[%s23174_s5] sm:$0xff] }
0x2292   :  { %20177 = vmatpush3.bf16.msra.mxu1 %v20176_v49  ;;  %20181 = vmatprep.subr.bf16.mxu0 %v20951_v23 }
0x2293   :  { %19017 = vmatprep.subr.mxu1 %v20953_v24 }
0x2295   :  { %20183 = vmatpush3.bf16.msra.mxu0 %v20182_v53  ;;  %v13005_v53 = vld [vmem:[%s23173_s25 + $0x8] sm:$0xff] }
0x2296   :  { %19033 = vmatprep.subr.mxu0 %v20953_v24 }
0x235b   :  { %v11990_v16 = vpop.f32.mrb[116].mxu1 }
0x235c   :  { %v11994_v55 = vadd.f32 %v11990_v16, %v11838_v25  ;;  %v18968_v27 = vpop.f32.mrb[117].mxu1  ;;  %v15885_v16 = vld [vmem:[%s23174_s5 + $0x8] sm:$0xff] }
0x235d   :  { %v13006_v27 = vld [vmem:[%s23173_s25 + $0x10] sm:$0xff] }
0x235f   :  { %v12144_v31 = vpop.f32.mrb[8].mxu0  ;;  %v12220_v37 = vpop.f32.mrb[118].mxu1 }
0x2360   :  { %v12148_v58 = vadd.f32 %v12144_v31, %v11994_v55  ;;  %v18989_v1 = vpop.f32.mrb[119].mxu1  ;;  %18999 = vmatmul.mubr.msk.f32.vlgmr.msra.gmra.mrb[120].mxu1 %vm6261_vm6, %v12220_v37  ;;  %v18984_v60 = vpop.f32.mrb[9].mxu0  ;;  %v20209_v55 = vpack.c.bf16 %v13005_v53, %v13004_v52  ;;  %v13007_v31 = vld [vmem:[%s23173_s25 + $0x18] sm:$0xff]  ;;  %v15921_v52 = vld [vmem:[%s23174_s5 + $0x30] sm:$0xff] }
0x2361   :  { %19018 = vmatpush3.msra.mxu1 %v22674_v19  ;;  %19019 = vmatprep.mubr.msk.f32.mxu1 %vm20952_vm3, %v20953_v24  ;;  %v20212_v37 = vpack.c.bf16 %v13007_v31, %v13006_v27  ;;  %v15928_v27 = vld [vmem:[%s23174_s5 + $0x38] sm:$0xff]  ;;  %v15925_v31 = vld [vmem:[%s23173_s25 + $0xd0] sm:$0xff] }
0x2362   :  { %20184 = vmatprep.subr.bf16.mxu1 %v20951_v23 }
0x2363   :  { %v12374_v63 = vpop.f32.mrb[10].mxu0 }
0x2364   :  { %19015 = vmatmul.mubr.msk.f32.vlgmr.msra.gmra.mrb[12].mxu0 %vm6261_vm6, %v12374_v63  ;;  %19020 = vmatmul.mubr.msk.f32.vlgmr.msra.gmra.mrb[122].mxu1 %vm973_vm2, %v15862_v29  ;;  %v19005_v0 = vpop.f32.mrb[11].mxu0  ;;  %v15893_v63 = vld [vmem:[%s23174_s5 + $0x10] sm:$0xff] }
0x2365   :  { %19034 = vmatpush3.msra.mxu0 %v22674_v19  ;;  %19035 = vmatprep.mubr.msk.f32.mxu0 %vm20952_vm3, %v20953_v24  ;;  %v15900_v0 = vld [vmem:[%s23174_s5 + $0x18] sm:$0xff] }
0x2366   :  { %20186 = vmatpush3.bf16.msra.mxu1 %v20185_v62  ;;  %20190 = vmatprep.subr.bf16.mxu0 %v20951_v23 }
0x2367   :  { %20187 = vmatprep.subr.bf16.mxu1 %v20951_v23  ;;  %19030 = vmatprep.mubr.msk.f32.mxu1 %vm20952_vm3, %v20953_v24 }
0x2368   :  { %19036 = vmatmul.mubr.msk.f32.vlgmr.msra.gmra.mrb[14].mxu0 %vm973_vm2, %v15869_v2  ;;  %v15895_v2 = vld [vmem:[%s23173_s25 + $0x40] sm:$0xff] }
0x2369   :  { %19046 = vmatprep.mubr.msk.f32.mxu0 %vm20952_vm3, %v20953_v24  ;;  %20192 = vmatpush3.bf16.msra.mxu0 %v20191_v9  ;;  %v20215_v4 = vpack.c.bf16 %v15896_v3, %v15895_v2  ;;  %v15937_v3 = vld [vmem:[%s23173_s25 + $0x100] sm:$0xff] }
0x236a   :  { %20189 = vmatpush3.bf16.msra.mxu1 %v20188_v5  ;;  %20193 = vmatprep.subr.bf16.mxu0 %v20951_v23  ;;  %v15897_v5 = vld [vmem:[%s23173_s25 + $0x50] sm:$0xff] }
0x236b   :  { %19049 = vmatprep.subr.mxu1 %v20953_v24  ;;  %v20218_v9 = vpack.c.bf16 %v15898_v7, %v15897_v5 }
0x236d   :  { %20195 = vmatpush3.bf16.msra.mxu0 %v20194_v35  ;;  %v15904_v35 = vld [vmem:[%s23173_s25 + $0x70] sm:$0xff] }
0x236e   :  { %19065 = vmatprep.subr.mxu0 %v20953_v24 }
0x2433   :  { %v12298_v44 = vpop.f32.mrb[120].mxu1 }
0x2434   :  { %v12302_v51 = vadd.f32 %v12298_v44, %v12148_v58  ;;  %v19000_v59 = vpop.f32.mrb[121].mxu1  ;;  %v20206_v58 = vpack.c.bf16 %v15890_v57, %v15889_v40  ;;  %v15905_v44 = vld [vmem:[%s23173_s25 + $0x78] sm:$0xff]  ;;  %v15930_v57 = vld [vmem:[%s23173_s25 + $0xe0] sm:$0xff] }
0x2437   :  { %v12452_v12 = vpop.f32.mrb[12].mxu0  ;;  %v12528_v41 = vpop.f32.mrb[122].mxu1 }
0x2438   :  { %v12456_v14 = vadd.f32 %v12452_v12, %v12302_v51  ;;  %v19021_v15 = vpop.f32.mrb[123].mxu1  ;;  %19031 = vmatmul.mubr.msk.f32.vlgmr.msra.gmra.mrb[124].mxu1 %vm6261_vm6, %v12528_v41  ;;  %v19016_v17 = vpop.f32.mrb[13].mxu0  ;;  %v20224_v51 = vpack.c.bf16 %v15905_v44, %v15904_v35 }
0x2439   :  { %19050 = vmatpush3.msra.mxu1 %v22674_v19  ;;  %19051 = vmatprep.mubr.msk.f32.mxu1 %vm20952_vm3, %v20953_v24  ;;  %v15880_v19 = vld [vmem:[%s23171_s30 + $0x110] sm:$0xff]  ;;  %v15909_v15 = vld [vmem:[%s23173_s25 + $0x80] sm:$0xff]  ;;  %v15910_v17 = vld [vmem:[%s23173_s25 + $0x88] sm:$0xff] }
0x243a   :  { %20196 = vmatprep.subr.bf16.mxu1 %v20951_v23  ;;  %v20200_v32 = vpack.c.bf16 %v15881_v28, %v15880_v19  ;;  %v15914_v28 = vld [vmem:[%s23174_s5 + $0x28] sm:$0xff] }
0x243b   :  { %v12682_v21 = vpop.f32.mrb[14].mxu0 }
0x243c   :  { %19047 = vmatmul.mubr.msk.f32.vlgmr.msra.gmra.mrb[16].mxu0 %vm6261_vm6, %v12682_v21  ;;  %19052 = vmatmul.mubr.msk.f32.vlgmr.msra.gmra.mrb[126].mxu1 %vm973_vm2, %v15876_v18  ;;  %v19037_v22 = vpop.f32.mrb[15].mxu0  ;;  %v20227_v21 = vpack.c.bf16 %v15910_v17, %v15909_v15 }
0x243d   :  { %20198 = vmatpush3.bf16.msra.mxu1 %v20197_v20  ;;  %19062 = vmatprep.mubr.msk.f32.mxu1 %vm20952_vm3, %v20953_v24  ;;  %v15907_v20 = vld [vmem:[%s23174_s5 + $0x20] sm:$0xff] }
0x243e   :  { %20199 = vmatprep.subr.bf16.mxu1 %v20951_v23  ;;  %19067 = vmatprep.mubr.msk.f32.mxu0 %vm20952_vm3, %v20953_v24 }
0x2441   :  { %20201 = vmatpush3.bf16.msra.mxu1 %v20200_v32  ;;  %v15911_v32 = vld [vmem:[%s23173_s25 + $0x90] sm:$0xff] }
0x2442   :  { %20202 = vmatprep.subr.bf16.mxu1 %v20951_v23 }
0x250b   :  { %v12606_v25 = vpop.f32.mrb[124].mxu1 }
0x250c   :  { %v12610_v34 = vadd.f32 %v12606_v25, %v12456_v14  ;;  %v19032_v36 = vpop.f32.mrb[125].mxu1  ;;  %v15912_v25 = vld [vmem:[%s23173_s25 + $0x98] sm:$0xff] }
0x250d   :  { %v20230_v36 = vpack.c.bf16 %v15912_v25, %v15911_v32  ;;  %v14323_v25 = vld [vmem:[%s23175_s29] sm:$0xff] }
0x250f   :  { %v12760_v26 = vpop.f32.mrb[16].mxu0  ;;  %v12836_v39 = vpop.f32.mrb[126].mxu1 }
0x2510   :  { %v12764_v42 = vadd.f32 %v12760_v26, %v12610_v34  ;;  %v19053_v38 = vpop.f32.mrb[127].mxu1  ;;  %19063 = vmatmul.mubr.msk.f32.vlgmr.msra.gmra.mrb[128].mxu1 %vm6261_vm6, %v12836_v39  ;;  %v19048_v46 = vpop.f32.mrb[17].mxu0  ;;  %v15916_v34 = vld [vmem:[%s23173_s25 + $0xa0] sm:$0xff]  ;;  %v15917_v26 = vld [vmem:[%s23173_s25 + $0xa8] sm:$0xff] }
0x2511   :  { %19083 = vmatprep.mubr.msk.f32.mxu1 %vm20952_vm3, %v20953_v24  ;;  %20204 = vmatpush3.bf16.msra.mxu1 %v20203_v56  ;;  %v20233_v39 = vpack.c.bf16 %v15917_v26, %v15916_v34  ;;  %v15919_v38 = vld [vmem:[%s23173_s25 + $0xb8] sm:$0xff]  ;;  %v14324_v34 = vld [vmem:[%s23175_s29 + $0x8] sm:$0xff]  ;;  %v14322_v26 = vld [vmem:[%s23176_s4] sm:$0xff] }
0x2512   :  { %20205 = vmatprep.subr.bf16.mxu1 %v20951_v23 }
0x2515   :  { %20207 = vmatpush3.bf16.msra.mxu1 %v20206_v58  ;;  %v15931_v58 = vld [vmem:[%s23173_s25 + $0xe8] sm:$0xff] }
0x2516   :  { %19097 = vmatprep.subr.mxu1 %v20953_v24 }
0x25e3   :  { %v12914_v45 = vpop.f32.mrb[128].mxu1 }
0x25e4   :  { %v12918_v48 = vadd.f32 %v12914_v45, %v12764_v42  ;;  %v19064_v61 = vpop.f32.mrb[129].mxu1  ;;  %v15918_v42 = vld [vmem:[%s23173_s25 + $0xb0] sm:$0xff] }
0x25e5   :  { %v20236_v46 = vpack.c.bf16 %v15919_v38, %v15918_v42  ;;  %v15924_v61 = vld [vmem:[%s23173_s25 + $0xc8] sm:$0xff]  ;;  %v14325_v38 = vld [vmem:[%s23175_s29 + $0x10] sm:$0xff] }
0x25e6   :  { %v12925_v49 = vadd.f32 %v15883_v54, %v12918_v48  ;;  %v15923_v48 = vld [vmem:[%s23173_s25 + $0xc0] sm:$0xff] }
0x25e7   :  { %v20239_v53 = vpack.c.bf16 %v15924_v61, %v15923_v48  ;;  %v14330_v48 = vld [vmem:[%s23175_s29 + $0x38] sm:$0xff] }
0x25e8   :  { %vm12926_vm4 = vcmp.gt.f32.partialorder %v12925_v49, 0.0  ;;  %v12927_v10 = vmul.f32 0.2, %v12925_v49 }
0x25ea   :  { %v22811_v6 = vsel %vm12926_vm4, %v12925_v49, %v12927_v10 }
0x25eb   :  { %19066 = vmatpush3.msra.mxu0 %v22811_v6 }
0x25ec   :  { %19068 = vmatmul.mubr.msk.f32.vlgmr.msra.gmra.mrb[18].mxu0 %vm973_vm2, %v12930_v50  ;;  %19070 = vmatprep.subr.mxu0 %v20953_v24 }
0x25ed   :  { %19071 = vmatpush3.msra.mxu0 %v22811_v6  ;;  %19072 = vmatprep.mubr.msk.f32.mxu0 %vm20952_vm3, %v20953_v24 }
0x25ee   :  { %20208 = vmatprep.subr.bf16.mxu0 %v20951_v23 }
0x25f0   :  { %19073 = vmatmul.mubr.msk.f32.vlgmr.msra.gmra.mrb[20].mxu0 %vm973_vm2, %v15885_v16 }
0x25f1   :  { %20210 = vmatpush3.bf16.msra.mxu0 %v20209_v55  ;;  %19094 = vmatprep.mubr.msk.f32.mxu0 %vm20952_vm3, %v20953_v24 }
0x25f2   :  { %20211 = vmatprep.subr.bf16.mxu0 %v20951_v23 }
0x25f5   :  { %20213 = vmatpush3.bf16.msra.mxu0 %v20212_v37  ;;  %v15926_v37 = vld [vmem:[%s23173_s25 + $0xd8] sm:$0xff] }
0x25f6   :  { %20214 = vmatprep.subr.bf16.mxu0 %v20951_v23  ;;  %v20242_v40 = vpack.c.bf16 %v15926_v37, %v15925_v31 }
0x26bf   :  { %v13000_v1 = vpop.f32.mrb[18].mxu0 }
0x26c0   :  { %v19069_v60 = vpop.f32.mrb[19].mxu0  ;;  %19095 = vmatmul.mubr.msk.f32.vlgmr.msra.gmra.mrb[22].mxu0 %vm6261_vm6, %v13000_v1  ;;  %v20245_v1 = vpack.c.bf16 %v15931_v58, %v15930_v57 }
0x26c1   :  { %19110 = vmatprep.mubr.msk.f32.mxu0 %vm20952_vm3, %v20953_v24  ;;  %20216 = vmatpush3.bf16.msra.mxu0 %v20215_v4  ;;  %v15932_v60 = vld [vmem:[%s23173_s25 + $0xf0] sm:$0xff]  ;;  %v15938_v4 = vld [vmem:[%s23173_s25 + $0x108] sm:$0xff] }
0x26c2   :  { %20217 = vmatprep.subr.bf16.mxu0 %v20951_v23  ;;  %v20251_v35 = vpack.c.bf16 %v15938_v4, %v15937_v3  ;;  %v14743_v3 = vld [vmem:[%s23179_s1 + $0x8] sm:$0xff] }
0x26c3   :  { %v13079_v29 = vpop.f32.mrb[20].mxu0 }
0x26c4   :  { %v19074_v62 = vpop.f32.mrb[21].mxu0  ;;  %19084 = vmatmul.mubr.msk.f32.vlgmr.msra.gmra.mrb[130].mxu1 %vm6261_vm6, %v13079_v29  ;;  %v15933_v29 = vld [vmem:[%s23173_s25 + $0xf8] sm:$0xff] }
0x26c5   :  { %19098 = vmatpush3.msra.mxu1 %v22811_v6  ;;  %19099 = vmatprep.mubr.msk.f32.mxu1 %vm20952_vm3, %v20953_v24  ;;  %v20248_v62 = vpack.c.bf16 %v15933_v29, %v15932_v60 }
0x26c6   :  { %19113 = vmatprep.subr.mxu1 %v20953_v24  ;;  %20219 = vmatpush3.bf16.msra.mxu0 %v20218_v9 }
0x26c7   :  { %19129 = vmatprep.subr.mxu0 %v20953_v24 }
0x26c8   :  { %19100 = vmatmul.mubr.msk.f32.vlgmr.msra.gmra.mrb[132].mxu1 %vm973_vm2, %v15893_v63 }
0x26c9   :  { %19114 = vmatpush3.msra.mxu1 %v22811_v6  ;;  %19115 = vmatprep.mubr.msk.f32.mxu1 %vm20952_vm3, %v20953_v24 }
0x26ca   :  { %20220 = vmatprep.subr.bf16.mxu1 %v20951_v23 }
0x26cc   :  { %19116 = vmatmul.mubr.msk.f32.vlgmr.msra.gmra.mrb[134].mxu1 %vm973_vm2, %v15900_v0 }
0x26cd   :  { %19126 = vmatprep.mubr.msk.f32.mxu1 %vm20952_vm3, %v20953_v24  ;;  %20222 = vmatpush3.bf16.msra.mxu1 %v20221_v30  ;;  %v15935_v30 = vld [vmem:[%s23174_s5 + $0x40] sm:$0xff] }
0x26ce   :  { %20223 = vmatprep.subr.bf16.mxu1 %v20951_v23 }
0x26d1   :  { %20225 = vmatpush3.bf16.msra.mxu1 %v20224_v51 }
0x26d2   :  { %19145 = vmatprep.subr.mxu1 %v20953_v24 }
0x2793   :  { %v13230_v59 = vpop.f32.mrb[22].mxu0 }
0x2794   :  { %v19096_v33 = vpop.f32.mrb[23].mxu0 }
0x2797   :  { %v13157_v13 = vpop.f32.mrb[130].mxu1 }
0x2798   :  { %v13231_v12 = vadd.f32 %v13230_v59, %v13157_v13  ;;  %v19085_v41 = vpop.f32.mrb[131].mxu1  ;;  %v15940_v59 = vld [vmem:[%s23173_s25 + $0x118] sm:$0xff] }
0x279b   :  { %v13305_v14 = vpop.f32.mrb[132].mxu1 }
0x279c   :  { %v19101_v18 = vpop.f32.mrb[133].mxu1  ;;  %19111 = vmatmul.mubr.msk.f32.vlgmr.msra.gmra.mrb[24].mxu0 %vm6261_vm6, %v13305_v14 }
0x279d   :  { %19130 = vmatpush3.msra.mxu0 %v22811_v6  ;;  %19131 = vmatprep.mubr.msk.f32.mxu0 %vm20952_vm3, %v20953_v24 }
0x279e   :  { %20226 = vmatprep.subr.bf16.mxu0 %v20951_v23 }
0x279f   :  { %v13459_v22 = vpop.f32.mrb[134].mxu1 }
0x27a0   :  { %19127 = vmatmul.mubr.msk.f32.vlgmr.msra.gmra.mrb[136].mxu1 %vm6261_vm6, %v13459_v22  ;;  %19132 = vmatmul.mubr.msk.f32.vlgmr.msra.gmra.mrb[26].mxu0 %vm973_vm2, %v15907_v20  ;;  %v19117_v19 = vpop.f32.mrb[135].mxu1 }
0x27a1   :  { %19146 = vmatpush3.msra.mxu1 %v22811_v6  ;;  %19147 = vmatprep.mubr.msk.f32.mxu1 %vm20952_vm3, %v20953_v24 }
0x27a2   :  { %20228 = vmatpush3.bf16.msra.mxu0 %v20227_v21  ;;  %20232 = vmatprep.subr.bf16.mxu1 %v20951_v23  ;;  %v15942_v21 = vld [vmem:[#allocation15] ss:$0 sm:$0xff] }
0x27a3   :  { %20229 = vmatprep.subr.bf16.mxu0 %v20951_v23  ;;  %19142 = vmatprep.mubr.msk.f32.mxu0 %vm20952_vm3, %v20953_v24 }
0x27a4   :  { %19148 = vmatmul.mubr.msk.f32.vlgmr.msra.gmra.mrb[138].mxu1 %vm973_vm2, %v15914_v28 }
0x27a5   :  { %19158 = vmatprep.mubr.msk.f32.mxu1 %vm20952_vm3, %v20953_v24  ;;  %20234 = vmatpush3.bf16.msra.mxu1 %v20233_v39  ;;  %v20257_v39 = vpack.c.bf16 %v14324_v34, %v14323_v25  ;;  %v14987_v25 = vld [vmem:[%s21222_s21 + $0x18] sm:$0xff] }
0x27a6   :  { %20231 = vmatpush3.bf16.msra.mxu0 %v20230_v36  ;;  %20235 = vmatprep.subr.bf16.mxu1 %v20951_v23 }
0x27a7   :  { %19161 = vmatprep.subr.mxu0 %v20953_v24 }
0x27a9   :  { %20237 = vmatpush3.bf16.msra.mxu1 %v20236_v46  ;;  %v14326_v46 = vld [vmem:[%s23175_s29 + $0x18] sm:$0xff] }
0x27aa   :  { %19177 = vmatprep.subr.mxu1 %v20953_v24 }
0x286f   :  { %v13383_v43 = vpop.f32.mrb[24].mxu0 }
0x2870   :  { %v13387_v47 = vadd.f32 %v13383_v43, %v13231_v12  ;;  %v19112_v56 = vpop.f32.mrb[25].mxu0  ;;  %v20260_v43 = vpack.c.bf16 %v14326_v46, %v14325_v38  ;;  %v14991_v38 = vld [vmem:[%s21222_s21 + $0x38] sm:$0xff] }
0x2871   :  { %v14328_v56 = vld [vmem:[%s23175_s29 + $0x28] sm:$0xff] }
0x2873   :  { %v13537_v54 = vpop.f32.mrb[136].mxu1  ;;  %v13613_v45 = vpop.f32.mrb[26].mxu0 }
0x2874   :  { %v13541_v49 = vadd.f32 %v13537_v54, %v13387_v47  ;;  %v19133_v10 = vpop.f32.mrb[27].mxu0  ;;  %19143 = vmatmul.mubr.msk.f32.vlgmr.msra.gmra.mrb[28].mxu0 %vm6261_vm6, %v13613_v45  ;;  %v19128_v50 = vpop.f32.mrb[137].mxu1  ;;  %v14327_v47 = vld [vmem:[%s23175_s29 + $0x20] sm:$0xff]  ;;  %v14329_v45 = vld [vmem:[%s23175_s29 + $0x30] sm:$0xff] }
0x2875   :  { %19162 = vmatpush3.msra.mxu0 %v22811_v6  ;;  %19163 = vmatprep.mubr.msk.f32.mxu0 %vm20952_vm3, %v20953_v24  ;;  %v20263_v54 = vpack.c.bf16 %v14328_v56, %v14327_v47  ;;  %v20266_v61 = vpack.c.bf16 %v14330_v48, %v14329_v45  ;;  %v14332_v50 = vld [vmem:[%s23177_s26] sm:$0xff] }
0x2876   :  { %20238 = vmatprep.subr.bf16.mxu0 %v20951_v23 }
0x2877   :  { %v13767_v16 = vpop.f32.mrb[138].mxu1 }
0x2878   :  { %19159 = vmatmul.mubr.msk.f32.vlgmr.msra.gmra.mrb[140].mxu1 %vm6261_vm6, %v13767_v16  ;;  %19164 = vmatmul.mubr.msk.f32.vlgmr.msra.gmra.mrb[30].mxu0 %vm973_vm2, %v15921_v52  ;;  %v19149_v55 = vpop.f32.mrb[139].mxu1  ;;  %v14333_v52 = vld [vmem:[%s23177_s26 + $0x8] sm:$0xff]  ;;  %v15944_v16 = vld [vmem:[#allocation16] ss:$0 sm:$0xff] }
0x2879   :  { %19178 = vmatpush3.msra.mxu1 %v22811_v6  ;;  %19179 = vmatprep.mubr.msk.f32.mxu1 %vm20952_vm3, %v20953_v24 }
0x287a   :  { %20240 = vmatpush3.bf16.msra.mxu0 %v20239_v53  ;;  %20244 = vmatprep.subr.bf16.mxu1 %v20951_v23  ;;  %v20269_v53 = vpack.c.bf16 %v14333_v52, %v14332_v50 }
0x287b   :  { %20241 = vmatprep.subr.bf16.mxu0 %v20951_v23  ;;  %19174 = vmatprep.mubr.msk.f32.mxu0 %vm20952_vm3, %v20953_v24 }
0x287c   :  { %19180 = vmatmul.mubr.msk.f32.vlgmr.msra.gmra.mrb[142].mxu1 %vm973_vm2, %v15928_v27 }
0x287d   :  { %19190 = vmatprep.mubr.msk.f32.mxu1 %vm20952_vm3, %v20953_v24  ;;  %20246 = vmatpush3.bf16.msra.mxu1 %v20245_v1 }
0x287e   :  { %20243 = vmatpush3.bf16.msra.mxu0 %v20242_v40  ;;  %20247 = vmatprep.subr.bf16.mxu1 %v20951_v23  ;;  %v15946_v40 = vld [vmem:[#allocation18] ss:$0 sm:$0xff] }
0x287f   :  { %19193 = vmatprep.subr.mxu0 %v20953_v24 }
0x2881   :  { %20249 = vmatpush3.bf16.msra.mxu1 %v20248_v62 }
0x2882   :  { %19209 = vmatprep.subr.mxu1 %v20953_v24 }
0x2947   :  { %v13691_v63 = vpop.f32.mrb[28].mxu0 }
0x2948   :  { %v13695_v0 = vadd.f32 %v13691_v63, %v13541_v49  ;;  %v19144_v2 = vpop.f32.mrb[29].mxu0  ;;  %v14335_v63 = vld [vmem:[%s23178_s28] sm:$0xff] }
0x2949   :  { %v14742_v2 = vld [vmem:[%s23179_s1] sm:$0xff] }
0x294b   :  { %v13845_v5 = vpop.f32.mrb[140].mxu1  ;;  %v13921_v7 = vpop.f32.mrb[30].mxu0 }
0x294c   :  { %v13849_v8 = vadd.f32 %v13845_v5, %v13695_v0  ;;  %v19165_v9 = vpop.f32.mrb[31].mxu0  ;;  %19175 = vmatmul.mubr.msk.f32.vlgmr.msra.gmra.mrb[32].mxu0 %vm6261_vm6, %v13921_v7  ;;  %v19160_v11 = vpop.f32.mrb[141].mxu1 }
0x294d   :  { %19194 = vmatpush3.msra.mxu0 %v22811_v6  ;;  %19195 = vmatprep.mubr.msk.f32.mxu0 %vm20952_vm3, %v20953_v24  ;;  %v15939_v6 = vld [vmem:[%s23173_s25 + $0x110] sm:$0xff]  ;;  %v20272_v9 = vpack.c.bf16 %v14743_v3, %v14742_v2 }
0x294e   :  { %20250 = vmatprep.subr.bf16.mxu0 %v20951_v23  ;;  %v20254_v33 = vpack.c.bf16 %v15940_v59, %v15939_v6  ;;  %v14744_v11 = vld [vmem:[%s23179_s1 + $0x10] sm:$0xff]  ;;  %v14747_v6 = vld [vmem:[%s23179_s1 + $0x28] sm:$0xff] }
0x294f   :  { %v14075_v44 = vpop.f32.mrb[142].mxu1  ;;  %v14652_v59 = vld [vmem:[%s23180_s2 + $0x10] sm:$0xff] }
0x2950   :  { %19191 = vmatmul.mubr.msk.f32.vlgmr.msra.gmra.mrb[144].mxu1 %vm6261_vm6, %v14075_v44  ;;  %19196 = vmatmul.mubr.msk.f32.vlgmr.msra.gmra.mrb[34].mxu0 %vm973_vm2, %v15935_v30  ;;  %v19181_v51 = vpop.f32.mrb[143].mxu1  ;;  %v14745_v30 = vld [vmem:[%s23179_s1 + $0x18] sm:$0xff] }
0x2951   :  { %20252 = vmatpush3.bf16.msra.mxu0 %v20251_v35  ;;  %19206 = vmatprep.mubr.msk.f32.mxu0 %vm20952_vm3, %v20953_v24  ;;  %v14651_v35 = vld [vmem:[%s23180_s2 + $0x8] sm:$0xff]  ;;  %v20275_v44 = vpack.c.bf16 %v14745_v30, %v14744_v11  ;;  %v14746_v51 = vld [vmem:[%s23179_s1 + $0x20] sm:$0xff] }
0x2952   :  { %20253 = vmatprep.subr.bf16.mxu0 %v20951_v23  ;;  %19211 = vmatprep.mubr.msk.f32.mxu1 %vm20952_vm3, %v20953_v24 }
0x2955   :  { %20255 = vmatpush3.bf16.msra.mxu0 %v20254_v33  ;;  %v20278_v33 = vpack.c.bf16 %v14747_v6, %v14746_v51  ;;  %v15964_v51 = vld [vmem:[#allocation21] ss:$0 sm:$0xff] }
0x2956   :  { %20268 = vmatprep.subr.bf16.mxu0 %v20951_v23 }
0x2a1f   :  { %v13999_v13 = vpop.f32.mrb[32].mxu0 }
0x2a20   :  { %v14003_v12 = vadd.f32 %v13999_v13, %v13849_v8  ;;  %v19176_v41 = vpop.f32.mrb[33].mxu0  ;;  %v14650_v8 = vld [vmem:[%s23180_s2] sm:$0xff]  ;;  %v14748_v13 = vld [vmem:[%s23179_s1 + $0x30] sm:$0xff] }
0x2a23   :  { %v14153_v14 = vpop.f32.mrb[144].mxu1  ;;  %v14229_v15 = vpop.f32.mrb[34].mxu0 }
0x2a24   :  { %v14157_v17 = vadd.f32 %v14153_v14, %v14003_v12  ;;  %v19197_v18 = vpop.f32.mrb[35].mxu0  ;;  %19207 = vmatmul.mubr.msk.f32.vlgmr.msra.gmra.mrb[36].mxu0 %vm6261_vm6, %v14229_v15  ;;  %v19192_v20 = vpop.f32.mrb[145].mxu1  ;;  %vm14415_vm6 = vcmask 523264   ;;  %v14749_v12 = vld [vmem:[%s23179_s1 + $0x38] sm:$0xff] }
0x2a25   :  { %19237 = vmatprep.mubr.msk.f32.mxu0 %vm20952_vm3, %v20953_v24  ;;  %20270 = vmatpush3.bf16.msra.mxu0 %v20269_v53  ;;  %v20281_v41 = vpack.c.bf16 %v14749_v12, %v14748_v13 }
0x2a26   :  { %19240 = vmatprep.subr.mxu0 %v20953_v24 }
0x2af7   :  { %v14307_v22 = vpop.f32.mrb[36].mxu0 }
0x2af8   :  { %v14311_v19 = vadd.f32 %v14307_v22, %v14157_v17  ;;  %v19208_v28 = vpop.f32.mrb[37].mxu0  ;;  %v14984_v22 = vld [vmem:[%s21222_s21] sm:$0xff] }
0x2af9   :  { %v14986_v28 = vld [vmem:[%s21222_s21 + $0x10] sm:$0xff] }
0x2afa   :  { %v14318_v32 = vadd.f32 %v15942_v21, %v14311_v19  ;;  %v14985_v19 = vld [vmem:[%s21222_s21 + $0x8] sm:$0xff]  ;;  %v20290_v34 = vpack.c.bf16 %v14987_v25, %v14986_v28 }
0x2afc   :  { %v14320_v36 = vmul.f32 0.2, %v14318_v32  ;;  %vm14319_vm5 = vcmp.gt.f32.partialorder %v14318_v32, 0.0 }
0x2afe   :  { %v14321_v42 = vsel %vm14319_vm5, %v14318_v32, %v14320_v36  ;;  %v20287_v32 = vpack.c.bf16 %v14985_v19, %v14984_v22  ;;  %v14988_v36 = vld [vmem:[%s21222_s21 + $0x20] sm:$0xff] }
0x2aff   :  { %19210 = vmatpush3.msra.mxu1 %v14321_v42 }
0x2b00   :  { %19212 = vmatmul.mubr.msk.f32.vlgmr.msra.gmra.mrb[146].mxu1 %vm973_vm2, %v14322_v26  ;;  %20256 = vmatprep.subr.bf16.mxu1 %v20951_v23  ;;  %v14989_v26 = vld [vmem:[%s21222_s21 + $0x28] sm:$0xff] }
0x2b01   :  { %20258 = vmatpush3.bf16.msra.mxu1 %v20257_v39  ;;  %19230 = vmatprep.mubr.msk.f32.mxu1 %vm20952_vm3, %v20953_v24  ;;  %v20293_v39 = vpack.c.bf16 %v14989_v26, %v14988_v36 }
0x2b02   :  { %20259 = vmatprep.subr.bf16.mxu1 %v20951_v23 }
0x2b05   :  { %20261 = vmatpush3.bf16.msra.mxu1 %v20260_v43  ;;  %v15953_v43 = vld [vmem:[#allocation19] ss:$0 sm:$0xff] }
0x2b06   :  { %20262 = vmatprep.subr.bf16.mxu1 %v20951_v23 }
0x2b09   :  { %20264 = vmatpush3.bf16.msra.mxu1 %v20263_v54 }
0x2b0a   :  { %20265 = vmatprep.subr.bf16.mxu1 %v20951_v23 }
0x2b0d   :  { %20267 = vmatpush3.bf16.msra.mxu1 %v20266_v61 }
0x2b0e   :  { %20283 = vmatprep.subr.bf16.mxu1 %v20951_v23 }
0x2bd3   :  { %v14405_v49 = vpop.f32.mrb[146].mxu1 }
0x2bd4   :  { %v19213_v10 = vpop.f32.mrb[147].mxu1  ;;  %19231 = vmatmul.mubr.msk.f32.vlgmr.msra.gmra.mrb[148].mxu1 %vm14415_vm6, %v14405_v49 }
0x2bd5   :  { %19287 = vmatprep.mubr.msk.f32.mxu1 %vm20952_vm3, %v20953_v24 }
0x2ca7   :  { %v14485_v55 = vpop.f32.mrb[148].mxu1 }
0x2ca8   :  { %v14486_v27 = vadd.f32 %v15944_v16, %v14485_v55  ;;  %v19232_v31 = vpop.f32.mrb[149].mxu1 }
0x2caa   :  { %v14489_v37 = vmax.f32 %v14486_v27, 0.0 }
0x2cac   :  { %19238 = vmatmul.mubr.msk.f32.vlgmr.msra.gmra.mrb[38].mxu0 %vm8204_vm15, %v14489_v37  ;;  %v14855_v37 = vld [vmem:[%s21217_s20] sm:$0xff] }
0x2cad   :  { %19242 = vmatprep.mubr.msk.f32.mxu0 %vm20952_vm3, %v20953_v24 }
0x2d7f   :  { %v14565_v57 = vpop.f32.mrb[38].mxu0 }
0x2d80   :  { %v14566_v58 = vadd.f32 %v15946_v40, %v14565_v57  ;;  %v19239_v1 = vpop.f32.mrb[39].mxu0  ;;  %v14856_v57 = vld [vmem:[%s21217_s20 + $0x8] sm:$0xff] }
0x2d81   :  { %v14858_v1 = vld [vmem:[%s21217_s20 + $0x18] sm:$0xff] }
0x2d82   :  { %v15948_v60 = vmul.f32 -1.442695, %v14566_v58  ;;  %v14857_v58 = vld [vmem:[%s21217_s20 + $0x10] sm:$0xff] }
0x2d84   :  { %20580 = vpow2.f32 %v15948_v60  ;;  %v14859_v60 = vld [vmem:[%s21217_s20 + $0x20] sm:$0xff] }
0x2d8e   :  { %v20581_v29 = vpop.eup %20580 }
0x2d8f   :  { %v14572_v62 = vadd.f32 1.0, %v20581_v29  ;;  %v14860_v29 = vld [vmem:[%s21217_s20 + $0x28] sm:$0xff] }
0x2d91   :  { %20582 = vrcp.f32 %v14572_v62  ;;  %v14861_v62 = vld [vmem:[%s21217_s20 + $0x30] sm:$0xff] }
0x2d9b   :  { %v20583_v0 = vpop.eup %20582 }
0x2d9c   :  { %19241 = vmatpush3.msra.mxu0 %v20583_v0 }
0x2d9d   :  { %19243 = vmatmul.mubr.msk.f32.vlgmr.msra.gmra.mrb[40].mxu0 %vm973_vm2, %v14335_v63  ;;  %19245 = vmatprep.subr.mxu0 %v20953_v24 }
0x2d9e   :  { %19247 = vmatprep.mubr.msk.f32.mxu0 %vm20952_vm3, %v20953_v24 }
0x2e70   :  { %v14644_v4 = vpop.f32.mrb[40].mxu0 }
0x2e71   :  { %v14648_v5 = vmul.f32 %v14644_v4, %v14321_v42  ;;  %v19244_v7 = vpop.f32.mrb[41].mxu0  ;;  %v14990_v42 = vld [vmem:[%s21222_s21 + $0x30] sm:$0xff] }
0x2e72   :  { %v20296_v46 = vpack.c.bf16 %v14991_v38, %v14990_v42 }
0x2e73   :  { %19246 = vmatpush3.msra.mxu0 %v14648_v5 }
0x2e74   :  { %19248 = vmatmul.mubr.msk.f32.vlgmr.msra.gmra.mrb[42].mxu0 %vm973_vm2, %v14650_v8  ;;  %20271 = vmatprep.subr.bf16.mxu0 %v20951_v23 }
0x2e75   :  { %19250 = vmatprep.mubr.msk.f32.mxu0 %vm20952_vm3, %v20953_v24  ;;  %20273 = vmatpush3.bf16.msra.mxu0 %v20272_v9 }
0x2e76   :  { %20274 = vmatprep.subr.bf16.mxu0 %v20951_v23 }
0x2e78   :  { %19251 = vmatmul.mubr.msk.f32.gmra.mrb[44].mxu0 %vm973_vm2, %v14651_v35 }
0x2e79   :  { %19253 = vmatprep.mubr.msk.f32.mxu0 %vm20952_vm3, %v20953_v24  ;;  %20276 = vmatpush3.bf16.msra.mxu0 %v20275_v44 }
0x2e7a   :  { %20277 = vmatprep.subr.bf16.mxu0 %v20951_v23 }
0x2e7c   :  { %19254 = vmatmul.mubr.msk.f32.gmra.mrb[46].mxu0 %vm973_vm2, %v14652_v59 }
0x2e7d   :  { %20279 = vmatpush3.bf16.msra.mxu0 %v20278_v33  ;;  %19272 = vmatprep.mubr.msk.f32.mxu0 %vm20952_vm3, %v20953_v24 }
0x2e7e   :  { %20280 = vmatprep.subr.bf16.mxu0 %v20951_v23 }
0x2e81   :  { %20282 = vmatpush3.bf16.msra.mxu0 %v20281_v41 }
0x2e82   :  { %20286 = vmatprep.subr.bf16.mxu0 %v20951_v23 }
0x2f47   :  { %v14728_v14 = vpop.f32.mrb[42].mxu0 }
0x2f48   :  { %19273 = vmatmul.mubr.msk.f32.vlgmr.msra.gmra.mrb[48].mxu0 %vm14415_vm6, %v14728_v14  ;;  %v19249_v15 = vpop.f32.mrb[43].mxu0 }
0x2f49   :  { %19275 = vmatprep.mubr.msk.f32.mxu0 %vm20952_vm3, %v20953_v24  ;;  %20288 = vmatpush3.bf16.msra.mxu0 %v20287_v32 }
0x2f4a   :  { %20289 = vmatprep.subr.bf16.mxu0 %v20951_v23 }
0x2f4b   :  { %v14733_v17 = vpop.f32.mrb[44].mxu0 }
0x2f4c   :  { %19276 = vmatmul.mubr.msk.f32.gmra.mrb[50].mxu0 %vm14415_vm6, %v14733_v17  ;;  %v19252_v18 = vpop.f32.mrb[45].mxu0 }
0x2f4d   :  { %19278 = vmatprep.mubr.msk.f32.mxu0 %vm20952_vm3, %v20953_v24  ;;  %20291 = vmatpush3.bf16.msra.mxu0 %v20290_v34 }
0x2f4e   :  { %20292 = vmatprep.subr.bf16.mxu0 %v20951_v23 }
0x2f4f   :  { %v14738_v20 = vpop.f32.mrb[46].mxu0 }
0x2f50   :  { %19279 = vmatmul.mubr.msk.f32.gmra.mrb[52].mxu0 %vm14415_vm6, %v14738_v20  ;;  %v19255_v21 = vpop.f32.mrb[47].mxu0 }
0x2f51   :  { %19324 = vmatprep.mubr.msk.f32.mxu0 %vm20952_vm3, %v20953_v24  ;;  %20294 = vmatpush3.bf16.msra.mxu0 %v20293_v39 }
0x2f52   :  { %20295 = vmatprep.subr.bf16.mxu0 %v20951_v23 }
0x2f55   :  { %20297 = vmatpush3.bf16.msra.mxu0 %v20296_v46 }
0x301b   :  { %v14831_v47 = vpop.f32.mrb[48].mxu0 }
0x301c   :  { %v14832_v56 = vadd.f32 %v15953_v43, %v14831_v47  ;;  %v19274_v54 = vpop.f32.mrb[49].mxu0 }
0x301e   :  { %v14848_v48 = vmul.f32 0.2, %v14832_v56  ;;  %vm14845_vm2 = vcmp.gt.f32.partialorder %v14832_v56, 0.0 }
0x301f   :  { %v14836_v45 = vpop.f32.mrb[50].mxu0 }
0x3020   :  { %v14837_v61 = vadd.f32 %v15953_v43, %v14836_v45  ;;  %v19277_v49 = vpop.f32.mrb[51].mxu0  ;;  %v14851_v52 = vsel %vm14845_vm2, %v14832_v56, %v14848_v48 }
0x3022   :  { %vm14846_vm7 = vcmp.gt.f32.partialorder %v14837_v61, 0.0  ;;  %v14849_v10 = vmul.f32 0.2, %v14837_v61 }
0x3023   :  { %v14841_v50 = vpop.f32.mrb[52].mxu0 }
0x3024   :  { %v14852_v53 = vsel %vm14846_vm7, %v14837_v61, %v14849_v10  ;;  %v14842_v16 = vadd.f32 %v15953_v43, %v14841_v50  ;;  %v19280_v55 = vpop.f32.mrb[53].mxu0 }
0x3025   :  { %v20284_v27 = vpack.c.bf16 %v14852_v53, %v14851_v52 }
0x3026   :  { %v14850_v31 = vmul.f32 0.2, %v14842_v16  ;;  %vm14847_vm8 = vcmp.gt.f32.partialorder %v14842_v16, 0.0 }
0x3027   :  { %20285 = vmatpush3.bf16.msra.mxu1 %v20284_v27 }
0x3028   :  { %19285 = vmatprep.subr.mxu1 %v20953_v24  ;;  %v14853_v40 = vsel %vm14847_vm8, %v14842_v16, %v14850_v31 }
0x302b   :  { %19286 = vmatpush3.msra.mxu1 %v14853_v40 }
0x302c   :  { %19288 = vmatmul.mubr.msk.f32.vlgmr.msra.gmra.mrb[150].mxu1 %vm14862_vm9, %v14855_v37  ;;  %20298 = vmatprep.subr.bf16.mxu1 %v20951_v23 }
0x302d   :  { %19290 = vmatprep.mubr.msk.f32.mxu1 %vm20952_vm3, %v20953_v24  ;;  %20302 = vmatpush3.bf16.msra.mxu1 %v20287_v32 }
0x302e   :  { %20299 = vmatprep.subr.bf16.mxu1 %v20951_v23 }
0x3030   :  { %19291 = vmatmul.mubr.msk.f32.gmra.mrb[152].mxu1 %vm14862_vm9, %v14856_v57 }
0x3031   :  { %19293 = vmatprep.mubr.msk.f32.mxu1 %vm20952_vm3, %v20953_v24  ;;  %20303 = vmatpush3.bf16.msra.mxu1 %v20290_v34 }
0x3032   :  { %20300 = vmatprep.subr.bf16.mxu1 %v20951_v23 }
0x3034   :  { %19294 = vmatmul.mubr.msk.f32.gmra.mrb[154].mxu1 %vm14862_vm9, %v14857_v58 }
0x3035   :  { %19296 = vmatprep.mubr.msk.f32.mxu1 %vm20952_vm3, %v20953_v24  ;;  %20304 = vmatpush3.bf16.msra.mxu1 %v20293_v39 }
0x3036   :  { %20301 = vmatprep.subr.bf16.mxu1 %v20951_v23 }
0x3038   :  { %19297 = vmatmul.mubr.msk.f32.gmra.mrb[156].mxu1 %vm14862_vm9, %v14858_v1 }
0x3039   :  { %19299 = vmatprep.mubr.msk.f32.mxu1 %vm20952_vm3, %v20953_v24  ;;  %20305 = vmatpush3.bf16.msra.mxu1 %v20296_v46 }
0x303c   :  { %19300 = vmatmul.mubr.msk.f32.gmra.mrb[158].mxu1 %vm14862_vm9, %v14859_v60 }
0x303d   :  { %19302 = vmatprep.mubr.msk.f32.mxu1 %vm20952_vm3, %v20953_v24 }
0x3040   :  { %19303 = vmatmul.mubr.msk.f32.gmra.mrb[160].mxu1 %vm14862_vm9, %v14860_v29 }
0x3041   :  { %19305 = vmatprep.mubr.msk.f32.mxu1 %vm20952_vm3, %v20953_v24 }
0x3044   :  { %19306 = vmatmul.mubr.msk.f32.gmra.mrb[162].mxu1 %vm14862_vm9, %v14861_v62 }
0x3045   :  { %19336 = vmatprep.mubr.msk.f32.mxu1 %vm20952_vm3, %v20953_v24 }
0x30ff   :  { %v14950_v23 = vpop.f32.mrb[150].mxu1 }
0x3100   :  { %19325 = vmatmul.mubr.msk.f32.vlgmr.msra.gmra.mrb[54].mxu0 %vm14415_vm6, %v14950_v23  ;;  %v19289_v63 = vpop.f32.mrb[151].mxu1 }
0x3101   :  { %19327 = vmatprep.mubr.msk.f32.mxu0 %vm20952_vm3, %v20953_v24 }
0x3103   :  { %v14955_v0 = vpop.f32.mrb[152].mxu1 }
0x3104   :  { %19328 = vmatmul.mubr.msk.f32.gmra.mrb[56].mxu0 %vm14415_vm6, %v14955_v0  ;;  %v19292_v2 = vpop.f32.mrb[153].mxu1 }
0x3105   :  { %19330 = vmatprep.mubr.msk.f32.mxu0 %vm20952_vm3, %v20953_v24 }
0x3107   :  { %v14960_v3 = vpop.f32.mrb[154].mxu1 }
0x3108   :  { %19331 = vmatmul.mubr.msk.f32.gmra.mrb[58].mxu0 %vm14415_vm6, %v14960_v3  ;;  %v19295_v4 = vpop.f32.mrb[155].mxu1 }
0x3109   :  { %19333 = vmatprep.mubr.msk.f32.mxu0 %vm20952_vm3, %v20953_v24 }
0x310b   :  { %v14965_v5 = vpop.f32.mrb[156].mxu1 }
0x310c   :  { %19334 = vmatmul.mubr.msk.f32.gmra.mrb[60].mxu0 %vm14415_vm6, %v14965_v5  ;;  %v19298_v7 = vpop.f32.mrb[157].mxu1 }
0x310f   :  { %v14970_v8 = vpop.f32.mrb[158].mxu1 }
0x3110   :  { %19337 = vmatmul.mubr.msk.f32.vlgmr.msra.gmra.mrb[164].mxu1 %vm14415_vm6, %v14970_v8  ;;  %v19301_v9 = vpop.f32.mrb[159].mxu1 }
0x3111   :  { %19339 = vmatprep.mubr.msk.f32.mxu1 %vm20952_vm3, %v20953_v24 }
0x3113   :  { %v14975_v11 = vpop.f32.mrb[160].mxu1 }
0x3114   :  { %19340 = vmatmul.mubr.msk.f32.gmra.mrb[166].mxu1 %vm14415_vm6, %v14975_v11  ;;  %v19304_v30 = vpop.f32.mrb[161].mxu1 }
0x3115   :  { %19342 = vmatprep.mubr.msk.f32.mxu1 %vm20952_vm3, %v20953_v24 }
0x3117   :  { %v14980_v35 = vpop.f32.mrb[162].mxu1 }
0x3118   :  { %19343 = vmatmul.mubr.msk.f32.gmra.mrb[168].mxu1 %vm14415_vm6, %v14980_v35  ;;  %v19307_v44 = vpop.f32.mrb[163].mxu1 }
0x31d3   :  { %v15085_v6 = vpop.f32.mrb[54].mxu0 }
0x31d4   :  { %v15086_v59 = vadd.f32 %v15964_v51, %v15085_v6  ;;  %v19326_v33 = vpop.f32.mrb[55].mxu0 }
0x31d6   :  { %vm15119_vm10 = vcmp.gt.f32.partialorder %v15086_v59, 0.0  ;;  %v15126_v13 = vmul.f32 0.2, %v15086_v59 }
0x31d7   :  { %v15090_v12 = vpop.f32.mrb[56].mxu0 }
0x31d8   :  { %v15133_v41 = vsel %vm15119_vm10, %v15086_v59, %v15126_v13  ;;  %v15091_v14 = vadd.f32 %v15964_v51, %v15090_v12  ;;  %v19329_v15 = vpop.f32.mrb[57].mxu0 }
0x31d9   :  { %15140 = vst.msk [vmem:[%s21232_s17] sm:$0xff] %vm14415_vm6, %v15133_v41 }
0x31da   :  { %vm15120_vm11 = vcmp.gt.f32.partialorder %v15091_v14, 0.0  ;;  %v15127_v24 = vmul.f32 0.2, %v15091_v14 }
0x31db   :  { %v15095_v17 = vpop.f32.mrb[58].mxu0 }
0x31dc   :  { %v15134_v18 = vsel %vm15120_vm11, %v15091_v14, %v15127_v24  ;;  %v15096_v20 = vadd.f32 %v15964_v51, %v15095_v17  ;;  %v19332_v21 = vpop.f32.mrb[59].mxu0 }
0x31dd   :  { %15141 = vst.msk [vmem:[%s21232_s17 + $0x8] sm:$0xff] %vm14415_vm6, %v15134_v18 }
0x31de   :  { %vm15121_vm3 = vcmp.gt.f32.partialorder %v15096_v20, 0.0  ;;  %v15128_v22 = vmul.f32 0.2, %v15096_v20 }
0x31df   :  { %v15100_v19 = vpop.f32.mrb[60].mxu0 }
0x31e0   :  { %v15135_v28 = vsel %vm15121_vm3, %v15096_v20, %v15128_v22  ;;  %v15101_v32 = vadd.f32 %v15964_v51, %v15100_v19  ;;  %v19335_v25 = vpop.f32.mrb[61].mxu0 }
0x31e1   :  { %15142 = vst.msk [vmem:[%s21232_s17 + $0x10] sm:$0xff] %vm14415_vm6, %v15135_v28 }
0x31e2   :  { %vm15122_vm12 = vcmp.gt.f32.partialorder %v15101_v32, 0.0  ;;  %v15129_v34 = vmul.f32 0.2, %v15101_v32 }
0x31e3   :  { %v15105_v36 = vpop.f32.mrb[164].mxu1 }
0x31e4   :  { %v15136_v26 = vsel %vm15122_vm12, %v15101_v32, %v15129_v34  ;;  %v15106_v39 = vadd.f32 %v15964_v51, %v15105_v36  ;;  %v19338_v42 = vpop.f32.mrb[165].mxu1 }
0x31e5   :  { %15143 = vst.msk [vmem:[%s21232_s17 + $0x18] sm:$0xff] %vm14415_vm6, %v15136_v26 }
0x31e6   :  { %vm15123_vm13 = vcmp.gt.f32.partialorder %v15106_v39, 0.0  ;;  %v15130_v38 = vmul.f32 0.2, %v15106_v39 }
0x31e7   :  { %v15110_v46 = vpop.f32.mrb[166].mxu1 }
0x31e8   :  { %v15137_v43 = vsel %vm15123_vm13, %v15106_v39, %v15130_v38  ;;  %v15111_v47 = vadd.f32 %v15964_v51, %v15110_v46  ;;  %v19341_v56 = vpop.f32.mrb[167].mxu1 }
0x31e9   :  { %15144 = vst.msk [vmem:[%s21232_s17 + $0x20] sm:$0xff] %vm14415_vm6, %v15137_v43 }
0x31ea   :  { %vm15124_vm14 = vcmp.gt.f32.partialorder %v15111_v47, 0.0  ;;  %v15131_v54 = vmul.f32 0.2, %v15111_v47 }
0x31eb   :  { %v15115_v45 = vpop.f32.mrb[168].mxu1 }
0x31ec   :  { %v15138_v48 = vsel %vm15124_vm14, %v15111_v47, %v15131_v54  ;;  %v15116_v61 = vadd.f32 %v15964_v51, %v15115_v45  ;;  %v19344_v49 = vpop.f32.mrb[169].mxu1 }
0x31ed   :  { %15145 = vst.msk [vmem:[%s21232_s17 + $0x28] sm:$0xff] %vm14415_vm6, %v15138_v48 }
0x31ee   :  { %vm15125_vm15 = vcmp.gt.f32.partialorder %v15116_v61, 0.0  ;;  %v15132_v10 = vmul.f32 0.2, %v15116_v61 }
0x31f0   :  { %v15139_v50 = vsel %vm15125_vm15, %v15116_v61, %v15132_v10 }
0x31f1   :  { %15146 = vst.msk [vmem:[%s21232_s17 + $0x30] sm:$0xff] %vm14415_vm6, %v15139_v50 }
0x31f2   :  { %15151 = vsyncpa [#allocation3], 1 }
0x31f3   :  { %15152 = vsyncpa [#allocation5], 1 }
0x31f4   :  { %15153 = vsyncpa [#allocation8], 1 }
0x31f5   :  { %15154 = vsyncpa [#allocation11], 1 }
0x31f6   :  { %15155 = vsyncpa [#allocation14], 1 }
0x31f7   :  { %15156 = vsyncpa [#allocation17], 1 }
0x31f8   :  { %15157 = vsyncpa [#allocation20], 1 }

</bundles_post_ra>
